<compile_context>
chip_gen: v6e
topology: v6e:2x2x1
jax: 0.10.0
libtpu: 0.0.40
codegen_flags: <defaults>
</compile_context>

<pallas_src>
import jax
import jax.numpy as jnp
import numpy as np
from jax import lax
from jax.experimental import pallas as pl
from jax.experimental.pallas import tpu as pltpu


# ----------------------------- Pallas kernel ------------------------------ #
def attn_lstm_kernel(x_ref, wih0_ref, wih12_ref, whh_ref, bias_ref,
                     w1_ref, b1_ref, w2_ref, b2_ref, w3_ref, b3_ref,
                     out_ref, gx_ref, hf_ref, hb_ref):
    # x_ref:     (T, B, IN)       time-major input sequence
    # wih0_ref:  (2, IN, 8H)      layer-0 input weights, fused gate layout (zero-padded per dir)
    # wih12_ref: (2, 2, 2H, 8H)   layer-1/2 input weights (layer, dir)
    # whh_ref:   (3, 2H, 8H)      block-diagonal recurrent weights
    # bias_ref:  (3, 1, 8H)       combined (b_ih + b_hh) biases, fused layout
    # w1..b3:    MLP head (2H -> 64 -> 16 -> OUT)
    # gx_ref:    (T, B, 8H) VMEM  hoisted input projections of the current layer
    # hf_ref:    (T, B, H)  VMEM  forward hidden history of the current layer
    # hb_ref:    (T, B, H)  VMEM  backward hidden history of the current layer
    #
    # Fused gate column layout (width 8H): [i_f i_b | f_f f_b | o_f o_b | g_f g_b]
    # so i/f/o come from one sigmoid over [:, :6H] and g from one tanh over
    # [:, 6H:], each slice aligned to the fused state h = [h_fwd | h_bwd].
    T, B, _ = x_ref.shape
    H = hf_ref.shape[2]

    def make_step(whh_l, store):
        def step(s, carry):
            h, c = carry
            gates = gx_ref[s] + jnp.dot(h, whh_l, preferred_element_type=jnp.float32)
            sig = jax.nn.sigmoid(gates[:, :6 * H])
            i_g = sig[:, 0 * H:2 * H]
            f_g = sig[:, 2 * H:4 * H]
            o_g = sig[:, 4 * H:6 * H]
            g_g = jnp.tanh(gates[:, 6 * H:])
            c_new = f_g * c + i_g * g_g
            h_new = o_g * jnp.tanh(c_new)
            if store:
                hf_ref[s] = h_new[:, :H]           # fwd hidden for time s
                hb_ref[T - 1 - s] = h_new[:, H:]   # bwd hidden for time T-1-s
            return h_new, c_new
        return step

    def run_layer(layer, read_in, store):
        # ---- hoisted input projection + bias (off the serial chain) ----
        if layer == 0:
            w_f, w_b = wih0_ref[0], wih0_ref[1]
        else:
            w_f, w_b = wih12_ref[layer - 1, 0], wih12_ref[layer - 1, 1]
        bias = bias_ref[layer]                     # (1, 8H)
        for t in range(T):                         # static, T is small
            gx_ref[t] = (bias
                         + jnp.dot(read_in(t), w_f, preferred_element_type=jnp.float32)
                         + jnp.dot(read_in(T - 1 - t), w_b, preferred_element_type=jnp.float32))

        whh_l = whh_ref[layer]                     # (2H, 8H), loop-invariant
        step = make_step(whh_l, store)
        h0 = jnp.zeros((B, 2 * H), jnp.float32)
        c0 = jnp.zeros((B, 2 * H), jnp.float32)

        if store:
            h, _ = lax.fori_loop(0, T, step, (h0, c0), unroll=True)
            return h
        # layer 2: no sequence stores; the backward direction only needs its
        # first step (it yields h_bwd at time T-1, the only value the head reads).
        h1, c1 = step(0, (h0, c0))
        h_bwd_last = h1[:, H:]
        h, _ = lax.fori_loop(1, T, step, (h1, c1), unroll=True)
        return jnp.concatenate([h[:, :H], h_bwd_last], axis=-1)      # (B, 2H)

    read_x = lambda t: x_ref[t]                                          # (B, IN)
    read_h = lambda t: jnp.concatenate([hf_ref[t], hb_ref[t]], axis=-1)  # (B, 2H)

    run_layer(0, read_x, store=True)
    run_layer(1, read_h, store=True)
    last = run_layer(2, read_h, store=False)       # == output[:, -1, :]

    # MLP head
    o = jnp.maximum(jnp.dot(last, w1_ref[...], preferred_element_type=jnp.float32) + b1_ref[...], 0.0)
    o = jnp.maximum(jnp.dot(o, w2_ref[...], preferred_element_type=jnp.float32) + b2_ref[...], 0.0)
    out_ref[...] = jnp.dot(o, w3_ref[...], preferred_element_type=jnp.float32) + b3_ref[...]


# ------------------------------ JAX wrapper -------------------------------- #
def attention_lstm_no(x, params):
    """x: (B, input_dim, T) -- PyTorch NCW layout. params in original [i,f,g,o] layout."""
    wih0, wih12, whh, bias, w1, b1, w2, b2, w3, b3 = params
    B, IN, T = x.shape
    H = whh.shape[2]
    OUT = w3.shape[1]

    x_seq = jnp.transpose(x, (2, 0, 1)).astype(jnp.float32)      # (T, B, IN)

    # Reorder PyTorch-style [i, f, g, o] gate columns into the fused
    # [i_f i_b | f_f f_b | o_f o_b | g_f g_b] layout (zero-padded per direction).
    def place(w4h, d):
        i = w4h[..., 0:H]
        f = w4h[..., H:2 * H]
        g = w4h[..., 2 * H:3 * H]
        o = w4h[..., 3 * H:4 * H]
        z = jnp.zeros_like(i)
        blocks = [i, z, f, z, o, z, g, z] if d == 0 else [z, i, z, f, z, o, z, g]
        return jnp.concatenate(blocks, axis=-1)

    wih0_big = jnp.stack([place(wih0[0], 0), place(wih0[1], 1)], axis=0)            # (2, IN, 8H)
    wih12_big = jnp.stack(
        [jnp.stack([place(wih12[l, 0], 0), place(wih12[l, 1], 1)], axis=0)
         for l in range(2)], axis=0)                                                 # (2, 2, 2H, 8H)
    whh_bd = jnp.stack(
        [jnp.concatenate([place(whh[l, 0], 0), place(whh[l, 1], 1)], axis=0)
         for l in range(3)], axis=0)                                                 # (3, 2H, 8H)
    bias_big = jnp.stack(
        [place(bias[l, 0], 0) + place(bias[l, 1], 1) for l in range(3)], axis=0)     # (3, 1, 8H)

    vmem = pl.BlockSpec(memory_space=pltpu.MemorySpace.VMEM)
    return pl.pallas_call(
        attn_lstm_kernel,
        out_shape=jax.ShapeDtypeStruct((B, OUT), jnp.float32),
        in_specs=[vmem] * 11,
        out_specs=vmem,
        scratch_shapes=[
            pltpu.VMEM((T, B, 8 * H), jnp.float32),   # gx: hoisted gate projections
            pltpu.VMEM((T, B, H), jnp.float32),       # fwd hidden history
            pltpu.VMEM((T, B, H), jnp.float32),       # bwd hidden history
        ],
    )(x_seq, wih0_big, wih12_big, whh_bd, bias_big, w1, b1, w2, b2, w3, b3)


# -------------------------- pure-JAX reference ----------------------------- #
def reference(x, params):
    wih0, wih12, whh, b, w1, b1, w2, b2, w3, b3 = params
    B, IN, T = x.shape
    H = whh.shape[2]
    inp = jnp.transpose(x, (2, 0, 1)).astype(jnp.float32)        # (T, B, IN)
    for layer in range(3):
        outs = []
        for d in range(2):
            w_ih = wih0[d] if layer == 0 else wih12[layer - 1, d]
            w_hh = whh[layer, d]
            bias = b[layer, d]
            h = jnp.zeros((B, H), jnp.float32)
            c = jnp.zeros((B, H), jnp.float32)
            hs = [None] * T
            ts = range(T) if d == 0 else range(T - 1, -1, -1)
            for t in ts:
                gates = inp[t] @ w_ih + h @ w_hh + bias
                i_g = jax.nn.sigmoid(gates[:, :H])
                f_g = jax.nn.sigmoid(gates[:, H:2 * H])
                g_g = jnp.tanh(gates[:, 2 * H:3 * H])
                o_g = jax.nn.sigmoid(gates[:, 3 * H:])
                c = f_g * c + i_g * g_g
                h = o_g * jnp.tanh(c)
                hs[t] = h
            outs.append(jnp.stack(hs, 0))
        inp = jnp.concatenate(outs, axis=-1)                      # (T, B, 2H)
    last = inp[T - 1]
    o = jax.nn.relu(last @ w1 + b1)
    o = jax.nn.relu(o @ w2 + b2)
    return o @ w3 + b3


# --------------------------------- main ------------------------------------ #
if __name__ == "__main__":
    # Small, module-consistent shapes: input_dim=8, hidden_dim=64 (H=32/dir),
    # output_dim=2, batch=2, seq=8.
    B, IN, T = 2, 8, 8
    HID = 64
    H = HID // 2
    OUT = 2

    key = jax.random.PRNGKey(0)
    ks = jax.random.split(key, 12)
    s = 0.1  # deterministic synthetic init (not a checkpoint load)

    wih0  = (jax.random.normal(ks[0], (2, IN, 4 * H)) * s).astype(jnp.float32)
    wih12 = (jax.random.normal(ks[1], (2, 2, 2 * H, 4 * H)) * s).astype(jnp.float32)
    whh   = (jax.random.normal(ks[2], (3, 2, H, 4 * H)) * s).astype(jnp.float32)
    bias  = (jax.random.normal(ks[3], (3, 2, 1, 4 * H)) * s).astype(jnp.float32)  # b_ih + b_hh combined
    w1 = (jax.random.normal(ks[4], (2 * H, 64)) * s).astype(jnp.float32)
    b1 = (jax.random.normal(ks[5], (1, 64)) * s).astype(jnp.float32)
    w2 = (jax.random.normal(ks[6], (64, 16)) * s).astype(jnp.float32)
    b2 = (jax.random.normal(ks[7], (1, 16)) * s).astype(jnp.float32)
    w3 = (jax.random.normal(ks[8], (16, OUT)) * s).astype(jnp.float32)
    b3 = (jax.random.normal(ks[9], (1, OUT)) * s).astype(jnp.float32)
    params = (wih0, wih12, whh, bias, w1, b1, w2, b2, w3, b3)

    x = jax.random.normal(ks[10], (B, IN, T), dtype=jnp.float32)

    out = attention_lstm_no(x, params)
    out = jax.block_until_ready(out)

    ref = reference(x, params)
    assert out.shape == (B, OUT), out.shape
    np.testing.assert_allclose(np.asarray(out), np.asarray(ref), atol=2e-3, rtol=2e-3)

    print("KERNEL_OK")
</pallas_src>

<mosaic_0001>
module attributes {stable_mosaic.version = 11 : i64} {
  func.func @attn_lstm_kernel(%arg0: memref<8x2x8xf32, #tpu.memory_space<vmem>>, %arg1: memref<2x8x256xf32, #tpu.memory_space<vmem>>, %arg2: memref<2x2x64x256xf32, #tpu.memory_space<vmem>>, %arg3: memref<3x64x256xf32, #tpu.memory_space<vmem>>, %arg4: memref<3x1x256xf32, #tpu.memory_space<vmem>>, %arg5: memref<64x64xf32, #tpu.memory_space<vmem>>, %arg6: memref<1x64xf32, #tpu.memory_space<vmem>>, %arg7: memref<64x16xf32, #tpu.memory_space<vmem>>, %arg8: memref<1x16xf32, #tpu.memory_space<vmem>>, %arg9: memref<16x2xf32, #tpu.memory_space<vmem>>, %arg10: memref<1x2xf32, #tpu.memory_space<vmem>>, %arg11: memref<2x2xf32, #tpu.memory_space<vmem>>, %arg12: memref<8x2x256xf32, #tpu.memory_space<vmem>>, %arg13: memref<8x2x32xf32, #tpu.memory_space<vmem>>, %arg14: memref<8x2x32xf32, #tpu.memory_space<vmem>>) attributes {dimension_semantics = [], scalar_prefetch = 0 : i64, scratch_operands = 3 : i64, tpu.core_type = #tpu.core_type<tc>} {
    %c0 = arith.constant 0 : index
    %c0_0 = arith.constant 0 : index
    %c0_1 = arith.constant 0 : index
    %0 = vector.load %arg1[%c0, %c0_0, %c0_1] : memref<2x8x256xf32, #tpu.memory_space<vmem>>, vector<1x8x256xf32>
    %1 = vector.shape_cast %0 : vector<1x8x256xf32> to vector<8x256xf32>
    %c1 = arith.constant 1 : index
    %c0_2 = arith.constant 0 : index
    %c0_3 = arith.constant 0 : index
    %2 = vector.load %arg1[%c1, %c0_2, %c0_3] : memref<2x8x256xf32, #tpu.memory_space<vmem>>, vector<1x8x256xf32>
    %3 = vector.shape_cast %2 : vector<1x8x256xf32> to vector<8x256xf32>
    %c0_4 = arith.constant 0 : index
    %c0_5 = arith.constant 0 : index
    %c0_6 = arith.constant 0 : index
    %4 = vector.load %arg4[%c0_4, %c0_5, %c0_6] : memref<3x1x256xf32, #tpu.memory_space<vmem>>, vector<1x1x256xf32>
    %5 = vector.shape_cast %4 : vector<1x1x256xf32> to vector<1x256xf32>
    %c0_7 = arith.constant 0 : index
    %c0_8 = arith.constant 0 : index
    %c0_9 = arith.constant 0 : index
    %6 = vector.load %arg0[%c0_7, %c0_8, %c0_9] : memref<8x2x8xf32, #tpu.memory_space<vmem>>, vector<1x2x8xf32>
    %7 = vector.shape_cast %6 : vector<1x2x8xf32> to vector<2x8xf32>
    %cst = arith.constant dense<0.000000e+00> : vector<2x256xf32>
    %8 = tpu.matmul %7, %1, %cst {dimension_numbers = #tpu.dot_dimension_numbers<[1], [0], [0], [1], [0, 0, 1, 1], [], []>} : vector<2x8xf32>, vector<8x256xf32>, vector<2x256xf32> -> vector<2x256xf32>
    %9 = vector.broadcast %5 : vector<1x256xf32> to vector<2x256xf32>
    %10 = arith.addf %9, %8 : vector<2x256xf32>
    %c7 = arith.constant 7 : index
    %c0_10 = arith.constant 0 : index
    %c0_11 = arith.constant 0 : index
    %11 = vector.load %arg0[%c7, %c0_10, %c0_11] : memref<8x2x8xf32, #tpu.memory_space<vmem>>, vector<1x2x8xf32>
    %12 = vector.shape_cast %11 : vector<1x2x8xf32> to vector<2x8xf32>
    %cst_12 = arith.constant dense<0.000000e+00> : vector<2x256xf32>
    %13 = tpu.matmul %12, %3, %cst_12 {dimension_numbers = #tpu.dot_dimension_numbers<[1], [0], [0], [1], [0, 0, 1, 1], [], []>} : vector<2x8xf32>, vector<8x256xf32>, vector<2x256xf32> -> vector<2x256xf32>
    %14 = arith.addf %10, %13 : vector<2x256xf32>
    %c0_13 = arith.constant 0 : index
    %c0_14 = arith.constant 0 : index
    %c0_15 = arith.constant 0 : index
    %15 = vector.load %arg12[%c0_13, %c0_14, %c0_15] : memref<8x2x256xf32, #tpu.memory_space<vmem>>, vector<1x2x256xf32>
    %16 = vector.shape_cast %15 : vector<1x2x256xf32> to vector<2x256xf32>
    %17 = vector.shape_cast %14 : vector<2x256xf32> to vector<1x2x256xf32>
    tpu.vector_store %arg12[%c0_13, %c0_14, %c0_15], %17 {strides = array<i32>} : memref<8x2x256xf32, #tpu.memory_space<vmem>>, vector<1x2x256xf32>,
    %c1_16 = arith.constant 1 : index
    %c0_17 = arith.constant 0 : index
    %c0_18 = arith.constant 0 : index
    %18 = vector.load %arg0[%c1_16, %c0_17, %c0_18] : memref<8x2x8xf32, #tpu.memory_space<vmem>>, vector<1x2x8xf32>
    %19 = vector.shape_cast %18 : vector<1x2x8xf32> to vector<2x8xf32>
    %cst_19 = arith.constant dense<0.000000e+00> : vector<2x256xf32>
    %20 = tpu.matmul %19, %1, %cst_19 {dimension_numbers = #tpu.dot_dimension_numbers<[1], [0], [0], [1], [0, 0, 1, 1], [], []>} : vector<2x8xf32>, vector<8x256xf32>, vector<2x256xf32> -> vector<2x256xf32>
    %21 = vector.broadcast %5 : vector<1x256xf32> to vector<2x256xf32>
    %22 = arith.addf %21, %20 : vector<2x256xf32>
    %c6 = arith.constant 6 : index
    %c0_20 = arith.constant 0 : index
    %c0_21 = arith.constant 0 : index
    %23 = vector.load %arg0[%c6, %c0_20, %c0_21] : memref<8x2x8xf32, #tpu.memory_space<vmem>>, vector<1x2x8xf32>
    %24 = vector.shape_cast %23 : vector<1x2x8xf32> to vector<2x8xf32>
    %cst_22 = arith.constant dense<0.000000e+00> : vector<2x256xf32>
    %25 = tpu.matmul %24, %3, %cst_22 {dimension_numbers = #tpu.dot_dimension_numbers<[1], [0], [0], [1], [0, 0, 1, 1], [], []>} : vector<2x8xf32>, vector<8x256xf32>, vector<2x256xf32> -> vector<2x256xf32>
    %26 = arith.addf %22, %25 : vector<2x256xf32>
    %c1_23 = arith.constant 1 : index
    %c0_24 = arith.constant 0 : index
    %c0_25 = arith.constant 0 : index
    %27 = vector.load %arg12[%c1_23, %c0_24, %c0_25] : memref<8x2x256xf32, #tpu.memory_space<vmem>>, vector<1x2x256xf32>
    %28 = vector.shape_cast %27 : vector<1x2x256xf32> to vector<2x256xf32>
    %29 = vector.shape_cast %26 : vector<2x256xf32> to vector<1x2x256xf32>
    tpu.vector_store %arg12[%c1_23, %c0_24, %c0_25], %29 {strides = array<i32>} : memref<8x2x256xf32, #tpu.memory_space<vmem>>, vector<1x2x256xf32>,
    %c2 = arith.constant 2 : index
    %c0_26 = arith.constant 0 : index
    %c0_27 = arith.constant 0 : index
    %30 = vector.load %arg0[%c2, %c0_26, %c0_27] : memref<8x2x8xf32, #tpu.memory_space<vmem>>, vector<1x2x8xf32>
    %31 = vector.shape_cast %30 : vector<1x2x8xf32> to vector<2x8xf32>
    %cst_28 = arith.constant dense<0.000000e+00> : vector<2x256xf32>
    %32 = tpu.matmul %31, %1, %cst_28 {dimension_numbers = #tpu.dot_dimension_numbers<[1], [0], [0], [1], [0, 0, 1, 1], [], []>} : vector<2x8xf32>, vector<8x256xf32>, vector<2x256xf32> -> vector<2x256xf32>
    %33 = vector.broadcast %5 : vector<1x256xf32> to vector<2x256xf32>
    %34 = arith.addf %33, %32 : vector<2x256xf32>
    %c5 = arith.constant 5 : index
    %c0_29 = arith.constant 0 : index
    %c0_30 = arith.constant 0 : index
    %35 = vector.load %arg0[%c5, %c0_29, %c0_30] : memref<8x2x8xf32, #tpu.memory_space<vmem>>, vector<1x2x8xf32>
    %36 = vector.shape_cast %35 : vector<1x2x8xf32> to vector<2x8xf32>
    %cst_31 = arith.constant dense<0.000000e+00> : vector<2x256xf32>
    %37 = tpu.matmul %36, %3, %cst_31 {dimension_numbers = #tpu.dot_dimension_numbers<[1], [0], [0], [1], [0, 0, 1, 1], [], []>} : vector<2x8xf32>, vector<8x256xf32>, vector<2x256xf32> -> vector<2x256xf32>
    %38 = arith.addf %34, %37 : vector<2x256xf32>
    %c2_32 = arith.constant 2 : index
    %c0_33 = arith.constant 0 : index
    %c0_34 = arith.constant 0 : index
    %39 = vector.load %arg12[%c2_32, %c0_33, %c0_34] : memref<8x2x256xf32, #tpu.memory_space<vmem>>, vector<1x2x256xf32>
    %40 = vector.shape_cast %39 : vector<1x2x256xf32> to vector<2x256xf32>
    %41 = vector.shape_cast %38 : vector<2x256xf32> to vector<1x2x256xf32>
    tpu.vector_store %arg12[%c2_32, %c0_33, %c0_34], %41 {strides = array<i32>} : memref<8x2x256xf32, #tpu.memory_space<vmem>>, vector<1x2x256xf32>,
    %c3 = arith.constant 3 : index
    %c0_35 = arith.constant 0 : index
    %c0_36 = arith.constant 0 : index
    %42 = vector.load %arg0[%c3, %c0_35, %c0_36] : memref<8x2x8xf32, #tpu.memory_space<vmem>>, vector<1x2x8xf32>
    %43 = vector.shape_cast %42 : vector<1x2x8xf32> to vector<2x8xf32>
    %cst_37 = arith.constant dense<0.000000e+00> : vector<2x256xf32>
    %44 = tpu.matmul %43, %1, %cst_37 {dimension_numbers = #tpu.dot_dimension_numbers<[1], [0], [0], [1], [0, 0, 1, 1], [], []>} : vector<2x8xf32>, vector<8x256xf32>, vector<2x256xf32> -> vector<2x256xf32>
    %45 = vector.broadcast %5 : vector<1x256xf32> to vector<2x256xf32>
    %46 = arith.addf %45, %44 : vector<2x256xf32>
    %c4 = arith.constant 4 : index
    %c0_38 = arith.constant 0 : index
    %c0_39 = arith.constant 0 : index
    %47 = vector.load %arg0[%c4, %c0_38, %c0_39] : memref<8x2x8xf32, #tpu.memory_space<vmem>>, vector<1x2x8xf32>
    %48 = vector.shape_cast %47 : vector<1x2x8xf32> to vector<2x8xf32>
    %cst_40 = arith.constant dense<0.000000e+00> : vector<2x256xf32>
    %49 = tpu.matmul %48, %3, %cst_40 {dimension_numbers = #tpu.dot_dimension_numbers<[1], [0], [0], [1], [0, 0, 1, 1], [], []>} : vector<2x8xf32>, vector<8x256xf32>, vector<2x256xf32> -> vector<2x256xf32>
    %50 = arith.addf %46, %49 : vector<2x256xf32>
    %c3_41 = arith.constant 3 : index
    %c0_42 = arith.constant 0 : index
    %c0_43 = arith.constant 0 : index
    %51 = vector.load %arg12[%c3_41, %c0_42, %c0_43] : memref<8x2x256xf32, #tpu.memory_space<vmem>>, vector<1x2x256xf32>
    %52 = vector.shape_cast %51 : vector<1x2x256xf32> to vector<2x256xf32>
    %53 = vector.shape_cast %50 : vector<2x256xf32> to vector<1x2x256xf32>
    tpu.vector_store %arg12[%c3_41, %c0_42, %c0_43], %53 {strides = array<i32>} : memref<8x2x256xf32, #tpu.memory_space<vmem>>, vector<1x2x256xf32>,
    %c4_44 = arith.constant 4 : index
    %c0_45 = arith.constant 0 : index
    %c0_46 = arith.constant 0 : index
    %54 = vector.load %arg0[%c4_44, %c0_45, %c0_46] : memref<8x2x8xf32, #tpu.memory_space<vmem>>, vector<1x2x8xf32>
    %55 = vector.shape_cast %54 : vector<1x2x8xf32> to vector<2x8xf32>
    %cst_47 = arith.constant dense<0.000000e+00> : vector<2x256xf32>
    %56 = tpu.matmul %55, %1, %cst_47 {dimension_numbers = #tpu.dot_dimension_numbers<[1], [0], [0], [1], [0, 0, 1, 1], [], []>} : vector<2x8xf32>, vector<8x256xf32>, vector<2x256xf32> -> vector<2x256xf32>
    %57 = vector.broadcast %5 : vector<1x256xf32> to vector<2x256xf32>
    %58 = arith.addf %57, %56 : vector<2x256xf32>
    %c3_48 = arith.constant 3 : index
    %c0_49 = arith.constant 0 : index
    %c0_50 = arith.constant 0 : index
    %59 = vector.load %arg0[%c3_48, %c0_49, %c0_50] : memref<8x2x8xf32, #tpu.memory_space<vmem>>, vector<1x2x8xf32>
    %60 = vector.shape_cast %59 : vector<1x2x8xf32> to vector<2x8xf32>
    %cst_51 = arith.constant dense<0.000000e+00> : vector<2x256xf32>
    %61 = tpu.matmul %60, %3, %cst_51 {dimension_numbers = #tpu.dot_dimension_numbers<[1], [0], [0], [1], [0, 0, 1, 1], [], []>} : vector<2x8xf32>, vector<8x256xf32>, vector<2x256xf32> -> vector<2x256xf32>
    %62 = arith.addf %58, %61 : vector<2x256xf32>
    %c4_52 = arith.constant 4 : index
    %c0_53 = arith.constant 0 : index
    %c0_54 = arith.constant 0 : index
    %63 = vector.load %arg12[%c4_52, %c0_53, %c0_54] : memref<8x2x256xf32, #tpu.memory_space<vmem>>, vector<1x2x256xf32>
    %64 = vector.shape_cast %63 : vector<1x2x256xf32> to vector<2x256xf32>
    %65 = vector.shape_cast %62 : vector<2x256xf32> to vector<1x2x256xf32>
    tpu.vector_store %arg12[%c4_52, %c0_53, %c0_54], %65 {strides = array<i32>} : memref<8x2x256xf32, #tpu.memory_space<vmem>>, vector<1x2x256xf32>,
    %c5_55 = arith.constant 5 : index
    %c0_56 = arith.constant 0 : index
    %c0_57 = arith.constant 0 : index
    %66 = vector.load %arg0[%c5_55, %c0_56, %c0_57] : memref<8x2x8xf32, #tpu.memory_space<vmem>>, vector<1x2x8xf32>
    %67 = vector.shape_cast %66 : vector<1x2x8xf32> to vector<2x8xf32>
    %cst_58 = arith.constant dense<0.000000e+00> : vector<2x256xf32>
    %68 = tpu.matmul %67, %1, %cst_58 {dimension_numbers = #tpu.dot_dimension_numbers<[1], [0], [0], [1], [0, 0, 1, 1], [], []>} : vector<2x8xf32>, vector<8x256xf32>, vector<2x256xf32> -> vector<2x256xf32>
    %69 = vector.broadcast %5 : vector<1x256xf32> to vector<2x256xf32>
    %70 = arith.addf %69, %68 : vector<2x256xf32>
    %c2_59 = arith.constant 2 : index
    %c0_60 = arith.constant 0 : index
    %c0_61 = arith.constant 0 : index
    %71 = vector.load %arg0[%c2_59, %c0_60, %c0_61] : memref<8x2x8xf32, #tpu.memory_space<vmem>>, vector<1x2x8xf32>
    %72 = vector.shape_cast %71 : vector<1x2x8xf32> to vector<2x8xf32>
    %cst_62 = arith.constant dense<0.000000e+00> : vector<2x256xf32>
    %73 = tpu.matmul %72, %3, %cst_62 {dimension_numbers = #tpu.dot_dimension_numbers<[1], [0], [0], [1], [0, 0, 1, 1], [], []>} : vector<2x8xf32>, vector<8x256xf32>, vector<2x256xf32> -> vector<2x256xf32>
    %74 = arith.addf %70, %73 : vector<2x256xf32>
    %c5_63 = arith.constant 5 : index
    %c0_64 = arith.constant 0 : index
    %c0_65 = arith.constant 0 : index
    %75 = vector.load %arg12[%c5_63, %c0_64, %c0_65] : memref<8x2x256xf32, #tpu.memory_space<vmem>>, vector<1x2x256xf32>
    %76 = vector.shape_cast %75 : vector<1x2x256xf32> to vector<2x256xf32>
    %77 = vector.shape_cast %74 : vector<2x256xf32> to vector<1x2x256xf32>
    tpu.vector_store %arg12[%c5_63, %c0_64, %c0_65], %77 {strides = array<i32>} : memref<8x2x256xf32, #tpu.memory_space<vmem>>, vector<1x2x256xf32>,
    %c6_66 = arith.constant 6 : index
    %c0_67 = arith.constant 0 : index
    %c0_68 = arith.constant 0 : index
    %78 = vector.load %arg0[%c6_66, %c0_67, %c0_68] : memref<8x2x8xf32, #tpu.memory_space<vmem>>, vector<1x2x8xf32>
    %79 = vector.shape_cast %78 : vector<1x2x8xf32> to vector<2x8xf32>
    %cst_69 = arith.constant dense<0.000000e+00> : vector<2x256xf32>
    %80 = tpu.matmul %79, %1, %cst_69 {dimension_numbers = #tpu.dot_dimension_numbers<[1], [0], [0], [1], [0, 0, 1, 1], [], []>} : vector<2x8xf32>, vector<8x256xf32>, vector<2x256xf32> -> vector<2x256xf32>
    %81 = vector.broadcast %5 : vector<1x256xf32> to vector<2x256xf32>
    %82 = arith.addf %81, %80 : vector<2x256xf32>
    %c1_70 = arith.constant 1 : index
    %c0_71 = arith.constant 0 : index
    %c0_72 = arith.constant 0 : index
    %83 = vector.load %arg0[%c1_70, %c0_71, %c0_72] : memref<8x2x8xf32, #tpu.memory_space<vmem>>, vector<1x2x8xf32>
    %84 = vector.shape_cast %83 : vector<1x2x8xf32> to vector<2x8xf32>
    %cst_73 = arith.constant dense<0.000000e+00> : vector<2x256xf32>
    %85 = tpu.matmul %84, %3, %cst_73 {dimension_numbers = #tpu.dot_dimension_numbers<[1], [0], [0], [1], [0, 0, 1, 1], [], []>} : vector<2x8xf32>, vector<8x256xf32>, vector<2x256xf32> -> vector<2x256xf32>
    %86 = arith.addf %82, %85 : vector<2x256xf32>
    %c6_74 = arith.constant 6 : index
    %c0_75 = arith.constant 0 : index
    %c0_76 = arith.constant 0 : index
    %87 = vector.load %arg12[%c6_74, %c0_75, %c0_76] : memref<8x2x256xf32, #tpu.memory_space<vmem>>, vector<1x2x256xf32>
    %88 = vector.shape_cast %87 : vector<1x2x256xf32> to vector<2x256xf32>
    %89 = vector.shape_cast %86 : vector<2x256xf32> to vector<1x2x256xf32>
    tpu.vector_store %arg12[%c6_74, %c0_75, %c0_76], %89 {strides = array<i32>} : memref<8x2x256xf32, #tpu.memory_space<vmem>>, vector<1x2x256xf32>,
    %c7_77 = arith.constant 7 : index
    %c0_78 = arith.constant 0 : index
    %c0_79 = arith.constant 0 : index
    %90 = vector.load %arg0[%c7_77, %c0_78, %c0_79] : memref<8x2x8xf32, #tpu.memory_space<vmem>>, vector<1x2x8xf32>
    %91 = vector.shape_cast %90 : vector<1x2x8xf32> to vector<2x8xf32>
    %cst_80 = arith.constant dense<0.000000e+00> : vector<2x256xf32>
    %92 = tpu.matmul %91, %1, %cst_80 {dimension_numbers = #tpu.dot_dimension_numbers<[1], [0], [0], [1], [0, 0, 1, 1], [], []>} : vector<2x8xf32>, vector<8x256xf32>, vector<2x256xf32> -> vector<2x256xf32>
    %93 = vector.broadcast %5 : vector<1x256xf32> to vector<2x256xf32>
    %94 = arith.addf %93, %92 : vector<2x256xf32>
    %c0_81 = arith.constant 0 : index
    %c0_82 = arith.constant 0 : index
    %c0_83 = arith.constant 0 : index
    %95 = vector.load %arg0[%c0_81, %c0_82, %c0_83] : memref<8x2x8xf32, #tpu.memory_space<vmem>>, vector<1x2x8xf32>
    %96 = vector.shape_cast %95 : vector<1x2x8xf32> to vector<2x8xf32>
    %cst_84 = arith.constant dense<0.000000e+00> : vector<2x256xf32>
    %97 = tpu.matmul %96, %3, %cst_84 {dimension_numbers = #tpu.dot_dimension_numbers<[1], [0], [0], [1], [0, 0, 1, 1], [], []>} : vector<2x8xf32>, vector<8x256xf32>, vector<2x256xf32> -> vector<2x256xf32>
    %98 = arith.addf %94, %97 : vector<2x256xf32>
    %c7_85 = arith.constant 7 : index
    %c0_86 = arith.constant 0 : index
    %c0_87 = arith.constant 0 : index
    %99 = vector.load %arg12[%c7_85, %c0_86, %c0_87] : memref<8x2x256xf32, #tpu.memory_space<vmem>>, vector<1x2x256xf32>
    %100 = vector.shape_cast %99 : vector<1x2x256xf32> to vector<2x256xf32>
    %101 = vector.shape_cast %98 : vector<2x256xf32> to vector<1x2x256xf32>
    tpu.vector_store %arg12[%c7_85, %c0_86, %c0_87], %101 {strides = array<i32>} : memref<8x2x256xf32, #tpu.memory_space<vmem>>, vector<1x2x256xf32>,
    %c0_88 = arith.constant 0 : index
    %c0_89 = arith.constant 0 : index
    %c0_90 = arith.constant 0 : index
    %102 = vector.load %arg3[%c0_88, %c0_89, %c0_90] : memref<3x64x256xf32, #tpu.memory_space<vmem>>, vector<1x64x256xf32>
    %103 = vector.shape_cast %102 : vector<1x64x256xf32> to vector<64x256xf32>
    %cst_91 = arith.constant 0.000000e+00 : f32
    %104 = vector.broadcast %cst_91 : f32 to vector<2x64xf32>
    %cst_92 = arith.constant 0.000000e+00 : f32
    %105 = vector.broadcast %cst_92 : f32 to vector<2x64xf32>
    %c0_i32 = arith.constant 0 : i32
    %106 = arith.index_cast %c0_i32 : i32 to index
    %c0_93 = arith.constant 0 : index
    %c0_94 = arith.constant 0 : index
    %107 = vector.load %arg12[%106, %c0_93, %c0_94] : memref<8x2x256xf32, #tpu.memory_space<vmem>>, vector<1x2x256xf32>
    %108 = vector.shape_cast %107 : vector<1x2x256xf32> to vector<2x256xf32>
    %cst_95 = arith.constant dense<0.000000e+00> : vector<2x256xf32>
    %109 = tpu.matmul %104, %103, %cst_95 {dimension_numbers = #tpu.dot_dimension_numbers<[1], [0], [0], [1], [0, 0, 1, 1], [], []>} : vector<2x64xf32>, vector<64x256xf32>, vector<2x256xf32> -> vector<2x256xf32>
    %110 = arith.addf %108, %109 : vector<2x256xf32>
    %111 = vector.extract_strided_slice %110 {offsets = [0, 0], sizes = [2, 192], strides = [1, 1]} : vector<2x256xf32> to vector<2x192xf32>
    %112 = arith.negf %111 : vector<2x192xf32>
    %113 = math.exp %112 : vector<2x192xf32>
    %cst_96 = arith.constant 1.000000e+00 : f32
    %114 = vector.broadcast %cst_96 : f32 to vector<2x192xf32>
    %115 = arith.addf %114, %113 : vector<2x192xf32>
    %116 = arith.divf %114, %115 : vector<2x192xf32>
    %117 = vector.extract_strided_slice %116 {offsets = [0, 0], sizes = [2, 64], strides = [1, 1]} : vector<2x192xf32> to vector<2x64xf32>
    %118 = vector.extract_strided_slice %116 {offsets = [0, 64], sizes = [2, 64], strides = [1, 1]} : vector<2x192xf32> to vector<2x64xf32>
    %119 = vector.extract_strided_slice %116 {offsets = [0, 128], sizes = [2, 64], strides = [1, 1]} : vector<2x192xf32> to vector<2x64xf32>
    %120 = vector.extract_strided_slice %110 {offsets = [0, 192], sizes = [2, 64], strides = [1, 1]} : vector<2x256xf32> to vector<2x64xf32>
    %121 = math.tanh %120 : vector<2x64xf32>
    %122 = arith.mulf %118, %105 : vector<2x64xf32>
    %123 = arith.mulf %117, %121 : vector<2x64xf32>
    %124 = arith.addf %122, %123 : vector<2x64xf32>
    %125 = math.tanh %124 : vector<2x64xf32>
    %126 = arith.mulf %119, %125 : vector<2x64xf32>
    %127 = vector.extract_strided_slice %126 {offsets = [0, 0], sizes = [2, 32], strides = [1, 1]} : vector<2x64xf32> to vector<2x32xf32>
    %128 = arith.index_cast %c0_i32 : i32 to index
    %c0_97 = arith.constant 0 : index
    %c0_98 = arith.constant 0 : index
    %129 = vector.load %arg13[%128, %c0_97, %c0_98] : memref<8x2x32xf32, #tpu.memory_space<vmem>>, vector<1x2x32xf32>
    %130 = vector.shape_cast %129 : vector<1x2x32xf32> to vector<2x32xf32>
    %131 = vector.shape_cast %127 : vector<2x32xf32> to vector<1x2x32xf32>
    tpu.vector_store %arg13[%128, %c0_97, %c0_98], %131 {strides = array<i32>} : memref<8x2x32xf32, #tpu.memory_space<vmem>>, vector<1x2x32xf32>,
    %132 = vector.extract_strided_slice %126 {offsets = [0, 32], sizes = [2, 32], strides = [1, 1]} : vector<2x64xf32> to vector<2x32xf32>
    %c7_i32 = arith.constant 7 : i32
    %133 = arith.subi %c7_i32, %c0_i32 : i32
    %134 = arith.index_cast %133 : i32 to index
    %c0_99 = arith.constant 0 : index
    %c0_100 = arith.constant 0 : index
    %135 = vector.load %arg14[%134, %c0_99, %c0_100] : memref<8x2x32xf32, #tpu.memory_space<vmem>>, vector<1x2x32xf32>
    %136 = vector.shape_cast %135 : vector<1x2x32xf32> to vector<2x32xf32>
    %137 = vector.shape_cast %132 : vector<2x32xf32> to vector<1x2x32xf32>
    tpu.vector_store %arg14[%134, %c0_99, %c0_100], %137 {strides = array<i32>} : memref<8x2x32xf32, #tpu.memory_space<vmem>>, vector<1x2x32xf32>,
    %c1_i32 = arith.constant 1 : i32
    %138 = arith.index_cast %c1_i32 : i32 to index
    %c0_101 = arith.constant 0 : index
    %c0_102 = arith.constant 0 : index
    %139 = vector.load %arg12[%138, %c0_101, %c0_102] : memref<8x2x256xf32, #tpu.memory_space<vmem>>, vector<1x2x256xf32>
    %140 = vector.shape_cast %139 : vector<1x2x256xf32> to vector<2x256xf32>
    %cst_103 = arith.constant dense<0.000000e+00> : vector<2x256xf32>
    %141 = tpu.matmul %126, %103, %cst_103 {dimension_numbers = #tpu.dot_dimension_numbers<[1], [0], [0], [1], [0, 0, 1, 1], [], []>} : vector<2x64xf32>, vector<64x256xf32>, vector<2x256xf32> -> vector<2x256xf32>
    %142 = arith.addf %140, %141 : vector<2x256xf32>
    %143 = vector.extract_strided_slice %142 {offsets = [0, 0], sizes = [2, 192], strides = [1, 1]} : vector<2x256xf32> to vector<2x192xf32>
    %144 = arith.negf %143 : vector<2x192xf32>
    %145 = math.exp %144 : vector<2x192xf32>
    %cst_104 = arith.constant 1.000000e+00 : f32
    %146 = vector.broadcast %cst_104 : f32 to vector<2x192xf32>
    %147 = arith.addf %146, %145 : vector<2x192xf32>
    %148 = arith.divf %146, %147 : vector<2x192xf32>
    %149 = vector.extract_strided_slice %148 {offsets = [0, 0], sizes = [2, 64], strides = [1, 1]} : vector<2x192xf32> to vector<2x64xf32>
    %150 = vector.extract_strided_slice %148 {offsets = [0, 64], sizes = [2, 64], strides = [1, 1]} : vector<2x192xf32> to vector<2x64xf32>
    %151 = vector.extract_strided_slice %148 {offsets = [0, 128], sizes = [2, 64], strides = [1, 1]} : vector<2x192xf32> to vector<2x64xf32>
    %152 = vector.extract_strided_slice %142 {offsets = [0, 192], sizes = [2, 64], strides = [1, 1]} : vector<2x256xf32> to vector<2x64xf32>
    %153 = math.tanh %152 : vector<2x64xf32>
    %154 = arith.mulf %150, %124 : vector<2x64xf32>
    %155 = arith.mulf %149, %153 : vector<2x64xf32>
    %156 = arith.addf %154, %155 : vector<2x64xf32>
    %157 = math.tanh %156 : vector<2x64xf32>
    %158 = arith.mulf %151, %157 : vector<2x64xf32>
    %159 = vector.extract_strided_slice %158 {offsets = [0, 0], sizes = [2, 32], strides = [1, 1]} : vector<2x64xf32> to vector<2x32xf32>
    %160 = arith.index_cast %c1_i32 : i32 to index
    %c0_105 = arith.constant 0 : index
    %c0_106 = arith.constant 0 : index
    %161 = vector.load %arg13[%160, %c0_105, %c0_106] : memref<8x2x32xf32, #tpu.memory_space<vmem>>, vector<1x2x32xf32>
    %162 = vector.shape_cast %161 : vector<1x2x32xf32> to vector<2x32xf32>
    %163 = vector.shape_cast %159 : vector<2x32xf32> to vector<1x2x32xf32>
    tpu.vector_store %arg13[%160, %c0_105, %c0_106], %163 {strides = array<i32>} : memref<8x2x32xf32, #tpu.memory_space<vmem>>, vector<1x2x32xf32>,
    %164 = vector.extract_strided_slice %158 {offsets = [0, 32], sizes = [2, 32], strides = [1, 1]} : vector<2x64xf32> to vector<2x32xf32>
    %c7_i32_107 = arith.constant 7 : i32
    %165 = arith.subi %c7_i32_107, %c1_i32 : i32
    %166 = arith.index_cast %165 : i32 to index
    %c0_108 = arith.constant 0 : index
    %c0_109 = arith.constant 0 : index
    %167 = vector.load %arg14[%166, %c0_108, %c0_109] : memref<8x2x32xf32, #tpu.memory_space<vmem>>, vector<1x2x32xf32>
    %168 = vector.shape_cast %167 : vector<1x2x32xf32> to vector<2x32xf32>
    %169 = vector.shape_cast %164 : vector<2x32xf32> to vector<1x2x32xf32>
    tpu.vector_store %arg14[%166, %c0_108, %c0_109], %169 {strides = array<i32>} : memref<8x2x32xf32, #tpu.memory_space<vmem>>, vector<1x2x32xf32>,
    %c2_i32 = arith.constant 2 : i32
    %170 = arith.index_cast %c2_i32 : i32 to index
    %c0_110 = arith.constant 0 : index
    %c0_111 = arith.constant 0 : index
    %171 = vector.load %arg12[%170, %c0_110, %c0_111] : memref<8x2x256xf32, #tpu.memory_space<vmem>>, vector<1x2x256xf32>
    %172 = vector.shape_cast %171 : vector<1x2x256xf32> to vector<2x256xf32>
    %cst_112 = arith.constant dense<0.000000e+00> : vector<2x256xf32>
    %173 = tpu.matmul %158, %103, %cst_112 {dimension_numbers = #tpu.dot_dimension_numbers<[1], [0], [0], [1], [0, 0, 1, 1], [], []>} : vector<2x64xf32>, vector<64x256xf32>, vector<2x256xf32> -> vector<2x256xf32>
    %174 = arith.addf %172, %173 : vector<2x256xf32>
    %175 = vector.extract_strided_slice %174 {offsets = [0, 0], sizes = [2, 192], strides = [1, 1]} : vector<2x256xf32> to vector<2x192xf32>
    %176 = arith.negf %175 : vector<2x192xf32>
    %177 = math.exp %176 : vector<2x192xf32>
    %cst_113 = arith.constant 1.000000e+00 : f32
    %178 = vector.broadcast %cst_113 : f32 to vector<2x192xf32>
    %179 = arith.addf %178, %177 : vector<2x192xf32>
    %180 = arith.divf %178, %179 : vector<2x192xf32>
    %181 = vector.extract_strided_slice %180 {offsets = [0, 0], sizes = [2, 64], strides = [1, 1]} : vector<2x192xf32> to vector<2x64xf32>
    %182 = vector.extract_strided_slice %180 {offsets = [0, 64], sizes = [2, 64], strides = [1, 1]} : vector<2x192xf32> to vector<2x64xf32>
    %183 = vector.extract_strided_slice %180 {offsets = [0, 128], sizes = [2, 64], strides = [1, 1]} : vector<2x192xf32> to vector<2x64xf32>
    %184 = vector.extract_strided_slice %174 {offsets = [0, 192], sizes = [2, 64], strides = [1, 1]} : vector<2x256xf32> to vector<2x64xf32>
    %185 = math.tanh %184 : vector<2x64xf32>
    %186 = arith.mulf %182, %156 : vector<2x64xf32>
    %187 = arith.mulf %181, %185 : vector<2x64xf32>
    %188 = arith.addf %186, %187 : vector<2x64xf32>
    %189 = math.tanh %188 : vector<2x64xf32>
    %190 = arith.mulf %183, %189 : vector<2x64xf32>
    %191 = vector.extract_strided_slice %190 {offsets = [0, 0], sizes = [2, 32], strides = [1, 1]} : vector<2x64xf32> to vector<2x32xf32>
    %192 = arith.index_cast %c2_i32 : i32 to index
    %c0_114 = arith.constant 0 : index
    %c0_115 = arith.constant 0 : index
    %193 = vector.load %arg13[%192, %c0_114, %c0_115] : memref<8x2x32xf32, #tpu.memory_space<vmem>>, vector<1x2x32xf32>
    %194 = vector.shape_cast %193 : vector<1x2x32xf32> to vector<2x32xf32>
    %195 = vector.shape_cast %191 : vector<2x32xf32> to vector<1x2x32xf32>
    tpu.vector_store %arg13[%192, %c0_114, %c0_115], %195 {strides = array<i32>} : memref<8x2x32xf32, #tpu.memory_space<vmem>>, vector<1x2x32xf32>,
    %196 = vector.extract_strided_slice %190 {offsets = [0, 32], sizes = [2, 32], strides = [1, 1]} : vector<2x64xf32> to vector<2x32xf32>
    %c7_i32_116 = arith.constant 7 : i32
    %197 = arith.subi %c7_i32_116, %c2_i32 : i32
    %198 = arith.index_cast %197 : i32 to index
    %c0_117 = arith.constant 0 : index
    %c0_118 = arith.constant 0 : index
    %199 = vector.load %arg14[%198, %c0_117, %c0_118] : memref<8x2x32xf32, #tpu.memory_space<vmem>>, vector<1x2x32xf32>
    %200 = vector.shape_cast %199 : vector<1x2x32xf32> to vector<2x32xf32>
    %201 = vector.shape_cast %196 : vector<2x32xf32> to vector<1x2x32xf32>
    tpu.vector_store %arg14[%198, %c0_117, %c0_118], %201 {strides = array<i32>} : memref<8x2x32xf32, #tpu.memory_space<vmem>>, vector<1x2x32xf32>,
    %c3_i32 = arith.constant 3 : i32
    %202 = arith.index_cast %c3_i32 : i32 to index
    %c0_119 = arith.constant 0 : index
    %c0_120 = arith.constant 0 : index
    %203 = vector.load %arg12[%202, %c0_119, %c0_120] : memref<8x2x256xf32, #tpu.memory_space<vmem>>, vector<1x2x256xf32>
    %204 = vector.shape_cast %203 : vector<1x2x256xf32> to vector<2x256xf32>
    %cst_121 = arith.constant dense<0.000000e+00> : vector<2x256xf32>
    %205 = tpu.matmul %190, %103, %cst_121 {dimension_numbers = #tpu.dot_dimension_numbers<[1], [0], [0], [1], [0, 0, 1, 1], [], []>} : vector<2x64xf32>, vector<64x256xf32>, vector<2x256xf32> -> vector<2x256xf32>
    %206 = arith.addf %204, %205 : vector<2x256xf32>
    %207 = vector.extract_strided_slice %206 {offsets = [0, 0], sizes = [2, 192], strides = [1, 1]} : vector<2x256xf32> to vector<2x192xf32>
    %208 = arith.negf %207 : vector<2x192xf32>
    %209 = math.exp %208 : vector<2x192xf32>
    %cst_122 = arith.constant 1.000000e+00 : f32
    %210 = vector.broadcast %cst_122 : f32 to vector<2x192xf32>
    %211 = arith.addf %210, %209 : vector<2x192xf32>
    %212 = arith.divf %210, %211 : vector<2x192xf32>
    %213 = vector.extract_strided_slice %212 {offsets = [0, 0], sizes = [2, 64], strides = [1, 1]} : vector<2x192xf32> to vector<2x64xf32>
    %214 = vector.extract_strided_slice %212 {offsets = [0, 64], sizes = [2, 64], strides = [1, 1]} : vector<2x192xf32> to vector<2x64xf32>
    %215 = vector.extract_strided_slice %212 {offsets = [0, 128], sizes = [2, 64], strides = [1, 1]} : vector<2x192xf32> to vector<2x64xf32>
    %216 = vector.extract_strided_slice %206 {offsets = [0, 192], sizes = [2, 64], strides = [1, 1]} : vector<2x256xf32> to vector<2x64xf32>
    %217 = math.tanh %216 : vector<2x64xf32>
    %218 = arith.mulf %214, %188 : vector<2x64xf32>
    %219 = arith.mulf %213, %217 : vector<2x64xf32>
    %220 = arith.addf %218, %219 : vector<2x64xf32>
    %221 = math.tanh %220 : vector<2x64xf32>
    %222 = arith.mulf %215, %221 : vector<2x64xf32>
    %223 = vector.extract_strided_slice %222 {offsets = [0, 0], sizes = [2, 32], strides = [1, 1]} : vector<2x64xf32> to vector<2x32xf32>
    %224 = arith.index_cast %c3_i32 : i32 to index
    %c0_123 = arith.constant 0 : index
    %c0_124 = arith.constant 0 : index
    %225 = vector.load %arg13[%224, %c0_123, %c0_124] : memref<8x2x32xf32, #tpu.memory_space<vmem>>, vector<1x2x32xf32>
    %226 = vector.shape_cast %225 : vector<1x2x32xf32> to vector<2x32xf32>
    %227 = vector.shape_cast %223 : vector<2x32xf32> to vector<1x2x32xf32>
    tpu.vector_store %arg13[%224, %c0_123, %c0_124], %227 {strides = array<i32>} : memref<8x2x32xf32, #tpu.memory_space<vmem>>, vector<1x2x32xf32>,
    %228 = vector.extract_strided_slice %222 {offsets = [0, 32], sizes = [2, 32], strides = [1, 1]} : vector<2x64xf32> to vector<2x32xf32>
    %c7_i32_125 = arith.constant 7 : i32
    %229 = arith.subi %c7_i32_125, %c3_i32 : i32
    %230 = arith.index_cast %229 : i32 to index
    %c0_126 = arith.constant 0 : index
    %c0_127 = arith.constant 0 : index
    %231 = vector.load %arg14[%230, %c0_126, %c0_127] : memref<8x2x32xf32, #tpu.memory_space<vmem>>, vector<1x2x32xf32>
    %232 = vector.shape_cast %231 : vector<1x2x32xf32> to vector<2x32xf32>
    %233 = vector.shape_cast %228 : vector<2x32xf32> to vector<1x2x32xf32>
    tpu.vector_store %arg14[%230, %c0_126, %c0_127], %233 {strides = array<i32>} : memref<8x2x32xf32, #tpu.memory_space<vmem>>, vector<1x2x32xf32>,
    %c4_i32 = arith.constant 4 : i32
    %234 = arith.index_cast %c4_i32 : i32 to index
    %c0_128 = arith.constant 0 : index
    %c0_129 = arith.constant 0 : index
    %235 = vector.load %arg12[%234, %c0_128, %c0_129] : memref<8x2x256xf32, #tpu.memory_space<vmem>>, vector<1x2x256xf32>
    %236 = vector.shape_cast %235 : vector<1x2x256xf32> to vector<2x256xf32>
    %cst_130 = arith.constant dense<0.000000e+00> : vector<2x256xf32>
    %237 = tpu.matmul %222, %103, %cst_130 {dimension_numbers = #tpu.dot_dimension_numbers<[1], [0], [0], [1], [0, 0, 1, 1], [], []>} : vector<2x64xf32>, vector<64x256xf32>, vector<2x256xf32> -> vector<2x256xf32>
    %238 = arith.addf %236, %237 : vector<2x256xf32>
    %239 = vector.extract_strided_slice %238 {offsets = [0, 0], sizes = [2, 192], strides = [1, 1]} : vector<2x256xf32> to vector<2x192xf32>
    %240 = arith.negf %239 : vector<2x192xf32>
    %241 = math.exp %240 : vector<2x192xf32>
    %cst_131 = arith.constant 1.000000e+00 : f32
    %242 = vector.broadcast %cst_131 : f32 to vector<2x192xf32>
    %243 = arith.addf %242, %241 : vector<2x192xf32>
    %244 = arith.divf %242, %243 : vector<2x192xf32>
    %245 = vector.extract_strided_slice %244 {offsets = [0, 0], sizes = [2, 64], strides = [1, 1]} : vector<2x192xf32> to vector<2x64xf32>
    %246 = vector.extract_strided_slice %244 {offsets = [0, 64], sizes = [2, 64], strides = [1, 1]} : vector<2x192xf32> to vector<2x64xf32>
    %247 = vector.extract_strided_slice %244 {offsets = [0, 128], sizes = [2, 64], strides = [1, 1]} : vector<2x192xf32> to vector<2x64xf32>
    %248 = vector.extract_strided_slice %238 {offsets = [0, 192], sizes = [2, 64], strides = [1, 1]} : vector<2x256xf32> to vector<2x64xf32>
    %249 = math.tanh %248 : vector<2x64xf32>
    %250 = arith.mulf %246, %220 : vector<2x64xf32>
    %251 = arith.mulf %245, %249 : vector<2x64xf32>
    %252 = arith.addf %250, %251 : vector<2x64xf32>
    %253 = math.tanh %252 : vector<2x64xf32>
    %254 = arith.mulf %247, %253 : vector<2x64xf32>
    %255 = vector.extract_strided_slice %254 {offsets = [0, 0], sizes = [2, 32], strides = [1, 1]} : vector<2x64xf32> to vector<2x32xf32>
    %256 = arith.index_cast %c4_i32 : i32 to index
    %c0_132 = arith.constant 0 : index
    %c0_133 = arith.constant 0 : index
    %257 = vector.load %arg13[%256, %c0_132, %c0_133] : memref<8x2x32xf32, #tpu.memory_space<vmem>>, vector<1x2x32xf32>
    %258 = vector.shape_cast %257 : vector<1x2x32xf32> to vector<2x32xf32>
    %259 = vector.shape_cast %255 : vector<2x32xf32> to vector<1x2x32xf32>
    tpu.vector_store %arg13[%256, %c0_132, %c0_133], %259 {strides = array<i32>} : memref<8x2x32xf32, #tpu.memory_space<vmem>>, vector<1x2x32xf32>,
    %260 = vector.extract_strided_slice %254 {offsets = [0, 32], sizes = [2, 32], strides = [1, 1]} : vector<2x64xf32> to vector<2x32xf32>
    %c7_i32_134 = arith.constant 7 : i32
    %261 = arith.subi %c7_i32_134, %c4_i32 : i32
    %262 = arith.index_cast %261 : i32 to index
    %c0_135 = arith.constant 0 : index
    %c0_136 = arith.constant 0 : index
    %263 = vector.load %arg14[%262, %c0_135, %c0_136] : memref<8x2x32xf32, #tpu.memory_space<vmem>>, vector<1x2x32xf32>
    %264 = vector.shape_cast %263 : vector<1x2x32xf32> to vector<2x32xf32>
    %265 = vector.shape_cast %260 : vector<2x32xf32> to vector<1x2x32xf32>
    tpu.vector_store %arg14[%262, %c0_135, %c0_136], %265 {strides = array<i32>} : memref<8x2x32xf32, #tpu.memory_space<vmem>>, vector<1x2x32xf32>,
    %c5_i32 = arith.constant 5 : i32
    %266 = arith.index_cast %c5_i32 : i32 to index
    %c0_137 = arith.constant 0 : index
    %c0_138 = arith.constant 0 : index
    %267 = vector.load %arg12[%266, %c0_137, %c0_138] : memref<8x2x256xf32, #tpu.memory_space<vmem>>, vector<1x2x256xf32>
    %268 = vector.shape_cast %267 : vector<1x2x256xf32> to vector<2x256xf32>
    %cst_139 = arith.constant dense<0.000000e+00> : vector<2x256xf32>
    %269 = tpu.matmul %254, %103, %cst_139 {dimension_numbers = #tpu.dot_dimension_numbers<[1], [0], [0], [1], [0, 0, 1, 1], [], []>} : vector<2x64xf32>, vector<64x256xf32>, vector<2x256xf32> -> vector<2x256xf32>
    %270 = arith.addf %268, %269 : vector<2x256xf32>
    %271 = vector.extract_strided_slice %270 {offsets = [0, 0], sizes = [2, 192], strides = [1, 1]} : vector<2x256xf32> to vector<2x192xf32>
    %272 = arith.negf %271 : vector<2x192xf32>
    %273 = math.exp %272 : vector<2x192xf32>
    %cst_140 = arith.constant 1.000000e+00 : f32
    %274 = vector.broadcast %cst_140 : f32 to vector<2x192xf32>
    %275 = arith.addf %274, %273 : vector<2x192xf32>
    %276 = arith.divf %274, %275 : vector<2x192xf32>
    %277 = vector.extract_strided_slice %276 {offsets = [0, 0], sizes = [2, 64], strides = [1, 1]} : vector<2x192xf32> to vector<2x64xf32>
    %278 = vector.extract_strided_slice %276 {offsets = [0, 64], sizes = [2, 64], strides = [1, 1]} : vector<2x192xf32> to vector<2x64xf32>
    %279 = vector.extract_strided_slice %276 {offsets = [0, 128], sizes = [2, 64], strides = [1, 1]} : vector<2x192xf32> to vector<2x64xf32>
    %280 = vector.extract_strided_slice %270 {offsets = [0, 192], sizes = [2, 64], strides = [1, 1]} : vector<2x256xf32> to vector<2x64xf32>
    %281 = math.tanh %280 : vector<2x64xf32>
    %282 = arith.mulf %278, %252 : vector<2x64xf32>
    %283 = arith.mulf %277, %281 : vector<2x64xf32>
    %284 = arith.addf %282, %283 : vector<2x64xf32>
    %285 = math.tanh %284 : vector<2x64xf32>
    %286 = arith.mulf %279, %285 : vector<2x64xf32>
    %287 = vector.extract_strided_slice %286 {offsets = [0, 0], sizes = [2, 32], strides = [1, 1]} : vector<2x64xf32> to vector<2x32xf32>
    %288 = arith.index_cast %c5_i32 : i32 to index
    %c0_141 = arith.constant 0 : index
    %c0_142 = arith.constant 0 : index
    %289 = vector.load %arg13[%288, %c0_141, %c0_142] : memref<8x2x32xf32, #tpu.memory_space<vmem>>, vector<1x2x32xf32>
    %290 = vector.shape_cast %289 : vector<1x2x32xf32> to vector<2x32xf32>
    %291 = vector.shape_cast %287 : vector<2x32xf32> to vector<1x2x32xf32>
    tpu.vector_store %arg13[%288, %c0_141, %c0_142], %291 {strides = array<i32>} : memref<8x2x32xf32, #tpu.memory_space<vmem>>, vector<1x2x32xf32>,
    %292 = vector.extract_strided_slice %286 {offsets = [0, 32], sizes = [2, 32], strides = [1, 1]} : vector<2x64xf32> to vector<2x32xf32>
    %c7_i32_143 = arith.constant 7 : i32
    %293 = arith.subi %c7_i32_143, %c5_i32 : i32
    %294 = arith.index_cast %293 : i32 to index
    %c0_144 = arith.constant 0 : index
    %c0_145 = arith.constant 0 : index
    %295 = vector.load %arg14[%294, %c0_144, %c0_145] : memref<8x2x32xf32, #tpu.memory_space<vmem>>, vector<1x2x32xf32>
    %296 = vector.shape_cast %295 : vector<1x2x32xf32> to vector<2x32xf32>
    %297 = vector.shape_cast %292 : vector<2x32xf32> to vector<1x2x32xf32>
    tpu.vector_store %arg14[%294, %c0_144, %c0_145], %297 {strides = array<i32>} : memref<8x2x32xf32, #tpu.memory_space<vmem>>, vector<1x2x32xf32>,
    %c6_i32 = arith.constant 6 : i32
    %298 = arith.index_cast %c6_i32 : i32 to index
    %c0_146 = arith.constant 0 : index
    %c0_147 = arith.constant 0 : index
    %299 = vector.load %arg12[%298, %c0_146, %c0_147] : memref<8x2x256xf32, #tpu.memory_space<vmem>>, vector<1x2x256xf32>
    %300 = vector.shape_cast %299 : vector<1x2x256xf32> to vector<2x256xf32>
    %cst_148 = arith.constant dense<0.000000e+00> : vector<2x256xf32>
    %301 = tpu.matmul %286, %103, %cst_148 {dimension_numbers = #tpu.dot_dimension_numbers<[1], [0], [0], [1], [0, 0, 1, 1], [], []>} : vector<2x64xf32>, vector<64x256xf32>, vector<2x256xf32> -> vector<2x256xf32>
    %302 = arith.addf %300, %301 : vector<2x256xf32>
    %303 = vector.extract_strided_slice %302 {offsets = [0, 0], sizes = [2, 192], strides = [1, 1]} : vector<2x256xf32> to vector<2x192xf32>
    %304 = arith.negf %303 : vector<2x192xf32>
    %305 = math.exp %304 : vector<2x192xf32>
    %cst_149 = arith.constant 1.000000e+00 : f32
    %306 = vector.broadcast %cst_149 : f32 to vector<2x192xf32>
    %307 = arith.addf %306, %305 : vector<2x192xf32>
    %308 = arith.divf %306, %307 : vector<2x192xf32>
    %309 = vector.extract_strided_slice %308 {offsets = [0, 0], sizes = [2, 64], strides = [1, 1]} : vector<2x192xf32> to vector<2x64xf32>
    %310 = vector.extract_strided_slice %308 {offsets = [0, 64], sizes = [2, 64], strides = [1, 1]} : vector<2x192xf32> to vector<2x64xf32>
    %311 = vector.extract_strided_slice %308 {offsets = [0, 128], sizes = [2, 64], strides = [1, 1]} : vector<2x192xf32> to vector<2x64xf32>
    %312 = vector.extract_strided_slice %302 {offsets = [0, 192], sizes = [2, 64], strides = [1, 1]} : vector<2x256xf32> to vector<2x64xf32>
    %313 = math.tanh %312 : vector<2x64xf32>
    %314 = arith.mulf %310, %284 : vector<2x64xf32>
    %315 = arith.mulf %309, %313 : vector<2x64xf32>
    %316 = arith.addf %314, %315 : vector<2x64xf32>
    %317 = math.tanh %316 : vector<2x64xf32>
    %318 = arith.mulf %311, %317 : vector<2x64xf32>
    %319 = vector.extract_strided_slice %318 {offsets = [0, 0], sizes = [2, 32], strides = [1, 1]} : vector<2x64xf32> to vector<2x32xf32>
    %320 = arith.index_cast %c6_i32 : i32 to index
    %c0_150 = arith.constant 0 : index
    %c0_151 = arith.constant 0 : index
    %321 = vector.load %arg13[%320, %c0_150, %c0_151] : memref<8x2x32xf32, #tpu.memory_space<vmem>>, vector<1x2x32xf32>
    %322 = vector.shape_cast %321 : vector<1x2x32xf32> to vector<2x32xf32>
    %323 = vector.shape_cast %319 : vector<2x32xf32> to vector<1x2x32xf32>
    tpu.vector_store %arg13[%320, %c0_150, %c0_151], %323 {strides = array<i32>} : memref<8x2x32xf32, #tpu.memory_space<vmem>>, vector<1x2x32xf32>,
    %324 = vector.extract_strided_slice %318 {offsets = [0, 32], sizes = [2, 32], strides = [1, 1]} : vector<2x64xf32> to vector<2x32xf32>
    %c7_i32_152 = arith.constant 7 : i32
    %325 = arith.subi %c7_i32_152, %c6_i32 : i32
    %326 = arith.index_cast %325 : i32 to index
    %c0_153 = arith.constant 0 : index
    %c0_154 = arith.constant 0 : index
    %327 = vector.load %arg14[%326, %c0_153, %c0_154] : memref<8x2x32xf32, #tpu.memory_space<vmem>>, vector<1x2x32xf32>
    %328 = vector.shape_cast %327 : vector<1x2x32xf32> to vector<2x32xf32>
    %329 = vector.shape_cast %324 : vector<2x32xf32> to vector<1x2x32xf32>
    tpu.vector_store %arg14[%326, %c0_153, %c0_154], %329 {strides = array<i32>} : memref<8x2x32xf32, #tpu.memory_space<vmem>>, vector<1x2x32xf32>,
    %c7_i32_155 = arith.constant 7 : i32
    %330 = arith.index_cast %c7_i32_155 : i32 to index
    %c0_156 = arith.constant 0 : index
    %c0_157 = arith.constant 0 : index
    %331 = vector.load %arg12[%330, %c0_156, %c0_157] : memref<8x2x256xf32, #tpu.memory_space<vmem>>, vector<1x2x256xf32>
    %332 = vector.shape_cast %331 : vector<1x2x256xf32> to vector<2x256xf32>
    %cst_158 = arith.constant dense<0.000000e+00> : vector<2x256xf32>
    %333 = tpu.matmul %318, %103, %cst_158 {dimension_numbers = #tpu.dot_dimension_numbers<[1], [0], [0], [1], [0, 0, 1, 1], [], []>} : vector<2x64xf32>, vector<64x256xf32>, vector<2x256xf32> -> vector<2x256xf32>
    %334 = arith.addf %332, %333 : vector<2x256xf32>
    %335 = vector.extract_strided_slice %334 {offsets = [0, 0], sizes = [2, 192], strides = [1, 1]} : vector<2x256xf32> to vector<2x192xf32>
    %336 = arith.negf %335 : vector<2x192xf32>
    %337 = math.exp %336 : vector<2x192xf32>
    %cst_159 = arith.constant 1.000000e+00 : f32
    %338 = vector.broadcast %cst_159 : f32 to vector<2x192xf32>
    %339 = arith.addf %338, %337 : vector<2x192xf32>
    %340 = arith.divf %338, %339 : vector<2x192xf32>
    %341 = vector.extract_strided_slice %340 {offsets = [0, 0], sizes = [2, 64], strides = [1, 1]} : vector<2x192xf32> to vector<2x64xf32>
    %342 = vector.extract_strided_slice %340 {offsets = [0, 64], sizes = [2, 64], strides = [1, 1]} : vector<2x192xf32> to vector<2x64xf32>
    %343 = vector.extract_strided_slice %340 {offsets = [0, 128], sizes = [2, 64], strides = [1, 1]} : vector<2x192xf32> to vector<2x64xf32>
    %344 = vector.extract_strided_slice %334 {offsets = [0, 192], sizes = [2, 64], strides = [1, 1]} : vector<2x256xf32> to vector<2x64xf32>
    %345 = math.tanh %344 : vector<2x64xf32>
    %346 = arith.mulf %342, %316 : vector<2x64xf32>
    %347 = arith.mulf %341, %345 : vector<2x64xf32>
    %348 = arith.addf %346, %347 : vector<2x64xf32>
    %349 = math.tanh %348 : vector<2x64xf32>
    %350 = arith.mulf %343, %349 : vector<2x64xf32>
    %351 = vector.extract_strided_slice %350 {offsets = [0, 0], sizes = [2, 32], strides = [1, 1]} : vector<2x64xf32> to vector<2x32xf32>
    %352 = arith.index_cast %c7_i32_155 : i32 to index
    %c0_160 = arith.constant 0 : index
    %c0_161 = arith.constant 0 : index
    %353 = vector.load %arg13[%352, %c0_160, %c0_161] : memref<8x2x32xf32, #tpu.memory_space<vmem>>, vector<1x2x32xf32>
    %354 = vector.shape_cast %353 : vector<1x2x32xf32> to vector<2x32xf32>
    %355 = vector.shape_cast %351 : vector<2x32xf32> to vector<1x2x32xf32>
    tpu.vector_store %arg13[%352, %c0_160, %c0_161], %355 {strides = array<i32>} : memref<8x2x32xf32, #tpu.memory_space<vmem>>, vector<1x2x32xf32>,
    %356 = vector.extract_strided_slice %350 {offsets = [0, 32], sizes = [2, 32], strides = [1, 1]} : vector<2x64xf32> to vector<2x32xf32>
    %c7_i32_162 = arith.constant 7 : i32
    %357 = arith.subi %c7_i32_162, %c7_i32_155 : i32
    %358 = arith.index_cast %357 : i32 to index
    %c0_163 = arith.constant 0 : index
    %c0_164 = arith.constant 0 : index
    %359 = vector.load %arg14[%358, %c0_163, %c0_164] : memref<8x2x32xf32, #tpu.memory_space<vmem>>, vector<1x2x32xf32>
    %360 = vector.shape_cast %359 : vector<1x2x32xf32> to vector<2x32xf32>
    %361 = vector.shape_cast %356 : vector<2x32xf32> to vector<1x2x32xf32>
    tpu.vector_store %arg14[%358, %c0_163, %c0_164], %361 {strides = array<i32>} : memref<8x2x32xf32, #tpu.memory_space<vmem>>, vector<1x2x32xf32>,
    %c8_i32 = arith.constant 8 : i32
    %c0_165 = arith.constant 0 : index
    %c0_166 = arith.constant 0 : index
    %c0_167 = arith.constant 0 : index
    %c0_168 = arith.constant 0 : index
    %362 = vector.load %arg2[%c0_165, %c0_166, %c0_167, %c0_168] : memref<2x2x64x256xf32, #tpu.memory_space<vmem>>, vector<1x1x64x256xf32>
    %363 = vector.shape_cast %362 : vector<1x1x64x256xf32> to vector<64x256xf32>
    %c0_169 = arith.constant 0 : index
    %c1_170 = arith.constant 1 : index
    %c0_171 = arith.constant 0 : index
    %c0_172 = arith.constant 0 : index
    %364 = vector.load %arg2[%c0_169, %c1_170, %c0_171, %c0_172] : memref<2x2x64x256xf32, #tpu.memory_space<vmem>>, vector<1x1x64x256xf32>
    %365 = vector.shape_cast %364 : vector<1x1x64x256xf32> to vector<64x256xf32>
    %c1_173 = arith.constant 1 : index
    %c0_174 = arith.constant 0 : index
    %c0_175 = arith.constant 0 : index
    %366 = vector.load %arg4[%c1_173, %c0_174, %c0_175] : memref<3x1x256xf32, #tpu.memory_space<vmem>>, vector<1x1x256xf32>
    %367 = vector.shape_cast %366 : vector<1x1x256xf32> to vector<1x256xf32>
    %c0_176 = arith.constant 0 : index
    %c0_177 = arith.constant 0 : index
    %c0_178 = arith.constant 0 : index
    %368 = vector.load %arg13[%c0_176, %c0_177, %c0_178] : memref<8x2x32xf32, #tpu.memory_space<vmem>>, vector<1x2x32xf32>
    %369 = vector.shape_cast %368 : vector<1x2x32xf32> to vector<2x32xf32>
    %c0_179 = arith.constant 0 : index
    %c0_180 = arith.constant 0 : index
    %c0_181 = arith.constant 0 : index
    %370 = vector.load %arg14[%c0_179, %c0_180, %c0_181] : memref<8x2x32xf32, #tpu.memory_space<vmem>>, vector<1x2x32xf32>
    %371 = vector.shape_cast %370 : vector<1x2x32xf32> to vector<2x32xf32>
    %372 = tpu.concatenate %369, %371 in 1 : vector<2x32xf32>, vector<2x32xf32> -> vector<2x64xf32>
    %cst_182 = arith.constant dense<0.000000e+00> : vector<2x256xf32>
    %373 = tpu.matmul %372, %363, %cst_182 {dimension_numbers = #tpu.dot_dimension_numbers<[1], [0], [0], [1], [0, 0, 1, 1], [], []>} : vector<2x64xf32>, vector<64x256xf32>, vector<2x256xf32> -> vector<2x256xf32>
    %374 = vector.broadcast %367 : vector<1x256xf32> to vector<2x256xf32>
    %375 = arith.addf %374, %373 : vector<2x256xf32>
    %c7_183 = arith.constant 7 : index
    %c0_184 = arith.constant 0 : index
    %c0_185 = arith.constant 0 : index
    %376 = vector.load %arg13[%c7_183, %c0_184, %c0_185] : memref<8x2x32xf32, #tpu.memory_space<vmem>>, vector<1x2x32xf32>
    %377 = vector.shape_cast %376 : vector<1x2x32xf32> to vector<2x32xf32>
    %c7_186 = arith.constant 7 : index
    %c0_187 = arith.constant 0 : index
    %c0_188 = arith.constant 0 : index
    %378 = vector.load %arg14[%c7_186, %c0_187, %c0_188] : memref<8x2x32xf32, #tpu.memory_space<vmem>>, vector<1x2x32xf32>
    %379 = vector.shape_cast %378 : vector<1x2x32xf32> to vector<2x32xf32>
    %380 = tpu.concatenate %377, %379 in 1 : vector<2x32xf32>, vector<2x32xf32> -> vector<2x64xf32>
    %cst_189 = arith.constant dense<0.000000e+00> : vector<2x256xf32>
    %381 = tpu.matmul %380, %365, %cst_189 {dimension_numbers = #tpu.dot_dimension_numbers<[1], [0], [0], [1], [0, 0, 1, 1], [], []>} : vector<2x64xf32>, vector<64x256xf32>, vector<2x256xf32> -> vector<2x256xf32>
    %382 = arith.addf %375, %381 : vector<2x256xf32>
    %c0_190 = arith.constant 0 : index
    %c0_191 = arith.constant 0 : index
    %c0_192 = arith.constant 0 : index
    %383 = vector.load %arg12[%c0_190, %c0_191, %c0_192] : memref<8x2x256xf32, #tpu.memory_space<vmem>>, vector<1x2x256xf32>
    %384 = vector.shape_cast %383 : vector<1x2x256xf32> to vector<2x256xf32>
    %385 = vector.shape_cast %382 : vector<2x256xf32> to vector<1x2x256xf32>
    tpu.vector_store %arg12[%c0_190, %c0_191, %c0_192], %385 {strides = array<i32>} : memref<8x2x256xf32, #tpu.memory_space<vmem>>, vector<1x2x256xf32>,
    %c1_193 = arith.constant 1 : index
    %c0_194 = arith.constant 0 : index
    %c0_195 = arith.constant 0 : index
    %386 = vector.load %arg13[%c1_193, %c0_194, %c0_195] : memref<8x2x32xf32, #tpu.memory_space<vmem>>, vector<1x2x32xf32>
    %387 = vector.shape_cast %386 : vector<1x2x32xf32> to vector<2x32xf32>
    %c1_196 = arith.constant 1 : index
    %c0_197 = arith.constant 0 : index
    %c0_198 = arith.constant 0 : index
    %388 = vector.load %arg14[%c1_196, %c0_197, %c0_198] : memref<8x2x32xf32, #tpu.memory_space<vmem>>, vector<1x2x32xf32>
    %389 = vector.shape_cast %388 : vector<1x2x32xf32> to vector<2x32xf32>
    %390 = tpu.concatenate %387, %389 in 1 : vector<2x32xf32>, vector<2x32xf32> -> vector<2x64xf32>
    %cst_199 = arith.constant dense<0.000000e+00> : vector<2x256xf32>
    %391 = tpu.matmul %390, %363, %cst_199 {dimension_numbers = #tpu.dot_dimension_numbers<[1], [0], [0], [1], [0, 0, 1, 1], [], []>} : vector<2x64xf32>, vector<64x256xf32>, vector<2x256xf32> -> vector<2x256xf32>
    %392 = vector.broadcast %367 : vector<1x256xf32> to vector<2x256xf32>
    %393 = arith.addf %392, %391 : vector<2x256xf32>
    %c6_200 = arith.constant 6 : index
    %c0_201 = arith.constant 0 : index
    %c0_202 = arith.constant 0 : index
    %394 = vector.load %arg13[%c6_200, %c0_201, %c0_202] : memref<8x2x32xf32, #tpu.memory_space<vmem>>, vector<1x2x32xf32>
    %395 = vector.shape_cast %394 : vector<1x2x32xf32> to vector<2x32xf32>
    %c6_203 = arith.constant 6 : index
    %c0_204 = arith.constant 0 : index
    %c0_205 = arith.constant 0 : index
    %396 = vector.load %arg14[%c6_203, %c0_204, %c0_205] : memref<8x2x32xf32, #tpu.memory_space<vmem>>, vector<1x2x32xf32>
    %397 = vector.shape_cast %396 : vector<1x2x32xf32> to vector<2x32xf32>
    %398 = tpu.concatenate %395, %397 in 1 : vector<2x32xf32>, vector<2x32xf32> -> vector<2x64xf32>
    %cst_206 = arith.constant dense<0.000000e+00> : vector<2x256xf32>
    %399 = tpu.matmul %398, %365, %cst_206 {dimension_numbers = #tpu.dot_dimension_numbers<[1], [0], [0], [1], [0, 0, 1, 1], [], []>} : vector<2x64xf32>, vector<64x256xf32>, vector<2x256xf32> -> vector<2x256xf32>
    %400 = arith.addf %393, %399 : vector<2x256xf32>
    %c1_207 = arith.constant 1 : index
    %c0_208 = arith.constant 0 : index
    %c0_209 = arith.constant 0 : index
    %401 = vector.load %arg12[%c1_207, %c0_208, %c0_209] : memref<8x2x256xf32, #tpu.memory_space<vmem>>, vector<1x2x256xf32>
    %402 = vector.shape_cast %401 : vector<1x2x256xf32> to vector<2x256xf32>
    %403 = vector.shape_cast %400 : vector<2x256xf32> to vector<1x2x256xf32>
    tpu.vector_store %arg12[%c1_207, %c0_208, %c0_209], %403 {strides = array<i32>} : memref<8x2x256xf32, #tpu.memory_space<vmem>>, vector<1x2x256xf32>,
    %c2_210 = arith.constant 2 : index
    %c0_211 = arith.constant 0 : index
    %c0_212 = arith.constant 0 : index
    %404 = vector.load %arg13[%c2_210, %c0_211, %c0_212] : memref<8x2x32xf32, #tpu.memory_space<vmem>>, vector<1x2x32xf32>
    %405 = vector.shape_cast %404 : vector<1x2x32xf32> to vector<2x32xf32>
    %c2_213 = arith.constant 2 : index
    %c0_214 = arith.constant 0 : index
    %c0_215 = arith.constant 0 : index
    %406 = vector.load %arg14[%c2_213, %c0_214, %c0_215] : memref<8x2x32xf32, #tpu.memory_space<vmem>>, vector<1x2x32xf32>
    %407 = vector.shape_cast %406 : vector<1x2x32xf32> to vector<2x32xf32>
    %408 = tpu.concatenate %405, %407 in 1 : vector<2x32xf32>, vector<2x32xf32> -> vector<2x64xf32>
    %cst_216 = arith.constant dense<0.000000e+00> : vector<2x256xf32>
    %409 = tpu.matmul %408, %363, %cst_216 {dimension_numbers = #tpu.dot_dimension_numbers<[1], [0], [0], [1], [0, 0, 1, 1], [], []>} : vector<2x64xf32>, vector<64x256xf32>, vector<2x256xf32> -> vector<2x256xf32>
    %410 = vector.broadcast %367 : vector<1x256xf32> to vector<2x256xf32>
    %411 = arith.addf %410, %409 : vector<2x256xf32>
    %c5_217 = arith.constant 5 : index
    %c0_218 = arith.constant 0 : index
    %c0_219 = arith.constant 0 : index
    %412 = vector.load %arg13[%c5_217, %c0_218, %c0_219] : memref<8x2x32xf32, #tpu.memory_space<vmem>>, vector<1x2x32xf32>
    %413 = vector.shape_cast %412 : vector<1x2x32xf32> to vector<2x32xf32>
    %c5_220 = arith.constant 5 : index
    %c0_221 = arith.constant 0 : index
    %c0_222 = arith.constant 0 : index
    %414 = vector.load %arg14[%c5_220, %c0_221, %c0_222] : memref<8x2x32xf32, #tpu.memory_space<vmem>>, vector<1x2x32xf32>
    %415 = vector.shape_cast %414 : vector<1x2x32xf32> to vector<2x32xf32>
    %416 = tpu.concatenate %413, %415 in 1 : vector<2x32xf32>, vector<2x32xf32> -> vector<2x64xf32>
    %cst_223 = arith.constant dense<0.000000e+00> : vector<2x256xf32>
    %417 = tpu.matmul %416, %365, %cst_223 {dimension_numbers = #tpu.dot_dimension_numbers<[1], [0], [0], [1], [0, 0, 1, 1], [], []>} : vector<2x64xf32>, vector<64x256xf32>, vector<2x256xf32> -> vector<2x256xf32>
    %418 = arith.addf %411, %417 : vector<2x256xf32>
    %c2_224 = arith.constant 2 : index
    %c0_225 = arith.constant 0 : index
    %c0_226 = arith.constant 0 : index
    %419 = vector.load %arg12[%c2_224, %c0_225, %c0_226] : memref<8x2x256xf32, #tpu.memory_space<vmem>>, vector<1x2x256xf32>
    %420 = vector.shape_cast %419 : vector<1x2x256xf32> to vector<2x256xf32>
    %421 = vector.shape_cast %418 : vector<2x256xf32> to vector<1x2x256xf32>
    tpu.vector_store %arg12[%c2_224, %c0_225, %c0_226], %421 {strides = array<i32>} : memref<8x2x256xf32, #tpu.memory_space<vmem>>, vector<1x2x256xf32>,
    %c3_227 = arith.constant 3 : index
    %c0_228 = arith.constant 0 : index
    %c0_229 = arith.constant 0 : index
    %422 = vector.load %arg13[%c3_227, %c0_228, %c0_229] : memref<8x2x32xf32, #tpu.memory_space<vmem>>, vector<1x2x32xf32>
    %423 = vector.shape_cast %422 : vector<1x2x32xf32> to vector<2x32xf32>
    %c3_230 = arith.constant 3 : index
    %c0_231 = arith.constant 0 : index
    %c0_232 = arith.constant 0 : index
    %424 = vector.load %arg14[%c3_230, %c0_231, %c0_232] : memref<8x2x32xf32, #tpu.memory_space<vmem>>, vector<1x2x32xf32>
    %425 = vector.shape_cast %424 : vector<1x2x32xf32> to vector<2x32xf32>
    %426 = tpu.concatenate %423, %425 in 1 : vector<2x32xf32>, vector<2x32xf32> -> vector<2x64xf32>
    %cst_233 = arith.constant dense<0.000000e+00> : vector<2x256xf32>
    %427 = tpu.matmul %426, %363, %cst_233 {dimension_numbers = #tpu.dot_dimension_numbers<[1], [0], [0], [1], [0, 0, 1, 1], [], []>} : vector<2x64xf32>, vector<64x256xf32>, vector<2x256xf32> -> vector<2x256xf32>
    %428 = vector.broadcast %367 : vector<1x256xf32> to vector<2x256xf32>
    %429 = arith.addf %428, %427 : vector<2x256xf32>
    %c4_234 = arith.constant 4 : index
    %c0_235 = arith.constant 0 : index
    %c0_236 = arith.constant 0 : index
    %430 = vector.load %arg13[%c4_234, %c0_235, %c0_236] : memref<8x2x32xf32, #tpu.memory_space<vmem>>, vector<1x2x32xf32>
    %431 = vector.shape_cast %430 : vector<1x2x32xf32> to vector<2x32xf32>
    %c4_237 = arith.constant 4 : index
    %c0_238 = arith.constant 0 : index
    %c0_239 = arith.constant 0 : index
    %432 = vector.load %arg14[%c4_237, %c0_238, %c0_239] : memref<8x2x32xf32, #tpu.memory_space<vmem>>, vector<1x2x32xf32>
    %433 = vector.shape_cast %432 : vector<1x2x32xf32> to vector<2x32xf32>
    %434 = tpu.concatenate %431, %433 in 1 : vector<2x32xf32>, vector<2x32xf32> -> vector<2x64xf32>
    %cst_240 = arith.constant dense<0.000000e+00> : vector<2x256xf32>
    %435 = tpu.matmul %434, %365, %cst_240 {dimension_numbers = #tpu.dot_dimension_numbers<[1], [0], [0], [1], [0, 0, 1, 1], [], []>} : vector<2x64xf32>, vector<64x256xf32>, vector<2x256xf32> -> vector<2x256xf32>
    %436 = arith.addf %429, %435 : vector<2x256xf32>
    %c3_241 = arith.constant 3 : index
    %c0_242 = arith.constant 0 : index
    %c0_243 = arith.constant 0 : index
    %437 = vector.load %arg12[%c3_241, %c0_242, %c0_243] : memref<8x2x256xf32, #tpu.memory_space<vmem>>, vector<1x2x256xf32>
    %438 = vector.shape_cast %437 : vector<1x2x256xf32> to vector<2x256xf32>
    %439 = vector.shape_cast %436 : vector<2x256xf32> to vector<1x2x256xf32>
    tpu.vector_store %arg12[%c3_241, %c0_242, %c0_243], %439 {strides = array<i32>} : memref<8x2x256xf32, #tpu.memory_space<vmem>>, vector<1x2x256xf32>,
    %c4_244 = arith.constant 4 : index
    %c0_245 = arith.constant 0 : index
    %c0_246 = arith.constant 0 : index
    %440 = vector.load %arg13[%c4_244, %c0_245, %c0_246] : memref<8x2x32xf32, #tpu.memory_space<vmem>>, vector<1x2x32xf32>
    %441 = vector.shape_cast %440 : vector<1x2x32xf32> to vector<2x32xf32>
    %c4_247 = arith.constant 4 : index
    %c0_248 = arith.constant 0 : index
    %c0_249 = arith.constant 0 : index
    %442 = vector.load %arg14[%c4_247, %c0_248, %c0_249] : memref<8x2x32xf32, #tpu.memory_space<vmem>>, vector<1x2x32xf32>
    %443 = vector.shape_cast %442 : vector<1x2x32xf32> to vector<2x32xf32>
    %444 = tpu.concatenate %441, %443 in 1 : vector<2x32xf32>, vector<2x32xf32> -> vector<2x64xf32>
    %cst_250 = arith.constant dense<0.000000e+00> : vector<2x256xf32>
    %445 = tpu.matmul %444, %363, %cst_250 {dimension_numbers = #tpu.dot_dimension_numbers<[1], [0], [0], [1], [0, 0, 1, 1], [], []>} : vector<2x64xf32>, vector<64x256xf32>, vector<2x256xf32> -> vector<2x256xf32>
    %446 = vector.broadcast %367 : vector<1x256xf32> to vector<2x256xf32>
    %447 = arith.addf %446, %445 : vector<2x256xf32>
    %c3_251 = arith.constant 3 : index
    %c0_252 = arith.constant 0 : index
    %c0_253 = arith.constant 0 : index
    %448 = vector.load %arg13[%c3_251, %c0_252, %c0_253] : memref<8x2x32xf32, #tpu.memory_space<vmem>>, vector<1x2x32xf32>
    %449 = vector.shape_cast %448 : vector<1x2x32xf32> to vector<2x32xf32>
    %c3_254 = arith.constant 3 : index
    %c0_255 = arith.constant 0 : index
    %c0_256 = arith.constant 0 : index
    %450 = vector.load %arg14[%c3_254, %c0_255, %c0_256] : memref<8x2x32xf32, #tpu.memory_space<vmem>>, vector<1x2x32xf32>
    %451 = vector.shape_cast %450 : vector<1x2x32xf32> to vector<2x32xf32>
    %452 = tpu.concatenate %449, %451 in 1 : vector<2x32xf32>, vector<2x32xf32> -> vector<2x64xf32>
    %cst_257 = arith.constant dense<0.000000e+00> : vector<2x256xf32>
    %453 = tpu.matmul %452, %365, %cst_257 {dimension_numbers = #tpu.dot_dimension_numbers<[1], [0], [0], [1], [0, 0, 1, 1], [], []>} : vector<2x64xf32>, vector<64x256xf32>, vector<2x256xf32> -> vector<2x256xf32>
    %454 = arith.addf %447, %453 : vector<2x256xf32>
    %c4_258 = arith.constant 4 : index
    %c0_259 = arith.constant 0 : index
    %c0_260 = arith.constant 0 : index
    %455 = vector.load %arg12[%c4_258, %c0_259, %c0_260] : memref<8x2x256xf32, #tpu.memory_space<vmem>>, vector<1x2x256xf32>
    %456 = vector.shape_cast %455 : vector<1x2x256xf32> to vector<2x256xf32>
    %457 = vector.shape_cast %454 : vector<2x256xf32> to vector<1x2x256xf32>
    tpu.vector_store %arg12[%c4_258, %c0_259, %c0_260], %457 {strides = array<i32>} : memref<8x2x256xf32, #tpu.memory_space<vmem>>, vector<1x2x256xf32>,
    %c5_261 = arith.constant 5 : index
    %c0_262 = arith.constant 0 : index
    %c0_263 = arith.constant 0 : index
    %458 = vector.load %arg13[%c5_261, %c0_262, %c0_263] : memref<8x2x32xf32, #tpu.memory_space<vmem>>, vector<1x2x32xf32>
    %459 = vector.shape_cast %458 : vector<1x2x32xf32> to vector<2x32xf32>
    %c5_264 = arith.constant 5 : index
    %c0_265 = arith.constant 0 : index
    %c0_266 = arith.constant 0 : index
    %460 = vector.load %arg14[%c5_264, %c0_265, %c0_266] : memref<8x2x32xf32, #tpu.memory_space<vmem>>, vector<1x2x32xf32>
    %461 = vector.shape_cast %460 : vector<1x2x32xf32> to vector<2x32xf32>
    %462 = tpu.concatenate %459, %461 in 1 : vector<2x32xf32>, vector<2x32xf32> -> vector<2x64xf32>
    %cst_267 = arith.constant dense<0.000000e+00> : vector<2x256xf32>
    %463 = tpu.matmul %462, %363, %cst_267 {dimension_numbers = #tpu.dot_dimension_numbers<[1], [0], [0], [1], [0, 0, 1, 1], [], []>} : vector<2x64xf32>, vector<64x256xf32>, vector<2x256xf32> -> vector<2x256xf32>
    %464 = vector.broadcast %367 : vector<1x256xf32> to vector<2x256xf32>
    %465 = arith.addf %464, %463 : vector<2x256xf32>
    %c2_268 = arith.constant 2 : index
    %c0_269 = arith.constant 0 : index
    %c0_270 = arith.constant 0 : index
    %466 = vector.load %arg13[%c2_268, %c0_269, %c0_270] : memref<8x2x32xf32, #tpu.memory_space<vmem>>, vector<1x2x32xf32>
    %467 = vector.shape_cast %466 : vector<1x2x32xf32> to vector<2x32xf32>
    %c2_271 = arith.constant 2 : index
    %c0_272 = arith.constant 0 : index
    %c0_273 = arith.constant 0 : index
    %468 = vector.load %arg14[%c2_271, %c0_272, %c0_273] : memref<8x2x32xf32, #tpu.memory_space<vmem>>, vector<1x2x32xf32>
    %469 = vector.shape_cast %468 : vector<1x2x32xf32> to vector<2x32xf32>
    %470 = tpu.concatenate %467, %469 in 1 : vector<2x32xf32>, vector<2x32xf32> -> vector<2x64xf32>
    %cst_274 = arith.constant dense<0.000000e+00> : vector<2x256xf32>
    %471 = tpu.matmul %470, %365, %cst_274 {dimension_numbers = #tpu.dot_dimension_numbers<[1], [0], [0], [1], [0, 0, 1, 1], [], []>} : vector<2x64xf32>, vector<64x256xf32>, vector<2x256xf32> -> vector<2x256xf32>
    %472 = arith.addf %465, %471 : vector<2x256xf32>
    %c5_275 = arith.constant 5 : index
    %c0_276 = arith.constant 0 : index
    %c0_277 = arith.constant 0 : index
    %473 = vector.load %arg12[%c5_275, %c0_276, %c0_277] : memref<8x2x256xf32, #tpu.memory_space<vmem>>, vector<1x2x256xf32>
    %474 = vector.shape_cast %473 : vector<1x2x256xf32> to vector<2x256xf32>
    %475 = vector.shape_cast %472 : vector<2x256xf32> to vector<1x2x256xf32>
    tpu.vector_store %arg12[%c5_275, %c0_276, %c0_277], %475 {strides = array<i32>} : memref<8x2x256xf32, #tpu.memory_space<vmem>>, vector<1x2x256xf32>,
    %c6_278 = arith.constant 6 : index
    %c0_279 = arith.constant 0 : index
    %c0_280 = arith.constant 0 : index
    %476 = vector.load %arg13[%c6_278, %c0_279, %c0_280] : memref<8x2x32xf32, #tpu.memory_space<vmem>>, vector<1x2x32xf32>
    %477 = vector.shape_cast %476 : vector<1x2x32xf32> to vector<2x32xf32>
    %c6_281 = arith.constant 6 : index
    %c0_282 = arith.constant 0 : index
    %c0_283 = arith.constant 0 : index
    %478 = vector.load %arg14[%c6_281, %c0_282, %c0_283] : memref<8x2x32xf32, #tpu.memory_space<vmem>>, vector<1x2x32xf32>
    %479 = vector.shape_cast %478 : vector<1x2x32xf32> to vector<2x32xf32>
    %480 = tpu.concatenate %477, %479 in 1 : vector<2x32xf32>, vector<2x32xf32> -> vector<2x64xf32>
    %cst_284 = arith.constant dense<0.000000e+00> : vector<2x256xf32>
    %481 = tpu.matmul %480, %363, %cst_284 {dimension_numbers = #tpu.dot_dimension_numbers<[1], [0], [0], [1], [0, 0, 1, 1], [], []>} : vector<2x64xf32>, vector<64x256xf32>, vector<2x256xf32> -> vector<2x256xf32>
    %482 = vector.broadcast %367 : vector<1x256xf32> to vector<2x256xf32>
    %483 = arith.addf %482, %481 : vector<2x256xf32>
    %c1_285 = arith.constant 1 : index
    %c0_286 = arith.constant 0 : index
    %c0_287 = arith.constant 0 : index
    %484 = vector.load %arg13[%c1_285, %c0_286, %c0_287] : memref<8x2x32xf32, #tpu.memory_space<vmem>>, vector<1x2x32xf32>
    %485 = vector.shape_cast %484 : vector<1x2x32xf32> to vector<2x32xf32>
    %c1_288 = arith.constant 1 : index
    %c0_289 = arith.constant 0 : index
    %c0_290 = arith.constant 0 : index
    %486 = vector.load %arg14[%c1_288, %c0_289, %c0_290] : memref<8x2x32xf32, #tpu.memory_space<vmem>>, vector<1x2x32xf32>
    %487 = vector.shape_cast %486 : vector<1x2x32xf32> to vector<2x32xf32>
    %488 = tpu.concatenate %485, %487 in 1 : vector<2x32xf32>, vector<2x32xf32> -> vector<2x64xf32>
    %cst_291 = arith.constant dense<0.000000e+00> : vector<2x256xf32>
    %489 = tpu.matmul %488, %365, %cst_291 {dimension_numbers = #tpu.dot_dimension_numbers<[1], [0], [0], [1], [0, 0, 1, 1], [], []>} : vector<2x64xf32>, vector<64x256xf32>, vector<2x256xf32> -> vector<2x256xf32>
    %490 = arith.addf %483, %489 : vector<2x256xf32>
    %c6_292 = arith.constant 6 : index
    %c0_293 = arith.constant 0 : index
    %c0_294 = arith.constant 0 : index
    %491 = vector.load %arg12[%c6_292, %c0_293, %c0_294] : memref<8x2x256xf32, #tpu.memory_space<vmem>>, vector<1x2x256xf32>
    %492 = vector.shape_cast %491 : vector<1x2x256xf32> to vector<2x256xf32>
    %493 = vector.shape_cast %490 : vector<2x256xf32> to vector<1x2x256xf32>
    tpu.vector_store %arg12[%c6_292, %c0_293, %c0_294], %493 {strides = array<i32>} : memref<8x2x256xf32, #tpu.memory_space<vmem>>, vector<1x2x256xf32>,
    %c7_295 = arith.constant 7 : index
    %c0_296 = arith.constant 0 : index
    %c0_297 = arith.constant 0 : index
    %494 = vector.load %arg13[%c7_295, %c0_296, %c0_297] : memref<8x2x32xf32, #tpu.memory_space<vmem>>, vector<1x2x32xf32>
    %495 = vector.shape_cast %494 : vector<1x2x32xf32> to vector<2x32xf32>
    %c7_298 = arith.constant 7 : index
    %c0_299 = arith.constant 0 : index
    %c0_300 = arith.constant 0 : index
    %496 = vector.load %arg14[%c7_298, %c0_299, %c0_300] : memref<8x2x32xf32, #tpu.memory_space<vmem>>, vector<1x2x32xf32>
    %497 = vector.shape_cast %496 : vector<1x2x32xf32> to vector<2x32xf32>
    %498 = tpu.concatenate %495, %497 in 1 : vector<2x32xf32>, vector<2x32xf32> -> vector<2x64xf32>
    %cst_301 = arith.constant dense<0.000000e+00> : vector<2x256xf32>
    %499 = tpu.matmul %498, %363, %cst_301 {dimension_numbers = #tpu.dot_dimension_numbers<[1], [0], [0], [1], [0, 0, 1, 1], [], []>} : vector<2x64xf32>, vector<64x256xf32>, vector<2x256xf32> -> vector<2x256xf32>
    %500 = vector.broadcast %367 : vector<1x256xf32> to vector<2x256xf32>
    %501 = arith.addf %500, %499 : vector<2x256xf32>
    %c0_302 = arith.constant 0 : index
    %c0_303 = arith.constant 0 : index
    %c0_304 = arith.constant 0 : index
    %502 = vector.load %arg13[%c0_302, %c0_303, %c0_304] : memref<8x2x32xf32, #tpu.memory_space<vmem>>, vector<1x2x32xf32>
    %503 = vector.shape_cast %502 : vector<1x2x32xf32> to vector<2x32xf32>
    %c0_305 = arith.constant 0 : index
    %c0_306 = arith.constant 0 : index
    %c0_307 = arith.constant 0 : index
    %504 = vector.load %arg14[%c0_305, %c0_306, %c0_307] : memref<8x2x32xf32, #tpu.memory_space<vmem>>, vector<1x2x32xf32>
    %505 = vector.shape_cast %504 : vector<1x2x32xf32> to vector<2x32xf32>
    %506 = tpu.concatenate %503, %505 in 1 : vector<2x32xf32>, vector<2x32xf32> -> vector<2x64xf32>
    %cst_308 = arith.constant dense<0.000000e+00> : vector<2x256xf32>
    %507 = tpu.matmul %506, %365, %cst_308 {dimension_numbers = #tpu.dot_dimension_numbers<[1], [0], [0], [1], [0, 0, 1, 1], [], []>} : vector<2x64xf32>, vector<64x256xf32>, vector<2x256xf32> -> vector<2x256xf32>
    %508 = arith.addf %501, %507 : vector<2x256xf32>
    %c7_309 = arith.constant 7 : index
    %c0_310 = arith.constant 0 : index
    %c0_311 = arith.constant 0 : index
    %509 = vector.load %arg12[%c7_309, %c0_310, %c0_311] : memref<8x2x256xf32, #tpu.memory_space<vmem>>, vector<1x2x256xf32>
    %510 = vector.shape_cast %509 : vector<1x2x256xf32> to vector<2x256xf32>
    %511 = vector.shape_cast %508 : vector<2x256xf32> to vector<1x2x256xf32>
    tpu.vector_store %arg12[%c7_309, %c0_310, %c0_311], %511 {strides = array<i32>} : memref<8x2x256xf32, #tpu.memory_space<vmem>>, vector<1x2x256xf32>,
    %c1_312 = arith.constant 1 : index
    %c0_313 = arith.constant 0 : index
    %c0_314 = arith.constant 0 : index
    %512 = vector.load %arg3[%c1_312, %c0_313, %c0_314] : memref<3x64x256xf32, #tpu.memory_space<vmem>>, vector<1x64x256xf32>
    %513 = vector.shape_cast %512 : vector<1x64x256xf32> to vector<64x256xf32>
    %cst_315 = arith.constant 0.000000e+00 : f32
    %514 = vector.broadcast %cst_315 : f32 to vector<2x64xf32>
    %cst_316 = arith.constant 0.000000e+00 : f32
    %515 = vector.broadcast %cst_316 : f32 to vector<2x64xf32>
    %c0_i32_317 = arith.constant 0 : i32
    %516 = arith.index_cast %c0_i32_317 : i32 to index
    %c0_318 = arith.constant 0 : index
    %c0_319 = arith.constant 0 : index
    %517 = vector.load %arg12[%516, %c0_318, %c0_319] : memref<8x2x256xf32, #tpu.memory_space<vmem>>, vector<1x2x256xf32>
    %518 = vector.shape_cast %517 : vector<1x2x256xf32> to vector<2x256xf32>
    %cst_320 = arith.constant dense<0.000000e+00> : vector<2x256xf32>
    %519 = tpu.matmul %514, %513, %cst_320 {dimension_numbers = #tpu.dot_dimension_numbers<[1], [0], [0], [1], [0, 0, 1, 1], [], []>} : vector<2x64xf32>, vector<64x256xf32>, vector<2x256xf32> -> vector<2x256xf32>
    %520 = arith.addf %518, %519 : vector<2x256xf32>
    %521 = vector.extract_strided_slice %520 {offsets = [0, 0], sizes = [2, 192], strides = [1, 1]} : vector<2x256xf32> to vector<2x192xf32>
    %522 = arith.negf %521 : vector<2x192xf32>
    %523 = math.exp %522 : vector<2x192xf32>
    %cst_321 = arith.constant 1.000000e+00 : f32
    %524 = vector.broadcast %cst_321 : f32 to vector<2x192xf32>
    %525 = arith.addf %524, %523 : vector<2x192xf32>
    %526 = arith.divf %524, %525 : vector<2x192xf32>
    %527 = vector.extract_strided_slice %526 {offsets = [0, 0], sizes = [2, 64], strides = [1, 1]} : vector<2x192xf32> to vector<2x64xf32>
    %528 = vector.extract_strided_slice %526 {offsets = [0, 64], sizes = [2, 64], strides = [1, 1]} : vector<2x192xf32> to vector<2x64xf32>
    %529 = vector.extract_strided_slice %526 {offsets = [0, 128], sizes = [2, 64], strides = [1, 1]} : vector<2x192xf32> to vector<2x64xf32>
    %530 = vector.extract_strided_slice %520 {offsets = [0, 192], sizes = [2, 64], strides = [1, 1]} : vector<2x256xf32> to vector<2x64xf32>
    %531 = math.tanh %530 : vector<2x64xf32>
    %532 = arith.mulf %528, %515 : vector<2x64xf32>
    %533 = arith.mulf %527, %531 : vector<2x64xf32>
    %534 = arith.addf %532, %533 : vector<2x64xf32>
    %535 = math.tanh %534 : vector<2x64xf32>
    %536 = arith.mulf %529, %535 : vector<2x64xf32>
    %537 = vector.extract_strided_slice %536 {offsets = [0, 0], sizes = [2, 32], strides = [1, 1]} : vector<2x64xf32> to vector<2x32xf32>
    %538 = arith.index_cast %c0_i32_317 : i32 to index
    %c0_322 = arith.constant 0 : index
    %c0_323 = arith.constant 0 : index
    %539 = vector.load %arg13[%538, %c0_322, %c0_323] : memref<8x2x32xf32, #tpu.memory_space<vmem>>, vector<1x2x32xf32>
    %540 = vector.shape_cast %539 : vector<1x2x32xf32> to vector<2x32xf32>
    %541 = vector.shape_cast %537 : vector<2x32xf32> to vector<1x2x32xf32>
    tpu.vector_store %arg13[%538, %c0_322, %c0_323], %541 {strides = array<i32>} : memref<8x2x32xf32, #tpu.memory_space<vmem>>, vector<1x2x32xf32>,
    %542 = vector.extract_strided_slice %536 {offsets = [0, 32], sizes = [2, 32], strides = [1, 1]} : vector<2x64xf32> to vector<2x32xf32>
    %c7_i32_324 = arith.constant 7 : i32
    %543 = arith.subi %c7_i32_324, %c0_i32_317 : i32
    %544 = arith.index_cast %543 : i32 to index
    %c0_325 = arith.constant 0 : index
    %c0_326 = arith.constant 0 : index
    %545 = vector.load %arg14[%544, %c0_325, %c0_326] : memref<8x2x32xf32, #tpu.memory_space<vmem>>, vector<1x2x32xf32>
    %546 = vector.shape_cast %545 : vector<1x2x32xf32> to vector<2x32xf32>
    %547 = vector.shape_cast %542 : vector<2x32xf32> to vector<1x2x32xf32>
    tpu.vector_store %arg14[%544, %c0_325, %c0_326], %547 {strides = array<i32>} : memref<8x2x32xf32, #tpu.memory_space<vmem>>, vector<1x2x32xf32>,
    %c1_i32_327 = arith.constant 1 : i32
    %548 = arith.index_cast %c1_i32_327 : i32 to index
    %c0_328 = arith.constant 0 : index
    %c0_329 = arith.constant 0 : index
    %549 = vector.load %arg12[%548, %c0_328, %c0_329] : memref<8x2x256xf32, #tpu.memory_space<vmem>>, vector<1x2x256xf32>
    %550 = vector.shape_cast %549 : vector<1x2x256xf32> to vector<2x256xf32>
    %cst_330 = arith.constant dense<0.000000e+00> : vector<2x256xf32>
    %551 = tpu.matmul %536, %513, %cst_330 {dimension_numbers = #tpu.dot_dimension_numbers<[1], [0], [0], [1], [0, 0, 1, 1], [], []>} : vector<2x64xf32>, vector<64x256xf32>, vector<2x256xf32> -> vector<2x256xf32>
    %552 = arith.addf %550, %551 : vector<2x256xf32>
    %553 = vector.extract_strided_slice %552 {offsets = [0, 0], sizes = [2, 192], strides = [1, 1]} : vector<2x256xf32> to vector<2x192xf32>
    %554 = arith.negf %553 : vector<2x192xf32>
    %555 = math.exp %554 : vector<2x192xf32>
    %cst_331 = arith.constant 1.000000e+00 : f32
    %556 = vector.broadcast %cst_331 : f32 to vector<2x192xf32>
    %557 = arith.addf %556, %555 : vector<2x192xf32>
    %558 = arith.divf %556, %557 : vector<2x192xf32>
    %559 = vector.extract_strided_slice %558 {offsets = [0, 0], sizes = [2, 64], strides = [1, 1]} : vector<2x192xf32> to vector<2x64xf32>
    %560 = vector.extract_strided_slice %558 {offsets = [0, 64], sizes = [2, 64], strides = [1, 1]} : vector<2x192xf32> to vector<2x64xf32>
    %561 = vector.extract_strided_slice %558 {offsets = [0, 128], sizes = [2, 64], strides = [1, 1]} : vector<2x192xf32> to vector<2x64xf32>
    %562 = vector.extract_strided_slice %552 {offsets = [0, 192], sizes = [2, 64], strides = [1, 1]} : vector<2x256xf32> to vector<2x64xf32>
    %563 = math.tanh %562 : vector<2x64xf32>
    %564 = arith.mulf %560, %534 : vector<2x64xf32>
    %565 = arith.mulf %559, %563 : vector<2x64xf32>
    %566 = arith.addf %564, %565 : vector<2x64xf32>
    %567 = math.tanh %566 : vector<2x64xf32>
    %568 = arith.mulf %561, %567 : vector<2x64xf32>
    %569 = vector.extract_strided_slice %568 {offsets = [0, 0], sizes = [2, 32], strides = [1, 1]} : vector<2x64xf32> to vector<2x32xf32>
    %570 = arith.index_cast %c1_i32_327 : i32 to index
    %c0_332 = arith.constant 0 : index
    %c0_333 = arith.constant 0 : index
    %571 = vector.load %arg13[%570, %c0_332, %c0_333] : memref<8x2x32xf32, #tpu.memory_space<vmem>>, vector<1x2x32xf32>
    %572 = vector.shape_cast %571 : vector<1x2x32xf32> to vector<2x32xf32>
    %573 = vector.shape_cast %569 : vector<2x32xf32> to vector<1x2x32xf32>
    tpu.vector_store %arg13[%570, %c0_332, %c0_333], %573 {strides = array<i32>} : memref<8x2x32xf32, #tpu.memory_space<vmem>>, vector<1x2x32xf32>,
    %574 = vector.extract_strided_slice %568 {offsets = [0, 32], sizes = [2, 32], strides = [1, 1]} : vector<2x64xf32> to vector<2x32xf32>
    %c7_i32_334 = arith.constant 7 : i32
    %575 = arith.subi %c7_i32_334, %c1_i32_327 : i32
    %576 = arith.index_cast %575 : i32 to index
    %c0_335 = arith.constant 0 : index
    %c0_336 = arith.constant 0 : index
    %577 = vector.load %arg14[%576, %c0_335, %c0_336] : memref<8x2x32xf32, #tpu.memory_space<vmem>>, vector<1x2x32xf32>
    %578 = vector.shape_cast %577 : vector<1x2x32xf32> to vector<2x32xf32>
    %579 = vector.shape_cast %574 : vector<2x32xf32> to vector<1x2x32xf32>
    tpu.vector_store %arg14[%576, %c0_335, %c0_336], %579 {strides = array<i32>} : memref<8x2x32xf32, #tpu.memory_space<vmem>>, vector<1x2x32xf32>,
    %c2_i32_337 = arith.constant 2 : i32
    %580 = arith.index_cast %c2_i32_337 : i32 to index
    %c0_338 = arith.constant 0 : index
    %c0_339 = arith.constant 0 : index
    %581 = vector.load %arg12[%580, %c0_338, %c0_339] : memref<8x2x256xf32, #tpu.memory_space<vmem>>, vector<1x2x256xf32>
    %582 = vector.shape_cast %581 : vector<1x2x256xf32> to vector<2x256xf32>
    %cst_340 = arith.constant dense<0.000000e+00> : vector<2x256xf32>
    %583 = tpu.matmul %568, %513, %cst_340 {dimension_numbers = #tpu.dot_dimension_numbers<[1], [0], [0], [1], [0, 0, 1, 1], [], []>} : vector<2x64xf32>, vector<64x256xf32>, vector<2x256xf32> -> vector<2x256xf32>
    %584 = arith.addf %582, %583 : vector<2x256xf32>
    %585 = vector.extract_strided_slice %584 {offsets = [0, 0], sizes = [2, 192], strides = [1, 1]} : vector<2x256xf32> to vector<2x192xf32>
    %586 = arith.negf %585 : vector<2x192xf32>
    %587 = math.exp %586 : vector<2x192xf32>
    %cst_341 = arith.constant 1.000000e+00 : f32
    %588 = vector.broadcast %cst_341 : f32 to vector<2x192xf32>
    %589 = arith.addf %588, %587 : vector<2x192xf32>
    %590 = arith.divf %588, %589 : vector<2x192xf32>
    %591 = vector.extract_strided_slice %590 {offsets = [0, 0], sizes = [2, 64], strides = [1, 1]} : vector<2x192xf32> to vector<2x64xf32>
    %592 = vector.extract_strided_slice %590 {offsets = [0, 64], sizes = [2, 64], strides = [1, 1]} : vector<2x192xf32> to vector<2x64xf32>
    %593 = vector.extract_strided_slice %590 {offsets = [0, 128], sizes = [2, 64], strides = [1, 1]} : vector<2x192xf32> to vector<2x64xf32>
    %594 = vector.extract_strided_slice %584 {offsets = [0, 192], sizes = [2, 64], strides = [1, 1]} : vector<2x256xf32> to vector<2x64xf32>
    %595 = math.tanh %594 : vector<2x64xf32>
    %596 = arith.mulf %592, %566 : vector<2x64xf32>
    %597 = arith.mulf %591, %595 : vector<2x64xf32>
    %598 = arith.addf %596, %597 : vector<2x64xf32>
    %599 = math.tanh %598 : vector<2x64xf32>
    %600 = arith.mulf %593, %599 : vector<2x64xf32>
    %601 = vector.extract_strided_slice %600 {offsets = [0, 0], sizes = [2, 32], strides = [1, 1]} : vector<2x64xf32> to vector<2x32xf32>
    %602 = arith.index_cast %c2_i32_337 : i32 to index
    %c0_342 = arith.constant 0 : index
    %c0_343 = arith.constant 0 : index
    %603 = vector.load %arg13[%602, %c0_342, %c0_343] : memref<8x2x32xf32, #tpu.memory_space<vmem>>, vector<1x2x32xf32>
    %604 = vector.shape_cast %603 : vector<1x2x32xf32> to vector<2x32xf32>
    %605 = vector.shape_cast %601 : vector<2x32xf32> to vector<1x2x32xf32>
    tpu.vector_store %arg13[%602, %c0_342, %c0_343], %605 {strides = array<i32>} : memref<8x2x32xf32, #tpu.memory_space<vmem>>, vector<1x2x32xf32>,
    %606 = vector.extract_strided_slice %600 {offsets = [0, 32], sizes = [2, 32], strides = [1, 1]} : vector<2x64xf32> to vector<2x32xf32>
    %c7_i32_344 = arith.constant 7 : i32
    %607 = arith.subi %c7_i32_344, %c2_i32_337 : i32
    %608 = arith.index_cast %607 : i32 to index
    %c0_345 = arith.constant 0 : index
    %c0_346 = arith.constant 0 : index
    %609 = vector.load %arg14[%608, %c0_345, %c0_346] : memref<8x2x32xf32, #tpu.memory_space<vmem>>, vector<1x2x32xf32>
    %610 = vector.shape_cast %609 : vector<1x2x32xf32> to vector<2x32xf32>
    %611 = vector.shape_cast %606 : vector<2x32xf32> to vector<1x2x32xf32>
    tpu.vector_store %arg14[%608, %c0_345, %c0_346], %611 {strides = array<i32>} : memref<8x2x32xf32, #tpu.memory_space<vmem>>, vector<1x2x32xf32>,
    %c3_i32_347 = arith.constant 3 : i32
    %612 = arith.index_cast %c3_i32_347 : i32 to index
    %c0_348 = arith.constant 0 : index
    %c0_349 = arith.constant 0 : index
    %613 = vector.load %arg12[%612, %c0_348, %c0_349] : memref<8x2x256xf32, #tpu.memory_space<vmem>>, vector<1x2x256xf32>
    %614 = vector.shape_cast %613 : vector<1x2x256xf32> to vector<2x256xf32>
    %cst_350 = arith.constant dense<0.000000e+00> : vector<2x256xf32>
    %615 = tpu.matmul %600, %513, %cst_350 {dimension_numbers = #tpu.dot_dimension_numbers<[1], [0], [0], [1], [0, 0, 1, 1], [], []>} : vector<2x64xf32>, vector<64x256xf32>, vector<2x256xf32> -> vector<2x256xf32>
    %616 = arith.addf %614, %615 : vector<2x256xf32>
    %617 = vector.extract_strided_slice %616 {offsets = [0, 0], sizes = [2, 192], strides = [1, 1]} : vector<2x256xf32> to vector<2x192xf32>
    %618 = arith.negf %617 : vector<2x192xf32>
    %619 = math.exp %618 : vector<2x192xf32>
    %cst_351 = arith.constant 1.000000e+00 : f32
    %620 = vector.broadcast %cst_351 : f32 to vector<2x192xf32>
    %621 = arith.addf %620, %619 : vector<2x192xf32>
    %622 = arith.divf %620, %621 : vector<2x192xf32>
    %623 = vector.extract_strided_slice %622 {offsets = [0, 0], sizes = [2, 64], strides = [1, 1]} : vector<2x192xf32> to vector<2x64xf32>
    %624 = vector.extract_strided_slice %622 {offsets = [0, 64], sizes = [2, 64], strides = [1, 1]} : vector<2x192xf32> to vector<2x64xf32>
    %625 = vector.extract_strided_slice %622 {offsets = [0, 128], sizes = [2, 64], strides = [1, 1]} : vector<2x192xf32> to vector<2x64xf32>
    %626 = vector.extract_strided_slice %616 {offsets = [0, 192], sizes = [2, 64], strides = [1, 1]} : vector<2x256xf32> to vector<2x64xf32>
    %627 = math.tanh %626 : vector<2x64xf32>
    %628 = arith.mulf %624, %598 : vector<2x64xf32>
    %629 = arith.mulf %623, %627 : vector<2x64xf32>
    %630 = arith.addf %628, %629 : vector<2x64xf32>
    %631 = math.tanh %630 : vector<2x64xf32>
    %632 = arith.mulf %625, %631 : vector<2x64xf32>
    %633 = vector.extract_strided_slice %632 {offsets = [0, 0], sizes = [2, 32], strides = [1, 1]} : vector<2x64xf32> to vector<2x32xf32>
    %634 = arith.index_cast %c3_i32_347 : i32 to index
    %c0_352 = arith.constant 0 : index
    %c0_353 = arith.constant 0 : index
    %635 = vector.load %arg13[%634, %c0_352, %c0_353] : memref<8x2x32xf32, #tpu.memory_space<vmem>>, vector<1x2x32xf32>
    %636 = vector.shape_cast %635 : vector<1x2x32xf32> to vector<2x32xf32>
    %637 = vector.shape_cast %633 : vector<2x32xf32> to vector<1x2x32xf32>
    tpu.vector_store %arg13[%634, %c0_352, %c0_353], %637 {strides = array<i32>} : memref<8x2x32xf32, #tpu.memory_space<vmem>>, vector<1x2x32xf32>,
    %638 = vector.extract_strided_slice %632 {offsets = [0, 32], sizes = [2, 32], strides = [1, 1]} : vector<2x64xf32> to vector<2x32xf32>
    %c7_i32_354 = arith.constant 7 : i32
    %639 = arith.subi %c7_i32_354, %c3_i32_347 : i32
    %640 = arith.index_cast %639 : i32 to index
    %c0_355 = arith.constant 0 : index
    %c0_356 = arith.constant 0 : index
    %641 = vector.load %arg14[%640, %c0_355, %c0_356] : memref<8x2x32xf32, #tpu.memory_space<vmem>>, vector<1x2x32xf32>
    %642 = vector.shape_cast %641 : vector<1x2x32xf32> to vector<2x32xf32>
    %643 = vector.shape_cast %638 : vector<2x32xf32> to vector<1x2x32xf32>
    tpu.vector_store %arg14[%640, %c0_355, %c0_356], %643 {strides = array<i32>} : memref<8x2x32xf32, #tpu.memory_space<vmem>>, vector<1x2x32xf32>,
    %c4_i32_357 = arith.constant 4 : i32
    %644 = arith.index_cast %c4_i32_357 : i32 to index
    %c0_358 = arith.constant 0 : index
    %c0_359 = arith.constant 0 : index
    %645 = vector.load %arg12[%644, %c0_358, %c0_359] : memref<8x2x256xf32, #tpu.memory_space<vmem>>, vector<1x2x256xf32>
    %646 = vector.shape_cast %645 : vector<1x2x256xf32> to vector<2x256xf32>
    %cst_360 = arith.constant dense<0.000000e+00> : vector<2x256xf32>
    %647 = tpu.matmul %632, %513, %cst_360 {dimension_numbers = #tpu.dot_dimension_numbers<[1], [0], [0], [1], [0, 0, 1, 1], [], []>} : vector<2x64xf32>, vector<64x256xf32>, vector<2x256xf32> -> vector<2x256xf32>
    %648 = arith.addf %646, %647 : vector<2x256xf32>
    %649 = vector.extract_strided_slice %648 {offsets = [0, 0], sizes = [2, 192], strides = [1, 1]} : vector<2x256xf32> to vector<2x192xf32>
    %650 = arith.negf %649 : vector<2x192xf32>
    %651 = math.exp %650 : vector<2x192xf32>
    %cst_361 = arith.constant 1.000000e+00 : f32
    %652 = vector.broadcast %cst_361 : f32 to vector<2x192xf32>
    %653 = arith.addf %652, %651 : vector<2x192xf32>
    %654 = arith.divf %652, %653 : vector<2x192xf32>
    %655 = vector.extract_strided_slice %654 {offsets = [0, 0], sizes = [2, 64], strides = [1, 1]} : vector<2x192xf32> to vector<2x64xf32>
    %656 = vector.extract_strided_slice %654 {offsets = [0, 64], sizes = [2, 64], strides = [1, 1]} : vector<2x192xf32> to vector<2x64xf32>
    %657 = vector.extract_strided_slice %654 {offsets = [0, 128], sizes = [2, 64], strides = [1, 1]} : vector<2x192xf32> to vector<2x64xf32>
    %658 = vector.extract_strided_slice %648 {offsets = [0, 192], sizes = [2, 64], strides = [1, 1]} : vector<2x256xf32> to vector<2x64xf32>
    %659 = math.tanh %658 : vector<2x64xf32>
    %660 = arith.mulf %656, %630 : vector<2x64xf32>
    %661 = arith.mulf %655, %659 : vector<2x64xf32>
    %662 = arith.addf %660, %661 : vector<2x64xf32>
    %663 = math.tanh %662 : vector<2x64xf32>
    %664 = arith.mulf %657, %663 : vector<2x64xf32>
    %665 = vector.extract_strided_slice %664 {offsets = [0, 0], sizes = [2, 32], strides = [1, 1]} : vector<2x64xf32> to vector<2x32xf32>
    %666 = arith.index_cast %c4_i32_357 : i32 to index
    %c0_362 = arith.constant 0 : index
    %c0_363 = arith.constant 0 : index
    %667 = vector.load %arg13[%666, %c0_362, %c0_363] : memref<8x2x32xf32, #tpu.memory_space<vmem>>, vector<1x2x32xf32>
    %668 = vector.shape_cast %667 : vector<1x2x32xf32> to vector<2x32xf32>
    %669 = vector.shape_cast %665 : vector<2x32xf32> to vector<1x2x32xf32>
    tpu.vector_store %arg13[%666, %c0_362, %c0_363], %669 {strides = array<i32>} : memref<8x2x32xf32, #tpu.memory_space<vmem>>, vector<1x2x32xf32>,
    %670 = vector.extract_strided_slice %664 {offsets = [0, 32], sizes = [2, 32], strides = [1, 1]} : vector<2x64xf32> to vector<2x32xf32>
    %c7_i32_364 = arith.constant 7 : i32
    %671 = arith.subi %c7_i32_364, %c4_i32_357 : i32
    %672 = arith.index_cast %671 : i32 to index
    %c0_365 = arith.constant 0 : index
    %c0_366 = arith.constant 0 : index
    %673 = vector.load %arg14[%672, %c0_365, %c0_366] : memref<8x2x32xf32, #tpu.memory_space<vmem>>, vector<1x2x32xf32>
    %674 = vector.shape_cast %673 : vector<1x2x32xf32> to vector<2x32xf32>
    %675 = vector.shape_cast %670 : vector<2x32xf32> to vector<1x2x32xf32>
    tpu.vector_store %arg14[%672, %c0_365, %c0_366], %675 {strides = array<i32>} : memref<8x2x32xf32, #tpu.memory_space<vmem>>, vector<1x2x32xf32>,
    %c5_i32_367 = arith.constant 5 : i32
    %676 = arith.index_cast %c5_i32_367 : i32 to index
    %c0_368 = arith.constant 0 : index
    %c0_369 = arith.constant 0 : index
    %677 = vector.load %arg12[%676, %c0_368, %c0_369] : memref<8x2x256xf32, #tpu.memory_space<vmem>>, vector<1x2x256xf32>
    %678 = vector.shape_cast %677 : vector<1x2x256xf32> to vector<2x256xf32>
    %cst_370 = arith.constant dense<0.000000e+00> : vector<2x256xf32>
    %679 = tpu.matmul %664, %513, %cst_370 {dimension_numbers = #tpu.dot_dimension_numbers<[1], [0], [0], [1], [0, 0, 1, 1], [], []>} : vector<2x64xf32>, vector<64x256xf32>, vector<2x256xf32> -> vector<2x256xf32>
    %680 = arith.addf %678, %679 : vector<2x256xf32>
    %681 = vector.extract_strided_slice %680 {offsets = [0, 0], sizes = [2, 192], strides = [1, 1]} : vector<2x256xf32> to vector<2x192xf32>
    %682 = arith.negf %681 : vector<2x192xf32>
    %683 = math.exp %682 : vector<2x192xf32>
    %cst_371 = arith.constant 1.000000e+00 : f32
    %684 = vector.broadcast %cst_371 : f32 to vector<2x192xf32>
    %685 = arith.addf %684, %683 : vector<2x192xf32>
    %686 = arith.divf %684, %685 : vector<2x192xf32>
    %687 = vector.extract_strided_slice %686 {offsets = [0, 0], sizes = [2, 64], strides = [1, 1]} : vector<2x192xf32> to vector<2x64xf32>
    %688 = vector.extract_strided_slice %686 {offsets = [0, 64], sizes = [2, 64], strides = [1, 1]} : vector<2x192xf32> to vector<2x64xf32>
    %689 = vector.extract_strided_slice %686 {offsets = [0, 128], sizes = [2, 64], strides = [1, 1]} : vector<2x192xf32> to vector<2x64xf32>
    %690 = vector.extract_strided_slice %680 {offsets = [0, 192], sizes = [2, 64], strides = [1, 1]} : vector<2x256xf32> to vector<2x64xf32>
    %691 = math.tanh %690 : vector<2x64xf32>
    %692 = arith.mulf %688, %662 : vector<2x64xf32>
    %693 = arith.mulf %687, %691 : vector<2x64xf32>
    %694 = arith.addf %692, %693 : vector<2x64xf32>
    %695 = math.tanh %694 : vector<2x64xf32>
    %696 = arith.mulf %689, %695 : vector<2x64xf32>
    %697 = vector.extract_strided_slice %696 {offsets = [0, 0], sizes = [2, 32], strides = [1, 1]} : vector<2x64xf32> to vector<2x32xf32>
    %698 = arith.index_cast %c5_i32_367 : i32 to index
    %c0_372 = arith.constant 0 : index
    %c0_373 = arith.constant 0 : index
    %699 = vector.load %arg13[%698, %c0_372, %c0_373] : memref<8x2x32xf32, #tpu.memory_space<vmem>>, vector<1x2x32xf32>
    %700 = vector.shape_cast %699 : vector<1x2x32xf32> to vector<2x32xf32>
    %701 = vector.shape_cast %697 : vector<2x32xf32> to vector<1x2x32xf32>
    tpu.vector_store %arg13[%698, %c0_372, %c0_373], %701 {strides = array<i32>} : memref<8x2x32xf32, #tpu.memory_space<vmem>>, vector<1x2x32xf32>,
    %702 = vector.extract_strided_slice %696 {offsets = [0, 32], sizes = [2, 32], strides = [1, 1]} : vector<2x64xf32> to vector<2x32xf32>
    %c7_i32_374 = arith.constant 7 : i32
    %703 = arith.subi %c7_i32_374, %c5_i32_367 : i32
    %704 = arith.index_cast %703 : i32 to index
    %c0_375 = arith.constant 0 : index
    %c0_376 = arith.constant 0 : index
    %705 = vector.load %arg14[%704, %c0_375, %c0_376] : memref<8x2x32xf32, #tpu.memory_space<vmem>>, vector<1x2x32xf32>
    %706 = vector.shape_cast %705 : vector<1x2x32xf32> to vector<2x32xf32>
    %707 = vector.shape_cast %702 : vector<2x32xf32> to vector<1x2x32xf32>
    tpu.vector_store %arg14[%704, %c0_375, %c0_376], %707 {strides = array<i32>} : memref<8x2x32xf32, #tpu.memory_space<vmem>>, vector<1x2x32xf32>,
    %c6_i32_377 = arith.constant 6 : i32
    %708 = arith.index_cast %c6_i32_377 : i32 to index
    %c0_378 = arith.constant 0 : index
    %c0_379 = arith.constant 0 : index
    %709 = vector.load %arg12[%708, %c0_378, %c0_379] : memref<8x2x256xf32, #tpu.memory_space<vmem>>, vector<1x2x256xf32>
    %710 = vector.shape_cast %709 : vector<1x2x256xf32> to vector<2x256xf32>
    %cst_380 = arith.constant dense<0.000000e+00> : vector<2x256xf32>
    %711 = tpu.matmul %696, %513, %cst_380 {dimension_numbers = #tpu.dot_dimension_numbers<[1], [0], [0], [1], [0, 0, 1, 1], [], []>} : vector<2x64xf32>, vector<64x256xf32>, vector<2x256xf32> -> vector<2x256xf32>
    %712 = arith.addf %710, %711 : vector<2x256xf32>
    %713 = vector.extract_strided_slice %712 {offsets = [0, 0], sizes = [2, 192], strides = [1, 1]} : vector<2x256xf32> to vector<2x192xf32>
    %714 = arith.negf %713 : vector<2x192xf32>
    %715 = math.exp %714 : vector<2x192xf32>
    %cst_381 = arith.constant 1.000000e+00 : f32
    %716 = vector.broadcast %cst_381 : f32 to vector<2x192xf32>
    %717 = arith.addf %716, %715 : vector<2x192xf32>
    %718 = arith.divf %716, %717 : vector<2x192xf32>
    %719 = vector.extract_strided_slice %718 {offsets = [0, 0], sizes = [2, 64], strides = [1, 1]} : vector<2x192xf32> to vector<2x64xf32>
    %720 = vector.extract_strided_slice %718 {offsets = [0, 64], sizes = [2, 64], strides = [1, 1]} : vector<2x192xf32> to vector<2x64xf32>
    %721 = vector.extract_strided_slice %718 {offsets = [0, 128], sizes = [2, 64], strides = [1, 1]} : vector<2x192xf32> to vector<2x64xf32>
    %722 = vector.extract_strided_slice %712 {offsets = [0, 192], sizes = [2, 64], strides = [1, 1]} : vector<2x256xf32> to vector<2x64xf32>
    %723 = math.tanh %722 : vector<2x64xf32>
    %724 = arith.mulf %720, %694 : vector<2x64xf32>
    %725 = arith.mulf %719, %723 : vector<2x64xf32>
    %726 = arith.addf %724, %725 : vector<2x64xf32>
    %727 = math.tanh %726 : vector<2x64xf32>
    %728 = arith.mulf %721, %727 : vector<2x64xf32>
    %729 = vector.extract_strided_slice %728 {offsets = [0, 0], sizes = [2, 32], strides = [1, 1]} : vector<2x64xf32> to vector<2x32xf32>
    %730 = arith.index_cast %c6_i32_377 : i32 to index
    %c0_382 = arith.constant 0 : index
    %c0_383 = arith.constant 0 : index
    %731 = vector.load %arg13[%730, %c0_382, %c0_383] : memref<8x2x32xf32, #tpu.memory_space<vmem>>, vector<1x2x32xf32>
    %732 = vector.shape_cast %731 : vector<1x2x32xf32> to vector<2x32xf32>
    %733 = vector.shape_cast %729 : vector<2x32xf32> to vector<1x2x32xf32>
    tpu.vector_store %arg13[%730, %c0_382, %c0_383], %733 {strides = array<i32>} : memref<8x2x32xf32, #tpu.memory_space<vmem>>, vector<1x2x32xf32>,
    %734 = vector.extract_strided_slice %728 {offsets = [0, 32], sizes = [2, 32], strides = [1, 1]} : vector<2x64xf32> to vector<2x32xf32>
    %c7_i32_384 = arith.constant 7 : i32
    %735 = arith.subi %c7_i32_384, %c6_i32_377 : i32
    %736 = arith.index_cast %735 : i32 to index
    %c0_385 = arith.constant 0 : index
    %c0_386 = arith.constant 0 : index
    %737 = vector.load %arg14[%736, %c0_385, %c0_386] : memref<8x2x32xf32, #tpu.memory_space<vmem>>, vector<1x2x32xf32>
    %738 = vector.shape_cast %737 : vector<1x2x32xf32> to vector<2x32xf32>
    %739 = vector.shape_cast %734 : vector<2x32xf32> to vector<1x2x32xf32>
    tpu.vector_store %arg14[%736, %c0_385, %c0_386], %739 {strides = array<i32>} : memref<8x2x32xf32, #tpu.memory_space<vmem>>, vector<1x2x32xf32>,
    %c7_i32_387 = arith.constant 7 : i32
    %740 = arith.index_cast %c7_i32_387 : i32 to index
    %c0_388 = arith.constant 0 : index
    %c0_389 = arith.constant 0 : index
    %741 = vector.load %arg12[%740, %c0_388, %c0_389] : memref<8x2x256xf32, #tpu.memory_space<vmem>>, vector<1x2x256xf32>
    %742 = vector.shape_cast %741 : vector<1x2x256xf32> to vector<2x256xf32>
    %cst_390 = arith.constant dense<0.000000e+00> : vector<2x256xf32>
    %743 = tpu.matmul %728, %513, %cst_390 {dimension_numbers = #tpu.dot_dimension_numbers<[1], [0], [0], [1], [0, 0, 1, 1], [], []>} : vector<2x64xf32>, vector<64x256xf32>, vector<2x256xf32> -> vector<2x256xf32>
    %744 = arith.addf %742, %743 : vector<2x256xf32>
    %745 = vector.extract_strided_slice %744 {offsets = [0, 0], sizes = [2, 192], strides = [1, 1]} : vector<2x256xf32> to vector<2x192xf32>
    %746 = arith.negf %745 : vector<2x192xf32>
    %747 = math.exp %746 : vector<2x192xf32>
    %cst_391 = arith.constant 1.000000e+00 : f32
    %748 = vector.broadcast %cst_391 : f32 to vector<2x192xf32>
    %749 = arith.addf %748, %747 : vector<2x192xf32>
    %750 = arith.divf %748, %749 : vector<2x192xf32>
    %751 = vector.extract_strided_slice %750 {offsets = [0, 0], sizes = [2, 64], strides = [1, 1]} : vector<2x192xf32> to vector<2x64xf32>
    %752 = vector.extract_strided_slice %750 {offsets = [0, 64], sizes = [2, 64], strides = [1, 1]} : vector<2x192xf32> to vector<2x64xf32>
    %753 = vector.extract_strided_slice %750 {offsets = [0, 128], sizes = [2, 64], strides = [1, 1]} : vector<2x192xf32> to vector<2x64xf32>
    %754 = vector.extract_strided_slice %744 {offsets = [0, 192], sizes = [2, 64], strides = [1, 1]} : vector<2x256xf32> to vector<2x64xf32>
    %755 = math.tanh %754 : vector<2x64xf32>
    %756 = arith.mulf %752, %726 : vector<2x64xf32>
    %757 = arith.mulf %751, %755 : vector<2x64xf32>
    %758 = arith.addf %756, %757 : vector<2x64xf32>
    %759 = math.tanh %758 : vector<2x64xf32>
    %760 = arith.mulf %753, %759 : vector<2x64xf32>
    %761 = vector.extract_strided_slice %760 {offsets = [0, 0], sizes = [2, 32], strides = [1, 1]} : vector<2x64xf32> to vector<2x32xf32>
    %762 = arith.index_cast %c7_i32_387 : i32 to index
    %c0_392 = arith.constant 0 : index
    %c0_393 = arith.constant 0 : index
    %763 = vector.load %arg13[%762, %c0_392, %c0_393] : memref<8x2x32xf32, #tpu.memory_space<vmem>>, vector<1x2x32xf32>
    %764 = vector.shape_cast %763 : vector<1x2x32xf32> to vector<2x32xf32>
    %765 = vector.shape_cast %761 : vector<2x32xf32> to vector<1x2x32xf32>
    tpu.vector_store %arg13[%762, %c0_392, %c0_393], %765 {strides = array<i32>} : memref<8x2x32xf32, #tpu.memory_space<vmem>>, vector<1x2x32xf32>,
    %766 = vector.extract_strided_slice %760 {offsets = [0, 32], sizes = [2, 32], strides = [1, 1]} : vector<2x64xf32> to vector<2x32xf32>
    %c7_i32_394 = arith.constant 7 : i32
    %767 = arith.subi %c7_i32_394, %c7_i32_387 : i32
    %768 = arith.index_cast %767 : i32 to index
    %c0_395 = arith.constant 0 : index
    %c0_396 = arith.constant 0 : index
    %769 = vector.load %arg14[%768, %c0_395, %c0_396] : memref<8x2x32xf32, #tpu.memory_space<vmem>>, vector<1x2x32xf32>
    %770 = vector.shape_cast %769 : vector<1x2x32xf32> to vector<2x32xf32>
    %771 = vector.shape_cast %766 : vector<2x32xf32> to vector<1x2x32xf32>
    tpu.vector_store %arg14[%768, %c0_395, %c0_396], %771 {strides = array<i32>} : memref<8x2x32xf32, #tpu.memory_space<vmem>>, vector<1x2x32xf32>,
    %c8_i32_397 = arith.constant 8 : i32
    %c1_398 = arith.constant 1 : index
    %c0_399 = arith.constant 0 : index
    %c0_400 = arith.constant 0 : index
    %c0_401 = arith.constant 0 : index
    %772 = vector.load %arg2[%c1_398, %c0_399, %c0_400, %c0_401] : memref<2x2x64x256xf32, #tpu.memory_space<vmem>>, vector<1x1x64x256xf32>
    %773 = vector.shape_cast %772 : vector<1x1x64x256xf32> to vector<64x256xf32>
    %c1_402 = arith.constant 1 : index
    %c1_403 = arith.constant 1 : index
    %c0_404 = arith.constant 0 : index
    %c0_405 = arith.constant 0 : index
    %774 = vector.load %arg2[%c1_402, %c1_403, %c0_404, %c0_405] : memref<2x2x64x256xf32, #tpu.memory_space<vmem>>, vector<1x1x64x256xf32>
    %775 = vector.shape_cast %774 : vector<1x1x64x256xf32> to vector<64x256xf32>
    %c2_406 = arith.constant 2 : index
    %c0_407 = arith.constant 0 : index
    %c0_408 = arith.constant 0 : index
    %776 = vector.load %arg4[%c2_406, %c0_407, %c0_408] : memref<3x1x256xf32, #tpu.memory_space<vmem>>, vector<1x1x256xf32>
    %777 = vector.shape_cast %776 : vector<1x1x256xf32> to vector<1x256xf32>
    %c0_409 = arith.constant 0 : index
    %c0_410 = arith.constant 0 : index
    %c0_411 = arith.constant 0 : index
    %778 = vector.load %arg13[%c0_409, %c0_410, %c0_411] : memref<8x2x32xf32, #tpu.memory_space<vmem>>, vector<1x2x32xf32>
    %779 = vector.shape_cast %778 : vector<1x2x32xf32> to vector<2x32xf32>
    %c0_412 = arith.constant 0 : index
    %c0_413 = arith.constant 0 : index
    %c0_414 = arith.constant 0 : index
    %780 = vector.load %arg14[%c0_412, %c0_413, %c0_414] : memref<8x2x32xf32, #tpu.memory_space<vmem>>, vector<1x2x32xf32>
    %781 = vector.shape_cast %780 : vector<1x2x32xf32> to vector<2x32xf32>
    %782 = tpu.concatenate %779, %781 in 1 : vector<2x32xf32>, vector<2x32xf32> -> vector<2x64xf32>
    %cst_415 = arith.constant dense<0.000000e+00> : vector<2x256xf32>
    %783 = tpu.matmul %782, %773, %cst_415 {dimension_numbers = #tpu.dot_dimension_numbers<[1], [0], [0], [1], [0, 0, 1, 1], [], []>} : vector<2x64xf32>, vector<64x256xf32>, vector<2x256xf32> -> vector<2x256xf32>
    %784 = vector.broadcast %777 : vector<1x256xf32> to vector<2x256xf32>
    %785 = arith.addf %784, %783 : vector<2x256xf32>
    %c7_416 = arith.constant 7 : index
    %c0_417 = arith.constant 0 : index
    %c0_418 = arith.constant 0 : index
    %786 = vector.load %arg13[%c7_416, %c0_417, %c0_418] : memref<8x2x32xf32, #tpu.memory_space<vmem>>, vector<1x2x32xf32>
    %787 = vector.shape_cast %786 : vector<1x2x32xf32> to vector<2x32xf32>
    %c7_419 = arith.constant 7 : index
    %c0_420 = arith.constant 0 : index
    %c0_421 = arith.constant 0 : index
    %788 = vector.load %arg14[%c7_419, %c0_420, %c0_421] : memref<8x2x32xf32, #tpu.memory_space<vmem>>, vector<1x2x32xf32>
    %789 = vector.shape_cast %788 : vector<1x2x32xf32> to vector<2x32xf32>
    %790 = tpu.concatenate %787, %789 in 1 : vector<2x32xf32>, vector<2x32xf32> -> vector<2x64xf32>
    %cst_422 = arith.constant dense<0.000000e+00> : vector<2x256xf32>
    %791 = tpu.matmul %790, %775, %cst_422 {dimension_numbers = #tpu.dot_dimension_numbers<[1], [0], [0], [1], [0, 0, 1, 1], [], []>} : vector<2x64xf32>, vector<64x256xf32>, vector<2x256xf32> -> vector<2x256xf32>
    %792 = arith.addf %785, %791 : vector<2x256xf32>
    %c0_423 = arith.constant 0 : index
    %c0_424 = arith.constant 0 : index
    %c0_425 = arith.constant 0 : index
    %793 = vector.load %arg12[%c0_423, %c0_424, %c0_425] : memref<8x2x256xf32, #tpu.memory_space<vmem>>, vector<1x2x256xf32>
    %794 = vector.shape_cast %793 : vector<1x2x256xf32> to vector<2x256xf32>
    %795 = vector.shape_cast %792 : vector<2x256xf32> to vector<1x2x256xf32>
    tpu.vector_store %arg12[%c0_423, %c0_424, %c0_425], %795 {strides = array<i32>} : memref<8x2x256xf32, #tpu.memory_space<vmem>>, vector<1x2x256xf32>,
    %c1_426 = arith.constant 1 : index
    %c0_427 = arith.constant 0 : index
    %c0_428 = arith.constant 0 : index
    %796 = vector.load %arg13[%c1_426, %c0_427, %c0_428] : memref<8x2x32xf32, #tpu.memory_space<vmem>>, vector<1x2x32xf32>
    %797 = vector.shape_cast %796 : vector<1x2x32xf32> to vector<2x32xf32>
    %c1_429 = arith.constant 1 : index
    %c0_430 = arith.constant 0 : index
    %c0_431 = arith.constant 0 : index
    %798 = vector.load %arg14[%c1_429, %c0_430, %c0_431] : memref<8x2x32xf32, #tpu.memory_space<vmem>>, vector<1x2x32xf32>
    %799 = vector.shape_cast %798 : vector<1x2x32xf32> to vector<2x32xf32>
    %800 = tpu.concatenate %797, %799 in 1 : vector<2x32xf32>, vector<2x32xf32> -> vector<2x64xf32>
    %cst_432 = arith.constant dense<0.000000e+00> : vector<2x256xf32>
    %801 = tpu.matmul %800, %773, %cst_432 {dimension_numbers = #tpu.dot_dimension_numbers<[1], [0], [0], [1], [0, 0, 1, 1], [], []>} : vector<2x64xf32>, vector<64x256xf32>, vector<2x256xf32> -> vector<2x256xf32>
    %802 = vector.broadcast %777 : vector<1x256xf32> to vector<2x256xf32>
    %803 = arith.addf %802, %801 : vector<2x256xf32>
    %c6_433 = arith.constant 6 : index
    %c0_434 = arith.constant 0 : index
    %c0_435 = arith.constant 0 : index
    %804 = vector.load %arg13[%c6_433, %c0_434, %c0_435] : memref<8x2x32xf32, #tpu.memory_space<vmem>>, vector<1x2x32xf32>
    %805 = vector.shape_cast %804 : vector<1x2x32xf32> to vector<2x32xf32>
    %c6_436 = arith.constant 6 : index
    %c0_437 = arith.constant 0 : index
    %c0_438 = arith.constant 0 : index
    %806 = vector.load %arg14[%c6_436, %c0_437, %c0_438] : memref<8x2x32xf32, #tpu.memory_space<vmem>>, vector<1x2x32xf32>
    %807 = vector.shape_cast %806 : vector<1x2x32xf32> to vector<2x32xf32>
    %808 = tpu.concatenate %805, %807 in 1 : vector<2x32xf32>, vector<2x32xf32> -> vector<2x64xf32>
    %cst_439 = arith.constant dense<0.000000e+00> : vector<2x256xf32>
    %809 = tpu.matmul %808, %775, %cst_439 {dimension_numbers = #tpu.dot_dimension_numbers<[1], [0], [0], [1], [0, 0, 1, 1], [], []>} : vector<2x64xf32>, vector<64x256xf32>, vector<2x256xf32> -> vector<2x256xf32>
    %810 = arith.addf %803, %809 : vector<2x256xf32>
    %c1_440 = arith.constant 1 : index
    %c0_441 = arith.constant 0 : index
    %c0_442 = arith.constant 0 : index
    %811 = vector.load %arg12[%c1_440, %c0_441, %c0_442] : memref<8x2x256xf32, #tpu.memory_space<vmem>>, vector<1x2x256xf32>
    %812 = vector.shape_cast %811 : vector<1x2x256xf32> to vector<2x256xf32>
    %813 = vector.shape_cast %810 : vector<2x256xf32> to vector<1x2x256xf32>
    tpu.vector_store %arg12[%c1_440, %c0_441, %c0_442], %813 {strides = array<i32>} : memref<8x2x256xf32, #tpu.memory_space<vmem>>, vector<1x2x256xf32>,
    %c2_443 = arith.constant 2 : index
    %c0_444 = arith.constant 0 : index
    %c0_445 = arith.constant 0 : index
    %814 = vector.load %arg13[%c2_443, %c0_444, %c0_445] : memref<8x2x32xf32, #tpu.memory_space<vmem>>, vector<1x2x32xf32>
    %815 = vector.shape_cast %814 : vector<1x2x32xf32> to vector<2x32xf32>
    %c2_446 = arith.constant 2 : index
    %c0_447 = arith.constant 0 : index
    %c0_448 = arith.constant 0 : index
    %816 = vector.load %arg14[%c2_446, %c0_447, %c0_448] : memref<8x2x32xf32, #tpu.memory_space<vmem>>, vector<1x2x32xf32>
    %817 = vector.shape_cast %816 : vector<1x2x32xf32> to vector<2x32xf32>
    %818 = tpu.concatenate %815, %817 in 1 : vector<2x32xf32>, vector<2x32xf32> -> vector<2x64xf32>
    %cst_449 = arith.constant dense<0.000000e+00> : vector<2x256xf32>
    %819 = tpu.matmul %818, %773, %cst_449 {dimension_numbers = #tpu.dot_dimension_numbers<[1], [0], [0], [1], [0, 0, 1, 1], [], []>} : vector<2x64xf32>, vector<64x256xf32>, vector<2x256xf32> -> vector<2x256xf32>
    %820 = vector.broadcast %777 : vector<1x256xf32> to vector<2x256xf32>
    %821 = arith.addf %820, %819 : vector<2x256xf32>
    %c5_450 = arith.constant 5 : index
    %c0_451 = arith.constant 0 : index
    %c0_452 = arith.constant 0 : index
    %822 = vector.load %arg13[%c5_450, %c0_451, %c0_452] : memref<8x2x32xf32, #tpu.memory_space<vmem>>, vector<1x2x32xf32>
    %823 = vector.shape_cast %822 : vector<1x2x32xf32> to vector<2x32xf32>
    %c5_453 = arith.constant 5 : index
    %c0_454 = arith.constant 0 : index
    %c0_455 = arith.constant 0 : index
    %824 = vector.load %arg14[%c5_453, %c0_454, %c0_455] : memref<8x2x32xf32, #tpu.memory_space<vmem>>, vector<1x2x32xf32>
    %825 = vector.shape_cast %824 : vector<1x2x32xf32> to vector<2x32xf32>
    %826 = tpu.concatenate %823, %825 in 1 : vector<2x32xf32>, vector<2x32xf32> -> vector<2x64xf32>
    %cst_456 = arith.constant dense<0.000000e+00> : vector<2x256xf32>
    %827 = tpu.matmul %826, %775, %cst_456 {dimension_numbers = #tpu.dot_dimension_numbers<[1], [0], [0], [1], [0, 0, 1, 1], [], []>} : vector<2x64xf32>, vector<64x256xf32>, vector<2x256xf32> -> vector<2x256xf32>
    %828 = arith.addf %821, %827 : vector<2x256xf32>
    %c2_457 = arith.constant 2 : index
    %c0_458 = arith.constant 0 : index
    %c0_459 = arith.constant 0 : index
    %829 = vector.load %arg12[%c2_457, %c0_458, %c0_459] : memref<8x2x256xf32, #tpu.memory_space<vmem>>, vector<1x2x256xf32>
    %830 = vector.shape_cast %829 : vector<1x2x256xf32> to vector<2x256xf32>
    %831 = vector.shape_cast %828 : vector<2x256xf32> to vector<1x2x256xf32>
    tpu.vector_store %arg12[%c2_457, %c0_458, %c0_459], %831 {strides = array<i32>} : memref<8x2x256xf32, #tpu.memory_space<vmem>>, vector<1x2x256xf32>,
    %c3_460 = arith.constant 3 : index
    %c0_461 = arith.constant 0 : index
    %c0_462 = arith.constant 0 : index
    %832 = vector.load %arg13[%c3_460, %c0_461, %c0_462] : memref<8x2x32xf32, #tpu.memory_space<vmem>>, vector<1x2x32xf32>
    %833 = vector.shape_cast %832 : vector<1x2x32xf32> to vector<2x32xf32>
    %c3_463 = arith.constant 3 : index
    %c0_464 = arith.constant 0 : index
    %c0_465 = arith.constant 0 : index
    %834 = vector.load %arg14[%c3_463, %c0_464, %c0_465] : memref<8x2x32xf32, #tpu.memory_space<vmem>>, vector<1x2x32xf32>
    %835 = vector.shape_cast %834 : vector<1x2x32xf32> to vector<2x32xf32>
    %836 = tpu.concatenate %833, %835 in 1 : vector<2x32xf32>, vector<2x32xf32> -> vector<2x64xf32>
    %cst_466 = arith.constant dense<0.000000e+00> : vector<2x256xf32>
    %837 = tpu.matmul %836, %773, %cst_466 {dimension_numbers = #tpu.dot_dimension_numbers<[1], [0], [0], [1], [0, 0, 1, 1], [], []>} : vector<2x64xf32>, vector<64x256xf32>, vector<2x256xf32> -> vector<2x256xf32>
    %838 = vector.broadcast %777 : vector<1x256xf32> to vector<2x256xf32>
    %839 = arith.addf %838, %837 : vector<2x256xf32>
    %c4_467 = arith.constant 4 : index
    %c0_468 = arith.constant 0 : index
    %c0_469 = arith.constant 0 : index
    %840 = vector.load %arg13[%c4_467, %c0_468, %c0_469] : memref<8x2x32xf32, #tpu.memory_space<vmem>>, vector<1x2x32xf32>
    %841 = vector.shape_cast %840 : vector<1x2x32xf32> to vector<2x32xf32>
    %c4_470 = arith.constant 4 : index
    %c0_471 = arith.constant 0 : index
    %c0_472 = arith.constant 0 : index
    %842 = vector.load %arg14[%c4_470, %c0_471, %c0_472] : memref<8x2x32xf32, #tpu.memory_space<vmem>>, vector<1x2x32xf32>
    %843 = vector.shape_cast %842 : vector<1x2x32xf32> to vector<2x32xf32>
    %844 = tpu.concatenate %841, %843 in 1 : vector<2x32xf32>, vector<2x32xf32> -> vector<2x64xf32>
    %cst_473 = arith.constant dense<0.000000e+00> : vector<2x256xf32>
    %845 = tpu.matmul %844, %775, %cst_473 {dimension_numbers = #tpu.dot_dimension_numbers<[1], [0], [0], [1], [0, 0, 1, 1], [], []>} : vector<2x64xf32>, vector<64x256xf32>, vector<2x256xf32> -> vector<2x256xf32>
    %846 = arith.addf %839, %845 : vector<2x256xf32>
    %c3_474 = arith.constant 3 : index
    %c0_475 = arith.constant 0 : index
    %c0_476 = arith.constant 0 : index
    %847 = vector.load %arg12[%c3_474, %c0_475, %c0_476] : memref<8x2x256xf32, #tpu.memory_space<vmem>>, vector<1x2x256xf32>
    %848 = vector.shape_cast %847 : vector<1x2x256xf32> to vector<2x256xf32>
    %849 = vector.shape_cast %846 : vector<2x256xf32> to vector<1x2x256xf32>
    tpu.vector_store %arg12[%c3_474, %c0_475, %c0_476], %849 {strides = array<i32>} : memref<8x2x256xf32, #tpu.memory_space<vmem>>, vector<1x2x256xf32>,
    %c4_477 = arith.constant 4 : index
    %c0_478 = arith.constant 0 : index
    %c0_479 = arith.constant 0 : index
    %850 = vector.load %arg13[%c4_477, %c0_478, %c0_479] : memref<8x2x32xf32, #tpu.memory_space<vmem>>, vector<1x2x32xf32>
    %851 = vector.shape_cast %850 : vector<1x2x32xf32> to vector<2x32xf32>
    %c4_480 = arith.constant 4 : index
    %c0_481 = arith.constant 0 : index
    %c0_482 = arith.constant 0 : index
    %852 = vector.load %arg14[%c4_480, %c0_481, %c0_482] : memref<8x2x32xf32, #tpu.memory_space<vmem>>, vector<1x2x32xf32>
    %853 = vector.shape_cast %852 : vector<1x2x32xf32> to vector<2x32xf32>
    %854 = tpu.concatenate %851, %853 in 1 : vector<2x32xf32>, vector<2x32xf32> -> vector<2x64xf32>
    %cst_483 = arith.constant dense<0.000000e+00> : vector<2x256xf32>
    %855 = tpu.matmul %854, %773, %cst_483 {dimension_numbers = #tpu.dot_dimension_numbers<[1], [0], [0], [1], [0, 0, 1, 1], [], []>} : vector<2x64xf32>, vector<64x256xf32>, vector<2x256xf32> -> vector<2x256xf32>
    %856 = vector.broadcast %777 : vector<1x256xf32> to vector<2x256xf32>
    %857 = arith.addf %856, %855 : vector<2x256xf32>
    %c3_484 = arith.constant 3 : index
    %c0_485 = arith.constant 0 : index
    %c0_486 = arith.constant 0 : index
    %858 = vector.load %arg13[%c3_484, %c0_485, %c0_486] : memref<8x2x32xf32, #tpu.memory_space<vmem>>, vector<1x2x32xf32>
    %859 = vector.shape_cast %858 : vector<1x2x32xf32> to vector<2x32xf32>
    %c3_487 = arith.constant 3 : index
    %c0_488 = arith.constant 0 : index
    %c0_489 = arith.constant 0 : index
    %860 = vector.load %arg14[%c3_487, %c0_488, %c0_489] : memref<8x2x32xf32, #tpu.memory_space<vmem>>, vector<1x2x32xf32>
    %861 = vector.shape_cast %860 : vector<1x2x32xf32> to vector<2x32xf32>
    %862 = tpu.concatenate %859, %861 in 1 : vector<2x32xf32>, vector<2x32xf32> -> vector<2x64xf32>
    %cst_490 = arith.constant dense<0.000000e+00> : vector<2x256xf32>
    %863 = tpu.matmul %862, %775, %cst_490 {dimension_numbers = #tpu.dot_dimension_numbers<[1], [0], [0], [1], [0, 0, 1, 1], [], []>} : vector<2x64xf32>, vector<64x256xf32>, vector<2x256xf32> -> vector<2x256xf32>
    %864 = arith.addf %857, %863 : vector<2x256xf32>
    %c4_491 = arith.constant 4 : index
    %c0_492 = arith.constant 0 : index
    %c0_493 = arith.constant 0 : index
    %865 = vector.load %arg12[%c4_491, %c0_492, %c0_493] : memref<8x2x256xf32, #tpu.memory_space<vmem>>, vector<1x2x256xf32>
    %866 = vector.shape_cast %865 : vector<1x2x256xf32> to vector<2x256xf32>
    %867 = vector.shape_cast %864 : vector<2x256xf32> to vector<1x2x256xf32>
    tpu.vector_store %arg12[%c4_491, %c0_492, %c0_493], %867 {strides = array<i32>} : memref<8x2x256xf32, #tpu.memory_space<vmem>>, vector<1x2x256xf32>,
    %c5_494 = arith.constant 5 : index
    %c0_495 = arith.constant 0 : index
    %c0_496 = arith.constant 0 : index
    %868 = vector.load %arg13[%c5_494, %c0_495, %c0_496] : memref<8x2x32xf32, #tpu.memory_space<vmem>>, vector<1x2x32xf32>
    %869 = vector.shape_cast %868 : vector<1x2x32xf32> to vector<2x32xf32>
    %c5_497 = arith.constant 5 : index
    %c0_498 = arith.constant 0 : index
    %c0_499 = arith.constant 0 : index
    %870 = vector.load %arg14[%c5_497, %c0_498, %c0_499] : memref<8x2x32xf32, #tpu.memory_space<vmem>>, vector<1x2x32xf32>
    %871 = vector.shape_cast %870 : vector<1x2x32xf32> to vector<2x32xf32>
    %872 = tpu.concatenate %869, %871 in 1 : vector<2x32xf32>, vector<2x32xf32> -> vector<2x64xf32>
    %cst_500 = arith.constant dense<0.000000e+00> : vector<2x256xf32>
    %873 = tpu.matmul %872, %773, %cst_500 {dimension_numbers = #tpu.dot_dimension_numbers<[1], [0], [0], [1], [0, 0, 1, 1], [], []>} : vector<2x64xf32>, vector<64x256xf32>, vector<2x256xf32> -> vector<2x256xf32>
    %874 = vector.broadcast %777 : vector<1x256xf32> to vector<2x256xf32>
    %875 = arith.addf %874, %873 : vector<2x256xf32>
    %c2_501 = arith.constant 2 : index
    %c0_502 = arith.constant 0 : index
    %c0_503 = arith.constant 0 : index
    %876 = vector.load %arg13[%c2_501, %c0_502, %c0_503] : memref<8x2x32xf32, #tpu.memory_space<vmem>>, vector<1x2x32xf32>
    %877 = vector.shape_cast %876 : vector<1x2x32xf32> to vector<2x32xf32>
    %c2_504 = arith.constant 2 : index
    %c0_505 = arith.constant 0 : index
    %c0_506 = arith.constant 0 : index
    %878 = vector.load %arg14[%c2_504, %c0_505, %c0_506] : memref<8x2x32xf32, #tpu.memory_space<vmem>>, vector<1x2x32xf32>
    %879 = vector.shape_cast %878 : vector<1x2x32xf32> to vector<2x32xf32>
    %880 = tpu.concatenate %877, %879 in 1 : vector<2x32xf32>, vector<2x32xf32> -> vector<2x64xf32>
    %cst_507 = arith.constant dense<0.000000e+00> : vector<2x256xf32>
    %881 = tpu.matmul %880, %775, %cst_507 {dimension_numbers = #tpu.dot_dimension_numbers<[1], [0], [0], [1], [0, 0, 1, 1], [], []>} : vector<2x64xf32>, vector<64x256xf32>, vector<2x256xf32> -> vector<2x256xf32>
    %882 = arith.addf %875, %881 : vector<2x256xf32>
    %c5_508 = arith.constant 5 : index
    %c0_509 = arith.constant 0 : index
    %c0_510 = arith.constant 0 : index
    %883 = vector.load %arg12[%c5_508, %c0_509, %c0_510] : memref<8x2x256xf32, #tpu.memory_space<vmem>>, vector<1x2x256xf32>
    %884 = vector.shape_cast %883 : vector<1x2x256xf32> to vector<2x256xf32>
    %885 = vector.shape_cast %882 : vector<2x256xf32> to vector<1x2x256xf32>
    tpu.vector_store %arg12[%c5_508, %c0_509, %c0_510], %885 {strides = array<i32>} : memref<8x2x256xf32, #tpu.memory_space<vmem>>, vector<1x2x256xf32>,
    %c6_511 = arith.constant 6 : index
    %c0_512 = arith.constant 0 : index
    %c0_513 = arith.constant 0 : index
    %886 = vector.load %arg13[%c6_511, %c0_512, %c0_513] : memref<8x2x32xf32, #tpu.memory_space<vmem>>, vector<1x2x32xf32>
    %887 = vector.shape_cast %886 : vector<1x2x32xf32> to vector<2x32xf32>
    %c6_514 = arith.constant 6 : index
    %c0_515 = arith.constant 0 : index
    %c0_516 = arith.constant 0 : index
    %888 = vector.load %arg14[%c6_514, %c0_515, %c0_516] : memref<8x2x32xf32, #tpu.memory_space<vmem>>, vector<1x2x32xf32>
    %889 = vector.shape_cast %888 : vector<1x2x32xf32> to vector<2x32xf32>
    %890 = tpu.concatenate %887, %889 in 1 : vector<2x32xf32>, vector<2x32xf32> -> vector<2x64xf32>
    %cst_517 = arith.constant dense<0.000000e+00> : vector<2x256xf32>
    %891 = tpu.matmul %890, %773, %cst_517 {dimension_numbers = #tpu.dot_dimension_numbers<[1], [0], [0], [1], [0, 0, 1, 1], [], []>} : vector<2x64xf32>, vector<64x256xf32>, vector<2x256xf32> -> vector<2x256xf32>
    %892 = vector.broadcast %777 : vector<1x256xf32> to vector<2x256xf32>
    %893 = arith.addf %892, %891 : vector<2x256xf32>
    %c1_518 = arith.constant 1 : index
    %c0_519 = arith.constant 0 : index
    %c0_520 = arith.constant 0 : index
    %894 = vector.load %arg13[%c1_518, %c0_519, %c0_520] : memref<8x2x32xf32, #tpu.memory_space<vmem>>, vector<1x2x32xf32>
    %895 = vector.shape_cast %894 : vector<1x2x32xf32> to vector<2x32xf32>
    %c1_521 = arith.constant 1 : index
    %c0_522 = arith.constant 0 : index
    %c0_523 = arith.constant 0 : index
    %896 = vector.load %arg14[%c1_521, %c0_522, %c0_523] : memref<8x2x32xf32, #tpu.memory_space<vmem>>, vector<1x2x32xf32>
    %897 = vector.shape_cast %896 : vector<1x2x32xf32> to vector<2x32xf32>
    %898 = tpu.concatenate %895, %897 in 1 : vector<2x32xf32>, vector<2x32xf32> -> vector<2x64xf32>
    %cst_524 = arith.constant dense<0.000000e+00> : vector<2x256xf32>
    %899 = tpu.matmul %898, %775, %cst_524 {dimension_numbers = #tpu.dot_dimension_numbers<[1], [0], [0], [1], [0, 0, 1, 1], [], []>} : vector<2x64xf32>, vector<64x256xf32>, vector<2x256xf32> -> vector<2x256xf32>
    %900 = arith.addf %893, %899 : vector<2x256xf32>
    %c6_525 = arith.constant 6 : index
    %c0_526 = arith.constant 0 : index
    %c0_527 = arith.constant 0 : index
    %901 = vector.load %arg12[%c6_525, %c0_526, %c0_527] : memref<8x2x256xf32, #tpu.memory_space<vmem>>, vector<1x2x256xf32>
    %902 = vector.shape_cast %901 : vector<1x2x256xf32> to vector<2x256xf32>
    %903 = vector.shape_cast %900 : vector<2x256xf32> to vector<1x2x256xf32>
    tpu.vector_store %arg12[%c6_525, %c0_526, %c0_527], %903 {strides = array<i32>} : memref<8x2x256xf32, #tpu.memory_space<vmem>>, vector<1x2x256xf32>,
    %c7_528 = arith.constant 7 : index
    %c0_529 = arith.constant 0 : index
    %c0_530 = arith.constant 0 : index
    %904 = vector.load %arg13[%c7_528, %c0_529, %c0_530] : memref<8x2x32xf32, #tpu.memory_space<vmem>>, vector<1x2x32xf32>
    %905 = vector.shape_cast %904 : vector<1x2x32xf32> to vector<2x32xf32>
    %c7_531 = arith.constant 7 : index
    %c0_532 = arith.constant 0 : index
    %c0_533 = arith.constant 0 : index
    %906 = vector.load %arg14[%c7_531, %c0_532, %c0_533] : memref<8x2x32xf32, #tpu.memory_space<vmem>>, vector<1x2x32xf32>
    %907 = vector.shape_cast %906 : vector<1x2x32xf32> to vector<2x32xf32>
    %908 = tpu.concatenate %905, %907 in 1 : vector<2x32xf32>, vector<2x32xf32> -> vector<2x64xf32>
    %cst_534 = arith.constant dense<0.000000e+00> : vector<2x256xf32>
    %909 = tpu.matmul %908, %773, %cst_534 {dimension_numbers = #tpu.dot_dimension_numbers<[1], [0], [0], [1], [0, 0, 1, 1], [], []>} : vector<2x64xf32>, vector<64x256xf32>, vector<2x256xf32> -> vector<2x256xf32>
    %910 = vector.broadcast %777 : vector<1x256xf32> to vector<2x256xf32>
    %911 = arith.addf %910, %909 : vector<2x256xf32>
    %c0_535 = arith.constant 0 : index
    %c0_536 = arith.constant 0 : index
    %c0_537 = arith.constant 0 : index
    %912 = vector.load %arg13[%c0_535, %c0_536, %c0_537] : memref<8x2x32xf32, #tpu.memory_space<vmem>>, vector<1x2x32xf32>
    %913 = vector.shape_cast %912 : vector<1x2x32xf32> to vector<2x32xf32>
    %c0_538 = arith.constant 0 : index
    %c0_539 = arith.constant 0 : index
    %c0_540 = arith.constant 0 : index
    %914 = vector.load %arg14[%c0_538, %c0_539, %c0_540] : memref<8x2x32xf32, #tpu.memory_space<vmem>>, vector<1x2x32xf32>
    %915 = vector.shape_cast %914 : vector<1x2x32xf32> to vector<2x32xf32>
    %916 = tpu.concatenate %913, %915 in 1 : vector<2x32xf32>, vector<2x32xf32> -> vector<2x64xf32>
    %cst_541 = arith.constant dense<0.000000e+00> : vector<2x256xf32>
    %917 = tpu.matmul %916, %775, %cst_541 {dimension_numbers = #tpu.dot_dimension_numbers<[1], [0], [0], [1], [0, 0, 1, 1], [], []>} : vector<2x64xf32>, vector<64x256xf32>, vector<2x256xf32> -> vector<2x256xf32>
    %918 = arith.addf %911, %917 : vector<2x256xf32>
    %c7_542 = arith.constant 7 : index
    %c0_543 = arith.constant 0 : index
    %c0_544 = arith.constant 0 : index
    %919 = vector.load %arg12[%c7_542, %c0_543, %c0_544] : memref<8x2x256xf32, #tpu.memory_space<vmem>>, vector<1x2x256xf32>
    %920 = vector.shape_cast %919 : vector<1x2x256xf32> to vector<2x256xf32>
    %921 = vector.shape_cast %918 : vector<2x256xf32> to vector<1x2x256xf32>
    tpu.vector_store %arg12[%c7_542, %c0_543, %c0_544], %921 {strides = array<i32>} : memref<8x2x256xf32, #tpu.memory_space<vmem>>, vector<1x2x256xf32>,
    %c2_545 = arith.constant 2 : index
    %c0_546 = arith.constant 0 : index
    %c0_547 = arith.constant 0 : index
    %922 = vector.load %arg3[%c2_545, %c0_546, %c0_547] : memref<3x64x256xf32, #tpu.memory_space<vmem>>, vector<1x64x256xf32>
    %923 = vector.shape_cast %922 : vector<1x64x256xf32> to vector<64x256xf32>
    %cst_548 = arith.constant 0.000000e+00 : f32
    %924 = vector.broadcast %cst_548 : f32 to vector<2x64xf32>
    %cst_549 = arith.constant 0.000000e+00 : f32
    %925 = vector.broadcast %cst_549 : f32 to vector<2x64xf32>
    %c0_550 = arith.constant 0 : index
    %c0_551 = arith.constant 0 : index
    %c0_552 = arith.constant 0 : index
    %926 = vector.load %arg12[%c0_550, %c0_551, %c0_552] : memref<8x2x256xf32, #tpu.memory_space<vmem>>, vector<1x2x256xf32>
    %927 = vector.shape_cast %926 : vector<1x2x256xf32> to vector<2x256xf32>
    %cst_553 = arith.constant dense<0.000000e+00> : vector<2x256xf32>
    %928 = tpu.matmul %924, %923, %cst_553 {dimension_numbers = #tpu.dot_dimension_numbers<[1], [0], [0], [1], [0, 0, 1, 1], [], []>} : vector<2x64xf32>, vector<64x256xf32>, vector<2x256xf32> -> vector<2x256xf32>
    %929 = arith.addf %927, %928 : vector<2x256xf32>
    %930 = vector.extract_strided_slice %929 {offsets = [0, 0], sizes = [2, 192], strides = [1, 1]} : vector<2x256xf32> to vector<2x192xf32>
    %931 = arith.negf %930 : vector<2x192xf32>
    %932 = math.exp %931 : vector<2x192xf32>
    %cst_554 = arith.constant 1.000000e+00 : f32
    %933 = vector.broadcast %cst_554 : f32 to vector<2x192xf32>
    %934 = arith.addf %933, %932 : vector<2x192xf32>
    %935 = arith.divf %933, %934 : vector<2x192xf32>
    %936 = vector.extract_strided_slice %935 {offsets = [0, 0], sizes = [2, 64], strides = [1, 1]} : vector<2x192xf32> to vector<2x64xf32>
    %937 = vector.extract_strided_slice %935 {offsets = [0, 64], sizes = [2, 64], strides = [1, 1]} : vector<2x192xf32> to vector<2x64xf32>
    %938 = vector.extract_strided_slice %935 {offsets = [0, 128], sizes = [2, 64], strides = [1, 1]} : vector<2x192xf32> to vector<2x64xf32>
    %939 = vector.extract_strided_slice %929 {offsets = [0, 192], sizes = [2, 64], strides = [1, 1]} : vector<2x256xf32> to vector<2x64xf32>
    %940 = math.tanh %939 : vector<2x64xf32>
    %941 = arith.mulf %937, %925 : vector<2x64xf32>
    %942 = arith.mulf %936, %940 : vector<2x64xf32>
    %943 = arith.addf %941, %942 : vector<2x64xf32>
    %944 = math.tanh %943 : vector<2x64xf32>
    %945 = arith.mulf %938, %944 : vector<2x64xf32>
    %946 = vector.extract_strided_slice %945 {offsets = [0, 32], sizes = [2, 32], strides = [1, 1]} : vector<2x64xf32> to vector<2x32xf32>
    %c1_i32_555 = arith.constant 1 : i32
    %947 = arith.index_cast %c1_i32_555 : i32 to index
    %c0_556 = arith.constant 0 : index
    %c0_557 = arith.constant 0 : index
    %948 = vector.load %arg12[%947, %c0_556, %c0_557] : memref<8x2x256xf32, #tpu.memory_space<vmem>>, vector<1x2x256xf32>
    %949 = vector.shape_cast %948 : vector<1x2x256xf32> to vector<2x256xf32>
    %cst_558 = arith.constant dense<0.000000e+00> : vector<2x256xf32>
    %950 = tpu.matmul %945, %923, %cst_558 {dimension_numbers = #tpu.dot_dimension_numbers<[1], [0], [0], [1], [0, 0, 1, 1], [], []>} : vector<2x64xf32>, vector<64x256xf32>, vector<2x256xf32> -> vector<2x256xf32>
    %951 = arith.addf %949, %950 : vector<2x256xf32>
    %952 = vector.extract_strided_slice %951 {offsets = [0, 0], sizes = [2, 192], strides = [1, 1]} : vector<2x256xf32> to vector<2x192xf32>
    %953 = arith.negf %952 : vector<2x192xf32>
    %954 = math.exp %953 : vector<2x192xf32>
    %cst_559 = arith.constant 1.000000e+00 : f32
    %955 = vector.broadcast %cst_559 : f32 to vector<2x192xf32>
    %956 = arith.addf %955, %954 : vector<2x192xf32>
    %957 = arith.divf %955, %956 : vector<2x192xf32>
    %958 = vector.extract_strided_slice %957 {offsets = [0, 0], sizes = [2, 64], strides = [1, 1]} : vector<2x192xf32> to vector<2x64xf32>
    %959 = vector.extract_strided_slice %957 {offsets = [0, 64], sizes = [2, 64], strides = [1, 1]} : vector<2x192xf32> to vector<2x64xf32>
    %960 = vector.extract_strided_slice %957 {offsets = [0, 128], sizes = [2, 64], strides = [1, 1]} : vector<2x192xf32> to vector<2x64xf32>
    %961 = vector.extract_strided_slice %951 {offsets = [0, 192], sizes = [2, 64], strides = [1, 1]} : vector<2x256xf32> to vector<2x64xf32>
    %962 = math.tanh %961 : vector<2x64xf32>
    %963 = arith.mulf %959, %943 : vector<2x64xf32>
    %964 = arith.mulf %958, %962 : vector<2x64xf32>
    %965 = arith.addf %963, %964 : vector<2x64xf32>
    %966 = math.tanh %965 : vector<2x64xf32>
    %967 = arith.mulf %960, %966 : vector<2x64xf32>
    %c2_i32_560 = arith.constant 2 : i32
    %968 = arith.index_cast %c2_i32_560 : i32 to index
    %c0_561 = arith.constant 0 : index
    %c0_562 = arith.constant 0 : index
    %969 = vector.load %arg12[%968, %c0_561, %c0_562] : memref<8x2x256xf32, #tpu.memory_space<vmem>>, vector<1x2x256xf32>
    %970 = vector.shape_cast %969 : vector<1x2x256xf32> to vector<2x256xf32>
    %cst_563 = arith.constant dense<0.000000e+00> : vector<2x256xf32>
    %971 = tpu.matmul %967, %923, %cst_563 {dimension_numbers = #tpu.dot_dimension_numbers<[1], [0], [0], [1], [0, 0, 1, 1], [], []>} : vector<2x64xf32>, vector<64x256xf32>, vector<2x256xf32> -> vector<2x256xf32>
    %972 = arith.addf %970, %971 : vector<2x256xf32>
    %973 = vector.extract_strided_slice %972 {offsets = [0, 0], sizes = [2, 192], strides = [1, 1]} : vector<2x256xf32> to vector<2x192xf32>
    %974 = arith.negf %973 : vector<2x192xf32>
    %975 = math.exp %974 : vector<2x192xf32>
    %cst_564 = arith.constant 1.000000e+00 : f32
    %976 = vector.broadcast %cst_564 : f32 to vector<2x192xf32>
    %977 = arith.addf %976, %975 : vector<2x192xf32>
    %978 = arith.divf %976, %977 : vector<2x192xf32>
    %979 = vector.extract_strided_slice %978 {offsets = [0, 0], sizes = [2, 64], strides = [1, 1]} : vector<2x192xf32> to vector<2x64xf32>
    %980 = vector.extract_strided_slice %978 {offsets = [0, 64], sizes = [2, 64], strides = [1, 1]} : vector<2x192xf32> to vector<2x64xf32>
    %981 = vector.extract_strided_slice %978 {offsets = [0, 128], sizes = [2, 64], strides = [1, 1]} : vector<2x192xf32> to vector<2x64xf32>
    %982 = vector.extract_strided_slice %972 {offsets = [0, 192], sizes = [2, 64], strides = [1, 1]} : vector<2x256xf32> to vector<2x64xf32>
    %983 = math.tanh %982 : vector<2x64xf32>
    %984 = arith.mulf %980, %965 : vector<2x64xf32>
    %985 = arith.mulf %979, %983 : vector<2x64xf32>
    %986 = arith.addf %984, %985 : vector<2x64xf32>
    %987 = math.tanh %986 : vector<2x64xf32>
    %988 = arith.mulf %981, %987 : vector<2x64xf32>
    %c3_i32_565 = arith.constant 3 : i32
    %989 = arith.index_cast %c3_i32_565 : i32 to index
    %c0_566 = arith.constant 0 : index
    %c0_567 = arith.constant 0 : index
    %990 = vector.load %arg12[%989, %c0_566, %c0_567] : memref<8x2x256xf32, #tpu.memory_space<vmem>>, vector<1x2x256xf32>
    %991 = vector.shape_cast %990 : vector<1x2x256xf32> to vector<2x256xf32>
    %cst_568 = arith.constant dense<0.000000e+00> : vector<2x256xf32>
    %992 = tpu.matmul %988, %923, %cst_568 {dimension_numbers = #tpu.dot_dimension_numbers<[1], [0], [0], [1], [0, 0, 1, 1], [], []>} : vector<2x64xf32>, vector<64x256xf32>, vector<2x256xf32> -> vector<2x256xf32>
    %993 = arith.addf %991, %992 : vector<2x256xf32>
    %994 = vector.extract_strided_slice %993 {offsets = [0, 0], sizes = [2, 192], strides = [1, 1]} : vector<2x256xf32> to vector<2x192xf32>
    %995 = arith.negf %994 : vector<2x192xf32>
    %996 = math.exp %995 : vector<2x192xf32>
    %cst_569 = arith.constant 1.000000e+00 : f32
    %997 = vector.broadcast %cst_569 : f32 to vector<2x192xf32>
    %998 = arith.addf %997, %996 : vector<2x192xf32>
    %999 = arith.divf %997, %998 : vector<2x192xf32>
    %1000 = vector.extract_strided_slice %999 {offsets = [0, 0], sizes = [2, 64], strides = [1, 1]} : vector<2x192xf32> to vector<2x64xf32>
    %1001 = vector.extract_strided_slice %999 {offsets = [0, 64], sizes = [2, 64], strides = [1, 1]} : vector<2x192xf32> to vector<2x64xf32>
    %1002 = vector.extract_strided_slice %999 {offsets = [0, 128], sizes = [2, 64], strides = [1, 1]} : vector<2x192xf32> to vector<2x64xf32>
    %1003 = vector.extract_strided_slice %993 {offsets = [0, 192], sizes = [2, 64], strides = [1, 1]} : vector<2x256xf32> to vector<2x64xf32>
    %1004 = math.tanh %1003 : vector<2x64xf32>
    %1005 = arith.mulf %1001, %986 : vector<2x64xf32>
    %1006 = arith.mulf %1000, %1004 : vector<2x64xf32>
    %1007 = arith.addf %1005, %1006 : vector<2x64xf32>
    %1008 = math.tanh %1007 : vector<2x64xf32>
    %1009 = arith.mulf %1002, %1008 : vector<2x64xf32>
    %c4_i32_570 = arith.constant 4 : i32
    %1010 = arith.index_cast %c4_i32_570 : i32 to index
    %c0_571 = arith.constant 0 : index
    %c0_572 = arith.constant 0 : index
    %1011 = vector.load %arg12[%1010, %c0_571, %c0_572] : memref<8x2x256xf32, #tpu.memory_space<vmem>>, vector<1x2x256xf32>
    %1012 = vector.shape_cast %1011 : vector<1x2x256xf32> to vector<2x256xf32>
    %cst_573 = arith.constant dense<0.000000e+00> : vector<2x256xf32>
    %1013 = tpu.matmul %1009, %923, %cst_573 {dimension_numbers = #tpu.dot_dimension_numbers<[1], [0], [0], [1], [0, 0, 1, 1], [], []>} : vector<2x64xf32>, vector<64x256xf32>, vector<2x256xf32> -> vector<2x256xf32>
    %1014 = arith.addf %1012, %1013 : vector<2x256xf32>
    %1015 = vector.extract_strided_slice %1014 {offsets = [0, 0], sizes = [2, 192], strides = [1, 1]} : vector<2x256xf32> to vector<2x192xf32>
    %1016 = arith.negf %1015 : vector<2x192xf32>
    %1017 = math.exp %1016 : vector<2x192xf32>
    %cst_574 = arith.constant 1.000000e+00 : f32
    %1018 = vector.broadcast %cst_574 : f32 to vector<2x192xf32>
    %1019 = arith.addf %1018, %1017 : vector<2x192xf32>
    %1020 = arith.divf %1018, %1019 : vector<2x192xf32>
    %1021 = vector.extract_strided_slice %1020 {offsets = [0, 0], sizes = [2, 64], strides = [1, 1]} : vector<2x192xf32> to vector<2x64xf32>
    %1022 = vector.extract_strided_slice %1020 {offsets = [0, 64], sizes = [2, 64], strides = [1, 1]} : vector<2x192xf32> to vector<2x64xf32>
    %1023 = vector.extract_strided_slice %1020 {offsets = [0, 128], sizes = [2, 64], strides = [1, 1]} : vector<2x192xf32> to vector<2x64xf32>
    %1024 = vector.extract_strided_slice %1014 {offsets = [0, 192], sizes = [2, 64], strides = [1, 1]} : vector<2x256xf32> to vector<2x64xf32>
    %1025 = math.tanh %1024 : vector<2x64xf32>
    %1026 = arith.mulf %1022, %1007 : vector<2x64xf32>
    %1027 = arith.mulf %1021, %1025 : vector<2x64xf32>
    %1028 = arith.addf %1026, %1027 : vector<2x64xf32>
    %1029 = math.tanh %1028 : vector<2x64xf32>
    %1030 = arith.mulf %1023, %1029 : vector<2x64xf32>
    %c5_i32_575 = arith.constant 5 : i32
    %1031 = arith.index_cast %c5_i32_575 : i32 to index
    %c0_576 = arith.constant 0 : index
    %c0_577 = arith.constant 0 : index
    %1032 = vector.load %arg12[%1031, %c0_576, %c0_577] : memref<8x2x256xf32, #tpu.memory_space<vmem>>, vector<1x2x256xf32>
    %1033 = vector.shape_cast %1032 : vector<1x2x256xf32> to vector<2x256xf32>
    %cst_578 = arith.constant dense<0.000000e+00> : vector<2x256xf32>
    %1034 = tpu.matmul %1030, %923, %cst_578 {dimension_numbers = #tpu.dot_dimension_numbers<[1], [0], [0], [1], [0, 0, 1, 1], [], []>} : vector<2x64xf32>, vector<64x256xf32>, vector<2x256xf32> -> vector<2x256xf32>
    %1035 = arith.addf %1033, %1034 : vector<2x256xf32>
    %1036 = vector.extract_strided_slice %1035 {offsets = [0, 0], sizes = [2, 192], strides = [1, 1]} : vector<2x256xf32> to vector<2x192xf32>
    %1037 = arith.negf %1036 : vector<2x192xf32>
    %1038 = math.exp %1037 : vector<2x192xf32>
    %cst_579 = arith.constant 1.000000e+00 : f32
    %1039 = vector.broadcast %cst_579 : f32 to vector<2x192xf32>
    %1040 = arith.addf %1039, %1038 : vector<2x192xf32>
    %1041 = arith.divf %1039, %1040 : vector<2x192xf32>
    %1042 = vector.extract_strided_slice %1041 {offsets = [0, 0], sizes = [2, 64], strides = [1, 1]} : vector<2x192xf32> to vector<2x64xf32>
    %1043 = vector.extract_strided_slice %1041 {offsets = [0, 64], sizes = [2, 64], strides = [1, 1]} : vector<2x192xf32> to vector<2x64xf32>
    %1044 = vector.extract_strided_slice %1041 {offsets = [0, 128], sizes = [2, 64], strides = [1, 1]} : vector<2x192xf32> to vector<2x64xf32>
    %1045 = vector.extract_strided_slice %1035 {offsets = [0, 192], sizes = [2, 64], strides = [1, 1]} : vector<2x256xf32> to vector<2x64xf32>
    %1046 = math.tanh %1045 : vector<2x64xf32>
    %1047 = arith.mulf %1043, %1028 : vector<2x64xf32>
    %1048 = arith.mulf %1042, %1046 : vector<2x64xf32>
    %1049 = arith.addf %1047, %1048 : vector<2x64xf32>
    %1050 = math.tanh %1049 : vector<2x64xf32>
    %1051 = arith.mulf %1044, %1050 : vector<2x64xf32>
    %c6_i32_580 = arith.constant 6 : i32
    %1052 = arith.index_cast %c6_i32_580 : i32 to index
    %c0_581 = arith.constant 0 : index
    %c0_582 = arith.constant 0 : index
    %1053 = vector.load %arg12[%1052, %c0_581, %c0_582] : memref<8x2x256xf32, #tpu.memory_space<vmem>>, vector<1x2x256xf32>
    %1054 = vector.shape_cast %1053 : vector<1x2x256xf32> to vector<2x256xf32>
    %cst_583 = arith.constant dense<0.000000e+00> : vector<2x256xf32>
    %1055 = tpu.matmul %1051, %923, %cst_583 {dimension_numbers = #tpu.dot_dimension_numbers<[1], [0], [0], [1], [0, 0, 1, 1], [], []>} : vector<2x64xf32>, vector<64x256xf32>, vector<2x256xf32> -> vector<2x256xf32>
    %1056 = arith.addf %1054, %1055 : vector<2x256xf32>
    %1057 = vector.extract_strided_slice %1056 {offsets = [0, 0], sizes = [2, 192], strides = [1, 1]} : vector<2x256xf32> to vector<2x192xf32>
    %1058 = arith.negf %1057 : vector<2x192xf32>
    %1059 = math.exp %1058 : vector<2x192xf32>
    %cst_584 = arith.constant 1.000000e+00 : f32
    %1060 = vector.broadcast %cst_584 : f32 to vector<2x192xf32>
    %1061 = arith.addf %1060, %1059 : vector<2x192xf32>
    %1062 = arith.divf %1060, %1061 : vector<2x192xf32>
    %1063 = vector.extract_strided_slice %1062 {offsets = [0, 0], sizes = [2, 64], strides = [1, 1]} : vector<2x192xf32> to vector<2x64xf32>
    %1064 = vector.extract_strided_slice %1062 {offsets = [0, 64], sizes = [2, 64], strides = [1, 1]} : vector<2x192xf32> to vector<2x64xf32>
    %1065 = vector.extract_strided_slice %1062 {offsets = [0, 128], sizes = [2, 64], strides = [1, 1]} : vector<2x192xf32> to vector<2x64xf32>
    %1066 = vector.extract_strided_slice %1056 {offsets = [0, 192], sizes = [2, 64], strides = [1, 1]} : vector<2x256xf32> to vector<2x64xf32>
    %1067 = math.tanh %1066 : vector<2x64xf32>
    %1068 = arith.mulf %1064, %1049 : vector<2x64xf32>
    %1069 = arith.mulf %1063, %1067 : vector<2x64xf32>
    %1070 = arith.addf %1068, %1069 : vector<2x64xf32>
    %1071 = math.tanh %1070 : vector<2x64xf32>
    %1072 = arith.mulf %1065, %1071 : vector<2x64xf32>
    %c7_i32_585 = arith.constant 7 : i32
    %1073 = arith.index_cast %c7_i32_585 : i32 to index
    %c0_586 = arith.constant 0 : index
    %c0_587 = arith.constant 0 : index
    %1074 = vector.load %arg12[%1073, %c0_586, %c0_587] : memref<8x2x256xf32, #tpu.memory_space<vmem>>, vector<1x2x256xf32>
    %1075 = vector.shape_cast %1074 : vector<1x2x256xf32> to vector<2x256xf32>
    %cst_588 = arith.constant dense<0.000000e+00> : vector<2x256xf32>
    %1076 = tpu.matmul %1072, %923, %cst_588 {dimension_numbers = #tpu.dot_dimension_numbers<[1], [0], [0], [1], [0, 0, 1, 1], [], []>} : vector<2x64xf32>, vector<64x256xf32>, vector<2x256xf32> -> vector<2x256xf32>
    %1077 = arith.addf %1075, %1076 : vector<2x256xf32>
    %1078 = vector.extract_strided_slice %1077 {offsets = [0, 0], sizes = [2, 192], strides = [1, 1]} : vector<2x256xf32> to vector<2x192xf32>
    %1079 = arith.negf %1078 : vector<2x192xf32>
    %1080 = math.exp %1079 : vector<2x192xf32>
    %cst_589 = arith.constant 1.000000e+00 : f32
    %1081 = vector.broadcast %cst_589 : f32 to vector<2x192xf32>
    %1082 = arith.addf %1081, %1080 : vector<2x192xf32>
    %1083 = arith.divf %1081, %1082 : vector<2x192xf32>
    %1084 = vector.extract_strided_slice %1083 {offsets = [0, 0], sizes = [2, 64], strides = [1, 1]} : vector<2x192xf32> to vector<2x64xf32>
    %1085 = vector.extract_strided_slice %1083 {offsets = [0, 64], sizes = [2, 64], strides = [1, 1]} : vector<2x192xf32> to vector<2x64xf32>
    %1086 = vector.extract_strided_slice %1083 {offsets = [0, 128], sizes = [2, 64], strides = [1, 1]} : vector<2x192xf32> to vector<2x64xf32>
    %1087 = vector.extract_strided_slice %1077 {offsets = [0, 192], sizes = [2, 64], strides = [1, 1]} : vector<2x256xf32> to vector<2x64xf32>
    %1088 = math.tanh %1087 : vector<2x64xf32>
    %1089 = arith.mulf %1085, %1070 : vector<2x64xf32>
    %1090 = arith.mulf %1084, %1088 : vector<2x64xf32>
    %1091 = arith.addf %1089, %1090 : vector<2x64xf32>
    %1092 = math.tanh %1091 : vector<2x64xf32>
    %1093 = arith.mulf %1086, %1092 : vector<2x64xf32>
    %c7_i32_590 = arith.constant 7 : i32
    %1094 = vector.extract_strided_slice %1093 {offsets = [0, 0], sizes = [2, 32], strides = [1, 1]} : vector<2x64xf32> to vector<2x32xf32>
    %1095 = tpu.concatenate %1094, %946 in 1 : vector<2x32xf32>, vector<2x32xf32> -> vector<2x64xf32>
    %c0_591 = arith.constant 0 : index
    %c0_592 = arith.constant 0 : index
    %1096 = vector.load %arg5[%c0_591, %c0_592] : memref<64x64xf32, #tpu.memory_space<vmem>>, vector<64x64xf32>
    %cst_593 = arith.constant dense<0.000000e+00> : vector<2x64xf32>
    %1097 = tpu.matmul %1095, %1096, %cst_593 {dimension_numbers = #tpu.dot_dimension_numbers<[1], [0], [0], [1], [0, 0, 1, 1], [], []>} : vector<2x64xf32>, vector<64x64xf32>, vector<2x64xf32> -> vector<2x64xf32>
    %c0_594 = arith.constant 0 : index
    %c0_595 = arith.constant 0 : index
    %1098 = vector.load %arg6[%c0_594, %c0_595] : memref<1x64xf32, #tpu.memory_space<vmem>>, vector<1x64xf32>
    %1099 = vector.broadcast %1098 : vector<1x64xf32> to vector<2x64xf32>
    %1100 = arith.addf %1097, %1099 : vector<2x64xf32>
    %cst_596 = arith.constant 0.000000e+00 : f32
    %1101 = vector.broadcast %cst_596 : f32 to vector<2x64xf32>
    %1102 = arith.maximumf %1100, %1101 : vector<2x64xf32>
    %c0_597 = arith.constant 0 : index
    %c0_598 = arith.constant 0 : index
    %1103 = vector.load %arg7[%c0_597, %c0_598] : memref<64x16xf32, #tpu.memory_space<vmem>>, vector<64x16xf32>
    %cst_599 = arith.constant dense<0.000000e+00> : vector<2x16xf32>
    %1104 = tpu.matmul %1102, %1103, %cst_599 {dimension_numbers = #tpu.dot_dimension_numbers<[1], [0], [0], [1], [0, 0, 1, 1], [], []>} : vector<2x64xf32>, vector<64x16xf32>, vector<2x16xf32> -> vector<2x16xf32>
    %c0_600 = arith.constant 0 : index
    %c0_601 = arith.constant 0 : index
    %1105 = vector.load %arg8[%c0_600, %c0_601] : memref<1x16xf32, #tpu.memory_space<vmem>>, vector<1x16xf32>
    %1106 = vector.broadcast %1105 : vector<1x16xf32> to vector<2x16xf32>
    %1107 = arith.addf %1104, %1106 : vector<2x16xf32>
    %cst_602 = arith.constant 0.000000e+00 : f32
    %1108 = vector.broadcast %cst_602 : f32 to vector<2x16xf32>
    %1109 = arith.maximumf %1107, %1108 : vector<2x16xf32>
    %c0_603 = arith.constant 0 : index
    %c0_604 = arith.constant 0 : index
    %1110 = vector.load %arg9[%c0_603, %c0_604] : memref<16x2xf32, #tpu.memory_space<vmem>>, vector<16x2xf32>
    %cst_605 = arith.constant dense<0.000000e+00> : vector<2x2xf32>
    %1111 = tpu.matmul %1109, %1110, %cst_605 {dimension_numbers = #tpu.dot_dimension_numbers<[1], [0], [0], [1], [0, 0, 1, 1], [], []>} : vector<2x16xf32>, vector<16x2xf32>, vector<2x2xf32> -> vector<2x2xf32>
    %c0_606 = arith.constant 0 : index
    %c0_607 = arith.constant 0 : index
    %1112 = vector.load %arg10[%c0_606, %c0_607] : memref<1x2xf32, #tpu.memory_space<vmem>>, vector<1x2xf32>
    %1113 = vector.broadcast %1112 : vector<1x2xf32> to vector<2x2xf32>
    %1114 = arith.addf %1111, %1113 : vector<2x2xf32>
    %c0_608 = arith.constant 0 : index
    %c0_609 = arith.constant 0 : index
    %1115 = vector.load %arg11[%c0_608, %c0_609] : memref<2x2xf32, #tpu.memory_space<vmem>>, vector<2x2xf32>
    tpu.vector_store %arg11[%c0_608, %c0_609], %1114 {strides = array<i32>} : memref<2x2xf32, #tpu.memory_space<vmem>>, vector<2x2xf32>,
    return
  }
}

</mosaic_0001>

<bundles_post_ra>
// kernel: tpu_custom_call.1
= control target key start
LH: loop header
LB: loop body
LE: loop exit
PB: predicated region body
PF: predicated region fallthrough
CT: control target
= control target key end

     0   :  { %16 = vsyncpa [#allocation6], 0  ;;  %s10129_s0 = inlined_call_operand.hbm [shape: f32[8,2,8], index: 0, kind: input, shape index: {}]   ;;  %s10130_s1 = inlined_call_operand.vmem [shape: f32[2,8,256], index: 1, kind: input, shape index: {}]   ;;  %s10131_s2 = inlined_call_operand.hbm [shape: f32[2,2,64,256], index: 2, kind: input, shape index: {}]   ;;  %s10132_s3 = inlined_call_operand.hbm [shape: f32[3,64,256], index: 3, kind: input, shape index: {}]   ;;  %s10133_s4 = inlined_call_operand.vmem [shape: f32[3,1,256], index: 4, kind: input, shape index: {}]   ;;  %s10134_s5 = inlined_call_operand.vmem [shape: f32[64,64], index: 5, kind: input, shape index: {}]   ;;  %s10135_s6 = inlined_call_operand.vmem [shape: f32[1,64], index: 6, kind: input, shape index: {}]   ;;  %s10136_s7 = inlined_call_operand.vmem [shape: f32[64,16], index: 7, kind: input, shape index: {}]   ;;  %s10137_s8 = inlined_call_operand.vmem [shape: f32[1,16], index: 8, kind: input, shape index: {}]   ;;  %s10138_s9 = inlined_call_operand.vmem [shape: f32[16,2], index: 9, kind: input, shape index: {}]   ;;  %s10139_s10 = inlined_call_operand.vmem [shape: f32[1,2], index: 10, kind: input, shape index: {}]   ;;  %s10140_s11 = inlined_call_operand.hbm [shape: f32[2,2], index: 11, kind: output, shape index: {}]  }
   0x1   :  { %17 = vsyncpa [#allocation9], 0 }
   0x2   :  { %18 = vsyncpa [#allocation7], 0  ;;  %s8160_s17 = smov [#allocation8]  }
   0x3   :  { %s38_s18 = sshll.u32 %s8160_s17, 4  ;;  %s39_s18 = int_to_ptr.vmem [resolvable:$true] %s38_s18 }
   0x4   :  { %s8082_s19 = scalar_lea.vmem %s39_s18, 8192  ;;  %p8087_p1 = scmp.lt.s32.totalorder %s39_s18, %s39_s18 }
   0x5   :  { %p8083_p0 = scmp.ne.s32.totalorder %s39_s18, %s8082_s19  ;;  %p8088_p2 = scmp.lt.s32.totalorder %s8082_s19, %s8082_s19 }
   0x7   :  { %p8089_p3 = por %p8088_p2, %p8087_p1 }
   0x9   :  { %p8090_p4 = pnand %p8089_p3, %p8083_p0 }
   0xb   :  { %8093 = shalt.err (!%p8090_p4)
}
   0xc   :  { %s8161_s20 = smov 256   ;;  %s8162_s21 = smov 16  }
   0xd   :  { %44 = dma.hbm_to_vmem [thread:$0]  %s10131_s2, 8192, %s39_s18, [#allocation9], %s8161_s20, %s8161_s20, %s8162_s21  }
   0xe   :  { %s8163_s24 = smov [#allocation5]  }
   0xf   :  { %s24_s25 = sshll.u32 %s8163_s24, 4  ;;  %s25_s25 = int_to_ptr.vmem [resolvable:$true] %s24_s25 }
  0x10   :  { %s8102_s26 = scalar_lea.vmem %s25_s25, 256  ;;  %p8107_p6 = scmp.lt.s32.totalorder %s25_s25, %s25_s25 }
  0x11   :  { %p8103_p5 = scmp.ne.s32.totalorder %s25_s25, %s8102_s26  ;;  %p8108_p7 = scmp.lt.s32.totalorder %s8102_s26, %s8102_s26 }
  0x13   :  { %p8109_p8 = por %p8108_p7, %p8107_p6 }
  0x15   :  { %p8110_p9 = pnand %p8109_p8, %p8103_p5 }
  0x17   :  { %8113 = shalt.err (!%p8110_p9)
}
  0x18   :  { %s8164_s27 = smov 32   ;;  %s8165_s28 = smov 2  }
  0x19   :  { %30 = dma.hbm_to_vmem [thread:$0]  %s10129_s0, 256, %s25_s25, [#allocation6], %s8164_s27, %s8164_s27, %s8165_s28  }
  0x1a   :  { %s8166_s12 = smov [#allocation10]  }
  0x1b   :  { %s50_s2 = sshll.u32 %s8166_s12, 4  ;;  %s51_s2 = int_to_ptr.vmem [resolvable:$true] %s50_s2 }
  0x1c   :  { %s8122_s13 = scalar_lea.vmem %s51_s2, 6144  ;;  %p8127_p11 = scmp.lt.s32.totalorder %s51_s2, %s51_s2 }
  0x1d   :  { %p8123_p10 = scmp.ne.s32.totalorder %s51_s2, %s8122_s13  ;;  %p8128_p12 = scmp.lt.s32.totalorder %s8122_s13, %s8122_s13 }
  0x1f   :  { %p8129_p13 = por %p8128_p12, %p8127_p11 }
  0x21   :  { %p8130_p0 = pnand %p8129_p13, %p8123_p10 }
  0x23   :  { %8133 = shalt.err (!%p8130_p0)
}
  0x24   :  { %56 = dma.hbm_to_vmem [thread:$0]  %s10132_s3, 6144, %s51_s2, [#allocation9], %s8161_s20, %s8161_s20, %s8162_s21  }
  0x25   :  { %8154 = dma.done.wait [#allocation6], 256  }
  0x26   :  { %8155 = vsyncadd [#allocation6], 4294967040 }
  0x27   :  { %8156 = dma.done.wait [#allocation9], 14336  }
  0x28   :  { %8157 = vsyncadd [#allocation9], 4294952960  ;;  %v8167_v0 = vmov 0.0   ;;  %v8249_v1 = vld [vmem:[%s10130_s1 + $0x8] sm:$0xff]  ;;  %v8254_v2 = vld [vmem:[%s10130_s1] sm:$0xff]  ;;  %vm87_vm0 = vcmask 64512   ;;  %v163_v37 = vlaneseq }
  0x29   :  { %155 = vmatprep.mubr.f32.mxu0 %v8167_v0  ;;  %244 = vmatprep.mubr.f32.mxu1 %v8167_v0  ;;  %v86_v3 = vld [vmem:[#allocation5] sm:$0x3]  ;;  %v8260_v4 = vld [vmem:[%s10130_s1 + $0x18] sm:$0xff]  ;;  %v8265_v5 = vld [vmem:[%s10130_s1 + $0x10] sm:$0xff]  ;;  %s8169_s23 = smov 64   ;;  %vm1572_vm1 = vcmask 254976  }
  0x2a   :  { %121 = vmatprep.subr.mxu0 %v8249_v1  ;;  %210 = vmatprep.subr.mxu1 %v8260_v4  ;;  %v176_v6 = vld [vmem:[#allocation5 + $0xe] sm:$0x3]  ;;  %v266_v7 = vld [vmem:[#allocation5 + $0x2] sm:$0x3]  ;;  %v344_v8 = vld [vmem:[#allocation5 + $0xc] sm:$0x3] }
  0x2b   :  { %122 = vmatpush1.msra.mxu0 %v8254_v2  ;;  %211 = vmatpush1.msra.mxu1 %v8265_v5  ;;  %v435_v9 = vld [vmem:[#allocation5 + $0x4] sm:$0x3]  ;;  %v513_v10 = vld [vmem:[#allocation5 + $0xa] sm:$0x3]  ;;  %v604_v11 = vld [vmem:[#allocation5 + $0x6] sm:$0x3] }
  0x2c   :  { %7678 = vmatmul.mubr.msk.f32.vlgmr.msra.gmra.mxu0 %vm87_vm0, %v86_v3  ;;  %300 = vmatprep.subr.mxu0 %v8249_v1  ;;  %v682_v12 = vld [vmem:[#allocation5 + $0x8] sm:$0x3]  ;;  %v849_v14 = vld [vmem:[#allocation5 + $0x6] sm:$0x3]  ;;  %v939_v15 = vld [vmem:[#allocation5 + $0xa] sm:$0x3] }
  0x2d   :  { %301 = vmatpush1.msra.mxu0 %v8254_v2  ;;  %7679 = vmatmul.mubr.msk.f32.vlgmr.msra.gmra.mxu1 %vm87_vm0, %v176_v6  ;;  %v772_v13 = vld [vmem:[#allocation5 + $0x8] sm:$0x3]  ;;  %v1016_v16 = vld [vmem:[#allocation5 + $0x4] sm:$0x3]  ;;  %v1106_v17 = vld [vmem:[#allocation5 + $0xc] sm:$0x3] }
  0x2e   :  { %334 = vmatprep.mubr.f32.mxu0 %v8167_v0  ;;  %378 = vmatprep.subr.mxu1 %v8260_v4  ;;  %v1183_v18 = vld [vmem:[#allocation5 + $0x2] sm:$0x3]  ;;  %v8319_v19 = vld [vmem:[#allocation10 + $0x78] sm:$0xff]  ;;  %v8329_v22 = vld [vmem:[#allocation10 + $0x68] sm:$0xff]  ;;  %v8414_v38 = vshrl.u32 %v163_v37, 7  ;;  %vm1457_vm2 = vcmask 523264  }
  0x2f   :  { %469 = vmatprep.subr.mxu0 %v8249_v1  ;;  %379 = vmatpush1.msra.mxu1 %v8265_v5  ;;  %v1273_v20 = vld [vmem:[#allocation5 + $0xe] sm:$0x3]  ;;  %v8325_v21 = vld [vmem:[#allocation10 + $0x70] sm:$0xff]  ;;  %v8333_v24 = vld [vmem:[#allocation10 + $0x60] sm:$0xff]  ;;  %s8170_s24 = smov 96   ;;  %vm2530_vm3 = vcmask 261120  }
  0x30   :  { %7681 = vmatmul.mubr.msk.f32.vlgmr.msra.gmra.mxu0 %vm87_vm0, %v266_v7  ;;  %412 = vmatprep.mubr.f32.mxu1 %v8167_v0  ;;  %v1350_v23 = vld [vmem:[#allocation5] sm:$0x3]  ;;  %v8337_v25 = vld [vmem:[#allocation10 + $0x58] sm:$0xff]  ;;  %v8344_v27 = vld [vmem:[#allocation10 + $0x48] sm:$0xff]  ;;  %v8417_v39 = vsub.s32 0, %v8414_v38  ;;  %v8423_v41 = vsub.s32 1, %v8414_v38 }
  0x31   :  { %470 = vmatpush1.msra.mxu0 %v8254_v2  ;;  %7682 = vmatmul.mubr.msk.f32.vlgmr.msra.gmra.mxu1 %vm87_vm0, %v344_v8  ;;  %v8341_v26 = vld [vmem:[#allocation10 + $0x50] sm:$0xff]  ;;  %v8348_v28 = vld [vmem:[#allocation10 + $0x40] sm:$0xff]  ;;  %v8352_v29 = vld [vmem:[#allocation10 + $0x38] sm:$0xff]  ;;  %vm8171_vm4 = vmmov 0   ;;  %vm7584_vm5 = vcmask 130048   ;;  %s8172_s21 = smov [#allocation11]  }
  0x32   :  { %503 = vmatprep.mubr.f32.mxu0 %v8167_v0  ;;  %547 = vmatprep.subr.mxu1 %v8260_v4  ;;  %v8356_v30 = vld [vmem:[#allocation10 + $0x30] sm:$0xff]  ;;  %v8360_v31 = vld [vmem:[#allocation10 + $0x28] sm:$0xff]  ;;  %v8364_v32 = vld [vmem:[#allocation10 + $0x20] sm:$0xff]  ;;  %s7666_s1 = sshll.u32 %s8172_s21, 4  ;;  %vm7658_vm6 = vcmask 9216   ;;  %s7667_s1 = int_to_ptr.vmem [resolvable:$true] %s7666_s1 }
  0x33   :  { %638 = vmatprep.subr.mxu0 %v8249_v1  ;;  %548 = vmatpush1.msra.mxu1 %v8265_v5  ;;  %v8368_v33 = vld [vmem:[#allocation10 + $0x18] sm:$0xff]  ;;  %v8372_v34 = vld [vmem:[#allocation10 + $0x10] sm:$0xff]  ;;  %v8376_v35 = vld [vmem:[#allocation10 + $0x8] sm:$0xff]  ;;  %p8139_p2 = scmp.lt.s32.totalorder %s7667_s1, %s7667_s1 }
  0x34   :  { %7684 = vmatmul.mubr.msk.f32.vlgmr.msra.gmra.mxu0 %vm87_vm0, %v435_v9  ;;  %581 = vmatprep.mubr.f32.mxu1 %v8167_v0  ;;  %v8380_v36 = vld [vmem:[#allocation10] sm:$0xff]  ;;  %v85_v40 = vld [vmem:[%s10133_s4] sm:$0x3] }
  0x35   :  { %639 = vmatpush1.msra.mxu0 %v8254_v2  ;;  %7685 = vmatmul.mubr.msk.f32.vlgmr.msra.gmra.mxu1 %vm87_vm0, %v513_v10  ;;  %v8426_v42 = vrot.slane %v85_v40, %v8417_v39  ;;  %v8429_v43 = vrot.slane %v85_v40, %v8423_v41 }
  0x36   :  { %672 = vmatprep.mubr.f32.mxu0 %v8167_v0  ;;  %716 = vmatprep.subr.mxu1 %v8260_v4 }
  0x37   :  { %806 = vmatprep.subr.mxu0 %v8249_v1  ;;  %717 = vmatpush1.msra.mxu1 %v8265_v5 }
  0x38   :  { %7687 = vmatmul.mubr.msk.f32.vlgmr.msra.gmra.mxu0 %vm87_vm0, %v604_v11  ;;  %750 = vmatprep.mubr.f32.mxu1 %v8167_v0 }
  0x39   :  { %807 = vmatpush1.msra.mxu0 %v8254_v2  ;;  %7688 = vmatmul.mubr.msk.f32.vlgmr.msra.gmra.mxu1 %vm87_vm0, %v682_v12 }
  0x3a   :  { %840 = vmatprep.mubr.f32.mxu0 %v8167_v0  ;;  %883 = vmatprep.subr.mxu1 %v8260_v4 }
  0x3b   :  { %973 = vmatprep.subr.mxu0 %v8249_v1  ;;  %884 = vmatpush1.msra.mxu1 %v8265_v5 }
  0x3c   :  { %7690 = vmatmul.mubr.msk.f32.vlgmr.msra.gmra.mxu0 %vm87_vm0, %v772_v13  ;;  %917 = vmatprep.mubr.f32.mxu1 %v8167_v0 }
  0x3d   :  { %974 = vmatpush1.msra.mxu0 %v8254_v2  ;;  %7691 = vmatmul.mubr.msk.f32.vlgmr.msra.gmra.mxu1 %vm87_vm0, %v849_v14 }
  0x3e   :  { %1007 = vmatprep.mubr.f32.mxu0 %v8167_v0  ;;  %1050 = vmatprep.subr.mxu1 %v8260_v4 }
  0x3f   :  { %1140 = vmatprep.subr.mxu0 %v8249_v1  ;;  %1051 = vmatpush1.msra.mxu1 %v8265_v5 }
  0x40   :  { %7693 = vmatmul.mubr.msk.f32.vlgmr.msra.gmra.mxu0 %vm87_vm0, %v939_v15  ;;  %1084 = vmatprep.mubr.f32.mxu1 %v8167_v0 }
  0x41   :  { %1141 = vmatpush1.msra.mxu0 %v8254_v2  ;;  %7694 = vmatmul.mubr.msk.f32.vlgmr.msra.gmra.mxu1 %vm87_vm0, %v1016_v16 }
  0x42   :  { %1174 = vmatprep.mubr.f32.mxu0 %v8167_v0  ;;  %1217 = vmatprep.subr.mxu1 %v8260_v4 }
  0x43   :  { %1307 = vmatprep.subr.mxu0 %v8249_v1  ;;  %1218 = vmatpush1.msra.mxu1 %v8265_v5 }
  0x44   :  { %7696 = vmatmul.mubr.msk.f32.vlgmr.msra.gmra.mxu0 %vm87_vm0, %v1106_v17  ;;  %1251 = vmatprep.mubr.f32.mxu1 %v8167_v0 }
  0x45   :  { %1308 = vmatpush1.msra.mxu0 %v8254_v2  ;;  %7697 = vmatmul.mubr.msk.f32.vlgmr.msra.gmra.mxu1 %vm87_vm0, %v1183_v18 }
  0x46   :  { %1341 = vmatprep.mubr.f32.mxu0 %v8167_v0  ;;  %1477 = vmatprep.subr.mxu0 %v8319_v19 }
  0x47   :  { %1384 = vmatprep.subr.mxu1 %v8260_v4  ;;  %1418 = vmatprep.mubr.f32.mxu1 %v8167_v0 }
  0x48   :  { %7699 = vmatmul.mubr.msk.f32.vlgmr.msra.gmra.mxu0 %vm87_vm0, %v1273_v20  ;;  %1385 = vmatpush1.msra.mxu1 %v8265_v5 }
  0x49   :  { %1478 = vmatpush1.msra.mxu0 %v8325_v21  ;;  %7700 = vmatmul.mubr.msk.f32.vlgmr.msra.gmra.mxu1 %vm87_vm0, %v1350_v23 }
  0x4a   :  { %1479 = vmatprep.subr.mxu0 %v8329_v22  ;;  %1525 = vmatprep.mubr.f32.mxu0 %v8167_v0 }
  0x4b   :  { %1480 = vmatpush1.msra.mxu0 %v8333_v24  ;;  %1606 = vmatprep.subr.mxu1 %v8319_v19 }
  0x4c   :  { %1481 = vmatprep.subr.mxu0 %v8337_v25  ;;  %1607 = vmatpush1.msra.mxu1 %v8325_v21 }
  0x4d   :  { %1482 = vmatpush1.msra.mxu0 %v8341_v26  ;;  %1608 = vmatprep.subr.mxu1 %v8329_v22 }
  0x4e   :  { %1483 = vmatprep.subr.mxu0 %v8344_v27  ;;  %1609 = vmatpush1.msra.mxu1 %v8333_v24 }
  0x4f   :  { %1484 = vmatpush1.msra.mxu0 %v8348_v28  ;;  %1610 = vmatprep.subr.mxu1 %v8337_v25 }
  0x50   :  { %1485 = vmatprep.subr.mxu0 %v8352_v29  ;;  %1611 = vmatpush1.msra.mxu1 %v8341_v26 }
  0x51   :  { %1486 = vmatpush1.msra.mxu0 %v8356_v30  ;;  %1612 = vmatprep.subr.mxu1 %v8344_v27 }
  0x52   :  { %1487 = vmatprep.subr.mxu0 %v8360_v31  ;;  %1613 = vmatpush1.msra.mxu1 %v8348_v28 }
  0x53   :  { %1488 = vmatpush1.msra.mxu0 %v8364_v32  ;;  %1614 = vmatprep.subr.mxu1 %v8352_v29 }
  0x54   :  { %1489 = vmatprep.subr.mxu0 %v8368_v33  ;;  %1615 = vmatpush1.msra.mxu1 %v8356_v30 }
  0x55   :  { %1490 = vmatpush1.msra.mxu0 %v8372_v34  ;;  %1616 = vmatprep.subr.mxu1 %v8360_v31 }
  0x56   :  { %1491 = vmatprep.subr.mxu0 %v8376_v35  ;;  %1617 = vmatpush1.msra.mxu1 %v8364_v32 }
  0x57   :  { %1492 = vmatpush1.msra.mxu0 %v8380_v36  ;;  %1618 = vmatprep.subr.mxu1 %v8368_v33 }
  0x58   :  { %1526 = vmatmul.mubr.f32.vlgmr.msra.gmra.mxu0 %v8167_v0  ;;  %1619 = vmatpush1.msra.mxu1 %v8372_v34 }
  0x59   :  { %1654 = vmatprep.mubr.f32.mxu1 %v8167_v0  ;;  %1620 = vmatprep.subr.mxu1 %v8376_v35 }
  0x5a   :  { %1735 = vmatprep.subr.mxu0 %v8319_v19  ;;  %1621 = vmatpush1.msra.mxu1 %v8380_v36 }
  0x5b   :  { %1736 = vmatpush1.msra.mxu0 %v8325_v21  ;;  %1783 = vmatprep.mubr.f32.mxu0 %v8167_v0 }
  0x5c   :  { %1737 = vmatprep.subr.mxu0 %v8329_v22  ;;  %1864 = vmatprep.subr.mxu1 %v8319_v19 }
  0x5d   :  { %1738 = vmatpush1.msra.mxu0 %v8333_v24 }
  0x5e   :  { %1739 = vmatprep.subr.mxu0 %v8337_v25 }
  0x5f   :  { %1740 = vmatpush1.msra.mxu0 %v8341_v26 }
  0x60   :  { %1741 = vmatprep.subr.mxu0 %v8344_v27 }
  0x61   :  { %1742 = vmatpush1.msra.mxu0 %v8348_v28 }
  0x62   :  { %1743 = vmatprep.subr.mxu0 %v8352_v29 }
  0x63   :  { %1744 = vmatpush1.msra.mxu0 %v8356_v30 }
  0x64   :  { %1745 = vmatprep.subr.mxu0 %v8360_v31 }
  0x65   :  { %1746 = vmatpush1.msra.mxu0 %v8364_v32 }
  0x66   :  { %1747 = vmatprep.subr.mxu0 %v8368_v33 }
  0x67   :  { %1748 = vmatpush1.msra.mxu0 %v8372_v34 }
  0x68   :  { %1749 = vmatprep.subr.mxu0 %v8376_v35 }
  0x69   :  { %1750 = vmatpush1.msra.mxu0 %v8380_v36 }
  0x6a   :  { %1993 = vmatprep.subr.mxu0 %v8319_v19 }
  0xec   :  { %v157_v44 = vpop.f32.mrf.mxu0 }
  0xed   :  { %v173_v45 = vadd.f32 %v8426_v42, %v157_v44  ;;  %v246_v47 = vpop.f32.mrf.mxu1 }
  0xee   :  { %v159_v46 = vpop.f32.mrf.mxu0 }
  0xef   :  { %v174_v48 = vadd.f32 %v8429_v43, %v159_v46  ;;  %v248_v49 = vpop.f32.mrf.mxu1  ;;  %v251_v51 = vadd.f32 %v246_v47, %v173_v45 }
  0xf0   :  { %v336_v50 = vpop.f32.mrf.mxu0 }
  0xf1   :  { %v252_v52 = vadd.f32 %v248_v49, %v174_v48  ;;  %v341_v53 = vadd.f32 %v336_v50, %v8426_v42  ;;  %v414_v55 = vpop.f32.mrf.mxu1 }
  0xf2   :  { %v338_v54 = vpop.f32.mrf.mxu0 }
  0xf3   :  { %v255_v56 = vcombine.low %v251_v51, %v252_v52  ;;  %v342_v57 = vadd.f32 %v338_v54, %v8429_v43  ;;  %v416_v58 = vpop.f32.mrf.mxu1  ;;  %v419_v60 = vadd.f32 %v414_v55, %v341_v53 }
  0xf4   :  { %v505_v59 = vpop.f32.mrf.mxu0 }
  0xf5   :  { %7680 = vst.sshfl [vmem:[#allocation2] sm:$0x33 pattern:$0x76325410] %v255_v56  ;;  %v420_v61 = vadd.f32 %v416_v58, %v342_v57  ;;  %v510_v62 = vadd.f32 %v505_v59, %v8426_v42  ;;  %v583_v1 = vpop.f32.mrf.mxu1 }
  0xf6   :  { %v507_v63 = vpop.f32.mrf.mxu0 }
  0xf7   :  { %v423_v2 = vcombine.low %v419_v60, %v420_v61  ;;  %v511_v3 = vadd.f32 %v507_v63, %v8429_v43  ;;  %v585_v4 = vpop.f32.mrf.mxu1  ;;  %v588_v6 = vadd.f32 %v583_v1, %v510_v62 }
  0xf8   :  { %v674_v5 = vpop.f32.mrf.mxu0 }
  0xf9   :  { %7683 = vst.sshfl [vmem:[#allocation2 + $0x4] sm:$0x33 pattern:$0x76325410] %v423_v2  ;;  %v589_v7 = vadd.f32 %v585_v4, %v511_v3  ;;  %v679_v8 = vadd.f32 %v674_v5, %v8426_v42  ;;  %v752_v10 = vpop.f32.mrf.mxu1 }
  0xfa   :  { %v676_v9 = vpop.f32.mrf.mxu0 }
  0xfb   :  { %v592_v11 = vcombine.low %v588_v6, %v589_v7  ;;  %v680_v12 = vadd.f32 %v676_v9, %v8429_v43  ;;  %v754_v13 = vpop.f32.mrf.mxu1  ;;  %v757_v15 = vadd.f32 %v752_v10, %v679_v8 }
  0xfc   :  { %v842_v14 = vpop.f32.mrf.mxu0 }
  0xfd   :  { %7686 = vst.sshfl [vmem:[#allocation2 + $0x8] sm:$0x33 pattern:$0x76325410] %v592_v11  ;;  %v758_v16 = vadd.f32 %v754_v13, %v680_v12  ;;  %v847_v17 = vadd.f32 %v842_v14, %v8426_v42  ;;  %v919_v20 = vpop.f32.mrf.mxu1  ;;  %v8168_v11 = vmov 1983009808  }
  0xfe   :  { %v844_v18 = vpop.f32.mrf.mxu0  ;;  %v1536_v12 = vunpack.c.l.s4 %v8168_v11 }
  0xff   :  { %v761_v23 = vcombine.low %v757_v15, %v758_v16  ;;  %v848_v37 = vadd.f32 %v844_v18, %v8429_v43  ;;  %v921_v40 = vpop.f32.mrf.mxu1  ;;  %v924_v45 = vadd.f32 %v919_v20, %v847_v17  ;;  %v1456_v18 = vld [vmem:[#allocation2] sm:$0xf] }
 0x100   :  { %v1009_v44 = vpop.f32.mrf.mxu0  ;;  %v1537_v13 = vunpack.c.0.s8 %v1536_v12 }
 0x101   :  { %7689 = vst.sshfl [vmem:[#allocation2 + $0xc] sm:$0x33 pattern:$0x76325410] %v761_v23  ;;  %v925_v46 = vadd.f32 %v921_v40, %v848_v37  ;;  %v1014_v47 = vadd.f32 %v1009_v44, %v8426_v42  ;;  %v1086_v49 = vpop.f32.mrf.mxu1 }
 0x102   :  { %v1011_v48 = vpop.f32.mrf.mxu0  ;;  %v8448_v15 = vsub.s32 %v1537_v13, %v8414_v38 }
 0x103   :  { %v928_v50 = vcombine.low %v924_v45, %v925_v46  ;;  %v1015_v51 = vadd.f32 %v1011_v48, %v8429_v43  ;;  %v1088_v52 = vpop.f32.mrf.mxu1  ;;  %v1091_v54 = vadd.f32 %v1086_v49, %v1014_v47 }
 0x104   :  { %v1176_v53 = vpop.f32.mrf.mxu0 }
 0x105   :  { %7692 = vst.sshfl [vmem:[#allocation2 + $0x10] sm:$0x33 pattern:$0x76325410] %v928_v50  ;;  %v1092_v55 = vadd.f32 %v1088_v52, %v1015_v51  ;;  %v1181_v56 = vadd.f32 %v1176_v53, %v8426_v42  ;;  %v1253_v58 = vpop.f32.mrf.mxu1 }
 0x106   :  { %v1178_v57 = vpop.f32.mrf.mxu0 }
 0x107   :  { %v1095_v59 = vcombine.low %v1091_v54, %v1092_v55  ;;  %v1182_v60 = vadd.f32 %v1178_v57, %v8429_v43  ;;  %v1255_v61 = vpop.f32.mrf.mxu1  ;;  %v1258_v63 = vadd.f32 %v1253_v58, %v1181_v56  ;;  %v1587_v58 = vld [vmem:[#allocation2 + $0x4] sm:$0xf] }
 0x108   :  { %v1343_v62 = vpop.f32.mrf.mxu0 }
 0x109   :  { %7695 = vst.sshfl [vmem:[#allocation2 + $0x14] sm:$0x33 pattern:$0x76325410] %v1095_v59  ;;  %v1259_v1 = vadd.f32 %v1255_v61, %v1182_v60  ;;  %v1348_v2 = vadd.f32 %v1343_v62, %v8426_v42  ;;  %v1420_v4 = vpop.f32.mrf.mxu1 }
 0x10a   :  { %v1345_v3 = vpop.f32.mrf.mxu0 }
 0x10b   :  { %v1262_v5 = vcombine.low %v1258_v63, %v1259_v1  ;;  %v1349_v6 = vadd.f32 %v1345_v3, %v8429_v43  ;;  %v1422_v7 = vpop.f32.mrf.mxu1  ;;  %v1425_v8 = vadd.f32 %v1420_v4, %v1348_v2 }
 0x10d   :  { %7698 = vst.sshfl [vmem:[#allocation2 + $0x18] sm:$0x33 pattern:$0x76325410] %v1262_v5  ;;  %v1426_v9 = vadd.f32 %v1422_v7, %v1349_v6 }
 0x10f   :  { %v1429_v10 = vcombine.low %v1425_v8, %v1426_v9 }
 0x111   :  { %7701 = vst.sshfl [vmem:[#allocation2 + $0x1c] sm:$0x33 pattern:$0x76325410] %v1429_v10 }
 0x118   :  { %v1527_v14 = vpop.f32.mrf.mxu0 }
 0x11a   :  { %v1529_v16 = vpop.f32.mrf.mxu0 }
 0x11b   :  { %v1534_v42 = vcombine.low %v1527_v14, %v1529_v16 }
 0x11d   :  { %v1541_v17 = vrot.slane %v1534_v42, %v8448_v15  ;;  %v1716_v42 = vld [vmem:[#allocation2 + $0x8] sm:$0xf] }
 0x11f   :  { %v1543_v20 = vadd.f32 %v1541_v17, %v1456_v18 }
 0x121   :  { %1551 = vrot.lane.b32.xlu0 %v1543_v20, %s8169_s23  ;;  %v7702_v43 = vmul.f32 -1.442695, %v1543_v20 }
 0x123   :  { %7882 = vpow2.f32 %v7702_v43 }
 0x130   :  { %v7883_v23 = vpop.eup %7882 }
 0x131   :  { %v1547_v37 = vadd.f32 1.0, %v7883_v23 }
 0x133   :  { %7884 = vrcp.f32 %v1547_v37 }
 0x140   :  { %v7885_v45 = vpop.eup %7884 }
 0x141   :  { %v1556_v47 = vmul.f32 0.0, %v7885_v45  ;;  %v1565_v51 = vrot.slane %v7885_v45, 2 }
 0x193   :  { %v1552_v40 = vpop.permute.xlu0 %1551 }
 0x194   :  { %v1553_v44 = vrot.slane %v1552_v40, 2 }
 0x196   :  { %7886 = vtanh.f32 %v1553_v44 }
 0x1a3   :  { %v7887_v38 = vpop.eup %7886 }
 0x1a4   :  { %v1557_v46 = vmul.f32 %v7887_v38, %v7885_v45 }
 0x1a6   :  { %1559 = vrot.lane.b32.xlu0 %v1557_v46, %s8169_s23 }
 0x218   :  { %v1560_v48 = vpop.permute.xlu0 %1559 }
 0x219   :  { %v1562_v49 = vadd.f32 %v1560_v48, %v1556_v47 }
 0x21b   :  { %7888 = vtanh.f32 %v1562_v49 }
 0x228   :  { %v7889_v50 = vpop.eup %7888 }
 0x229   :  { %1568 = vrot.lane.b32.xlu1 %v7889_v50, %s8169_s23 }
 0x29b   :  { %v1569_v52 = vpop.permute.xlu1 %1568 }
 0x29c   :  { %v8454_v53 = vmul.f32 %v1569_v52, %v1565_v51 }
 0x29e   :  { %1573 = vst.msk [vmem:[#allocation3] sm:$0x3] %vm1572_vm1, %v8454_v53  ;;  %7703 = vmatmul.mubr.msk.f32.vlgmr.msra.gmra.mxu1 %vm1457_vm2, %v8454_v53 }
 0x29f   :  { %1865 = vmatpush1.msra.mxu1 %v8325_v21  ;;  %1912 = vmatprep.mubr.f32.mxu1 %v8167_v0 }
 0x2a0   :  { %1866 = vmatprep.subr.mxu1 %v8329_v22 }
 0x2a1   :  { %1867 = vmatpush1.msra.mxu1 %v8333_v24 }
 0x2a2   :  { %1868 = vmatprep.subr.mxu1 %v8337_v25 }
 0x2a3   :  { %1869 = vmatpush1.msra.mxu1 %v8341_v26 }
 0x2a4   :  { %1870 = vmatprep.subr.mxu1 %v8344_v27 }
 0x2a5   :  { %1871 = vmatpush1.msra.mxu1 %v8348_v28 }
 0x2a6   :  { %1872 = vmatprep.subr.mxu1 %v8352_v29 }
 0x2a7   :  { %1873 = vmatpush1.msra.mxu1 %v8356_v30 }
 0x2a8   :  { %1874 = vmatprep.subr.mxu1 %v8360_v31 }
 0x2a9   :  { %1875 = vmatpush1.msra.mxu1 %v8364_v32 }
 0x2aa   :  { %1876 = vmatprep.subr.mxu1 %v8368_v33 }
 0x2ab   :  { %1877 = vmatpush1.msra.mxu1 %v8372_v34 }
 0x2ac   :  { %1878 = vmatprep.subr.mxu1 %v8376_v35 }
 0x2ad   :  { %1879 = vmatpush1.msra.mxu1 %v8380_v36 }
 0x2ae   :  { %2122 = vmatprep.subr.mxu1 %v8319_v19 }
 0x35e   :  { %v1656_v54 = vpop.f32.mrf.mxu1 }
 0x360   :  { %v1658_v55 = vpop.f32.mrf.mxu1 }
 0x361   :  { %v1663_v56 = vcombine.low %v1656_v54, %v1658_v55 }
 0x363   :  { %v1670_v57 = vrot.slane %v1663_v56, %v8448_v15 }
 0x365   :  { %v1672_v59 = vadd.f32 %v1670_v57, %v1587_v58  ;;  %v1845_v57 = vld [vmem:[#allocation2 + $0xc] sm:$0xf] }
 0x367   :  { %1680 = vrot.lane.b32.xlu1 %v1672_v59, %s8169_s23  ;;  %v7704_v60 = vmul.f32 -1.442695, %v1672_v59 }
 0x369   :  { %7890 = vpow2.f32 %v7704_v60 }
 0x376   :  { %v7891_v61 = vpop.eup %7890 }
 0x377   :  { %v1676_v62 = vadd.f32 1.0, %v7891_v61 }
 0x379   :  { %7892 = vrcp.f32 %v1676_v62 }
 0x386   :  { %v7893_v2 = vpop.eup %7892 }
 0x387   :  { %v1685_v5 = vmul.f32 %v7893_v2, %v1562_v49  ;;  %v1694_v9 = vrot.slane %v7893_v2, 2 }
 0x3d9   :  { %v1681_v63 = vpop.permute.xlu1 %1680 }
 0x3da   :  { %v1682_v1 = vrot.slane %v1681_v63, 2 }
 0x3dc   :  { %7894 = vtanh.f32 %v1682_v1 }
 0x3e9   :  { %v7895_v3 = vpop.eup %7894 }
 0x3ea   :  { %v1686_v4 = vmul.f32 %v7895_v3, %v7893_v2 }
 0x3ec   :  { %1688 = vrot.lane.b32.xlu0 %v1686_v4, %s8169_s23 }
 0x45e   :  { %v1689_v6 = vpop.permute.xlu0 %1688 }
 0x45f   :  { %v1691_v7 = vadd.f32 %v1689_v6, %v1685_v5 }
 0x461   :  { %7896 = vtanh.f32 %v1691_v7 }
 0x46e   :  { %v7897_v8 = vpop.eup %7896 }
 0x46f   :  { %1697 = vrot.lane.b32.xlu1 %v7897_v8, %s8169_s23 }
 0x4e1   :  { %v1698_v10 = vpop.permute.xlu1 %1697 }
 0x4e2   :  { %v8481_v11 = vmul.f32 %v1698_v10, %v1694_v9 }
 0x4e4   :  { %1702 = vst.msk [vmem:[#allocation3 + $0x2] sm:$0x3] %vm1572_vm1, %v8481_v11  ;;  %7705 = vmatmul.mubr.msk.f32.vlgmr.msra.gmra.mxu0 %vm1457_vm2, %v8481_v11 }
 0x4e5   :  { %1994 = vmatpush1.msra.mxu0 %v8325_v21  ;;  %2041 = vmatprep.mubr.f32.mxu0 %v8167_v0 }
 0x4e6   :  { %1995 = vmatprep.subr.mxu0 %v8329_v22 }
 0x4e7   :  { %1996 = vmatpush1.msra.mxu0 %v8333_v24 }
 0x4e8   :  { %1997 = vmatprep.subr.mxu0 %v8337_v25 }
 0x4e9   :  { %1998 = vmatpush1.msra.mxu0 %v8341_v26 }
 0x4ea   :  { %1999 = vmatprep.subr.mxu0 %v8344_v27 }
 0x4eb   :  { %2000 = vmatpush1.msra.mxu0 %v8348_v28 }
 0x4ec   :  { %2001 = vmatprep.subr.mxu0 %v8352_v29 }
 0x4ed   :  { %2002 = vmatpush1.msra.mxu0 %v8356_v30 }
 0x4ee   :  { %2003 = vmatprep.subr.mxu0 %v8360_v31 }
 0x4ef   :  { %2004 = vmatpush1.msra.mxu0 %v8364_v32 }
 0x4f0   :  { %2005 = vmatprep.subr.mxu0 %v8368_v33 }
 0x4f1   :  { %2006 = vmatpush1.msra.mxu0 %v8372_v34 }
 0x4f2   :  { %2007 = vmatprep.subr.mxu0 %v8376_v35 }
 0x4f3   :  { %2008 = vmatpush1.msra.mxu0 %v8380_v36 }
 0x4f4   :  { %2251 = vmatprep.subr.mxu0 %v8319_v19 }
 0x5a4   :  { %v1785_v12 = vpop.f32.mrf.mxu0 }
 0x5a6   :  { %v1787_v13 = vpop.f32.mrf.mxu0 }
 0x5a7   :  { %v1792_v14 = vcombine.low %v1785_v12, %v1787_v13 }
 0x5a9   :  { %v1799_v16 = vrot.slane %v1792_v14, %v8448_v15 }
 0x5ab   :  { %v1801_v17 = vadd.f32 %v1799_v16, %v1716_v42  ;;  %v1974_v16 = vld [vmem:[#allocation2 + $0x10] sm:$0xf] }
 0x5ad   :  { %1809 = vrot.lane.b32.xlu0 %v1801_v17, %s8169_s23  ;;  %v7706_v18 = vmul.f32 -1.442695, %v1801_v17 }
 0x5af   :  { %7898 = vpow2.f32 %v7706_v18 }
 0x5bc   :  { %v7899_v20 = vpop.eup %7898 }
 0x5bd   :  { %v1805_v43 = vadd.f32 1.0, %v7899_v20 }
 0x5bf   :  { %7900 = vrcp.f32 %v1805_v43 }
 0x5cc   :  { %v7901_v40 = vpop.eup %7900 }
 0x5cd   :  { %v1814_v38 = vmul.f32 %v7901_v40, %v1691_v7  ;;  %v1823_v49 = vrot.slane %v7901_v40, 2 }
 0x61f   :  { %v1810_v23 = vpop.permute.xlu0 %1809 }
 0x620   :  { %v1811_v37 = vrot.slane %v1810_v23, 2 }
 0x622   :  { %7902 = vtanh.f32 %v1811_v37 }
 0x62f   :  { %v7903_v44 = vpop.eup %7902 }
 0x630   :  { %v1815_v45 = vmul.f32 %v7903_v44, %v7901_v40 }
 0x632   :  { %1817 = vrot.lane.b32.xlu1 %v1815_v45, %s8169_s23 }
 0x6a4   :  { %v1818_v46 = vpop.permute.xlu1 %1817 }
 0x6a5   :  { %v1820_v47 = vadd.f32 %v1818_v46, %v1814_v38 }
 0x6a7   :  { %7904 = vtanh.f32 %v1820_v47 }
 0x6b4   :  { %v7905_v48 = vpop.eup %7904 }
 0x6b5   :  { %1826 = vrot.lane.b32.xlu0 %v7905_v48, %s8169_s23 }
 0x727   :  { %v1827_v50 = vpop.permute.xlu0 %1826 }
 0x728   :  { %v8508_v51 = vmul.f32 %v1827_v50, %v1823_v49 }
 0x72a   :  { %1831 = vst.msk [vmem:[#allocation3 + $0x4] sm:$0x3] %vm1572_vm1, %v8508_v51  ;;  %7707 = vmatmul.mubr.msk.f32.vlgmr.msra.gmra.mxu1 %vm1457_vm2, %v8508_v51 }
 0x72b   :  { %2123 = vmatpush1.msra.mxu1 %v8325_v21  ;;  %2170 = vmatprep.mubr.f32.mxu1 %v8167_v0 }
 0x72c   :  { %2124 = vmatprep.subr.mxu1 %v8329_v22 }
 0x72d   :  { %2125 = vmatpush1.msra.mxu1 %v8333_v24 }
 0x72e   :  { %2126 = vmatprep.subr.mxu1 %v8337_v25 }
 0x72f   :  { %2127 = vmatpush1.msra.mxu1 %v8341_v26 }
 0x730   :  { %2128 = vmatprep.subr.mxu1 %v8344_v27 }
 0x731   :  { %2129 = vmatpush1.msra.mxu1 %v8348_v28 }
 0x732   :  { %2130 = vmatprep.subr.mxu1 %v8352_v29 }
 0x733   :  { %2131 = vmatpush1.msra.mxu1 %v8356_v30 }
 0x734   :  { %2132 = vmatprep.subr.mxu1 %v8360_v31 }
 0x735   :  { %2133 = vmatpush1.msra.mxu1 %v8364_v32 }
 0x736   :  { %2134 = vmatprep.subr.mxu1 %v8368_v33 }
 0x737   :  { %2135 = vmatpush1.msra.mxu1 %v8372_v34 }
 0x738   :  { %2136 = vmatprep.subr.mxu1 %v8376_v35 }
 0x739   :  { %2137 = vmatpush1.msra.mxu1 %v8380_v36 }
 0x73a   :  { %2380 = vmatprep.subr.mxu1 %v8319_v19 }
 0x7ea   :  { %v1914_v52 = vpop.f32.mrf.mxu1 }
 0x7ec   :  { %v1916_v54 = vpop.f32.mrf.mxu1 }
 0x7ed   :  { %v1921_v55 = vcombine.low %v1914_v52, %v1916_v54 }
 0x7ef   :  { %v1928_v56 = vrot.slane %v1921_v55, %v8448_v15 }
 0x7f1   :  { %v1930_v58 = vadd.f32 %v1928_v56, %v1845_v57 }
 0x7f3   :  { %1938 = vrot.lane.b32.xlu1 %v1930_v58, %s8169_s23  ;;  %v7708_v59 = vmul.f32 -1.442695, %v1930_v58 }
 0x7f5   :  { %7906 = vpow2.f32 %v7708_v59 }
 0x802   :  { %v7907_v60 = vpop.eup %7906 }
 0x803   :  { %v1934_v61 = vadd.f32 1.0, %v7907_v60 }
 0x805   :  { %7908 = vrcp.f32 %v1934_v61 }
 0x812   :  { %v7909_v1 = vpop.eup %7908 }
 0x813   :  { %v1943_v3 = vmul.f32 %v7909_v1, %v1820_v47  ;;  %v1952_v7 = vrot.slane %v7909_v1, 2 }
 0x865   :  { %v1939_v62 = vpop.permute.xlu1 %1938 }
 0x866   :  { %v1940_v63 = vrot.slane %v1939_v62, 2 }
 0x868   :  { %7910 = vtanh.f32 %v1940_v63  ;;  %v2232_v63 = vld [vmem:[#allocation2 + $0x18] sm:$0xf] }
 0x875   :  { %v7911_v2 = vpop.eup %7910 }
 0x876   :  { %v1944_v19 = vmul.f32 %v7911_v2, %v7909_v1 }
 0x878   :  { %1946 = vrot.lane.b32.xlu0 %v1944_v19, %s8169_s23 }
 0x8ea   :  { %v1947_v4 = vpop.permute.xlu0 %1946 }
 0x8eb   :  { %v1949_v5 = vadd.f32 %v1947_v4, %v1943_v3 }
 0x8ed   :  { %7912 = vtanh.f32 %v1949_v5 }
 0x8fa   :  { %v7913_v6 = vpop.eup %7912 }
 0x8fb   :  { %1955 = vrot.lane.b32.xlu1 %v7913_v6, %s8169_s23 }
 0x96d   :  { %v1956_v8 = vpop.permute.xlu1 %1955 }
 0x96e   :  { %v8535_v9 = vmul.f32 %v1956_v8, %v1952_v7 }
 0x970   :  { %1960 = vst.msk [vmem:[#allocation3 + $0x6] sm:$0x3] %vm1572_vm1, %v8535_v9  ;;  %7709 = vmatmul.mubr.msk.f32.vlgmr.msra.gmra.mxu0 %vm1457_vm2, %v8535_v9 }
 0x971   :  { %2252 = vmatpush1.msra.mxu0 %v8325_v21  ;;  %2299 = vmatprep.mubr.f32.mxu0 %v8167_v0 }
 0x972   :  { %2253 = vmatprep.subr.mxu0 %v8329_v22 }
 0x973   :  { %2254 = vmatpush1.msra.mxu0 %v8333_v24 }
 0x974   :  { %2255 = vmatprep.subr.mxu0 %v8337_v25 }
 0x975   :  { %2256 = vmatpush1.msra.mxu0 %v8341_v26 }
 0x976   :  { %2257 = vmatprep.subr.mxu0 %v8344_v27 }
 0x977   :  { %2258 = vmatpush1.msra.mxu0 %v8348_v28 }
 0x978   :  { %2259 = vmatprep.subr.mxu0 %v8352_v29 }
 0x979   :  { %2260 = vmatpush1.msra.mxu0 %v8356_v30 }
 0x97a   :  { %2261 = vmatprep.subr.mxu0 %v8360_v31 }
 0x97b   :  { %2262 = vmatpush1.msra.mxu0 %v8364_v32 }
 0x97c   :  { %2263 = vmatprep.subr.mxu0 %v8368_v33 }
 0x97d   :  { %2264 = vmatpush1.msra.mxu0 %v8372_v34 }
 0x97e   :  { %2265 = vmatprep.subr.mxu0 %v8376_v35 }
 0x97f   :  { %2266 = vmatpush1.msra.mxu0 %v8380_v36 }
 0xa30   :  { %v2043_v10 = vpop.f32.mrf.mxu0 }
 0xa32   :  { %v2045_v12 = vpop.f32.mrf.mxu0 }
 0xa33   :  { %v2050_v13 = vcombine.low %v2043_v10, %v2045_v12 }
 0xa35   :  { %v2057_v14 = vrot.slane %v2050_v13, %v8448_v15 }
 0xa37   :  { %v2059_v42 = vadd.f32 %v2057_v14, %v1974_v16 }
 0xa39   :  { %2067 = vrot.lane.b32.xlu0 %v2059_v42, %s8169_s23  ;;  %v7710_v17 = vmul.f32 -1.442695, %v2059_v42 }
 0xa3b   :  { %7914 = vpow2.f32 %v7710_v17 }
 0xa48   :  { %v7915_v18 = vpop.eup %7914 }
 0xa49   :  { %v2063_v20 = vadd.f32 1.0, %v7915_v18 }
 0xa4b   :  { %7916 = vrcp.f32 %v2063_v20 }
 0xa58   :  { %v7917_v37 = vpop.eup %7916 }
 0xa59   :  { %v2072_v45 = vmul.f32 %v7917_v37, %v1949_v5  ;;  %v2081_v48 = vrot.slane %v7917_v37, 2 }
 0xaab   :  { %v2068_v43 = vpop.permute.xlu0 %2067 }
 0xaac   :  { %v2069_v23 = vrot.slane %v2068_v43, 2 }
 0xaae   :  { %7918 = vtanh.f32 %v2069_v23 }
 0xabb   :  { %v7919_v40 = vpop.eup %7918 }
 0xabc   :  { %v2073_v44 = vmul.f32 %v7919_v40, %v7917_v37  ;;  %v2361_v37 = vld [vmem:[#allocation2 + $0x1c] sm:$0xf] }
 0xabe   :  { %2075 = vrot.lane.b32.xlu1 %v2073_v44, %s8169_s23 }
 0xb30   :  { %v2076_v38 = vpop.permute.xlu1 %2075 }
 0xb31   :  { %v2078_v46 = vadd.f32 %v2076_v38, %v2072_v45 }
 0xb33   :  { %7920 = vtanh.f32 %v2078_v46 }
 0xb40   :  { %v7921_v47 = vpop.eup %7920 }
 0xb41   :  { %2084 = vrot.lane.b32.xlu0 %v7921_v47, %s8169_s23 }
 0xbb3   :  { %v2085_v49 = vpop.permute.xlu0 %2084 }
 0xbb4   :  { %v8561_v50 = vmul.f32 %v2085_v49, %v2081_v48 }
 0xbb6   :  { %2089 = vst.msk [vmem:[#allocation3 + $0x8] sm:$0x3] %vm1572_vm1, %v8561_v50  ;;  %7711 = vmatmul.mubr.msk.f32.vlgmr.msra.gmra.mxu1 %vm1457_vm2, %v8561_v50 }
 0xbb7   :  { %2381 = vmatpush1.msra.mxu1 %v8325_v21  ;;  %2428 = vmatprep.mubr.f32.mxu1 %v8167_v0 }
 0xbb8   :  { %2382 = vmatprep.subr.mxu1 %v8329_v22 }
 0xbb9   :  { %2383 = vmatpush1.msra.mxu1 %v8333_v24 }
 0xbba   :  { %2384 = vmatprep.subr.mxu1 %v8337_v25 }
 0xbbb   :  { %2385 = vmatpush1.msra.mxu1 %v8341_v26  ;;  %v2103_v26 = vld [vmem:[#allocation2 + $0x14] sm:$0xf] }
 0xbbc   :  { %2386 = vmatprep.subr.mxu1 %v8344_v27 }
 0xbbd   :  { %2387 = vmatpush1.msra.mxu1 %v8348_v28 }
 0xbbe   :  { %2388 = vmatprep.subr.mxu1 %v8352_v29 }
 0xbbf   :  { %2389 = vmatpush1.msra.mxu1 %v8356_v30 }
 0xbc0   :  { %2390 = vmatprep.subr.mxu1 %v8360_v31 }
 0xbc1   :  { %2391 = vmatpush1.msra.mxu1 %v8364_v32 }
 0xbc2   :  { %2392 = vmatprep.subr.mxu1 %v8368_v33 }
 0xbc3   :  { %2393 = vmatpush1.msra.mxu1 %v8372_v34 }
 0xbc4   :  { %2394 = vmatprep.subr.mxu1 %v8376_v35 }
 0xbc5   :  { %2395 = vmatpush1.msra.mxu1 %v8380_v36 }
 0xc76   :  { %v2172_v21 = vpop.f32.mrf.mxu1 }
 0xc78   :  { %v2174_v22 = vpop.f32.mrf.mxu1 }
 0xc79   :  { %v2179_v24 = vcombine.low %v2172_v21, %v2174_v22 }
 0xc7b   :  { %v2186_v25 = vrot.slane %v2179_v24, %v8448_v15 }
 0xc7d   :  { %v2188_v27 = vadd.f32 %v2186_v25, %v2103_v26 }
 0xc7f   :  { %2196 = vrot.lane.b32.xlu1 %v2188_v27, %s8169_s23  ;;  %v7712_v28 = vmul.f32 -1.442695, %v2188_v27 }
 0xc81   :  { %7922 = vpow2.f32 %v7712_v28  ;;  %v2097_v28 = vrot.slane %v8561_v50, %v8448_v15  ;;  %v1968_v50 = vrot.slane %v8535_v9, %v8448_v15  ;;  %v8632_v9 = vld [vmem:[#allocation8 + $0x70] sm:$0xff] }
 0xc8e   :  { %v7923_v29 = vpop.eup %7922 }
 0xc8f   :  { %v2192_v30 = vadd.f32 1.0, %v7923_v29 }
 0xc91   :  { %7924 = vrcp.f32 %v2192_v30 }
 0xc9e   :  { %v7925_v33 = vpop.eup %7924 }
 0xc9f   :  { %v2201_v36 = vmul.f32 %v7925_v33, %v2078_v46  ;;  %v2210_v56 = vrot.slane %v7925_v33, 2 }
 0xcf1   :  { %v2197_v31 = vpop.permute.xlu1 %2196 }
 0xcf2   :  { %v2198_v32 = vrot.slane %v2197_v31, 2 }
 0xcf4   :  { %7926 = vtanh.f32 %v2198_v32 }
 0xd01   :  { %v7927_v34 = vpop.eup %7926 }
 0xd02   :  { %v2202_v35 = vmul.f32 %v7927_v34, %v7925_v33 }
 0xd04   :  { %2204 = vrot.lane.b32.xlu0 %v2202_v35, %s8169_s23 }
 0xd76   :  { %v2205_v52 = vpop.permute.xlu0 %2204 }
 0xd77   :  { %v2207_v54 = vadd.f32 %v2205_v52, %v2201_v36  ;;  %v1839_v36 = vrot.slane %v8508_v51, %v8448_v15  ;;  %v1710_v52 = vrot.slane %v8481_v11, %v8448_v15  ;;  %v8637_v51 = vld [vmem:[#allocation8 + $0x60] sm:$0xff]  ;;  %v8640_v11 = vld [vmem:[#allocation8 + $0x58] sm:$0xff] }
 0xd79   :  { %7928 = vtanh.f32 %v2207_v54 }
 0xd86   :  { %v7929_v55 = vpop.eup %7928 }
 0xd87   :  { %2213 = vrot.lane.b32.xlu1 %v7929_v55, %s8169_s23  ;;  %v8630_v55 = vld [vmem:[#allocation8 + $0x78] sm:$0xff] }
 0xd88   :  { %2551 = vmatprep.subr.mxu0 %v8630_v55 }
 0xdf9   :  { %v2214_v57 = vpop.permute.xlu1 %2213 }
 0xdfa   :  { %v8587_v58 = vmul.f32 %v2214_v57, %v2210_v56  ;;  %v8634_v56 = vld [vmem:[#allocation8 + $0x68] sm:$0xff]  ;;  %v8643_v57 = vld [vmem:[#allocation8 + $0x50] sm:$0xff] }
 0xdfc   :  { %2218 = vst.msk [vmem:[#allocation3 + $0xa] sm:$0x3] %vm1572_vm1, %v8587_v58  ;;  %7713 = vmatmul.mubr.msk.f32.vlgmr.msra.gmra.mxu0 %vm1457_vm2, %v8587_v58  ;;  %v2226_v34 = vrot.slane %v8587_v58, %v8448_v15  ;;  %v8649_v58 = vld [vmem:[#allocation8 + $0x40] sm:$0xff] }
 0xdfd   :  { %2599 = vmatprep.mubr.f32.mxu0 %v8167_v0  ;;  %2552 = vmatpush1.msra.mxu0 %v8632_v9 }
 0xdfe   :  { %2553 = vmatprep.subr.mxu0 %v8634_v56 }
 0xdff   :  { %2554 = vmatpush1.msra.mxu0 %v8637_v51 }
 0xe00   :  { %2555 = vmatprep.subr.mxu0 %v8640_v11 }
 0xe01   :  { %2556 = vmatpush1.msra.mxu0 %v8643_v57 }
 0xebc   :  { %v2301_v59 = vpop.f32.mrf.mxu0 }
 0xebe   :  { %v2303_v60 = vpop.f32.mrf.mxu0 }
 0xebf   :  { %v2308_v61 = vcombine.low %v2301_v59, %v2303_v60  ;;  %v8652_v59 = vld [vmem:[#allocation8 + $0x38] sm:$0xff]  ;;  %v8655_v60 = vld [vmem:[#allocation8 + $0x30] sm:$0xff] }
 0xec1   :  { %v2315_v62 = vrot.slane %v2308_v61, %v8448_v15  ;;  %v8658_v61 = vld [vmem:[#allocation8 + $0x28] sm:$0xff] }
 0xec3   :  { %v2317_v1 = vadd.f32 %v2315_v62, %v2232_v63  ;;  %v8661_v62 = vld [vmem:[#allocation8 + $0x20] sm:$0xff]  ;;  %v8664_v63 = vld [vmem:[#allocation8 + $0x18] sm:$0xff] }
 0xec5   :  { %2325 = vrot.lane.b32.xlu0 %v2317_v1, %s8169_s23  ;;  %v7714_v2 = vmul.f32 -1.442695, %v2317_v1  ;;  %v8667_v1 = vld [vmem:[#allocation8 + $0x10] sm:$0xff] }
 0xec7   :  { %7930 = vpow2.f32 %v7714_v2  ;;  %v8670_v2 = vld [vmem:[#allocation8 + $0x8] sm:$0xff] }
 0xed4   :  { %v7931_v19 = vpop.eup %7930 }
 0xed5   :  { %v2321_v3 = vadd.f32 1.0, %v7931_v19  ;;  %v8673_v19 = vld [vmem:[#allocation8] sm:$0xff] }
 0xed7   :  { %7932 = vrcp.f32 %v2321_v3 }
 0xee4   :  { %v7933_v6 = vpop.eup %7932 }
 0xee5   :  { %v2330_v10 = vmul.f32 %v7933_v6, %v2207_v54  ;;  %v2339_v16 = vrot.slane %v7933_v6, 2  ;;  %v1581_v54 = vrot.slane %v8454_v53, %v8448_v15  ;;  %v8646_v53 = vld [vmem:[#allocation8 + $0x48] sm:$0xff] }
 0xee6   :  { %2557 = vmatprep.subr.mxu0 %v8646_v53 }
 0xee7   :  { %2558 = vmatpush1.msra.mxu0 %v8649_v58 }
 0xee8   :  { %2559 = vmatprep.subr.mxu0 %v8652_v59 }
 0xee9   :  { %2560 = vmatpush1.msra.mxu0 %v8655_v60 }
 0xeea   :  { %2561 = vmatprep.subr.mxu0 %v8658_v61 }
 0xeeb   :  { %2562 = vmatpush1.msra.mxu0 %v8661_v62 }
 0xeec   :  { %2563 = vmatprep.subr.mxu0 %v8664_v63 }
 0xeed   :  { %2564 = vmatpush1.msra.mxu0 %v8667_v1 }
 0xeee   :  { %2565 = vmatprep.subr.mxu0 %v8670_v2 }
 0xeef   :  { %2566 = vmatpush1.msra.mxu0 %v8673_v19 }
 0xef0   :  { %2740 = vmatprep.subr.mxu0 %v8630_v55 }
 0xf37   :  { %v2326_v4 = vpop.permute.xlu0 %2325 }
 0xf38   :  { %v2327_v5 = vrot.slane %v2326_v4, 2  ;;  %v8679_v4 = vld [vmem:[#allocation8 + $0xf8] sm:$0xff] }
 0xf39   :  { %2645 = vmatprep.subr.mxu1 %v8679_v4 }
 0xf3a   :  { %7934 = vtanh.f32 %v2327_v5  ;;  %v8683_v5 = vld [vmem:[#allocation8 + $0xf0] sm:$0xff] }
 0xf47   :  { %v7935_v7 = vpop.eup %7934 }
 0xf48   :  { %v2331_v8 = vmul.f32 %v7935_v7, %v7933_v6  ;;  %v8686_v6 = vld [vmem:[#allocation8 + $0xe8] sm:$0xff]  ;;  %v8689_v7 = vld [vmem:[#allocation8 + $0xe0] sm:$0xff] }
 0xf4a   :  { %2333 = vrot.lane.b32.xlu1 %v2331_v8, %s8169_s23 }
 0xfbc   :  { %v2334_v12 = vpop.permute.xlu1 %2333 }
 0xfbd   :  { %v2336_v13 = vadd.f32 %v2334_v12, %v2330_v10  ;;  %v8692_v10 = vld [vmem:[#allocation8 + $0xd8] sm:$0xff]  ;;  %v8696_v12 = vld [vmem:[#allocation8 + $0xd0] sm:$0xff] }
 0xfbf   :  { %7936 = vtanh.f32 %v2336_v13 }
 0xfcc   :  { %v7937_v14 = vpop.eup %7936 }
 0xfcd   :  { %2342 = vrot.lane.b32.xlu0 %v7937_v14, %s8169_s23  ;;  %v8702_v14 = vld [vmem:[#allocation8 + $0xc0] sm:$0xff] }
0x103f   :  { %v2343_v42 = vpop.permute.xlu0 %2342 }
0x1040   :  { %v2345_v17 = vmul.f32 %v2343_v42, %v2339_v16 }
0x1042   :  { %2347 = vst.msk [vmem:[#allocation3 + $0xc] sm:$0x3] %vm1572_vm1, %v2345_v17  ;;  %7715 = vmatmul.mubr.msk.f32.vlgmr.msra.gmra.mxu1 %vm1457_vm2, %v2345_v17  ;;  %v2355_v27 = vrot.slane %v2345_v17, %v8448_v15  ;;  %v8705_v17 = vld [vmem:[#allocation8 + $0xb8] sm:$0xff] }
0x1043   :  { %2693 = vmatprep.mubr.f32.mxu1 %v8167_v0  ;;  %2646 = vmatpush1.msra.mxu1 %v8683_v5 }
0x1044   :  { %2647 = vmatprep.subr.mxu1 %v8686_v6 }
0x1045   :  { %2648 = vmatpush1.msra.mxu1 %v8689_v7 }
0x1046   :  { %2649 = vmatprep.subr.mxu1 %v8692_v10 }
0x1047   :  { %2650 = vmatpush1.msra.mxu1 %v8696_v12 }
0x1102   :  { %v2430_v18 = vpop.f32.mrf.mxu1 }
0x1104   :  { %v2432_v20 = vpop.f32.mrf.mxu1 }
0x1105   :  { %v2437_v43 = vcombine.low %v2430_v18, %v2432_v20  ;;  %v8710_v18 = vld [vmem:[#allocation8 + $0xb0] sm:$0xff]  ;;  %v8713_v20 = vld [vmem:[#allocation8 + $0xa8] sm:$0xff] }
0x1107   :  { %v2444_v23 = vrot.slane %v2437_v43, %v8448_v15  ;;  %v8716_v43 = vld [vmem:[#allocation8 + $0xa0] sm:$0xff] }
0x1109   :  { %v2446_v40 = vadd.f32 %v2444_v23, %v2361_v37 }
0x110b   :  { %2454 = vrot.lane.b32.xlu1 %v2446_v40, %s8169_s23  ;;  %v7716_v44 = vmul.f32 -1.442695, %v2446_v40  ;;  %v8719_v40 = vld [vmem:[#allocation8 + $0x98] sm:$0xff] }
0x110d   :  { %7938 = vpow2.f32 %v7716_v44  ;;  %v8724_v44 = vld [vmem:[#allocation8 + $0x90] sm:$0xff] }
0x111a   :  { %v7939_v45 = vpop.eup %7938 }
0x111b   :  { %v2450_v38 = vadd.f32 1.0, %v7939_v45  ;;  %v8727_v45 = vld [vmem:[#allocation8 + $0x88] sm:$0xff] }
0x111d   :  { %7940 = vrcp.f32 %v2450_v38  ;;  %v8730_v38 = vld [vmem:[#allocation8 + $0x80] sm:$0xff] }
0x112a   :  { %v7941_v48 = vpop.eup %7940 }
0x112b   :  { %v2459_v22 = vmul.f32 %v7941_v48, %v2336_v13  ;;  %v2468_v29 = vrot.slane %v7941_v48, 2  ;;  %v8699_v13 = vld [vmem:[#allocation8 + $0xc8] sm:$0xff] }
0x112c   :  { %2651 = vmatprep.subr.mxu1 %v8699_v13 }
0x112d   :  { %2652 = vmatpush1.msra.mxu1 %v8702_v14 }
0x112e   :  { %2653 = vmatprep.subr.mxu1 %v8705_v17 }
0x112f   :  { %2654 = vmatpush1.msra.mxu1 %v8710_v18 }
0x1130   :  { %2655 = vmatprep.subr.mxu1 %v8713_v20 }
0x1131   :  { %2656 = vmatpush1.msra.mxu1 %v8716_v43 }
0x1132   :  { %2657 = vmatprep.subr.mxu1 %v8719_v40 }
0x1133   :  { %2658 = vmatpush1.msra.mxu1 %v8724_v44 }
0x1134   :  { %2659 = vmatprep.subr.mxu1 %v8727_v45 }
0x1135   :  { %2660 = vmatpush1.msra.mxu1 %v8730_v38 }
0x1136   :  { %2823 = vmatprep.subr.mxu1 %v8679_v4 }
0x117d   :  { %v2455_v46 = vpop.permute.xlu1 %2454 }
0x117e   :  { %v2456_v47 = vrot.slane %v2455_v46, 2 }
0x1180   :  { %7942 = vtanh.f32 %v2456_v47 }
0x118d   :  { %v7943_v49 = vpop.eup %7942 }
0x118e   :  { %v2460_v21 = vmul.f32 %v7943_v49, %v7941_v48 }
0x1190   :  { %2462 = vrot.lane.b32.xlu0 %v2460_v21, %s8169_s23 }
0x1202   :  { %v2463_v24 = vpop.permute.xlu0 %2462 }
0x1203   :  { %v2465_v25 = vadd.f32 %v2463_v24, %v2459_v22 }
0x1205   :  { %7944 = vtanh.f32 %v2465_v25 }
0x1212   :  { %v7945_v26 = vpop.eup %7944 }
0x1213   :  { %2471 = vrot.lane.b32.xlu1 %v7945_v26, %s8169_s23 }
0x1217   :  { %2356 = vrot.lane.b32.xlu1 %v2355_v27, %s8170_s24 }
0x121b   :  { %2098 = vrot.lane.b32.xlu1 %v2097_v28, %s8170_s24 }
0x1285   :  { %v2472_v30 = vpop.permute.xlu1 %2471 }
0x1286   :  { %v2474_v31 = vmul.f32 %v2472_v30, %v2468_v29 }
0x1288   :  { %2476 = vst.msk [vmem:[#allocation3 + $0xe] sm:$0x3] %vm1572_vm1, %v2474_v31  ;;  %v2484_v32 = vrot.slane %v2474_v31, %v8448_v15 }
0x1289   :  { %v2357_v33 = vpop.permute.xlu1 %2356 }
0x128a   :  { %2360 = vst.msk [vmem:[#allocation4 + $0x2] sm:$0x3] %vm1572_vm1, %v2357_v33  ;;  %2485 = vrot.lane.b32.xlu0 %v2484_v32, %s8170_s24  ;;  %v2524_v32 = vld [vmem:[#allocation3] sm:$0x3] }
0x128d   :  { %v2099_v35 = vpop.permute.xlu1 %2098 }
0x128e   :  { %2102 = vst.msk [vmem:[#allocation4 + $0x6] sm:$0x3] %vm1572_vm1, %v2099_v35  ;;  %2227 = vrot.lane.b32.xlu0 %v2226_v34, %s8170_s24 }
0x1291   :  { %v2715_v37 = vld [vmem:[#allocation4 + $0x2] sm:$0x3] }
0x1292   :  { %1969 = vrot.lane.b32.xlu0 %v1968_v50, %s8170_s24  ;;  %v3688_v30 = vld [vmem:[#allocation4 + $0x2] sm:$0x3]  ;;  %v2714_v50 = vld [vmem:[#allocation3 + $0x2] sm:$0x3] }
0x1295   :  { %v3071_v21 = vld [vmem:[#allocation4 + $0x6] sm:$0x3] }
0x1296   :  { %1840 = vrot.lane.b32.xlu0 %v1839_v36, %s8170_s24  ;;  %v3332_v29 = vld [vmem:[#allocation4 + $0x6] sm:$0x3] }
0x129a   :  { %1711 = vrot.lane.b32.xlu0 %v1710_v52, %s8170_s24 }
0x129e   :  { %1582 = vrot.lane.b32.xlu0 %v1581_v54, %s8170_s24  ;;  %v2619_v54 = vld [vmem:[#allocation3 + $0xe] sm:$0x3] }
0x12fc   :  { %v2486_v3 = vpop.permute.xlu0 %2485 }
0x12fd   :  { %2488 = vst.msk [vmem:[#allocation4] sm:$0x3] %vm1572_vm1, %v2486_v3 }
0x1300   :  { %v2228_v8 = vpop.permute.xlu0 %2227 }
0x1301   :  { %2231 = vst.msk [vmem:[#allocation4 + $0x4] sm:$0x3] %vm1572_vm1, %v2228_v8 }
0x1304   :  { %v1970_v16 = vpop.permute.xlu0 %1969  ;;  %v2525_v42 = vld [vmem:[#allocation4] sm:$0x3] }
0x1305   :  { %1973 = vst.msk [vmem:[#allocation4 + $0x8] sm:$0x3] %vm1572_vm1, %v1970_v16  ;;  %2527 = vrot.lane.b32.xlu1 %v2525_v42, %s8164_s27  ;;  %v2892_v42 = vld [vmem:[#allocation3 + $0x4] sm:$0x3] }
0x1308   :  { %v1841_v23 = vpop.permute.xlu0 %1840  ;;  %v2893_v47 = vld [vmem:[#allocation4 + $0x4] sm:$0x3] }
0x1309   :  { %1844 = vst.msk [vmem:[#allocation4 + $0xa] sm:$0x3] %vm1572_vm1, %v1841_v23  ;;  %2717 = vrot.lane.b32.xlu1 %v2715_v37, %s8164_s27 }
0x130c   :  { %v1712_v46 = vpop.permute.xlu0 %1711  ;;  %v3249_v48 = vld [vmem:[#allocation4 + $0x8] sm:$0x3] }
0x130d   :  { %1715 = vst.msk [vmem:[#allocation4 + $0xc] sm:$0x3] %vm1572_vm1, %v1712_v46  ;;  %2895 = vrot.lane.b32.xlu1 %v2893_v47, %s8164_s27  ;;  %3251 = vrot.lane.b32.xlu0 %v3249_v48, %s8164_s27  ;;  %v3154_v28 = vld [vmem:[#allocation4 + $0x8] sm:$0x3]  ;;  %v2797_v46 = vld [vmem:[#allocation3 + $0xc] sm:$0x3] }
0x1310   :  { %v1583_v49 = vpop.permute.xlu0 %1582  ;;  %v3427_v22 = vld [vmem:[#allocation4 + $0xa] sm:$0x3] }
0x1311   :  { %1586 = vst.msk [vmem:[#allocation4 + $0xe] sm:$0x3] %vm1572_vm1, %v1583_v49  ;;  %3073 = vrot.lane.b32.xlu1 %v3071_v21, %s8164_s27  ;;  %v3070_v49 = vld [vmem:[#allocation3 + $0x6] sm:$0x3] }
0x1314   :  { %v3605_v24 = vld [vmem:[#allocation4 + $0xc] sm:$0x3] }
0x1315   :  { %3429 = vrot.lane.b32.xlu1 %v3427_v22, %s8164_s27  ;;  %3607 = vrot.lane.b32.xlu0 %v3605_v24, %s8164_s27  ;;  %v2798_v27 = vld [vmem:[#allocation4 + $0xc] sm:$0x3]  ;;  %v3248_v22 = vld [vmem:[#allocation3 + $0x8] sm:$0x3] }
0x1318   :  { %v3783_v25 = vld [vmem:[#allocation4 + $0xe] sm:$0x3] }
0x1319   :  { %v2620_v26 = vld [vmem:[#allocation4 + $0xe] sm:$0x3]  ;;  %3785 = vrot.lane.b32.xlu1 %v3783_v25, %s8164_s27 }
0x131a   :  { %2622 = vrot.lane.b32.xlu0 %v2620_v26, %s8164_s27  ;;  %v3426_v26 = vld [vmem:[#allocation3 + $0xa] sm:$0x3] }
0x131e   :  { %2800 = vrot.lane.b32.xlu0 %v2798_v27, %s8164_s27 }
0x1322   :  { %3156 = vrot.lane.b32.xlu0 %v3154_v28, %s8164_s27  ;;  %v3604_v28 = vld [vmem:[#allocation3 + $0xc] sm:$0x3] }
0x1326   :  { %3334 = vrot.lane.b32.xlu0 %v3332_v29, %s8164_s27 }
0x132a   :  { %3690 = vrot.lane.b32.xlu0 %v3688_v30, %s8164_s27  ;;  %v8963_v30 = vld [vmem:[#allocation10 + $0x90] sm:$0xff] }
0x1377   :  { %v2528_v31 = vpop.permute.xlu1 %2527 }
0x1378   :  { %v2531_v33 = vsel %vm2530_vm3, %v2524_v32, %v2528_v31  ;;  %v8966_v31 = vld [vmem:[#allocation10 + $0x88] sm:$0xff]  ;;  %v8969_v32 = vld [vmem:[#allocation10 + $0x80] sm:$0xff] }
0x1379   :  { %7718 = vmatmul.mubr.msk.f32.vlgmr.msra.gmra.mxu0 %vm1457_vm2, %v2531_v33  ;;  %v7717_v33 = vld [vmem:[%s10133_s4 + $0x2] sm:$0x3] }
0x137a   :  { %2741 = vmatpush1.msra.mxu0 %v8632_v9  ;;  %2788 = vmatprep.mubr.f32.mxu0 %v8167_v0 }
0x137b   :  { %2742 = vmatprep.subr.mxu0 %v8634_v56  ;;  %v2718_v35 = vpop.permute.xlu1 %2717 }
0x137c   :  { %2743 = vmatpush1.msra.mxu0 %v8637_v51  ;;  %v2720_v52 = vsel %vm2530_vm3, %v2714_v50, %v2718_v35  ;;  %v8997_v35 = vrot.slane %v7717_v33, %v8417_v39  ;;  %v9000_v50 = vrot.slane %v7717_v33, %v8423_v41 }
0x137d   :  { %2744 = vmatprep.subr.mxu0 %v8640_v11 }
0x137e   :  { %2745 = vmatpush1.msra.mxu0 %v8643_v57 }
0x137f   :  { %2746 = vmatprep.subr.mxu0 %v8646_v53  ;;  %v8759_v34 = vpop.permute.xlu0 %3251  ;;  %v2896_v16 = vpop.permute.xlu1 %2895 }
0x1380   :  { %2747 = vmatpush1.msra.mxu0 %v8649_v58  ;;  %v2898_v23 = vsel %vm2530_vm3, %v2892_v42, %v2896_v16  ;;  %v3254_v24 = vsel %vm2530_vm3, %v3248_v22, %v8759_v34 }
0x1381   :  { %2748 = vmatprep.subr.mxu0 %v8652_v59 }
0x1382   :  { %2749 = vmatpush1.msra.mxu0 %v8655_v60 }
0x1383   :  { %2750 = vmatprep.subr.mxu0 %v8658_v61  ;;  %v3074_v48 = vpop.permute.xlu1 %3073 }
0x1384   :  { %2751 = vmatpush1.msra.mxu0 %v8661_v62  ;;  %v3076_v21 = vsel %vm2530_vm3, %v3070_v49, %v3074_v48 }
0x1385   :  { %2752 = vmatprep.subr.mxu0 %v8664_v63 }
0x1386   :  { %2753 = vmatpush1.msra.mxu0 %v8667_v1 }
0x1387   :  { %2754 = vmatprep.subr.mxu0 %v8670_v2  ;;  %v8766_v36 = vpop.permute.xlu0 %3607  ;;  %v3430_v25 = vpop.permute.xlu1 %3429 }
0x1388   :  { %2755 = vmatpush1.msra.mxu0 %v8673_v19  ;;  %v3432_v27 = vsel %vm2530_vm3, %v3426_v26, %v3430_v25  ;;  %v3610_v29 = vsel %vm2530_vm3, %v3604_v28, %v8766_v36 }
0x1389   :  { %7721 = vmatmul.mubr.msk.f32.vlgmr.msra.gmra.mxu0 %vm1457_vm2, %v2720_v52  ;;  %2918 = vmatprep.subr.mxu0 %v8630_v55 }
0x138a   :  { %2919 = vmatpush1.msra.mxu0 %v8632_v9  ;;  %2966 = vmatprep.mubr.f32.mxu0 %v8167_v0 }
0x138b   :  { %2920 = vmatprep.subr.mxu0 %v8634_v56 }
0x138c   :  { %v2623_v3 = vpop.permute.xlu0 %2622  ;;  %2921 = vmatpush1.msra.mxu0 %v8637_v51 }
0x138d   :  { %v2625_v8 = vsel %vm2530_vm3, %v2619_v54, %v2623_v3  ;;  %2922 = vmatprep.subr.mxu0 %v8640_v11 }
0x138e   :  { %7719 = vmatmul.mubr.msk.f32.vlgmr.msra.gmra.mxu1 %vm1457_vm2, %v2625_v8  ;;  %2923 = vmatpush1.msra.mxu0 %v8643_v57 }
0x138f   :  { %2824 = vmatpush1.msra.mxu1 %v8683_v5  ;;  %2924 = vmatprep.subr.mxu0 %v8646_v53 }
0x1390   :  { %2825 = vmatprep.subr.mxu1 %v8686_v6  ;;  %2925 = vmatpush1.msra.mxu0 %v8649_v58  ;;  %v2801_v37 = vpop.permute.xlu0 %2800 }
0x1391   :  { %2826 = vmatpush1.msra.mxu1 %v8689_v7  ;;  %2926 = vmatprep.subr.mxu0 %v8652_v59  ;;  %v2803_v47 = vsel %vm2530_vm3, %v2797_v46, %v2801_v37 }
0x1392   :  { %2827 = vmatprep.subr.mxu1 %v8692_v10  ;;  %2927 = vmatpush1.msra.mxu0 %v8655_v60 }
0x1393   :  { %2828 = vmatpush1.msra.mxu1 %v8696_v12  ;;  %2928 = vmatprep.subr.mxu0 %v8658_v61 }
0x1394   :  { %2829 = vmatprep.subr.mxu1 %v8699_v13  ;;  %2929 = vmatpush1.msra.mxu0 %v8661_v62 }
0x1395   :  { %2830 = vmatpush1.msra.mxu1 %v8702_v14  ;;  %2930 = vmatprep.subr.mxu0 %v8664_v63 }
0x1396   :  { %2831 = vmatprep.subr.mxu1 %v8705_v17  ;;  %2931 = vmatpush1.msra.mxu0 %v8667_v1 }
0x1397   :  { %2832 = vmatpush1.msra.mxu1 %v8710_v18  ;;  %2932 = vmatprep.subr.mxu0 %v8670_v2 }
0x1398   :  { %2833 = vmatprep.subr.mxu1 %v8713_v20  ;;  %2933 = vmatpush1.msra.mxu0 %v8673_v19 }
0x1399   :  { %2834 = vmatpush1.msra.mxu1 %v8716_v43  ;;  %7724 = vmatmul.mubr.msk.f32.vlgmr.msra.gmra.mxu0 %vm1457_vm2, %v2898_v23 }
0x139a   :  { %2835 = vmatprep.subr.mxu1 %v8719_v40  ;;  %3096 = vmatprep.subr.mxu0 %v8630_v55 }
0x139b   :  { %2836 = vmatpush1.msra.mxu1 %v8724_v44  ;;  %3097 = vmatpush1.msra.mxu0 %v8632_v9 }
0x139c   :  { %2837 = vmatprep.subr.mxu1 %v8727_v45  ;;  %3098 = vmatprep.subr.mxu0 %v8634_v56 }
0x139d   :  { %2838 = vmatpush1.msra.mxu1 %v8730_v38  ;;  %2871 = vmatprep.mubr.f32.mxu1 %v8167_v0 }
0x139e   :  { %3099 = vmatpush1.msra.mxu0 %v8637_v51  ;;  %7722 = vmatmul.mubr.msk.f32.vlgmr.msra.gmra.mxu1 %vm1457_vm2, %v2803_v47 }
0x139f   :  { %3100 = vmatprep.subr.mxu0 %v8640_v11  ;;  %3144 = vmatprep.mubr.f32.mxu0 %v8167_v0 }
0x13a0   :  { %3101 = vmatpush1.msra.mxu0 %v8643_v57  ;;  %3001 = vmatprep.subr.mxu1 %v8679_v4 }
0x13a1   :  { %3102 = vmatprep.subr.mxu0 %v8646_v53  ;;  %3002 = vmatpush1.msra.mxu1 %v8683_v5 }
0x13a2   :  { %3103 = vmatpush1.msra.mxu0 %v8649_v58  ;;  %3003 = vmatprep.subr.mxu1 %v8686_v6 }
0x13a3   :  { %3104 = vmatprep.subr.mxu0 %v8652_v59  ;;  %3004 = vmatpush1.msra.mxu1 %v8689_v7 }
0x13a4   :  { %3105 = vmatpush1.msra.mxu0 %v8655_v60  ;;  %3005 = vmatprep.subr.mxu1 %v8692_v10 }
0x13a5   :  { %3106 = vmatprep.subr.mxu0 %v8658_v61  ;;  %3006 = vmatpush1.msra.mxu1 %v8696_v12 }
0x13a6   :  { %3107 = vmatpush1.msra.mxu0 %v8661_v62  ;;  %3007 = vmatprep.subr.mxu1 %v8699_v13 }
0x13a7   :  { %3108 = vmatprep.subr.mxu0 %v8664_v63  ;;  %3008 = vmatpush1.msra.mxu1 %v8702_v14 }
0x13a8   :  { %3109 = vmatpush1.msra.mxu0 %v8667_v1  ;;  %3009 = vmatprep.subr.mxu1 %v8705_v17 }
0x13a9   :  { %3110 = vmatprep.subr.mxu0 %v8670_v2  ;;  %3010 = vmatpush1.msra.mxu1 %v8710_v18 }
0x13aa   :  { %3111 = vmatpush1.msra.mxu0 %v8673_v19  ;;  %3011 = vmatprep.subr.mxu1 %v8713_v20 }
0x13ab   :  { %7727 = vmatmul.mubr.msk.f32.vlgmr.msra.gmra.mxu0 %vm1457_vm2, %v3076_v21  ;;  %3274 = vmatprep.subr.mxu0 %v8630_v55 }
0x13ac   :  { %3275 = vmatpush1.msra.mxu0 %v8632_v9  ;;  %3322 = vmatprep.mubr.f32.mxu0 %v8167_v0 }
0x13ad   :  { %3276 = vmatprep.subr.mxu0 %v8634_v56  ;;  %3012 = vmatpush1.msra.mxu1 %v8716_v43 }
0x13ae   :  { %3277 = vmatpush1.msra.mxu0 %v8637_v51  ;;  %3013 = vmatprep.subr.mxu1 %v8719_v40 }
0x13af   :  { %3278 = vmatprep.subr.mxu0 %v8640_v11  ;;  %3014 = vmatpush1.msra.mxu1 %v8724_v44 }
0x13b0   :  { %3279 = vmatpush1.msra.mxu0 %v8643_v57  ;;  %3015 = vmatprep.subr.mxu1 %v8727_v45 }
0x13b1   :  { %3280 = vmatprep.subr.mxu0 %v8646_v53  ;;  %3016 = vmatpush1.msra.mxu1 %v8730_v38 }
0x13b2   :  { %3281 = vmatpush1.msra.mxu0 %v8649_v58  ;;  %3049 = vmatprep.mubr.f32.mxu1 %v8167_v0 }
0x13b3   :  { %3282 = vmatprep.subr.mxu0 %v8652_v59  ;;  %3179 = vmatprep.subr.mxu1 %v8679_v4 }
0x13b4   :  { %3283 = vmatpush1.msra.mxu0 %v8655_v60 }
0x13b5   :  { %3284 = vmatprep.subr.mxu0 %v8658_v61 }
0x13b6   :  { %3285 = vmatpush1.msra.mxu0 %v8661_v62 }
0x13b7   :  { %3286 = vmatprep.subr.mxu0 %v8664_v63 }
0x13b8   :  { %3287 = vmatpush1.msra.mxu0 %v8667_v1 }
0x13b9   :  { %3288 = vmatprep.subr.mxu0 %v8670_v2 }
0x13ba   :  { %3289 = vmatpush1.msra.mxu0 %v8673_v19 }
0x13bb   :  { %7730 = vmatmul.mubr.msk.f32.vlgmr.msra.gmra.mxu0 %vm1457_vm2, %v3254_v24  ;;  %3452 = vmatprep.subr.mxu0 %v8630_v55 }
0x13bc   :  { %3453 = vmatpush1.msra.mxu0 %v8632_v9  ;;  %3500 = vmatprep.mubr.f32.mxu0 %v8167_v0 }
0x13bd   :  { %3454 = vmatprep.subr.mxu0 %v8634_v56 }
0x13be   :  { %3455 = vmatpush1.msra.mxu0 %v8637_v51 }
0x13bf   :  { %3456 = vmatprep.subr.mxu0 %v8640_v11 }
0x13c0   :  { %3457 = vmatpush1.msra.mxu0 %v8643_v57 }
0x13c1   :  { %3458 = vmatprep.subr.mxu0 %v8646_v53 }
0x13c2   :  { %3459 = vmatpush1.msra.mxu0 %v8649_v58 }
0x13c3   :  { %3460 = vmatprep.subr.mxu0 %v8652_v59 }
0x13c4   :  { %3461 = vmatpush1.msra.mxu0 %v8655_v60 }
0x13c5   :  { %3462 = vmatprep.subr.mxu0 %v8658_v61 }
0x13c6   :  { %3463 = vmatpush1.msra.mxu0 %v8661_v62 }
0x13c7   :  { %3464 = vmatprep.subr.mxu0 %v8664_v63 }
0x13c8   :  { %3465 = vmatpush1.msra.mxu0 %v8667_v1 }
0x13c9   :  { %3466 = vmatprep.subr.mxu0 %v8670_v2 }
0x13ca   :  { %3467 = vmatpush1.msra.mxu0 %v8673_v19 }
0x13cb   :  { %7733 = vmatmul.mubr.msk.f32.vlgmr.msra.gmra.mxu0 %vm1457_vm2, %v3432_v27  ;;  %3630 = vmatprep.subr.mxu0 %v8630_v55 }
0x13cc   :  { %3631 = vmatpush1.msra.mxu0 %v8632_v9  ;;  %3678 = vmatprep.mubr.f32.mxu0 %v8167_v0 }
0x13cd   :  { %3632 = vmatprep.subr.mxu0 %v8634_v56 }
0x13ce   :  { %3633 = vmatpush1.msra.mxu0 %v8637_v51 }
0x13cf   :  { %3634 = vmatprep.subr.mxu0 %v8640_v11 }
0x13d0   :  { %3635 = vmatpush1.msra.mxu0 %v8643_v57 }
0x13d1   :  { %3636 = vmatprep.subr.mxu0 %v8646_v53 }
0x13d2   :  { %3637 = vmatpush1.msra.mxu0 %v8649_v58 }
0x13d3   :  { %3638 = vmatprep.subr.mxu0 %v8652_v59 }
0x13d4   :  { %3639 = vmatpush1.msra.mxu0 %v8655_v60 }
0x13d5   :  { %3640 = vmatprep.subr.mxu0 %v8658_v61 }
0x13d6   :  { %3641 = vmatpush1.msra.mxu0 %v8661_v62 }
0x13d7   :  { %3642 = vmatprep.subr.mxu0 %v8664_v63 }
0x13d8   :  { %3643 = vmatpush1.msra.mxu0 %v8667_v1 }
0x13d9   :  { %3644 = vmatprep.subr.mxu0 %v8670_v2 }
0x13da   :  { %3645 = vmatpush1.msra.mxu0 %v8673_v19 }
0x13db   :  { %7736 = vmatmul.mubr.msk.f32.vlgmr.msra.gmra.mxu0 %vm1457_vm2, %v3610_v29  ;;  %3808 = vmatprep.subr.mxu0 %v8630_v55  ;;  %v3786_v55 = vpop.permute.xlu1 %3785 }
0x13dc   :  { %3809 = vmatpush1.msra.mxu0 %v8632_v9  ;;  %3856 = vmatprep.mubr.f32.mxu0 %v8167_v0  ;;  %v8921_v9 = vld [vmem:[#allocation10 + $0xf8] sm:$0xff] }
0x13dd   :  { %3810 = vmatprep.subr.mxu0 %v8634_v56  ;;  %v3782_v56 = vld [vmem:[#allocation3 + $0xe] sm:$0x3] }
0x13de   :  { %3811 = vmatpush1.msra.mxu0 %v8637_v51  ;;  %v8924_v51 = vld [vmem:[#allocation10 + $0xf0] sm:$0xff] }
0x13df   :  { %3812 = vmatprep.subr.mxu0 %v8640_v11  ;;  %v3788_v11 = vsel %vm2530_vm3, %v3782_v56, %v3786_v55 }
0x13e0   :  { %3813 = vmatpush1.msra.mxu0 %v8643_v57  ;;  %v8928_v57 = vld [vmem:[#allocation10 + $0xe8] sm:$0xff] }
0x13e1   :  { %3814 = vmatprep.subr.mxu0 %v8646_v53  ;;  %v8932_v53 = vld [vmem:[#allocation10 + $0xe0] sm:$0xff] }
0x13e2   :  { %3815 = vmatpush1.msra.mxu0 %v8649_v58  ;;  %v8935_v58 = vld [vmem:[#allocation10 + $0xd8] sm:$0xff] }
0x13e3   :  { %3816 = vmatprep.subr.mxu0 %v8652_v59  ;;  %v8939_v59 = vld [vmem:[#allocation10 + $0xd0] sm:$0xff] }
0x13e4   :  { %3817 = vmatpush1.msra.mxu0 %v8655_v60  ;;  %v8942_v60 = vld [vmem:[#allocation10 + $0xc8] sm:$0xff] }
0x13e5   :  { %3818 = vmatprep.subr.mxu0 %v8658_v61  ;;  %v8945_v61 = vld [vmem:[#allocation10 + $0xc0] sm:$0xff] }
0x13e6   :  { %3819 = vmatpush1.msra.mxu0 %v8661_v62  ;;  %v8948_v62 = vld [vmem:[#allocation10 + $0xb8] sm:$0xff] }
0x13e7   :  { %3820 = vmatprep.subr.mxu0 %v8664_v63  ;;  %v8951_v63 = vld [vmem:[#allocation10 + $0xb0] sm:$0xff] }
0x13e8   :  { %3821 = vmatpush1.msra.mxu0 %v8667_v1  ;;  %v8954_v1 = vld [vmem:[#allocation10 + $0xa8] sm:$0xff] }
0x13e9   :  { %3822 = vmatprep.subr.mxu0 %v8670_v2  ;;  %v8957_v2 = vld [vmem:[#allocation10 + $0xa0] sm:$0xff] }
0x13ea   :  { %3823 = vmatpush1.msra.mxu0 %v8673_v19  ;;  %v8960_v19 = vld [vmem:[#allocation10 + $0x98] sm:$0xff] }
0x13eb   :  { %7739 = vmatmul.mubr.msk.f32.vlgmr.msra.gmra.mxu0 %vm1457_vm2, %v3788_v11  ;;  %3994 = vmatprep.subr.mxu0 %v8921_v9 }
0x13ec   :  { %3995 = vmatpush1.msra.mxu0 %v8924_v51  ;;  %4042 = vmatprep.mubr.f32.mxu0 %v8167_v0 }
0x13ed   :  { %3996 = vmatprep.subr.mxu0 %v8928_v57 }
0x13ee   :  { %3997 = vmatpush1.msra.mxu0 %v8932_v53 }
0x13ef   :  { %3998 = vmatprep.subr.mxu0 %v8935_v58 }
0x13f0   :  { %3999 = vmatpush1.msra.mxu0 %v8939_v59 }
0x13f1   :  { %4000 = vmatprep.subr.mxu0 %v8942_v60 }
0x13f2   :  { %4001 = vmatpush1.msra.mxu0 %v8945_v61 }
0x13f3   :  { %4002 = vmatprep.subr.mxu0 %v8948_v62 }
0x13f4   :  { %4003 = vmatpush1.msra.mxu0 %v8951_v63 }
0x13f5   :  { %4004 = vmatprep.subr.mxu0 %v8954_v1 }
0x13f6   :  { %4005 = vmatpush1.msra.mxu0 %v8957_v2 }
0x13f7   :  { %4006 = vmatprep.subr.mxu0 %v8960_v19 }
0x13f8   :  { %4007 = vmatpush1.msra.mxu0 %v8963_v30 }
0x13f9   :  { %4008 = vmatprep.subr.mxu0 %v8966_v31 }
0x13fa   :  { %4009 = vmatpush1.msra.mxu0 %v8969_v32 }
0x13fb   :  { %4043 = vmatmul.mubr.f32.vlgmr.msra.gmra.mxu0 %v8167_v0  ;;  %4248 = vmatprep.subr.mxu0 %v8921_v9 }
0x13fc   :  { %4249 = vmatpush1.msra.mxu0 %v8924_v51  ;;  %4296 = vmatprep.mubr.f32.mxu0 %v8167_v0 }
0x13fd   :  { %4250 = vmatprep.subr.mxu0 %v8928_v57 }
0x13fe   :  { %4251 = vmatpush1.msra.mxu0 %v8932_v53 }
0x13ff   :  { %4252 = vmatprep.subr.mxu0 %v8935_v58 }
0x1400   :  { %4253 = vmatpush1.msra.mxu0 %v8939_v59 }
0x1401   :  { %4254 = vmatprep.subr.mxu0 %v8942_v60 }
0x1402   :  { %4255 = vmatpush1.msra.mxu0 %v8945_v61 }
0x1403   :  { %4256 = vmatprep.subr.mxu0 %v8948_v62 }
0x1404   :  { %4257 = vmatpush1.msra.mxu0 %v8951_v63 }
0x1405   :  { %4258 = vmatprep.subr.mxu0 %v8954_v1 }
0x1406   :  { %4259 = vmatpush1.msra.mxu0 %v8957_v2 }
0x1407   :  { %4260 = vmatprep.subr.mxu0 %v8960_v19 }
0x1408   :  { %4261 = vmatpush1.msra.mxu0 %v8963_v30 }
0x1409   :  { %4262 = vmatprep.subr.mxu0 %v8966_v31 }
0x140a   :  { %4263 = vmatpush1.msra.mxu0 %v8969_v32 }
0x140b   :  { %4502 = vmatprep.subr.mxu0 %v8921_v9 }
0x1439   :  { %v2601_v34 = vpop.f32.mrf.mxu0 }
0x143a   :  { %v2617_v54 = vadd.f32 %v8997_v35, %v2601_v34 }
0x143b   :  { %v2603_v36 = vpop.f32.mrf.mxu0 }
0x143c   :  { %v2618_v3 = vadd.f32 %v9000_v50, %v2603_v36 }
0x1449   :  { %v2790_v37 = vpop.f32.mrf.mxu0 }
0x144a   :  { %v2795_v48 = vadd.f32 %v2790_v37, %v8997_v35 }
0x144b   :  { %v2792_v46 = vpop.f32.mrf.mxu0 }
0x144c   :  { %v2796_v49 = vadd.f32 %v2792_v46, %v9000_v50  ;;  %v2976_v46 = vld [vmem:[#allocation4 + $0xa] sm:$0x3] }
0x144e   :  { %v2695_v52 = vpop.f32.mrf.mxu1 }
0x144f   :  { %v2700_v16 = vadd.f32 %v2695_v52, %v2617_v54 }
0x1450   :  { %v2697_v8 = vpop.f32.mrf.mxu1 }
0x1451   :  { %v2701_v42 = vadd.f32 %v2697_v8, %v2618_v3 }
0x1453   :  { %v2704_v23 = vcombine.low %v2700_v16, %v2701_v42 }
0x1455   :  { %7720 = vst.sshfl [vmem:[#allocation2] sm:$0x33 pattern:$0x76325410] %v2704_v23 }
0x1459   :  { %v9006_v26 = vpop.f32.mrf.mxu0 }
0x145b   :  { %v9008_v27 = vpop.f32.mrf.mxu0 }
0x145c   :  { %v3977_v23 = vld [vmem:[#allocation2] sm:$0xf] }
0x145e   :  { %v2873_v47 = vpop.f32.mrf.mxu1 }
0x145f   :  { %v2878_v22 = vadd.f32 %v2873_v47, %v2795_v48 }
0x1460   :  { %v2875_v21 = vpop.f32.mrf.mxu1 }
0x1461   :  { %v2879_v24 = vadd.f32 %v2875_v21, %v2796_v49 }
0x1463   :  { %v2882_v25 = vcombine.low %v2878_v22, %v2879_v24  ;;  %v2975_v24 = vld [vmem:[#allocation3 + $0xa] sm:$0x3] }
0x1465   :  { %7723 = vst.sshfl [vmem:[#allocation2 + $0x4] sm:$0x33 pattern:$0x76325410] %v2882_v25 }
0x146b   :  { %v9010_v28 = vpop.f32.mrf.mxu0 }
0x146d   :  { %v9012_v29 = vpop.f32.mrf.mxu0 }
0x147b   :  { %v9014_v55 = vpop.f32.mrf.mxu0 }
0x147d   :  { %v9016_v56 = vpop.f32.mrf.mxu0 }
0x148b   :  { %v9018_v11 = vpop.f32.mrf.mxu0 }
0x148d   :  { %v9020_v33 = vpop.f32.mrf.mxu0 }
0x149b   :  { %v9022_v34 = vpop.f32.mrf.mxu0 }
0x149d   :  { %v9024_v36 = vpop.f32.mrf.mxu0 }
0x14ab   :  { %v9026_v52 = vpop.f32.mrf.mxu0 }
0x14ad   :  { %v9028_v54 = vpop.f32.mrf.mxu0 }
0x14bb   :  { %v4044_v3 = vpop.f32.mrf.mxu0 }
0x14bd   :  { %v4046_v8 = vpop.f32.mrf.mxu0 }
0x14be   :  { %v4051_v16 = vcombine.low %v4044_v3, %v4046_v8 }
0x14c0   :  { %v4058_v42 = vrot.slane %v4051_v16, %v8448_v15 }
0x14c2   :  { %v4060_v37 = vadd.f32 %v4058_v42, %v3977_v23  ;;  %v3157_v23 = vpop.permute.xlu0 %3156 }
0x14c4   :  { %4068 = vrot.lane.b32.xlu1 %v4060_v37, %s8169_s23  ;;  %v7742_v47 = vmul.f32 -1.442695, %v4060_v37  ;;  %v3153_v37 = vld [vmem:[#allocation3 + $0x8] sm:$0x3] }
0x14c6   :  { %7946 = vpow2.f32 %v7742_v47  ;;  %v3510_v47 = vld [vmem:[#allocation4 + $0x4] sm:$0x3] }
0x14c8   :  { %2978 = vrot.lane.b32.xlu1 %v2976_v46, %s8164_s27  ;;  %v3159_v46 = vsel %vm2530_vm3, %v3153_v37, %v3157_v23 }
0x14d3   :  { %v7947_v48 = vpop.eup %7946 }
0x14d4   :  { %v4064_v49 = vadd.f32 1.0, %v7947_v48  ;;  %v3866_v48 = vld [vmem:[#allocation4] sm:$0x3] }
0x14d6   :  { %7948 = vrcp.f32 %v4064_v49  ;;  %v3335_v49 = vpop.permute.xlu0 %3334 }
0x14e3   :  { %v9044_v8 = vpop.eup %7948 }
0x1536   :  { %v4069_v21 = vpop.permute.xlu1 %4068 }
0x1537   :  { %v4070_v22 = vrot.slane %v4069_v21, 2  ;;  %v3331_v21 = vld [vmem:[#allocation3 + $0x6] sm:$0x3] }
0x1539   :  { %7950 = vtanh.f32 %v4070_v22  ;;  %v3337_v22 = vsel %vm2530_vm3, %v3331_v21, %v3335_v49  ;;  %v3330_v21 = vadd.f32 %v9016_v56, %v9000_v50  ;;  %v3507_v56 = vadd.f32 %v9018_v11, %v8997_v35 }
0x153a   :  { %v2979_v25 = vpop.permute.xlu1 %2978 }
0x153b   :  { %v2981_v3 = vsel %vm2530_vm3, %v2975_v24, %v2979_v25  ;;  %v4073_v24 = vmul.f32 0.0, %v9044_v8 }
0x153c   :  { %7725 = vmatmul.mubr.msk.f32.vlgmr.msra.gmra.mxu1 %vm1457_vm2, %v2981_v3 }
0x153d   :  { %3180 = vmatpush1.msra.mxu1 %v8683_v5  ;;  %3227 = vmatprep.mubr.f32.mxu1 %v8167_v0 }
0x153e   :  { %3181 = vmatprep.subr.mxu1 %v8686_v6 }
0x153f   :  { %3182 = vmatpush1.msra.mxu1 %v8689_v7 }
0x1540   :  { %3183 = vmatprep.subr.mxu1 %v8692_v10 }
0x1541   :  { %3184 = vmatpush1.msra.mxu1 %v8696_v12 }
0x1542   :  { %3185 = vmatprep.subr.mxu1 %v8699_v13 }
0x1543   :  { %3186 = vmatpush1.msra.mxu1 %v8702_v14 }
0x1544   :  { %3187 = vmatprep.subr.mxu1 %v8705_v17 }
0x1545   :  { %3188 = vmatpush1.msra.mxu1 %v8710_v18 }
0x1546   :  { %v7951_v16 = vpop.eup %7950  ;;  %3189 = vmatprep.subr.mxu1 %v8713_v20 }
0x1547   :  { %3190 = vmatpush1.msra.mxu1 %v8716_v43  ;;  %v4074_v42 = vmul.f32 %v7951_v16, %v9044_v8  ;;  %v3509_v16 = vld [vmem:[#allocation3 + $0x4] sm:$0x3] }
0x1548   :  { %3191 = vmatprep.subr.mxu1 %v8719_v40 }
0x1549   :  { %3192 = vmatpush1.msra.mxu1 %v8724_v44  ;;  %4076 = vrot.lane.b32.xlu1 %v4074_v42, %s8169_s23 }
0x154a   :  { %3193 = vmatprep.subr.mxu1 %v8727_v45 }
0x154b   :  { %3194 = vmatpush1.msra.mxu1 %v8730_v38 }
0x154c   :  { %7728 = vmatmul.mubr.msk.f32.vlgmr.msra.gmra.mxu1 %vm1457_vm2, %v3159_v46  ;;  %3357 = vmatprep.subr.mxu1 %v8679_v4  ;;  %v3691_v46 = vpop.permute.xlu0 %3690 }
0x154d   :  { %3358 = vmatpush1.msra.mxu1 %v8683_v5  ;;  %3512 = vrot.lane.b32.xlu1 %v3510_v47, %s8164_s27  ;;  %v3687_v47 = vld [vmem:[#allocation3 + $0x2] sm:$0x3] }
0x154e   :  { %3359 = vmatprep.subr.mxu1 %v8686_v6  ;;  %3405 = vmatprep.mubr.f32.mxu1 %v8167_v0 }
0x154f   :  { %3360 = vmatpush1.msra.mxu1 %v8689_v7 }
0x1550   :  { %3361 = vmatprep.subr.mxu1 %v8692_v10 }
0x1551   :  { %3362 = vmatpush1.msra.mxu1 %v8696_v12  ;;  %3868 = vrot.lane.b32.xlu1 %v3866_v48, %s8164_s27  ;;  %v3693_v48 = vsel %vm2530_vm3, %v3687_v47, %v3691_v46 }
0x1552   :  { %3363 = vmatprep.subr.mxu1 %v8699_v13 }
0x1553   :  { %3364 = vmatpush1.msra.mxu1 %v8702_v14 }
0x1554   :  { %3365 = vmatprep.subr.mxu1 %v8705_v17 }
0x1555   :  { %3366 = vmatpush1.msra.mxu1 %v8710_v18 }
0x1556   :  { %3367 = vmatprep.subr.mxu1 %v8713_v20 }
0x1557   :  { %3368 = vmatpush1.msra.mxu1 %v8716_v43 }
0x1558   :  { %3369 = vmatprep.subr.mxu1 %v8719_v40 }
0x1559   :  { %3370 = vmatpush1.msra.mxu1 %v8724_v44 }
0x155a   :  { %3371 = vmatprep.subr.mxu1 %v8727_v45 }
0x155b   :  { %3372 = vmatpush1.msra.mxu1 %v8730_v38 }
0x155c   :  { %7731 = vmatmul.mubr.msk.f32.vlgmr.msra.gmra.mxu1 %vm1457_vm2, %v3337_v22  ;;  %3535 = vmatprep.subr.mxu1 %v8679_v4 }
0x155d   :  { %3536 = vmatpush1.msra.mxu1 %v8683_v5  ;;  %3583 = vmatprep.mubr.f32.mxu1 %v8167_v0 }
0x155e   :  { %3537 = vmatprep.subr.mxu1 %v8686_v6 }
0x155f   :  { %3538 = vmatpush1.msra.mxu1 %v8689_v7 }
0x1560   :  { %3539 = vmatprep.subr.mxu1 %v8692_v10 }
0x1561   :  { %3540 = vmatpush1.msra.mxu1 %v8696_v12 }
0x1562   :  { %3541 = vmatprep.subr.mxu1 %v8699_v13 }
0x1563   :  { %3542 = vmatpush1.msra.mxu1 %v8702_v14 }
0x1564   :  { %3543 = vmatprep.subr.mxu1 %v8705_v17 }
0x1565   :  { %3544 = vmatpush1.msra.mxu1 %v8710_v18 }
0x1566   :  { %3545 = vmatprep.subr.mxu1 %v8713_v20 }
0x1567   :  { %3546 = vmatpush1.msra.mxu1 %v8716_v43 }
0x1568   :  { %3547 = vmatprep.subr.mxu1 %v8719_v40 }
0x1569   :  { %3548 = vmatpush1.msra.mxu1 %v8724_v44 }
0x156a   :  { %3549 = vmatprep.subr.mxu1 %v8727_v45 }
0x156b   :  { %3550 = vmatpush1.msra.mxu1 %v8730_v38 }
0x156c   :  { %3713 = vmatprep.subr.mxu1 %v8679_v4 }
0x15bb   :  { %v4077_v25 = vpop.permute.xlu1 %4076 }
0x15bc   :  { %v9097_v3 = vadd.f32 %v4077_v25, %v4073_v24 }
0x15be   :  { %7952 = vtanh.f32 %v9097_v3 }
0x15bf   :  { %v3513_v42 = vpop.permute.xlu1 %3512 }
0x15c0   :  { %v3515_v23 = vsel %vm2530_vm3, %v3509_v16, %v3513_v42 }
0x15c1   :  { %7734 = vmatmul.mubr.msk.f32.vlgmr.msra.gmra.mxu1 %vm1457_vm2, %v3515_v23 }
0x15c2   :  { %3714 = vmatpush1.msra.mxu1 %v8683_v5  ;;  %3761 = vmatprep.mubr.f32.mxu1 %v8167_v0 }
0x15c3   :  { %3715 = vmatprep.subr.mxu1 %v8686_v6 }
0x15c4   :  { %3716 = vmatpush1.msra.mxu1 %v8689_v7 }
0x15c5   :  { %3717 = vmatprep.subr.mxu1 %v8692_v10 }
0x15c6   :  { %3718 = vmatpush1.msra.mxu1 %v8696_v12 }
0x15c7   :  { %3719 = vmatprep.subr.mxu1 %v8699_v13 }
0x15c8   :  { %3720 = vmatpush1.msra.mxu1 %v8702_v14 }
0x15c9   :  { %3721 = vmatprep.subr.mxu1 %v8705_v17 }
0x15ca   :  { %3722 = vmatpush1.msra.mxu1 %v8710_v18 }
0x15cb   :  { %v7953_v37 = vpop.eup %7952  ;;  %3723 = vmatprep.subr.mxu1 %v8713_v20 }
0x15cc   :  { %3724 = vmatpush1.msra.mxu1 %v8716_v43  ;;  %4085 = vrot.lane.b32.xlu0 %v7953_v37, %s8169_s23 }
0x15cd   :  { %3725 = vmatprep.subr.mxu1 %v8719_v40 }
0x15ce   :  { %3726 = vmatpush1.msra.mxu1 %v8724_v44 }
0x15cf   :  { %3727 = vmatprep.subr.mxu1 %v8727_v45 }
0x15d0   :  { %3728 = vmatpush1.msra.mxu1 %v8730_v38 }
0x15d1   :  { %7737 = vmatmul.mubr.msk.f32.vlgmr.msra.gmra.mxu1 %vm1457_vm2, %v3693_v48  ;;  %3891 = vmatprep.subr.mxu1 %v8679_v4  ;;  %v3869_v4 = vpop.permute.xlu1 %3868 }
0x15d2   :  { %3892 = vmatpush1.msra.mxu1 %v8683_v5  ;;  %3939 = vmatprep.mubr.f32.mxu1 %v8167_v0  ;;  %v3865_v5 = vld [vmem:[#allocation3] sm:$0x3] }
0x15d3   :  { %3893 = vmatprep.subr.mxu1 %v8686_v6  ;;  %v3871_v6 = vsel %vm2530_vm3, %v3865_v5, %v3869_v4  ;;  %v3685_v4 = vadd.f32 %v9022_v34, %v8997_v35  ;;  %v3686_v5 = vadd.f32 %v9024_v36, %v9000_v50 }
0x15d4   :  { %3894 = vmatpush1.msra.mxu1 %v8689_v7 }
0x15d5   :  { %3895 = vmatprep.subr.mxu1 %v8692_v10  ;;  %v2973_v10 = vadd.f32 %v9006_v26, %v8997_v35 }
0x15d6   :  { %3896 = vmatpush1.msra.mxu1 %v8696_v12  ;;  %v2974_v12 = vadd.f32 %v9008_v27, %v9000_v50  ;;  %v3329_v27 = vadd.f32 %v9014_v55, %v8997_v35 }
0x15d7   :  { %3897 = vmatprep.subr.mxu1 %v8699_v13 }
0x15d8   :  { %3898 = vmatpush1.msra.mxu1 %v8702_v14 }
0x15d9   :  { %3899 = vmatprep.subr.mxu1 %v8705_v17 }
0x15da   :  { %3900 = vmatpush1.msra.mxu1 %v8710_v18 }
0x15db   :  { %3901 = vmatprep.subr.mxu1 %v8713_v20 }
0x15dc   :  { %3902 = vmatpush1.msra.mxu1 %v8716_v43  ;;  %v3151_v43 = vadd.f32 %v9010_v28, %v8997_v35  ;;  %v4082_v28 = vrot.slane %v9044_v8, 2  ;;  %v3508_v8 = vadd.f32 %v9020_v33, %v9000_v50  ;;  %v3863_v33 = vadd.f32 %v9026_v52, %v8997_v35 }
0x15dd   :  { %3903 = vmatprep.subr.mxu1 %v8719_v40  ;;  %v3152_v40 = vadd.f32 %v9012_v29, %v9000_v50 }
0x15de   :  { %3904 = vmatpush1.msra.mxu1 %v8724_v44 }
0x15df   :  { %3905 = vmatprep.subr.mxu1 %v8727_v45 }
0x15e0   :  { %3906 = vmatpush1.msra.mxu1 %v8730_v38 }
0x15e1   :  { %7740 = vmatmul.mubr.msk.f32.vlgmr.msra.gmra.mxu1 %vm1457_vm2, %v3871_v6  ;;  %4121 = vmatprep.subr.mxu1 %v8921_v9 }
0x15e2   :  { %4122 = vmatpush1.msra.mxu1 %v8924_v51  ;;  %4169 = vmatprep.mubr.f32.mxu1 %v8167_v0 }
0x15e3   :  { %4123 = vmatprep.subr.mxu1 %v8928_v57 }
0x15e4   :  { %4124 = vmatpush1.msra.mxu1 %v8932_v53 }
0x15e5   :  { %4125 = vmatprep.subr.mxu1 %v8935_v58 }
0x15e6   :  { %4126 = vmatpush1.msra.mxu1 %v8939_v59 }
0x15e7   :  { %4127 = vmatprep.subr.mxu1 %v8942_v60 }
0x15e8   :  { %4128 = vmatpush1.msra.mxu1 %v8945_v61 }
0x15e9   :  { %4129 = vmatprep.subr.mxu1 %v8948_v62 }
0x15ea   :  { %4130 = vmatpush1.msra.mxu1 %v8951_v63 }
0x15eb   :  { %4131 = vmatprep.subr.mxu1 %v8954_v1 }
0x15ec   :  { %4132 = vmatpush1.msra.mxu1 %v8957_v2 }
0x15ed   :  { %4133 = vmatprep.subr.mxu1 %v8960_v19 }
0x15ee   :  { %4134 = vmatpush1.msra.mxu1 %v8963_v30 }
0x15ef   :  { %4135 = vmatprep.subr.mxu1 %v8966_v31 }
0x15f0   :  { %4136 = vmatpush1.msra.mxu1 %v8969_v32 }
0x15f1   :  { %4375 = vmatprep.subr.mxu1 %v8921_v9 }
0x15fc   :  { %v3051_v7 = vpop.f32.mrf.mxu1 }
0x15fd   :  { %v3056_v14 = vadd.f32 %v3051_v7, %v2973_v10 }
0x15fe   :  { %v3053_v13 = vpop.f32.mrf.mxu1 }
0x15ff   :  { %v3057_v17 = vadd.f32 %v3053_v13, %v2974_v12  ;;  %v3864_v13 = vadd.f32 %v9028_v54, %v9000_v50 }
0x1601   :  { %v3060_v18 = vcombine.low %v3056_v14, %v3057_v17 }
0x1603   :  { %7726 = vst.sshfl [vmem:[#allocation2 + $0x8] sm:$0x33 pattern:$0x76325410] %v3060_v18 }
0x160c   :  { %v3229_v20 = vpop.f32.mrf.mxu1 }
0x160d   :  { %v3234_v45 = vadd.f32 %v3229_v20, %v3151_v43 }
0x160e   :  { %v3231_v44 = vpop.f32.mrf.mxu1 }
0x160f   :  { %v3235_v38 = vadd.f32 %v3231_v44, %v3152_v40  ;;  %v4102_v44 = vld [vmem:[#allocation2 + $0x4] sm:$0xf] }
0x1611   :  { %v3238_v49 = vcombine.low %v3234_v45, %v3235_v38 }
0x1613   :  { %7729 = vst.sshfl [vmem:[#allocation2 + $0xc] sm:$0x33 pattern:$0x76325410] %v3238_v49 }
0x161c   :  { %v3407_v26 = vpop.f32.mrf.mxu1 }
0x161d   :  { %v3412_v24 = vadd.f32 %v3407_v26, %v3329_v27 }
0x161e   :  { %v3409_v22 = vpop.f32.mrf.mxu1 }
0x161f   :  { %v3413_v25 = vadd.f32 %v3409_v22, %v3330_v21 }
0x1621   :  { %v3416_v16 = vcombine.low %v3412_v24, %v3413_v25 }
0x1623   :  { %7732 = vst.sshfl [vmem:[#allocation2 + $0x10] sm:$0x33 pattern:$0x76325410] %v3416_v16 }
0x163e   :  { %v4086_v29 = vpop.permute.xlu0 %4085 }
0x163f   :  { %v9171_v42 = vmul.f32 %v4086_v29, %v4082_v28 }
0x1641   :  { %4089 = vst.msk [vmem:[#allocation3] sm:$0x3] %vm1572_vm1, %v9171_v42  ;;  %7743 = vmatmul.mubr.msk.f32.vlgmr.msra.gmra.mxu1 %vm1457_vm2, %v9171_v42 }
0x1642   :  { %4376 = vmatpush1.msra.mxu1 %v8924_v51  ;;  %4423 = vmatprep.mubr.f32.mxu1 %v8167_v0 }
0x1643   :  { %4377 = vmatprep.subr.mxu1 %v8928_v57 }
0x1644   :  { %4378 = vmatpush1.msra.mxu1 %v8932_v53 }
0x1645   :  { %4379 = vmatprep.subr.mxu1 %v8935_v58 }
0x1646   :  { %4380 = vmatpush1.msra.mxu1 %v8939_v59 }
0x1647   :  { %4381 = vmatprep.subr.mxu1 %v8942_v60 }
0x1648   :  { %4382 = vmatpush1.msra.mxu1 %v8945_v61 }
0x1649   :  { %4383 = vmatprep.subr.mxu1 %v8948_v62 }
0x164a   :  { %4384 = vmatpush1.msra.mxu1 %v8951_v63 }
0x164b   :  { %4385 = vmatprep.subr.mxu1 %v8954_v1 }
0x164c   :  { %4386 = vmatpush1.msra.mxu1 %v8957_v2 }
0x164d   :  { %4387 = vmatprep.subr.mxu1 %v8960_v19 }
0x164e   :  { %4388 = vmatpush1.msra.mxu1 %v8963_v30 }
0x164f   :  { %4389 = vmatprep.subr.mxu1 %v8966_v31 }
0x1650   :  { %4390 = vmatpush1.msra.mxu1 %v8969_v32 }
0x1651   :  { %4629 = vmatprep.subr.mxu1 %v8921_v9 }
0x1681   :  { %v3585_v55 = vpop.f32.mrf.mxu1 }
0x1682   :  { %v3590_v37 = vadd.f32 %v3585_v55, %v3507_v56 }
0x1683   :  { %v3587_v23 = vpop.f32.mrf.mxu1 }
0x1684   :  { %v3591_v46 = vadd.f32 %v3587_v23, %v3508_v8  ;;  %v4229_v23 = vld [vmem:[#allocation2 + $0x8] sm:$0xf] }
0x1686   :  { %v3594_v47 = vcombine.low %v3590_v37, %v3591_v46 }
0x1688   :  { %7735 = vst.sshfl [vmem:[#allocation2 + $0x14] sm:$0x33 pattern:$0x76325410] %v3594_v47 }
0x1691   :  { %v3763_v48 = vpop.f32.mrf.mxu1 }
0x1692   :  { %v3768_v7 = vadd.f32 %v3763_v48, %v3685_v4 }
0x1693   :  { %v3765_v6 = vpop.f32.mrf.mxu1 }
0x1694   :  { %v3769_v10 = vadd.f32 %v3765_v6, %v3686_v5 }
0x1696   :  { %v3772_v12 = vcombine.low %v3768_v7, %v3769_v10 }
0x1698   :  { %7738 = vst.sshfl [vmem:[#allocation2 + $0x18] sm:$0x33 pattern:$0x76325410] %v3772_v12 }
0x16a1   :  { %v3941_v11 = vpop.f32.mrf.mxu1 }
0x16a2   :  { %v3946_v17 = vadd.f32 %v3941_v11, %v3863_v33 }
0x16a3   :  { %v3943_v14 = vpop.f32.mrf.mxu1 }
0x16a4   :  { %v3947_v18 = vadd.f32 %v3943_v14, %v3864_v13 }
0x16a6   :  { %v3950_v20 = vcombine.low %v3946_v17, %v3947_v18 }
0x16a8   :  { %7741 = vst.sshfl [vmem:[#allocation2 + $0x1c] sm:$0x33 pattern:$0x76325410] %v3950_v20 }
0x1701   :  { %v4171_v34 = vpop.f32.mrf.mxu1 }
0x1703   :  { %v4173_v43 = vpop.f32.mrf.mxu1 }
0x1704   :  { %v4178_v36 = vcombine.low %v4171_v34, %v4173_v43 }
0x1706   :  { %v4185_v40 = vrot.slane %v4178_v36, %v8448_v15 }
0x1708   :  { %v4187_v45 = vadd.f32 %v4185_v40, %v4102_v44  ;;  %v4356_v40 = vld [vmem:[#allocation2 + $0xc] sm:$0xf] }
0x170a   :  { %4195 = vrot.lane.b32.xlu1 %v4187_v45, %s8169_s23  ;;  %v7744_v38 = vmul.f32 -1.442695, %v4187_v45 }
0x170c   :  { %7954 = vpow2.f32 %v7744_v38 }
0x1719   :  { %v7955_v35 = vpop.eup %7954 }
0x171a   :  { %v4191_v52 = vadd.f32 1.0, %v7955_v35 }
0x171c   :  { %7956 = vrcp.f32 %v4191_v52 }
0x1729   :  { %v7957_v54 = vpop.eup %7956 }
0x172a   :  { %v4200_v21 = vmul.f32 %v7957_v54, %v9097_v3  ;;  %v4209_v16 = vrot.slane %v7957_v54, 2 }
0x177c   :  { %v4196_v49 = vpop.permute.xlu1 %4195 }
0x177d   :  { %v4197_v50 = vrot.slane %v4196_v49, 2 }
0x177f   :  { %7958 = vtanh.f32 %v4197_v50 }
0x178c   :  { %v7959_v26 = vpop.eup %7958 }
0x178d   :  { %v4201_v27 = vmul.f32 %v7959_v26, %v7957_v54 }
0x178f   :  { %4203 = vrot.lane.b32.xlu0 %v4201_v27, %s8169_s23 }
0x1801   :  { %v4204_v22 = vpop.permute.xlu0 %4203 }
0x1802   :  { %v4206_v24 = vadd.f32 %v4204_v22, %v4200_v21 }
0x1804   :  { %7960 = vtanh.f32 %v4206_v24 }
0x1811   :  { %v7961_v25 = vpop.eup %7960 }
0x1812   :  { %4212 = vrot.lane.b32.xlu1 %v7961_v25, %s8169_s23 }
0x1884   :  { %v4213_v28 = vpop.permute.xlu1 %4212 }
0x1885   :  { %v9211_v29 = vmul.f32 %v4213_v28, %v4209_v16 }
0x1887   :  { %4216 = vst.msk [vmem:[#allocation3 + $0x2] sm:$0x3] %vm1572_vm1, %v9211_v29  ;;  %7745 = vmatmul.mubr.msk.f32.vlgmr.msra.gmra.mxu0 %vm1457_vm2, %v9211_v29 }
0x1888   :  { %4503 = vmatpush1.msra.mxu0 %v8924_v51  ;;  %4550 = vmatprep.mubr.f32.mxu0 %v8167_v0 }
0x1889   :  { %4504 = vmatprep.subr.mxu0 %v8928_v57 }
0x188a   :  { %4505 = vmatpush1.msra.mxu0 %v8932_v53 }
0x188b   :  { %4506 = vmatprep.subr.mxu0 %v8935_v58 }
0x188c   :  { %4507 = vmatpush1.msra.mxu0 %v8939_v59 }
0x188d   :  { %4508 = vmatprep.subr.mxu0 %v8942_v60 }
0x188e   :  { %4509 = vmatpush1.msra.mxu0 %v8945_v61 }
0x188f   :  { %4510 = vmatprep.subr.mxu0 %v8948_v62 }
0x1890   :  { %4511 = vmatpush1.msra.mxu0 %v8951_v63 }
0x1891   :  { %4512 = vmatprep.subr.mxu0 %v8954_v1 }
0x1892   :  { %4513 = vmatpush1.msra.mxu0 %v8957_v2 }
0x1893   :  { %4514 = vmatprep.subr.mxu0 %v8960_v19 }
0x1894   :  { %4515 = vmatpush1.msra.mxu0 %v8963_v30 }
0x1895   :  { %4516 = vmatprep.subr.mxu0 %v8966_v31 }
0x1896   :  { %4517 = vmatpush1.msra.mxu0 %v8969_v32 }
0x1897   :  { %4756 = vmatprep.subr.mxu0 %v8921_v9 }
0x1947   :  { %v4298_v3 = vpop.f32.mrf.mxu0 }
0x1949   :  { %v4300_v55 = vpop.f32.mrf.mxu0 }
0x194a   :  { %v4305_v56 = vcombine.low %v4298_v3, %v4300_v55 }
0x194c   :  { %v4312_v8 = vrot.slane %v4305_v56, %v8448_v15 }
0x194e   :  { %v4314_v37 = vadd.f32 %v4312_v8, %v4229_v23  ;;  %v4483_v8 = vld [vmem:[#allocation2 + $0x10] sm:$0xf] }
0x1950   :  { %4322 = vrot.lane.b32.xlu0 %v4314_v37, %s8169_s23  ;;  %v7746_v46 = vmul.f32 -1.442695, %v4314_v37 }
0x1952   :  { %7962 = vpow2.f32 %v7746_v46 }
0x195f   :  { %v7963_v47 = vpop.eup %7962 }
0x1960   :  { %v4318_v48 = vadd.f32 1.0, %v7963_v47 }
0x1962   :  { %7964 = vrcp.f32 %v4318_v48 }
0x196f   :  { %v7965_v6 = vpop.eup %7964 }
0x1970   :  { %v4327_v12 = vmul.f32 %v7965_v6, %v4206_v24  ;;  %v4336_v14 = vrot.slane %v7965_v6, 2 }
0x19c2   :  { %v4323_v4 = vpop.permute.xlu0 %4322 }
0x19c3   :  { %v4324_v5 = vrot.slane %v4323_v4, 2 }
0x19c5   :  { %7966 = vtanh.f32 %v4324_v5 }
0x19d2   :  { %v7967_v7 = vpop.eup %7966 }
0x19d3   :  { %v4328_v10 = vmul.f32 %v7967_v7, %v7965_v6 }
0x19d5   :  { %4330 = vrot.lane.b32.xlu1 %v4328_v10, %s8169_s23 }
0x1a47   :  { %v4331_v11 = vpop.permute.xlu1 %4330 }
0x1a48   :  { %v4333_v33 = vadd.f32 %v4331_v11, %v4327_v12 }
0x1a4a   :  { %7968 = vtanh.f32 %v4333_v33 }
0x1a57   :  { %v7969_v13 = vpop.eup %7968 }
0x1a58   :  { %4339 = vrot.lane.b32.xlu0 %v7969_v13, %s8169_s23 }
0x1aca   :  { %v4340_v17 = vpop.permute.xlu0 %4339 }
0x1acb   :  { %v9238_v18 = vmul.f32 %v4340_v17, %v4336_v14 }
0x1acd   :  { %4343 = vst.msk [vmem:[#allocation3 + $0x4] sm:$0x3] %vm1572_vm1, %v9238_v18  ;;  %7747 = vmatmul.mubr.msk.f32.vlgmr.msra.gmra.mxu1 %vm1457_vm2, %v9238_v18 }
0x1ace   :  { %4630 = vmatpush1.msra.mxu1 %v8924_v51  ;;  %4677 = vmatprep.mubr.f32.mxu1 %v8167_v0 }
0x1acf   :  { %4631 = vmatprep.subr.mxu1 %v8928_v57 }
0x1ad0   :  { %4632 = vmatpush1.msra.mxu1 %v8932_v53 }
0x1ad1   :  { %4633 = vmatprep.subr.mxu1 %v8935_v58 }
0x1ad2   :  { %4634 = vmatpush1.msra.mxu1 %v8939_v59 }
0x1ad3   :  { %4635 = vmatprep.subr.mxu1 %v8942_v60 }
0x1ad4   :  { %4636 = vmatpush1.msra.mxu1 %v8945_v61 }
0x1ad5   :  { %4637 = vmatprep.subr.mxu1 %v8948_v62 }
0x1ad6   :  { %4638 = vmatpush1.msra.mxu1 %v8951_v63 }
0x1ad7   :  { %4639 = vmatprep.subr.mxu1 %v8954_v1 }
0x1ad8   :  { %4640 = vmatpush1.msra.mxu1 %v8957_v2 }
0x1ad9   :  { %4641 = vmatprep.subr.mxu1 %v8960_v19 }
0x1ada   :  { %4642 = vmatpush1.msra.mxu1 %v8963_v30 }
0x1adb   :  { %4643 = vmatprep.subr.mxu1 %v8966_v31 }
0x1adc   :  { %4644 = vmatpush1.msra.mxu1 %v8969_v32 }
0x1add   :  { %4883 = vmatprep.subr.mxu1 %v8921_v9 }
0x1b8d   :  { %v4425_v20 = vpop.f32.mrf.mxu1 }
0x1b8f   :  { %v4427_v34 = vpop.f32.mrf.mxu1 }
0x1b90   :  { %v4432_v43 = vcombine.low %v4425_v20, %v4427_v34 }
0x1b92   :  { %v4439_v36 = vrot.slane %v4432_v43, %v8448_v15 }
0x1b94   :  { %v4441_v44 = vadd.f32 %v4439_v36, %v4356_v40 }
0x1b96   :  { %4449 = vrot.lane.b32.xlu1 %v4441_v44, %s8169_s23  ;;  %v7748_v45 = vmul.f32 -1.442695, %v4441_v44 }
0x1b98   :  { %7970 = vpow2.f32 %v7748_v45 }
0x1ba5   :  { %v7971_v38 = vpop.eup %7970 }
0x1ba6   :  { %v4445_v35 = vadd.f32 1.0, %v7971_v38 }
0x1ba8   :  { %7972 = vrcp.f32 %v4445_v35 }
0x1bb5   :  { %v7973_v50 = vpop.eup %7972 }
0x1bb6   :  { %v4454_v26 = vmul.f32 %v7973_v50, %v4333_v33  ;;  %v4463_v24 = vrot.slane %v7973_v50, 2 }
0x1c08   :  { %v4450_v52 = vpop.permute.xlu1 %4449 }
0x1c09   :  { %v4451_v49 = vrot.slane %v4450_v52, 2 }
0x1c0b   :  { %7974 = vtanh.f32 %v4451_v49  ;;  %v4737_v49 = vld [vmem:[#allocation2 + $0x18] sm:$0xf] }
0x1c18   :  { %v7975_v54 = vpop.eup %7974 }
0x1c19   :  { %v4455_v9 = vmul.f32 %v7975_v54, %v7973_v50 }
0x1c1b   :  { %4457 = vrot.lane.b32.xlu0 %v4455_v9, %s8169_s23 }
0x1c8d   :  { %v4458_v27 = vpop.permute.xlu0 %4457 }
0x1c8e   :  { %v4460_v21 = vadd.f32 %v4458_v27, %v4454_v26 }
0x1c90   :  { %7976 = vtanh.f32 %v4460_v21 }
0x1c9d   :  { %v7977_v22 = vpop.eup %7976 }
0x1c9e   :  { %4466 = vrot.lane.b32.xlu1 %v7977_v22, %s8169_s23 }
0x1d10   :  { %v4467_v25 = vpop.permute.xlu1 %4466 }
0x1d11   :  { %v9265_v16 = vmul.f32 %v4467_v25, %v4463_v24 }
0x1d13   :  { %4470 = vst.msk [vmem:[#allocation3 + $0x6] sm:$0x3] %vm1572_vm1, %v9265_v16  ;;  %7749 = vmatmul.mubr.msk.f32.vlgmr.msra.gmra.mxu0 %vm1457_vm2, %v9265_v16 }
0x1d14   :  { %4757 = vmatpush1.msra.mxu0 %v8924_v51  ;;  %4804 = vmatprep.mubr.f32.mxu0 %v8167_v0 }
0x1d15   :  { %4758 = vmatprep.subr.mxu0 %v8928_v57 }
0x1d16   :  { %4759 = vmatpush1.msra.mxu0 %v8932_v53 }
0x1d17   :  { %4760 = vmatprep.subr.mxu0 %v8935_v58 }
0x1d18   :  { %4761 = vmatpush1.msra.mxu0 %v8939_v59 }
0x1d19   :  { %4762 = vmatprep.subr.mxu0 %v8942_v60 }
0x1d1a   :  { %4763 = vmatpush1.msra.mxu0 %v8945_v61 }
0x1d1b   :  { %4764 = vmatprep.subr.mxu0 %v8948_v62 }
0x1d1c   :  { %4765 = vmatpush1.msra.mxu0 %v8951_v63 }
0x1d1d   :  { %4766 = vmatprep.subr.mxu0 %v8954_v1 }
0x1d1e   :  { %4767 = vmatpush1.msra.mxu0 %v8957_v2 }
0x1d1f   :  { %4768 = vmatprep.subr.mxu0 %v8960_v19 }
0x1d20   :  { %4769 = vmatpush1.msra.mxu0 %v8963_v30 }
0x1d21   :  { %4770 = vmatprep.subr.mxu0 %v8966_v31 }
0x1d22   :  { %4771 = vmatpush1.msra.mxu0 %v8969_v32 }
0x1dd3   :  { %v4552_v28 = vpop.f32.mrf.mxu0 }
0x1dd5   :  { %v4554_v3 = vpop.f32.mrf.mxu0 }
0x1dd6   :  { %v4559_v55 = vcombine.low %v4552_v28, %v4554_v3 }
0x1dd8   :  { %v4566_v56 = vrot.slane %v4559_v55, %v8448_v15 }
0x1dda   :  { %v4568_v23 = vadd.f32 %v4566_v56, %v4483_v8 }
0x1ddc   :  { %4576 = vrot.lane.b32.xlu0 %v4568_v23, %s8169_s23  ;;  %v7750_v37 = vmul.f32 -1.442695, %v4568_v23 }
0x1dde   :  { %7978 = vpow2.f32 %v7750_v37 }
0x1deb   :  { %v7979_v46 = vpop.eup %7978 }
0x1dec   :  { %v4572_v47 = vadd.f32 1.0, %v7979_v46 }
0x1dee   :  { %7980 = vrcp.f32 %v4572_v47 }
0x1dfb   :  { %v7981_v5 = vpop.eup %7980 }
0x1dfc   :  { %v4581_v10 = vmul.f32 %v7981_v5, %v4460_v21  ;;  %v4590_v13 = vrot.slane %v7981_v5, 2 }
0x1e4e   :  { %v4577_v48 = vpop.permute.xlu0 %4576 }
0x1e4f   :  { %v4578_v4 = vrot.slane %v4577_v48, 2 }
0x1e51   :  { %7982 = vtanh.f32 %v4578_v4 }
0x1e5e   :  { %v7983_v6 = vpop.eup %7982 }
0x1e5f   :  { %v4582_v7 = vmul.f32 %v7983_v6, %v7981_v5  ;;  %v4864_v5 = vld [vmem:[#allocation2 + $0x1c] sm:$0xf] }
0x1e61   :  { %4584 = vrot.lane.b32.xlu1 %v4582_v7, %s8169_s23 }
0x1ed3   :  { %v4585_v12 = vpop.permute.xlu1 %4584 }
0x1ed4   :  { %v4587_v11 = vadd.f32 %v4585_v12, %v4581_v10 }
0x1ed6   :  { %7984 = vtanh.f32 %v4587_v11 }
0x1ee3   :  { %v7985_v33 = vpop.eup %7984 }
0x1ee4   :  { %4593 = vrot.lane.b32.xlu0 %v7985_v33, %s8169_s23 }
0x1f56   :  { %v4594_v14 = vpop.permute.xlu0 %4593 }
0x1f57   :  { %v9291_v17 = vmul.f32 %v4594_v14, %v4590_v13 }
0x1f59   :  { %4597 = vst.msk [vmem:[#allocation3 + $0x8] sm:$0x3] %vm1572_vm1, %v9291_v17  ;;  %7751 = vmatmul.mubr.msk.f32.vlgmr.msra.gmra.mxu1 %vm1457_vm2, %v9291_v17 }
0x1f5a   :  { %4884 = vmatpush1.msra.mxu1 %v8924_v51  ;;  %4931 = vmatprep.mubr.f32.mxu1 %v8167_v0 }
0x1f5b   :  { %4885 = vmatprep.subr.mxu1 %v8928_v57 }
0x1f5c   :  { %4886 = vmatpush1.msra.mxu1 %v8932_v53 }
0x1f5d   :  { %4887 = vmatprep.subr.mxu1 %v8935_v58 }
0x1f5e   :  { %4888 = vmatpush1.msra.mxu1 %v8939_v59  ;;  %v4610_v59 = vld [vmem:[#allocation2 + $0x14] sm:$0xf] }
0x1f5f   :  { %4889 = vmatprep.subr.mxu1 %v8942_v60 }
0x1f60   :  { %4890 = vmatpush1.msra.mxu1 %v8945_v61 }
0x1f61   :  { %4891 = vmatprep.subr.mxu1 %v8948_v62 }
0x1f62   :  { %4892 = vmatpush1.msra.mxu1 %v8951_v63 }
0x1f63   :  { %4893 = vmatprep.subr.mxu1 %v8954_v1 }
0x1f64   :  { %4894 = vmatpush1.msra.mxu1 %v8957_v2 }
0x1f65   :  { %4895 = vmatprep.subr.mxu1 %v8960_v19 }
0x1f66   :  { %4896 = vmatpush1.msra.mxu1 %v8963_v30 }
0x1f67   :  { %4897 = vmatprep.subr.mxu1 %v8966_v31 }
0x1f68   :  { %4898 = vmatpush1.msra.mxu1 %v8969_v32 }
0x2019   :  { %v4679_v51 = vpop.f32.mrf.mxu1 }
0x201b   :  { %v4681_v57 = vpop.f32.mrf.mxu1 }
0x201c   :  { %v4686_v53 = vcombine.low %v4679_v51, %v4681_v57 }
0x201e   :  { %v4693_v58 = vrot.slane %v4686_v53, %v8448_v15 }
0x2020   :  { %v4695_v60 = vadd.f32 %v4693_v58, %v4610_v59 }
0x2022   :  { %4703 = vrot.lane.b32.xlu1 %v4695_v60, %s8169_s23  ;;  %v7752_v61 = vmul.f32 -1.442695, %v4695_v60 }
0x2024   :  { %7986 = vpow2.f32 %v7752_v61  ;;  %v4605_v61 = vrot.slane %v9291_v17, %v8448_v15  ;;  %v4478_v17 = vrot.slane %v9265_v16, %v8448_v15  ;;  %v9362_v16 = vld [vmem:[#allocation8 + $0x170] sm:$0xff] }
0x2031   :  { %v7987_v62 = vpop.eup %7986 }
0x2032   :  { %v4699_v63 = vadd.f32 1.0, %v7987_v62 }
0x2034   :  { %7988 = vrcp.f32 %v4699_v63 }
0x2041   :  { %v7989_v19 = vpop.eup %7988 }
0x2042   :  { %v4708_v32 = vmul.f32 %v7989_v19, %v4587_v11  ;;  %v4717_v36 = vrot.slane %v7989_v19, 2 }
0x2094   :  { %v4704_v1 = vpop.permute.xlu1 %4703 }
0x2095   :  { %v4705_v2 = vrot.slane %v4704_v1, 2 }
0x2097   :  { %7990 = vtanh.f32 %v4705_v2 }
0x20a4   :  { %v7991_v30 = vpop.eup %7990 }
0x20a5   :  { %v4709_v31 = vmul.f32 %v7991_v30, %v7989_v19 }
0x20a7   :  { %4711 = vrot.lane.b32.xlu0 %v4709_v31, %s8169_s23 }
0x2119   :  { %v4712_v20 = vpop.permute.xlu0 %4711 }
0x211a   :  { %v4714_v34 = vadd.f32 %v4712_v20, %v4708_v32  ;;  %v4351_v32 = vrot.slane %v9238_v18, %v8448_v15  ;;  %v4224_v20 = vrot.slane %v9211_v29, %v8448_v15  ;;  %v9367_v18 = vld [vmem:[#allocation8 + $0x160] sm:$0xff]  ;;  %v9370_v29 = vld [vmem:[#allocation8 + $0x158] sm:$0xff] }
0x211c   :  { %7992 = vtanh.f32 %v4714_v34 }
0x2129   :  { %v7993_v43 = vpop.eup %7992 }
0x212a   :  { %4720 = vrot.lane.b32.xlu1 %v7993_v43, %s8169_s23  ;;  %v9360_v43 = vld [vmem:[#allocation8 + $0x178] sm:$0xff] }
0x212b   :  { %5053 = vmatprep.subr.mxu0 %v9360_v43 }
0x219c   :  { %v4721_v40 = vpop.permute.xlu1 %4720 }
0x219d   :  { %v9317_v44 = vmul.f32 %v4721_v40, %v4717_v36  ;;  %v9364_v36 = vld [vmem:[#allocation8 + $0x168] sm:$0xff]  ;;  %v9373_v40 = vld [vmem:[#allocation8 + $0x150] sm:$0xff] }
0x219f   :  { %4724 = vst.msk [vmem:[#allocation3 + $0xa] sm:$0x3] %vm1572_vm1, %v9317_v44  ;;  %7753 = vmatmul.mubr.msk.f32.vlgmr.msra.gmra.mxu0 %vm1457_vm2, %v9317_v44  ;;  %v4732_v30 = vrot.slane %v9317_v44, %v8448_v15  ;;  %v9379_v44 = vld [vmem:[#allocation8 + $0x140] sm:$0xff] }
0x21a0   :  { %5101 = vmatprep.mubr.f32.mxu0 %v8167_v0  ;;  %5054 = vmatpush1.msra.mxu0 %v9362_v16 }
0x21a1   :  { %5055 = vmatprep.subr.mxu0 %v9364_v36 }
0x21a2   :  { %5056 = vmatpush1.msra.mxu0 %v9367_v18 }
0x21a3   :  { %5057 = vmatprep.subr.mxu0 %v9370_v29 }
0x21a4   :  { %5058 = vmatpush1.msra.mxu0 %v9373_v40 }
0x225f   :  { %v4806_v45 = vpop.f32.mrf.mxu0 }
0x2261   :  { %v4808_v38 = vpop.f32.mrf.mxu0 }
0x2262   :  { %v4813_v35 = vcombine.low %v4806_v45, %v4808_v38  ;;  %v9382_v45 = vld [vmem:[#allocation8 + $0x138] sm:$0xff]  ;;  %v9385_v38 = vld [vmem:[#allocation8 + $0x130] sm:$0xff] }
0x2264   :  { %v4820_v52 = vrot.slane %v4813_v35, %v8448_v15  ;;  %v9388_v35 = vld [vmem:[#allocation8 + $0x128] sm:$0xff] }
0x2266   :  { %v4822_v50 = vadd.f32 %v4820_v52, %v4737_v49  ;;  %v9391_v52 = vld [vmem:[#allocation8 + $0x120] sm:$0xff]  ;;  %v9394_v49 = vld [vmem:[#allocation8 + $0x118] sm:$0xff] }
0x2268   :  { %4830 = vrot.lane.b32.xlu0 %v4822_v50, %s8169_s23  ;;  %v7754_v54 = vmul.f32 -1.442695, %v4822_v50  ;;  %v9397_v50 = vld [vmem:[#allocation8 + $0x110] sm:$0xff] }
0x226a   :  { %7994 = vpow2.f32 %v7754_v54  ;;  %v9400_v54 = vld [vmem:[#allocation8 + $0x108] sm:$0xff] }
0x2277   :  { %v7995_v9 = vpop.eup %7994 }
0x2278   :  { %v4826_v26 = vadd.f32 1.0, %v7995_v9  ;;  %v9403_v9 = vld [vmem:[#allocation8 + $0x100] sm:$0xff] }
0x227a   :  { %7996 = vrcp.f32 %v4826_v26 }
0x2287   :  { %v7997_v22 = vpop.eup %7996 }
0x2288   :  { %v4835_v28 = vmul.f32 %v7997_v22, %v4714_v34  ;;  %v4844_v8 = vrot.slane %v7997_v22, 2  ;;  %v4097_v34 = vrot.slane %v9171_v42, %v8448_v15  ;;  %v9376_v42 = vld [vmem:[#allocation8 + $0x148] sm:$0xff] }
0x2289   :  { %5059 = vmatprep.subr.mxu0 %v9376_v42 }
0x228a   :  { %5060 = vmatpush1.msra.mxu0 %v9379_v44 }
0x228b   :  { %5061 = vmatprep.subr.mxu0 %v9382_v45 }
0x228c   :  { %5062 = vmatpush1.msra.mxu0 %v9385_v38 }
0x228d   :  { %5063 = vmatprep.subr.mxu0 %v9388_v35 }
0x228e   :  { %5064 = vmatpush1.msra.mxu0 %v9391_v52 }
0x228f   :  { %5065 = vmatprep.subr.mxu0 %v9394_v49 }
0x2290   :  { %5066 = vmatpush1.msra.mxu0 %v9397_v50 }
0x2291   :  { %5067 = vmatprep.subr.mxu0 %v9400_v54 }
0x2292   :  { %5068 = vmatpush1.msra.mxu0 %v9403_v9 }
0x2293   :  { %5242 = vmatprep.subr.mxu0 %v9360_v43 }
0x22da   :  { %v4831_v27 = vpop.permute.xlu0 %4830 }
0x22db   :  { %v4832_v21 = vrot.slane %v4831_v27, 2  ;;  %v9409_v27 = vld [vmem:[#allocation8 + $0x1f8] sm:$0xff] }
0x22dc   :  { %5147 = vmatprep.subr.mxu1 %v9409_v27 }
0x22dd   :  { %7998 = vtanh.f32 %v4832_v21  ;;  %v9413_v21 = vld [vmem:[#allocation8 + $0x1f0] sm:$0xff] }
0x22ea   :  { %v7999_v24 = vpop.eup %7998 }
0x22eb   :  { %v4836_v25 = vmul.f32 %v7999_v24, %v7997_v22  ;;  %v9416_v22 = vld [vmem:[#allocation8 + $0x1e8] sm:$0xff]  ;;  %v9419_v24 = vld [vmem:[#allocation8 + $0x1e0] sm:$0xff] }
0x22ed   :  { %4838 = vrot.lane.b32.xlu1 %v4836_v25, %s8169_s23 }
0x235f   :  { %v4839_v3 = vpop.permute.xlu1 %4838 }
0x2360   :  { %v4841_v55 = vadd.f32 %v4839_v3, %v4835_v28  ;;  %v9422_v28 = vld [vmem:[#allocation8 + $0x1d8] sm:$0xff]  ;;  %v9426_v3 = vld [vmem:[#allocation8 + $0x1d0] sm:$0xff] }
0x2362   :  { %8000 = vtanh.f32 %v4841_v55 }
0x236f   :  { %v8001_v56 = vpop.eup %8000 }
0x2370   :  { %4847 = vrot.lane.b32.xlu0 %v8001_v56, %s8169_s23  ;;  %v9432_v56 = vld [vmem:[#allocation8 + $0x1c0] sm:$0xff] }
0x23e2   :  { %v4848_v23 = vpop.permute.xlu0 %4847 }
0x23e3   :  { %v4850_v37 = vmul.f32 %v4848_v23, %v4844_v8 }
0x23e5   :  { %4851 = vst.msk [vmem:[#allocation3 + $0xc] sm:$0x3] %vm1572_vm1, %v4850_v37  ;;  %7755 = vmatmul.mubr.msk.f32.vlgmr.msra.gmra.mxu1 %vm1457_vm2, %v4850_v37  ;;  %v4859_v60 = vrot.slane %v4850_v37, %v8448_v15  ;;  %v9435_v37 = vld [vmem:[#allocation8 + $0x1b8] sm:$0xff] }
0x23e6   :  { %5195 = vmatprep.mubr.f32.mxu1 %v8167_v0  ;;  %5148 = vmatpush1.msra.mxu1 %v9413_v21 }
0x23e7   :  { %5149 = vmatprep.subr.mxu1 %v9416_v22 }
0x23e8   :  { %5150 = vmatpush1.msra.mxu1 %v9419_v24 }
0x23e9   :  { %5151 = vmatprep.subr.mxu1 %v9422_v28 }
0x23ea   :  { %5152 = vmatpush1.msra.mxu1 %v9426_v3 }
0x24a5   :  { %v4933_v46 = vpop.f32.mrf.mxu1 }
0x24a7   :  { %v4935_v47 = vpop.f32.mrf.mxu1 }
0x24a8   :  { %v4940_v48 = vcombine.low %v4933_v46, %v4935_v47  ;;  %v9440_v46 = vld [vmem:[#allocation8 + $0x1b0] sm:$0xff]  ;;  %v9443_v47 = vld [vmem:[#allocation8 + $0x1a8] sm:$0xff] }
0x24aa   :  { %v4947_v4 = vrot.slane %v4940_v48, %v8448_v15  ;;  %v9446_v48 = vld [vmem:[#allocation8 + $0x1a0] sm:$0xff] }
0x24ac   :  { %v4949_v6 = vadd.f32 %v4947_v4, %v4864_v5 }
0x24ae   :  { %4957 = vrot.lane.b32.xlu1 %v4949_v6, %s8169_s23  ;;  %v7756_v7 = vmul.f32 -1.442695, %v4949_v6  ;;  %v9449_v6 = vld [vmem:[#allocation8 + $0x198] sm:$0xff] }
0x24b0   :  { %8002 = vpow2.f32 %v7756_v7  ;;  %v9454_v7 = vld [vmem:[#allocation8 + $0x190] sm:$0xff] }
0x24bd   :  { %v8003_v10 = vpop.eup %8002 }
0x24be   :  { %v4953_v12 = vadd.f32 1.0, %v8003_v10  ;;  %v9457_v10 = vld [vmem:[#allocation8 + $0x188] sm:$0xff] }
0x24c0   :  { %8004 = vrcp.f32 %v4953_v12  ;;  %v9460_v12 = vld [vmem:[#allocation8 + $0x180] sm:$0xff] }
0x24cd   :  { %v8005_v13 = vpop.eup %8004 }
0x24ce   :  { %v4962_v57 = vmul.f32 %v8005_v13, %v4841_v55  ;;  %v4971_v62 = vrot.slane %v8005_v13, 2  ;;  %v9429_v55 = vld [vmem:[#allocation8 + $0x1c8] sm:$0xff] }
0x24cf   :  { %5153 = vmatprep.subr.mxu1 %v9429_v55 }
0x24d0   :  { %5154 = vmatpush1.msra.mxu1 %v9432_v56 }
0x24d1   :  { %5155 = vmatprep.subr.mxu1 %v9435_v37 }
0x24d2   :  { %5156 = vmatpush1.msra.mxu1 %v9440_v46 }
0x24d3   :  { %5157 = vmatprep.subr.mxu1 %v9443_v47 }
0x24d4   :  { %5158 = vmatpush1.msra.mxu1 %v9446_v48 }
0x24d5   :  { %5159 = vmatprep.subr.mxu1 %v9449_v6 }
0x24d6   :  { %5160 = vmatpush1.msra.mxu1 %v9454_v7 }
0x24d7   :  { %5161 = vmatprep.subr.mxu1 %v9457_v10 }
0x24d8   :  { %5162 = vmatpush1.msra.mxu1 %v9460_v12 }
0x24d9   :  { %5325 = vmatprep.subr.mxu1 %v9409_v27 }
0x2520   :  { %v4958_v11 = vpop.permute.xlu1 %4957 }
0x2521   :  { %v4959_v33 = vrot.slane %v4958_v11, 2 }
0x2523   :  { %8006 = vtanh.f32 %v4959_v33 }
0x2530   :  { %v8007_v14 = vpop.eup %8006 }
0x2531   :  { %v4963_v51 = vmul.f32 %v8007_v14, %v8005_v13 }
0x2533   :  { %4965 = vrot.lane.b32.xlu0 %v4963_v51, %s8169_s23 }
0x25a5   :  { %v4966_v53 = vpop.permute.xlu0 %4965 }
0x25a6   :  { %v4968_v58 = vadd.f32 %v4966_v53, %v4962_v57 }
0x25a8   :  { %8008 = vtanh.f32 %v4968_v58 }
0x25b5   :  { %v8009_v59 = vpop.eup %8008 }
0x25b6   :  { %4974 = vrot.lane.b32.xlu1 %v8009_v59, %s8169_s23 }
0x25ba   :  { %4860 = vrot.lane.b32.xlu1 %v4859_v60, %s8170_s24 }
0x25be   :  { %4606 = vrot.lane.b32.xlu1 %v4605_v61, %s8170_s24 }
0x2628   :  { %v4975_v63 = vpop.permute.xlu1 %4974 }
0x2629   :  { %v4977_v1 = vmul.f32 %v4975_v63, %v4971_v62 }
0x262b   :  { %4978 = vst.msk [vmem:[#allocation3 + $0xe] sm:$0x3] %vm1572_vm1, %v4977_v1  ;;  %v4986_v2 = vrot.slane %v4977_v1, %v8448_v15 }
0x262c   :  { %v4861_v19 = vpop.permute.xlu1 %4860 }
0x262d   :  { %4863 = vst.msk [vmem:[#allocation4 + $0x2] sm:$0x3] %vm1572_vm1, %v4861_v19  ;;  %4987 = vrot.lane.b32.xlu0 %v4986_v2, %s8170_s24  ;;  %v5027_v2 = vld [vmem:[#allocation3] sm:$0x3] }
0x2630   :  { %v4607_v31 = vpop.permute.xlu1 %4606 }
0x2631   :  { %4609 = vst.msk [vmem:[#allocation4 + $0x6] sm:$0x3] %vm1572_vm1, %v4607_v31  ;;  %4733 = vrot.lane.b32.xlu0 %v4732_v30, %s8170_s24 }
0x2634   :  { %v5217_v5 = vld [vmem:[#allocation4 + $0x2] sm:$0x3] }
0x2635   :  { %4479 = vrot.lane.b32.xlu0 %v4478_v17, %s8170_s24  ;;  %v6190_v63 = vld [vmem:[#allocation4 + $0x2] sm:$0x3]  ;;  %v5216_v17 = vld [vmem:[#allocation3 + $0x2] sm:$0x3] }
0x2638   :  { %v5573_v51 = vld [vmem:[#allocation4 + $0x6] sm:$0x3] }
0x2639   :  { %4352 = vrot.lane.b32.xlu0 %v4351_v32, %s8170_s24  ;;  %v5834_v62 = vld [vmem:[#allocation4 + $0x6] sm:$0x3] }
0x263d   :  { %4225 = vrot.lane.b32.xlu0 %v4224_v20, %s8170_s24 }
0x2641   :  { %4098 = vrot.lane.b32.xlu0 %v4097_v34, %s8170_s24  ;;  %v5121_v34 = vld [vmem:[#allocation3 + $0xe] sm:$0x3] }
0x269f   :  { %v4988_v26 = vpop.permute.xlu0 %4987 }
0x26a0   :  { %4990 = vst.msk [vmem:[#allocation4] sm:$0x3] %vm1572_vm1, %v4988_v26 }
0x26a3   :  { %v4734_v25 = vpop.permute.xlu0 %4733 }
0x26a4   :  { %4736 = vst.msk [vmem:[#allocation4 + $0x4] sm:$0x3] %vm1572_vm1, %v4734_v25 }
0x26a7   :  { %v4480_v8 = vpop.permute.xlu0 %4479  ;;  %v5028_v23 = vld [vmem:[#allocation4] sm:$0x3] }
0x26a8   :  { %4482 = vst.msk [vmem:[#allocation4 + $0x8] sm:$0x3] %vm1572_vm1, %v4480_v8  ;;  %5030 = vrot.lane.b32.xlu1 %v5028_v23, %s8164_s27  ;;  %v5394_v23 = vld [vmem:[#allocation3 + $0x4] sm:$0x3] }
0x26ab   :  { %v4353_v4 = vpop.permute.xlu0 %4352  ;;  %v5395_v33 = vld [vmem:[#allocation4 + $0x4] sm:$0x3] }
0x26ac   :  { %4355 = vst.msk [vmem:[#allocation4 + $0xa] sm:$0x3] %vm1572_vm1, %v4353_v4  ;;  %5219 = vrot.lane.b32.xlu1 %v5217_v5, %s8164_s27 }
0x26af   :  { %v4226_v11 = vpop.permute.xlu0 %4225  ;;  %v5751_v13 = vld [vmem:[#allocation4 + $0x8] sm:$0x3] }
0x26b0   :  { %4228 = vst.msk [vmem:[#allocation4 + $0xc] sm:$0x3] %vm1572_vm1, %v4226_v11  ;;  %5397 = vrot.lane.b32.xlu1 %v5395_v33, %s8164_s27  ;;  %5753 = vrot.lane.b32.xlu0 %v5751_v13, %s8164_s27  ;;  %v5656_v61 = vld [vmem:[#allocation4 + $0x8] sm:$0x3]  ;;  %v5299_v11 = vld [vmem:[#allocation3 + $0xc] sm:$0x3] }
0x26b3   :  { %v4099_v14 = vpop.permute.xlu0 %4098  ;;  %v5929_v57 = vld [vmem:[#allocation4 + $0xa] sm:$0x3] }
0x26b4   :  { %4101 = vst.msk [vmem:[#allocation4 + $0xe] sm:$0x3] %vm1572_vm1, %v4099_v14  ;;  %5575 = vrot.lane.b32.xlu1 %v5573_v51, %s8164_s27  ;;  %v5572_v14 = vld [vmem:[#allocation3 + $0x6] sm:$0x3] }
0x26b7   :  { %v6107_v53 = vld [vmem:[#allocation4 + $0xc] sm:$0x3] }
0x26b8   :  { %5931 = vrot.lane.b32.xlu1 %v5929_v57, %s8164_s27  ;;  %6109 = vrot.lane.b32.xlu0 %v6107_v53, %s8164_s27  ;;  %v5300_v60 = vld [vmem:[#allocation4 + $0xc] sm:$0x3]  ;;  %v5750_v57 = vld [vmem:[#allocation3 + $0x8] sm:$0x3] }
0x26bb   :  { %v6285_v58 = vld [vmem:[#allocation4 + $0xe] sm:$0x3] }
0x26bc   :  { %v5122_v59 = vld [vmem:[#allocation4 + $0xe] sm:$0x3]  ;;  %6287 = vrot.lane.b32.xlu1 %v6285_v58, %s8164_s27 }
0x26bd   :  { %5124 = vrot.lane.b32.xlu0 %v5122_v59, %s8164_s27  ;;  %v5928_v59 = vld [vmem:[#allocation3 + $0xa] sm:$0x3] }
0x26c1   :  { %5302 = vrot.lane.b32.xlu0 %v5300_v60, %s8164_s27 }
0x26c5   :  { %5658 = vrot.lane.b32.xlu0 %v5656_v61, %s8164_s27  ;;  %v6106_v61 = vld [vmem:[#allocation3 + $0xc] sm:$0x3] }
0x26c9   :  { %5836 = vrot.lane.b32.xlu0 %v5834_v62, %s8164_s27 }
0x26cd   :  { %6192 = vrot.lane.b32.xlu0 %v6190_v63, %s8164_s27  ;;  %v9693_v63 = vld [vmem:[#allocation10 + $0x110] sm:$0xff] }
0x271a   :  { %v5031_v1 = vpop.permute.xlu1 %5030 }
0x271b   :  { %v5033_v19 = vsel %vm2530_vm3, %v5027_v2, %v5031_v1  ;;  %v9696_v1 = vld [vmem:[#allocation10 + $0x108] sm:$0xff]  ;;  %v9699_v2 = vld [vmem:[#allocation10 + $0x100] sm:$0xff] }
0x271c   :  { %7758 = vmatmul.mubr.msk.f32.vlgmr.msra.gmra.mxu0 %vm1457_vm2, %v5033_v19  ;;  %v7757_v19 = vld [vmem:[%s10133_s4 + $0x4] sm:$0x3] }
0x271d   :  { %5243 = vmatpush1.msra.mxu0 %v9362_v16  ;;  %5290 = vmatprep.mubr.f32.mxu0 %v8167_v0 }
0x271e   :  { %5244 = vmatprep.subr.mxu0 %v9364_v36  ;;  %v5220_v31 = vpop.permute.xlu1 %5219 }
0x271f   :  { %5245 = vmatpush1.msra.mxu0 %v9367_v18  ;;  %v5222_v20 = vsel %vm2530_vm3, %v5216_v17, %v5220_v31  ;;  %v9727_v31 = vrot.slane %v7757_v19, %v8417_v39  ;;  %v9730_v17 = vrot.slane %v7757_v19, %v8423_v41 }
0x2720   :  { %5246 = vmatprep.subr.mxu0 %v9370_v29 }
0x2721   :  { %5247 = vmatpush1.msra.mxu0 %v9373_v40 }
0x2722   :  { %5248 = vmatprep.subr.mxu0 %v9376_v42  ;;  %v9489_v30 = vpop.permute.xlu0 %5753  ;;  %v5398_v8 = vpop.permute.xlu1 %5397 }
0x2723   :  { %5249 = vmatpush1.msra.mxu0 %v9379_v44  ;;  %v5400_v4 = vsel %vm2530_vm3, %v5394_v23, %v5398_v8  ;;  %v5756_v53 = vsel %vm2530_vm3, %v5750_v57, %v9489_v30 }
0x2724   :  { %5250 = vmatprep.subr.mxu0 %v9382_v45 }
0x2725   :  { %5251 = vmatpush1.msra.mxu0 %v9385_v38 }
0x2726   :  { %5252 = vmatprep.subr.mxu0 %v9388_v35  ;;  %v5576_v13 = vpop.permute.xlu1 %5575 }
0x2727   :  { %5253 = vmatpush1.msra.mxu0 %v9391_v52  ;;  %v5578_v51 = vsel %vm2530_vm3, %v5572_v14, %v5576_v13 }
0x2728   :  { %5254 = vmatprep.subr.mxu0 %v9394_v49 }
0x2729   :  { %5255 = vmatpush1.msra.mxu0 %v9397_v50 }
0x272a   :  { %5256 = vmatprep.subr.mxu0 %v9400_v54  ;;  %v9496_v32 = vpop.permute.xlu0 %6109  ;;  %v5932_v58 = vpop.permute.xlu1 %5931 }
0x272b   :  { %5257 = vmatpush1.msra.mxu0 %v9403_v9  ;;  %v5934_v60 = vsel %vm2530_vm3, %v5928_v59, %v5932_v58  ;;  %v6112_v62 = vsel %vm2530_vm3, %v6106_v61, %v9496_v32 }
0x272c   :  { %7761 = vmatmul.mubr.msk.f32.vlgmr.msra.gmra.mxu0 %vm1457_vm2, %v5222_v20  ;;  %5420 = vmatprep.subr.mxu0 %v9360_v43 }
0x272d   :  { %5421 = vmatpush1.msra.mxu0 %v9362_v16  ;;  %5468 = vmatprep.mubr.f32.mxu0 %v8167_v0 }
0x272e   :  { %5422 = vmatprep.subr.mxu0 %v9364_v36 }
0x272f   :  { %v5125_v26 = vpop.permute.xlu0 %5124  ;;  %5423 = vmatpush1.msra.mxu0 %v9367_v18 }
0x2730   :  { %v5127_v25 = vsel %vm2530_vm3, %v5121_v34, %v5125_v26  ;;  %5424 = vmatprep.subr.mxu0 %v9370_v29 }
0x2731   :  { %7759 = vmatmul.mubr.msk.f32.vlgmr.msra.gmra.mxu1 %vm1457_vm2, %v5127_v25  ;;  %5425 = vmatpush1.msra.mxu0 %v9373_v40 }
0x2732   :  { %5326 = vmatpush1.msra.mxu1 %v9413_v21  ;;  %5426 = vmatprep.subr.mxu0 %v9376_v42 }
0x2733   :  { %5327 = vmatprep.subr.mxu1 %v9416_v22  ;;  %5427 = vmatpush1.msra.mxu0 %v9379_v44  ;;  %v5303_v5 = vpop.permute.xlu0 %5302 }
0x2734   :  { %5328 = vmatpush1.msra.mxu1 %v9419_v24  ;;  %5428 = vmatprep.subr.mxu0 %v9382_v45  ;;  %v5305_v33 = vsel %vm2530_vm3, %v5299_v11, %v5303_v5 }
0x2735   :  { %5329 = vmatprep.subr.mxu1 %v9422_v28  ;;  %5429 = vmatpush1.msra.mxu0 %v9385_v38 }
0x2736   :  { %5330 = vmatpush1.msra.mxu1 %v9426_v3  ;;  %5430 = vmatprep.subr.mxu0 %v9388_v35 }
0x2737   :  { %5331 = vmatprep.subr.mxu1 %v9429_v55  ;;  %5431 = vmatpush1.msra.mxu0 %v9391_v52 }
0x2738   :  { %5332 = vmatpush1.msra.mxu1 %v9432_v56  ;;  %5432 = vmatprep.subr.mxu0 %v9394_v49 }
0x2739   :  { %5333 = vmatprep.subr.mxu1 %v9435_v37  ;;  %5433 = vmatpush1.msra.mxu0 %v9397_v50 }
0x273a   :  { %5334 = vmatpush1.msra.mxu1 %v9440_v46  ;;  %5434 = vmatprep.subr.mxu0 %v9400_v54 }
0x273b   :  { %5335 = vmatprep.subr.mxu1 %v9443_v47  ;;  %5435 = vmatpush1.msra.mxu0 %v9403_v9 }
0x273c   :  { %5336 = vmatpush1.msra.mxu1 %v9446_v48  ;;  %7764 = vmatmul.mubr.msk.f32.vlgmr.msra.gmra.mxu0 %vm1457_vm2, %v5400_v4 }
0x273d   :  { %5337 = vmatprep.subr.mxu1 %v9449_v6  ;;  %5598 = vmatprep.subr.mxu0 %v9360_v43 }
0x273e   :  { %5338 = vmatpush1.msra.mxu1 %v9454_v7  ;;  %5599 = vmatpush1.msra.mxu0 %v9362_v16 }
0x273f   :  { %5339 = vmatprep.subr.mxu1 %v9457_v10  ;;  %5600 = vmatprep.subr.mxu0 %v9364_v36 }
0x2740   :  { %5340 = vmatpush1.msra.mxu1 %v9460_v12  ;;  %5373 = vmatprep.mubr.f32.mxu1 %v8167_v0 }
0x2741   :  { %5601 = vmatpush1.msra.mxu0 %v9367_v18  ;;  %7762 = vmatmul.mubr.msk.f32.vlgmr.msra.gmra.mxu1 %vm1457_vm2, %v5305_v33 }
0x2742   :  { %5602 = vmatprep.subr.mxu0 %v9370_v29  ;;  %5646 = vmatprep.mubr.f32.mxu0 %v8167_v0 }
0x2743   :  { %5603 = vmatpush1.msra.mxu0 %v9373_v40  ;;  %5503 = vmatprep.subr.mxu1 %v9409_v27 }
0x2744   :  { %5604 = vmatprep.subr.mxu0 %v9376_v42  ;;  %5504 = vmatpush1.msra.mxu1 %v9413_v21 }
0x2745   :  { %5605 = vmatpush1.msra.mxu0 %v9379_v44  ;;  %5505 = vmatprep.subr.mxu1 %v9416_v22 }
0x2746   :  { %5606 = vmatprep.subr.mxu0 %v9382_v45  ;;  %5506 = vmatpush1.msra.mxu1 %v9419_v24 }
0x2747   :  { %5607 = vmatpush1.msra.mxu0 %v9385_v38  ;;  %5507 = vmatprep.subr.mxu1 %v9422_v28 }
0x2748   :  { %5608 = vmatprep.subr.mxu0 %v9388_v35  ;;  %5508 = vmatpush1.msra.mxu1 %v9426_v3 }
0x2749   :  { %5609 = vmatpush1.msra.mxu0 %v9391_v52  ;;  %5509 = vmatprep.subr.mxu1 %v9429_v55 }
0x274a   :  { %5610 = vmatprep.subr.mxu0 %v9394_v49  ;;  %5510 = vmatpush1.msra.mxu1 %v9432_v56 }
0x274b   :  { %5611 = vmatpush1.msra.mxu0 %v9397_v50  ;;  %5511 = vmatprep.subr.mxu1 %v9435_v37 }
0x274c   :  { %5612 = vmatprep.subr.mxu0 %v9400_v54  ;;  %5512 = vmatpush1.msra.mxu1 %v9440_v46 }
0x274d   :  { %5613 = vmatpush1.msra.mxu0 %v9403_v9  ;;  %5513 = vmatprep.subr.mxu1 %v9443_v47 }
0x274e   :  { %7767 = vmatmul.mubr.msk.f32.vlgmr.msra.gmra.mxu0 %vm1457_vm2, %v5578_v51  ;;  %5776 = vmatprep.subr.mxu0 %v9360_v43 }
0x274f   :  { %5777 = vmatpush1.msra.mxu0 %v9362_v16  ;;  %5824 = vmatprep.mubr.f32.mxu0 %v8167_v0 }
0x2750   :  { %5778 = vmatprep.subr.mxu0 %v9364_v36  ;;  %5514 = vmatpush1.msra.mxu1 %v9446_v48 }
0x2751   :  { %5779 = vmatpush1.msra.mxu0 %v9367_v18  ;;  %5515 = vmatprep.subr.mxu1 %v9449_v6 }
0x2752   :  { %5780 = vmatprep.subr.mxu0 %v9370_v29  ;;  %5516 = vmatpush1.msra.mxu1 %v9454_v7 }
0x2753   :  { %5781 = vmatpush1.msra.mxu0 %v9373_v40  ;;  %5517 = vmatprep.subr.mxu1 %v9457_v10 }
0x2754   :  { %5782 = vmatprep.subr.mxu0 %v9376_v42  ;;  %5518 = vmatpush1.msra.mxu1 %v9460_v12 }
0x2755   :  { %5783 = vmatpush1.msra.mxu0 %v9379_v44  ;;  %5551 = vmatprep.mubr.f32.mxu1 %v8167_v0 }
0x2756   :  { %5784 = vmatprep.subr.mxu0 %v9382_v45  ;;  %5681 = vmatprep.subr.mxu1 %v9409_v27 }
0x2757   :  { %5785 = vmatpush1.msra.mxu0 %v9385_v38 }
0x2758   :  { %5786 = vmatprep.subr.mxu0 %v9388_v35 }
0x2759   :  { %5787 = vmatpush1.msra.mxu0 %v9391_v52 }
0x275a   :  { %5788 = vmatprep.subr.mxu0 %v9394_v49 }
0x275b   :  { %5789 = vmatpush1.msra.mxu0 %v9397_v50 }
0x275c   :  { %5790 = vmatprep.subr.mxu0 %v9400_v54 }
0x275d   :  { %5791 = vmatpush1.msra.mxu0 %v9403_v9 }
0x275e   :  { %7770 = vmatmul.mubr.msk.f32.vlgmr.msra.gmra.mxu0 %vm1457_vm2, %v5756_v53  ;;  %5954 = vmatprep.subr.mxu0 %v9360_v43 }
0x275f   :  { %5955 = vmatpush1.msra.mxu0 %v9362_v16  ;;  %6002 = vmatprep.mubr.f32.mxu0 %v8167_v0 }
0x2760   :  { %5956 = vmatprep.subr.mxu0 %v9364_v36 }
0x2761   :  { %5957 = vmatpush1.msra.mxu0 %v9367_v18 }
0x2762   :  { %5958 = vmatprep.subr.mxu0 %v9370_v29 }
0x2763   :  { %5959 = vmatpush1.msra.mxu0 %v9373_v40 }
0x2764   :  { %5960 = vmatprep.subr.mxu0 %v9376_v42 }
0x2765   :  { %5961 = vmatpush1.msra.mxu0 %v9379_v44 }
0x2766   :  { %5962 = vmatprep.subr.mxu0 %v9382_v45 }
0x2767   :  { %5963 = vmatpush1.msra.mxu0 %v9385_v38 }
0x2768   :  { %5964 = vmatprep.subr.mxu0 %v9388_v35 }
0x2769   :  { %5965 = vmatpush1.msra.mxu0 %v9391_v52 }
0x276a   :  { %5966 = vmatprep.subr.mxu0 %v9394_v49 }
0x276b   :  { %5967 = vmatpush1.msra.mxu0 %v9397_v50 }
0x276c   :  { %5968 = vmatprep.subr.mxu0 %v9400_v54 }
0x276d   :  { %5969 = vmatpush1.msra.mxu0 %v9403_v9 }
0x276e   :  { %7773 = vmatmul.mubr.msk.f32.vlgmr.msra.gmra.mxu0 %vm1457_vm2, %v5934_v60  ;;  %6132 = vmatprep.subr.mxu0 %v9360_v43 }
0x276f   :  { %6133 = vmatpush1.msra.mxu0 %v9362_v16  ;;  %6180 = vmatprep.mubr.f32.mxu0 %v8167_v0 }
0x2770   :  { %6134 = vmatprep.subr.mxu0 %v9364_v36 }
0x2771   :  { %6135 = vmatpush1.msra.mxu0 %v9367_v18 }
0x2772   :  { %6136 = vmatprep.subr.mxu0 %v9370_v29 }
0x2773   :  { %6137 = vmatpush1.msra.mxu0 %v9373_v40 }
0x2774   :  { %6138 = vmatprep.subr.mxu0 %v9376_v42 }
0x2775   :  { %6139 = vmatpush1.msra.mxu0 %v9379_v44 }
0x2776   :  { %6140 = vmatprep.subr.mxu0 %v9382_v45 }
0x2777   :  { %6141 = vmatpush1.msra.mxu0 %v9385_v38 }
0x2778   :  { %6142 = vmatprep.subr.mxu0 %v9388_v35 }
0x2779   :  { %6143 = vmatpush1.msra.mxu0 %v9391_v52 }
0x277a   :  { %6144 = vmatprep.subr.mxu0 %v9394_v49 }
0x277b   :  { %6145 = vmatpush1.msra.mxu0 %v9397_v50 }
0x277c   :  { %6146 = vmatprep.subr.mxu0 %v9400_v54 }
0x277d   :  { %6147 = vmatpush1.msra.mxu0 %v9403_v9 }
0x277e   :  { %7776 = vmatmul.mubr.msk.f32.vlgmr.msra.gmra.mxu0 %vm1457_vm2, %v6112_v62  ;;  %6310 = vmatprep.subr.mxu0 %v9360_v43  ;;  %v6288_v43 = vpop.permute.xlu1 %6287 }
0x277f   :  { %6311 = vmatpush1.msra.mxu0 %v9362_v16  ;;  %6358 = vmatprep.mubr.f32.mxu0 %v8167_v0  ;;  %v9651_v16 = vld [vmem:[#allocation10 + $0x178] sm:$0xff] }
0x2780   :  { %6312 = vmatprep.subr.mxu0 %v9364_v36  ;;  %v6284_v36 = vld [vmem:[#allocation3 + $0xe] sm:$0x3] }
0x2781   :  { %6313 = vmatpush1.msra.mxu0 %v9367_v18  ;;  %v9654_v18 = vld [vmem:[#allocation10 + $0x170] sm:$0xff] }
0x2782   :  { %6314 = vmatprep.subr.mxu0 %v9370_v29  ;;  %v6290_v29 = vsel %vm2530_vm3, %v6284_v36, %v6288_v43 }
0x2783   :  { %6315 = vmatpush1.msra.mxu0 %v9373_v40  ;;  %v9658_v40 = vld [vmem:[#allocation10 + $0x168] sm:$0xff] }
0x2784   :  { %6316 = vmatprep.subr.mxu0 %v9376_v42  ;;  %v9662_v42 = vld [vmem:[#allocation10 + $0x160] sm:$0xff] }
0x2785   :  { %6317 = vmatpush1.msra.mxu0 %v9379_v44  ;;  %v9665_v44 = vld [vmem:[#allocation10 + $0x158] sm:$0xff] }
0x2786   :  { %6318 = vmatprep.subr.mxu0 %v9382_v45  ;;  %v9669_v45 = vld [vmem:[#allocation10 + $0x150] sm:$0xff] }
0x2787   :  { %6319 = vmatpush1.msra.mxu0 %v9385_v38  ;;  %v9672_v38 = vld [vmem:[#allocation10 + $0x148] sm:$0xff] }
0x2788   :  { %6320 = vmatprep.subr.mxu0 %v9388_v35  ;;  %v9675_v35 = vld [vmem:[#allocation10 + $0x140] sm:$0xff] }
0x2789   :  { %6321 = vmatpush1.msra.mxu0 %v9391_v52  ;;  %v9678_v52 = vld [vmem:[#allocation10 + $0x138] sm:$0xff] }
0x278a   :  { %6322 = vmatprep.subr.mxu0 %v9394_v49  ;;  %v9681_v49 = vld [vmem:[#allocation10 + $0x130] sm:$0xff] }
0x278b   :  { %6323 = vmatpush1.msra.mxu0 %v9397_v50  ;;  %v9684_v50 = vld [vmem:[#allocation10 + $0x128] sm:$0xff] }
0x278c   :  { %6324 = vmatprep.subr.mxu0 %v9400_v54  ;;  %v9687_v54 = vld [vmem:[#allocation10 + $0x120] sm:$0xff] }
0x278d   :  { %6325 = vmatpush1.msra.mxu0 %v9403_v9  ;;  %v9690_v9 = vld [vmem:[#allocation10 + $0x118] sm:$0xff] }
0x278e   :  { %7779 = vmatmul.mubr.msk.f32.vlgmr.msra.gmra.mxu0 %vm1457_vm2, %v6290_v29  ;;  %6496 = vmatprep.subr.mxu0 %v9651_v16 }
0x278f   :  { %6497 = vmatpush1.msra.mxu0 %v9654_v18  ;;  %6544 = vmatprep.mubr.f32.mxu0 %v8167_v0 }
0x2790   :  { %6498 = vmatprep.subr.mxu0 %v9658_v40 }
0x2791   :  { %6499 = vmatpush1.msra.mxu0 %v9662_v42 }
0x2792   :  { %6500 = vmatprep.subr.mxu0 %v9665_v44 }
0x2793   :  { %6501 = vmatpush1.msra.mxu0 %v9669_v45 }
0x2794   :  { %6502 = vmatprep.subr.mxu0 %v9672_v38 }
0x2795   :  { %6503 = vmatpush1.msra.mxu0 %v9675_v35 }
0x2796   :  { %6504 = vmatprep.subr.mxu0 %v9678_v52 }
0x2797   :  { %6505 = vmatpush1.msra.mxu0 %v9681_v49 }
0x2798   :  { %6506 = vmatprep.subr.mxu0 %v9684_v50 }
0x2799   :  { %6507 = vmatpush1.msra.mxu0 %v9687_v54 }
0x279a   :  { %6508 = vmatprep.subr.mxu0 %v9690_v9 }
0x279b   :  { %6509 = vmatpush1.msra.mxu0 %v9693_v63 }
0x279c   :  { %6510 = vmatprep.subr.mxu0 %v9696_v1 }
0x279d   :  { %6511 = vmatpush1.msra.mxu0 %v9699_v2 }
0x279e   :  { %6545 = vmatmul.mubr.f32.vlgmr.msra.gmra.mxu0 %v8167_v0  ;;  %6726 = vmatprep.subr.mxu0 %v9651_v16 }
0x279f   :  { %6727 = vmatpush1.msra.mxu0 %v9654_v18  ;;  %6774 = vmatprep.mubr.f32.mxu0 %v8167_v0 }
0x27a0   :  { %6728 = vmatprep.subr.mxu0 %v9658_v40 }
0x27a1   :  { %6729 = vmatpush1.msra.mxu0 %v9662_v42 }
0x27a2   :  { %6730 = vmatprep.subr.mxu0 %v9665_v44 }
0x27a3   :  { %6731 = vmatpush1.msra.mxu0 %v9669_v45 }
0x27a4   :  { %6732 = vmatprep.subr.mxu0 %v9672_v38 }
0x27a5   :  { %6733 = vmatpush1.msra.mxu0 %v9675_v35 }
0x27a6   :  { %6734 = vmatprep.subr.mxu0 %v9678_v52 }
0x27a7   :  { %6735 = vmatpush1.msra.mxu0 %v9681_v49 }
0x27a8   :  { %6736 = vmatprep.subr.mxu0 %v9684_v50 }
0x27a9   :  { %6737 = vmatpush1.msra.mxu0 %v9687_v54 }
0x27aa   :  { %6738 = vmatprep.subr.mxu0 %v9690_v9 }
0x27ab   :  { %6739 = vmatpush1.msra.mxu0 %v9693_v63 }
0x27ac   :  { %6740 = vmatprep.subr.mxu0 %v9696_v1 }
0x27ad   :  { %6741 = vmatpush1.msra.mxu0 %v9699_v2 }
0x27ae   :  { %6956 = vmatprep.subr.mxu0 %v9651_v16 }
0x27dc   :  { %v5103_v30 = vpop.f32.mrf.mxu0 }
0x27dd   :  { %v5119_v34 = vadd.f32 %v9727_v31, %v5103_v30 }
0x27de   :  { %v5105_v32 = vpop.f32.mrf.mxu0 }
0x27df   :  { %v5120_v26 = vadd.f32 %v9730_v17, %v5105_v32 }
0x27ec   :  { %v5292_v5 = vpop.f32.mrf.mxu0 }
0x27ed   :  { %v5297_v39 = vadd.f32 %v5292_v5, %v9727_v31 }
0x27ee   :  { %v5294_v11 = vpop.f32.mrf.mxu0 }
0x27ef   :  { %v5298_v13 = vadd.f32 %v5294_v11, %v9730_v17 }
0x27f1   :  { %v5197_v20 = vpop.f32.mrf.mxu1 }
0x27f2   :  { %v5202_v8 = vadd.f32 %v5197_v20, %v5119_v34 }
0x27f3   :  { %v5199_v25 = vpop.f32.mrf.mxu1 }
0x27f4   :  { %v5203_v23 = vadd.f32 %v5199_v25, %v5120_v26 }
0x27f6   :  { %v5206_v4 = vcombine.low %v5202_v8, %v5203_v23 }
0x27f8   :  { %7760 = vst.sshfl [vmem:[#allocation2] sm:$0x33 pattern:$0x76325410] %v5206_v4  ;;  %v5478_v4 = vld [vmem:[#allocation4 + $0xa] sm:$0x3] }
0x27fc   :  { %v9736_v53 = vpop.f32.mrf.mxu0 }
0x27fe   :  { %v9738_v58 = vpop.f32.mrf.mxu0 }
0x27ff   :  { %v6479_v8 = vld [vmem:[#allocation2] sm:$0xf] }
0x2801   :  { %v5375_v33 = vpop.f32.mrf.mxu1 }
0x2802   :  { %v5380_v14 = vadd.f32 %v5375_v33, %v5297_v39 }
0x2803   :  { %v5377_v41 = vpop.f32.mrf.mxu1 }
0x2804   :  { %v5381_v51 = vadd.f32 %v5377_v41, %v5298_v13  ;;  %v5477_v41 = vld [vmem:[#allocation3 + $0xa] sm:$0x3] }
0x2806   :  { %v5384_v57 = vcombine.low %v5380_v14, %v5381_v51 }
0x2808   :  { %7763 = vst.sshfl [vmem:[#allocation2 + $0x4] sm:$0x33 pattern:$0x76325410] %v5384_v57 }
0x280e   :  { %v9740_v59 = vpop.f32.mrf.mxu0 }
0x2810   :  { %v9742_v60 = vpop.f32.mrf.mxu0 }
0x281e   :  { %v9744_v61 = vpop.f32.mrf.mxu0 }
0x2820   :  { %v9746_v62 = vpop.f32.mrf.mxu0 }
0x282e   :  { %v9748_v43 = vpop.f32.mrf.mxu0 }
0x2830   :  { %v9750_v36 = vpop.f32.mrf.mxu0 }
0x283e   :  { %v9752_v29 = vpop.f32.mrf.mxu0 }
0x2840   :  { %v9754_v19 = vpop.f32.mrf.mxu0 }
0x284e   :  { %v9756_v30 = vpop.f32.mrf.mxu0 }
0x2850   :  { %v9758_v32 = vpop.f32.mrf.mxu0 }
0x285e   :  { %v6546_v20 = vpop.f32.mrf.mxu0 }
0x2860   :  { %v6548_v34 = vpop.f32.mrf.mxu0 }
0x2861   :  { %v6553_v26 = vcombine.low %v6546_v20, %v6548_v34 }
0x2863   :  { %v6560_v25 = vrot.slane %v6553_v26, %v8448_v15  ;;  %v5659_v26 = vpop.permute.xlu0 %5658 }
0x2865   :  { %v6562_v23 = vadd.f32 %v6560_v25, %v6479_v8  ;;  %v5655_v25 = vld [vmem:[#allocation3 + $0x8] sm:$0x3] }
0x2866   :  { %v5661_v8 = vsel %vm2530_vm3, %v5655_v25, %v5659_v26  ;;  %v6189_v25 = vld [vmem:[#allocation3 + $0x2] sm:$0x3] }
0x2867   :  { %6570 = vrot.lane.b32.xlu1 %v6562_v23, %s8169_s23  ;;  %v7782_v5 = vmul.f32 -1.442695, %v6562_v23  ;;  %v6012_v23 = vld [vmem:[#allocation4 + $0x4] sm:$0x3] }
0x2869   :  { %8010 = vpow2.f32 %v7782_v5  ;;  %v5837_v5 = vpop.permute.xlu0 %5836 }
0x286b   :  { %5480 = vrot.lane.b32.xlu1 %v5478_v4, %s8164_s27  ;;  %v6368_v4 = vld [vmem:[#allocation4] sm:$0x3] }
0x286d   :  { %v6193_v26 = vpop.permute.xlu0 %6192 }
0x2876   :  { %v8011_v11 = vpop.eup %8010 }
0x2877   :  { %v6566_v33 = vadd.f32 1.0, %v8011_v11  ;;  %v5833_v11 = vld [vmem:[#allocation3 + $0x6] sm:$0x3] }
0x2879   :  { %8012 = vrcp.f32 %v6566_v33  ;;  %v5839_v33 = vsel %vm2530_vm3, %v5833_v11, %v5837_v5 }
0x2886   :  { %v9774_v57 = vpop.eup %8012 }
0x28d9   :  { %v6571_v39 = vpop.permute.xlu1 %6570 }
0x28da   :  { %v6572_v13 = vrot.slane %v6571_v39, 2  ;;  %v6575_v39 = vmul.f32 0.0, %v9774_v57 }
0x28dc   :  { %8014 = vtanh.f32 %v6572_v13 }
0x28dd   :  { %v5481_v14 = vpop.permute.xlu1 %5480 }
0x28de   :  { %v5483_v51 = vsel %vm2530_vm3, %v5477_v41, %v5481_v14  ;;  %v6011_v14 = vld [vmem:[#allocation3 + $0x4] sm:$0x3] }
0x28df   :  { %7765 = vmatmul.mubr.msk.f32.vlgmr.msra.gmra.mxu1 %vm1457_vm2, %v5483_v51 }
0x28e0   :  { %5682 = vmatpush1.msra.mxu1 %v9413_v21  ;;  %5729 = vmatprep.mubr.f32.mxu1 %v8167_v0 }
0x28e1   :  { %5683 = vmatprep.subr.mxu1 %v9416_v22 }
0x28e2   :  { %5684 = vmatpush1.msra.mxu1 %v9419_v24 }
0x28e3   :  { %5685 = vmatprep.subr.mxu1 %v9422_v28 }
0x28e4   :  { %5686 = vmatpush1.msra.mxu1 %v9426_v3 }
0x28e5   :  { %5687 = vmatprep.subr.mxu1 %v9429_v55 }
0x28e6   :  { %5688 = vmatpush1.msra.mxu1 %v9432_v56 }
0x28e7   :  { %5689 = vmatprep.subr.mxu1 %v9435_v37 }
0x28e8   :  { %5690 = vmatpush1.msra.mxu1 %v9440_v46 }
0x28e9   :  { %v8015_v20 = vpop.eup %8014  ;;  %5691 = vmatprep.subr.mxu1 %v9443_v47 }
0x28ea   :  { %5692 = vmatpush1.msra.mxu1 %v9446_v48  ;;  %v6576_v34 = vmul.f32 %v8015_v20, %v9774_v57 }
0x28eb   :  { %5693 = vmatprep.subr.mxu1 %v9449_v6 }
0x28ec   :  { %5694 = vmatpush1.msra.mxu1 %v9454_v7  ;;  %6578 = vrot.lane.b32.xlu1 %v6576_v34, %s8169_s23 }
0x28ed   :  { %5695 = vmatprep.subr.mxu1 %v9457_v10 }
0x28ee   :  { %5696 = vmatpush1.msra.mxu1 %v9460_v12 }
0x28ef   :  { %7768 = vmatmul.mubr.msk.f32.vlgmr.msra.gmra.mxu1 %vm1457_vm2, %v5661_v8  ;;  %5859 = vmatprep.subr.mxu1 %v9409_v27  ;;  %v6195_v8 = vsel %vm2530_vm3, %v6189_v25, %v6193_v26  ;;  %v6187_v25 = vadd.f32 %v9752_v29, %v9727_v31 }
0x28f0   :  { %5860 = vmatpush1.msra.mxu1 %v9413_v21  ;;  %6014 = vrot.lane.b32.xlu1 %v6012_v23, %s8164_s27 }
0x28f1   :  { %5861 = vmatprep.subr.mxu1 %v9416_v22  ;;  %5907 = vmatprep.mubr.f32.mxu1 %v8167_v0 }
0x28f2   :  { %5862 = vmatpush1.msra.mxu1 %v9419_v24 }
0x28f3   :  { %5863 = vmatprep.subr.mxu1 %v9422_v28 }
0x28f4   :  { %5864 = vmatpush1.msra.mxu1 %v9426_v3  ;;  %6370 = vrot.lane.b32.xlu1 %v6368_v4, %s8164_s27  ;;  %v5832_v4 = vadd.f32 %v9746_v62, %v9730_v17  ;;  %v6009_v62 = vadd.f32 %v9748_v43, %v9727_v31 }
0x28f5   :  { %5865 = vmatprep.subr.mxu1 %v9429_v55 }
0x28f6   :  { %5866 = vmatpush1.msra.mxu1 %v9432_v56 }
0x28f7   :  { %5867 = vmatprep.subr.mxu1 %v9435_v37 }
0x28f8   :  { %5868 = vmatpush1.msra.mxu1 %v9440_v46 }
0x28f9   :  { %5869 = vmatprep.subr.mxu1 %v9443_v47 }
0x28fa   :  { %5870 = vmatpush1.msra.mxu1 %v9446_v48 }
0x28fb   :  { %5871 = vmatprep.subr.mxu1 %v9449_v6 }
0x28fc   :  { %5872 = vmatpush1.msra.mxu1 %v9454_v7 }
0x28fd   :  { %5873 = vmatprep.subr.mxu1 %v9457_v10 }
0x28fe   :  { %5874 = vmatpush1.msra.mxu1 %v9460_v12 }
0x28ff   :  { %7771 = vmatmul.mubr.msk.f32.vlgmr.msra.gmra.mxu1 %vm1457_vm2, %v5839_v33  ;;  %6037 = vmatprep.subr.mxu1 %v9409_v27 }
0x2900   :  { %6038 = vmatpush1.msra.mxu1 %v9413_v21  ;;  %6085 = vmatprep.mubr.f32.mxu1 %v8167_v0 }
0x2901   :  { %6039 = vmatprep.subr.mxu1 %v9416_v22 }
0x2902   :  { %6040 = vmatpush1.msra.mxu1 %v9419_v24 }
0x2903   :  { %6041 = vmatprep.subr.mxu1 %v9422_v28 }
0x2904   :  { %6042 = vmatpush1.msra.mxu1 %v9426_v3 }
0x2905   :  { %6043 = vmatprep.subr.mxu1 %v9429_v55 }
0x2906   :  { %6044 = vmatpush1.msra.mxu1 %v9432_v56 }
0x2907   :  { %6045 = vmatprep.subr.mxu1 %v9435_v37 }
0x2908   :  { %6046 = vmatpush1.msra.mxu1 %v9440_v46 }
0x2909   :  { %6047 = vmatprep.subr.mxu1 %v9443_v47 }
0x290a   :  { %6048 = vmatpush1.msra.mxu1 %v9446_v48 }
0x290b   :  { %6049 = vmatprep.subr.mxu1 %v9449_v6 }
0x290c   :  { %6050 = vmatpush1.msra.mxu1 %v9454_v7 }
0x290d   :  { %6051 = vmatprep.subr.mxu1 %v9457_v10 }
0x290e   :  { %6052 = vmatpush1.msra.mxu1 %v9460_v12 }
0x290f   :  { %6215 = vmatprep.subr.mxu1 %v9409_v27 }
0x295e   :  { %v6579_v13 = vpop.permute.xlu1 %6578 }
0x295f   :  { %v9827_v41 = vadd.f32 %v6579_v13, %v6575_v39 }
0x2961   :  { %8016 = vtanh.f32 %v9827_v41 }
0x2962   :  { %v6015_v51 = vpop.permute.xlu1 %6014 }
0x2963   :  { %v6017_v20 = vsel %vm2530_vm3, %v6011_v14, %v6015_v51 }
0x2964   :  { %7774 = vmatmul.mubr.msk.f32.vlgmr.msra.gmra.mxu1 %vm1457_vm2, %v6017_v20 }
0x2965   :  { %6216 = vmatpush1.msra.mxu1 %v9413_v21  ;;  %6263 = vmatprep.mubr.f32.mxu1 %v8167_v0 }
0x2966   :  { %6217 = vmatprep.subr.mxu1 %v9416_v22 }
0x2967   :  { %6218 = vmatpush1.msra.mxu1 %v9419_v24 }
0x2968   :  { %6219 = vmatprep.subr.mxu1 %v9422_v28 }
0x2969   :  { %6220 = vmatpush1.msra.mxu1 %v9426_v3 }
0x296a   :  { %6221 = vmatprep.subr.mxu1 %v9429_v55 }
0x296b   :  { %6222 = vmatpush1.msra.mxu1 %v9432_v56 }
0x296c   :  { %6223 = vmatprep.subr.mxu1 %v9435_v37 }
0x296d   :  { %6224 = vmatpush1.msra.mxu1 %v9440_v46 }
0x296e   :  { %v8017_v34 = vpop.eup %8016  ;;  %6225 = vmatprep.subr.mxu1 %v9443_v47 }
0x296f   :  { %6226 = vmatpush1.msra.mxu1 %v9446_v48  ;;  %6587 = vrot.lane.b32.xlu0 %v8017_v34, %s8169_s23 }
0x2970   :  { %6227 = vmatprep.subr.mxu1 %v9449_v6 }
0x2971   :  { %6228 = vmatpush1.msra.mxu1 %v9454_v7 }
0x2972   :  { %6229 = vmatprep.subr.mxu1 %v9457_v10 }
0x2973   :  { %6230 = vmatpush1.msra.mxu1 %v9460_v12 }
0x2974   :  { %7777 = vmatmul.mubr.msk.f32.vlgmr.msra.gmra.mxu1 %vm1457_vm2, %v6195_v8  ;;  %6393 = vmatprep.subr.mxu1 %v9409_v27  ;;  %v6371_v27 = vpop.permute.xlu1 %6370  ;;  %v6188_v8 = vadd.f32 %v9754_v19, %v9730_v17 }
0x2975   :  { %6394 = vmatpush1.msra.mxu1 %v9413_v21  ;;  %6441 = vmatprep.mubr.f32.mxu1 %v8167_v0  ;;  %v6367_v21 = vld [vmem:[#allocation3] sm:$0x3] }
0x2976   :  { %6395 = vmatprep.subr.mxu1 %v9416_v22  ;;  %v6373_v22 = vsel %vm2530_vm3, %v6367_v21, %v6371_v27 }
0x2977   :  { %6396 = vmatpush1.msra.mxu1 %v9419_v24 }
0x2978   :  { %6397 = vmatprep.subr.mxu1 %v9422_v28  ;;  %v5475_v28 = vadd.f32 %v9736_v53, %v9727_v31 }
0x2979   :  { %6398 = vmatpush1.msra.mxu1 %v9426_v3  ;;  %v5476_v3 = vadd.f32 %v9738_v58, %v9730_v17  ;;  %v5831_v58 = vadd.f32 %v9744_v61, %v9727_v31 }
0x297a   :  { %6399 = vmatprep.subr.mxu1 %v9429_v55 }
0x297b   :  { %6400 = vmatpush1.msra.mxu1 %v9432_v56 }
0x297c   :  { %6401 = vmatprep.subr.mxu1 %v9435_v37 }
0x297d   :  { %6402 = vmatpush1.msra.mxu1 %v9440_v46 }
0x297e   :  { %6403 = vmatprep.subr.mxu1 %v9443_v47 }
0x297f   :  { %6404 = vmatpush1.msra.mxu1 %v9446_v48  ;;  %v5653_v48 = vadd.f32 %v9740_v59, %v9727_v31  ;;  %v6584_v59 = vrot.slane %v9774_v57, 2  ;;  %v6010_v57 = vadd.f32 %v9750_v36, %v9730_v17  ;;  %v6365_v36 = vadd.f32 %v9756_v30, %v9727_v31 }
0x2980   :  { %6405 = vmatprep.subr.mxu1 %v9449_v6  ;;  %v5654_v6 = vadd.f32 %v9742_v60, %v9730_v17 }
0x2981   :  { %6406 = vmatpush1.msra.mxu1 %v9454_v7 }
0x2982   :  { %6407 = vmatprep.subr.mxu1 %v9457_v10 }
0x2983   :  { %6408 = vmatpush1.msra.mxu1 %v9460_v12 }
0x2984   :  { %7780 = vmatmul.mubr.msk.f32.vlgmr.msra.gmra.mxu1 %vm1457_vm2, %v6373_v22  ;;  %6611 = vmatprep.subr.mxu1 %v9651_v16 }
0x2985   :  { %6612 = vmatpush1.msra.mxu1 %v9654_v18  ;;  %6659 = vmatprep.mubr.f32.mxu1 %v8167_v0 }
0x2986   :  { %6613 = vmatprep.subr.mxu1 %v9658_v40 }
0x2987   :  { %6614 = vmatpush1.msra.mxu1 %v9662_v42 }
0x2988   :  { %6615 = vmatprep.subr.mxu1 %v9665_v44 }
0x2989   :  { %6616 = vmatpush1.msra.mxu1 %v9669_v45 }
0x298a   :  { %6617 = vmatprep.subr.mxu1 %v9672_v38 }
0x298b   :  { %6618 = vmatpush1.msra.mxu1 %v9675_v35 }
0x298c   :  { %6619 = vmatprep.subr.mxu1 %v9678_v52 }
0x298d   :  { %6620 = vmatpush1.msra.mxu1 %v9681_v49 }
0x298e   :  { %6621 = vmatprep.subr.mxu1 %v9684_v50 }
0x298f   :  { %6622 = vmatpush1.msra.mxu1 %v9687_v54 }
0x2990   :  { %6623 = vmatprep.subr.mxu1 %v9690_v9 }
0x2991   :  { %6624 = vmatpush1.msra.mxu1 %v9693_v63 }
0x2992   :  { %6625 = vmatprep.subr.mxu1 %v9696_v1 }
0x2993   :  { %6626 = vmatpush1.msra.mxu1 %v9699_v2 }
0x2994   :  { %6841 = vmatprep.subr.mxu1 %v9651_v16 }
0x299f   :  { %v5553_v24 = vpop.f32.mrf.mxu1 }
0x29a0   :  { %v5558_v56 = vadd.f32 %v5553_v24, %v5475_v28  ;;  %v6366_v28 = vadd.f32 %v9758_v32, %v9730_v17 }
0x29a1   :  { %v5555_v55 = vpop.f32.mrf.mxu1 }
0x29a2   :  { %v5559_v37 = vadd.f32 %v5555_v55, %v5476_v3 }
0x29a4   :  { %v5562_v46 = vcombine.low %v5558_v56, %v5559_v37 }
0x29a6   :  { %7766 = vst.sshfl [vmem:[#allocation2 + $0x8] sm:$0x33 pattern:$0x76325410] %v5562_v46 }
0x29af   :  { %v5731_v47 = vpop.f32.mrf.mxu1 }
0x29b0   :  { %v5736_v10 = vadd.f32 %v5731_v47, %v5653_v48  ;;  %v6591_v48 = vld [vmem:[#allocation2 + $0x4] sm:$0xf] }
0x29b1   :  { %v5733_v7 = vpop.f32.mrf.mxu1 }
0x29b2   :  { %v5737_v12 = vadd.f32 %v5733_v7, %v5654_v6 }
0x29b4   :  { %v5740_v23 = vcombine.low %v5736_v10, %v5737_v12 }
0x29b6   :  { %7769 = vst.sshfl [vmem:[#allocation2 + $0xc] sm:$0x33 pattern:$0x76325410] %v5740_v23 }
0x29bf   :  { %v5909_v53 = vpop.f32.mrf.mxu1 }
0x29c0   :  { %v5914_v11 = vadd.f32 %v5909_v53, %v5831_v58 }
0x29c1   :  { %v5911_v5 = vpop.f32.mrf.mxu1 }
0x29c2   :  { %v5915_v33 = vadd.f32 %v5911_v5, %v5832_v4 }
0x29c4   :  { %v5918_v39 = vcombine.low %v5914_v11, %v5915_v33 }
0x29c6   :  { %7772 = vst.sshfl [vmem:[#allocation2 + $0x10] sm:$0x33 pattern:$0x76325410] %v5918_v39 }
0x29e1   :  { %v6588_v60 = vpop.permute.xlu0 %6587 }
0x29e2   :  { %v9901_v13 = vmul.f32 %v6588_v60, %v6584_v59 }
0x29e4   :  { %7783 = vmatmul.mubr.msk.f32.vlgmr.msra.gmra.mxu1 %vm1457_vm2, %v9901_v13 }
0x29e5   :  { %6842 = vmatpush1.msra.mxu1 %v9654_v18  ;;  %6889 = vmatprep.mubr.f32.mxu1 %v8167_v0 }
0x29e6   :  { %6843 = vmatprep.subr.mxu1 %v9658_v40 }
0x29e7   :  { %6844 = vmatpush1.msra.mxu1 %v9662_v42 }
0x29e8   :  { %6845 = vmatprep.subr.mxu1 %v9665_v44 }
0x29e9   :  { %6846 = vmatpush1.msra.mxu1 %v9669_v45 }
0x29ea   :  { %6847 = vmatprep.subr.mxu1 %v9672_v38 }
0x29eb   :  { %6848 = vmatpush1.msra.mxu1 %v9675_v35 }
0x29ec   :  { %6849 = vmatprep.subr.mxu1 %v9678_v52 }
0x29ed   :  { %6850 = vmatpush1.msra.mxu1 %v9681_v49 }
0x29ee   :  { %6851 = vmatprep.subr.mxu1 %v9684_v50 }
0x29ef   :  { %6852 = vmatpush1.msra.mxu1 %v9687_v54 }
0x29f0   :  { %6853 = vmatprep.subr.mxu1 %v9690_v9 }
0x29f1   :  { %6854 = vmatpush1.msra.mxu1 %v9693_v63 }
0x29f2   :  { %6855 = vmatprep.subr.mxu1 %v9696_v1 }
0x29f3   :  { %6856 = vmatpush1.msra.mxu1 %v9699_v2 }
0x29f4   :  { %7071 = vmatprep.subr.mxu1 %v9651_v16 }
0x2a24   :  { %v6087_v61 = vpop.f32.mrf.mxu1 }
0x2a25   :  { %v6092_v51 = vadd.f32 %v6087_v61, %v6009_v62  ;;  %v6706_v62 = vld [vmem:[#allocation2 + $0x8] sm:$0xf] }
0x2a26   :  { %v6089_v14 = vpop.f32.mrf.mxu1 }
0x2a27   :  { %v6093_v20 = vadd.f32 %v6089_v14, %v6010_v57 }
0x2a29   :  { %v6096_v34 = vcombine.low %v6092_v51, %v6093_v20 }
0x2a2b   :  { %7775 = vst.sshfl [vmem:[#allocation2 + $0x14] sm:$0x33 pattern:$0x76325410] %v6096_v34 }
0x2a34   :  { %v6265_v26 = vpop.f32.mrf.mxu1 }
0x2a35   :  { %v6270_v21 = vadd.f32 %v6265_v26, %v6187_v25 }
0x2a36   :  { %v6267_v27 = vpop.f32.mrf.mxu1 }
0x2a37   :  { %v6271_v22 = vadd.f32 %v6267_v27, %v6188_v8 }
0x2a39   :  { %v6274_v24 = vcombine.low %v6270_v21, %v6271_v22 }
0x2a3b   :  { %7778 = vst.sshfl [vmem:[#allocation2 + $0x18] sm:$0x33 pattern:$0x76325410] %v6274_v24 }
0x2a44   :  { %v6443_v43 = vpop.f32.mrf.mxu1 }
0x2a45   :  { %v6448_v55 = vadd.f32 %v6443_v43, %v6365_v36 }
0x2a46   :  { %v6445_v3 = vpop.f32.mrf.mxu1 }
0x2a47   :  { %v6449_v56 = vadd.f32 %v6445_v3, %v6366_v28 }
0x2a49   :  { %v6452_v37 = vcombine.low %v6448_v55, %v6449_v56 }
0x2a4b   :  { %7781 = vst.sshfl [vmem:[#allocation2 + $0x1c] sm:$0x33 pattern:$0x76325410] %v6452_v37 }
0x2aa4   :  { %v6661_v29 = vpop.f32.mrf.mxu1 }
0x2aa6   :  { %v6663_v46 = vpop.f32.mrf.mxu1 }
0x2aa7   :  { %v6668_v19 = vcombine.low %v6661_v29, %v6663_v46  ;;  %v6821_v46 = vld [vmem:[#allocation2 + $0xc] sm:$0xf] }
0x2aa9   :  { %v6675_v47 = vrot.slane %v6668_v19, %v8448_v15 }
0x2aab   :  { %v6677_v6 = vadd.f32 %v6675_v47, %v6591_v48 }
0x2aad   :  { %6685 = vrot.lane.b32.xlu1 %v6677_v6, %s8169_s23  ;;  %v7784_v7 = vmul.f32 -1.442695, %v6677_v6 }
0x2aaf   :  { %8018 = vpow2.f32 %v7784_v7 }
0x2abc   :  { %v8019_v31 = vpop.eup %8018 }
0x2abd   :  { %v6681_v30 = vadd.f32 1.0, %v8019_v31 }
0x2abf   :  { %8020 = vrcp.f32 %v6681_v30 }
0x2acc   :  { %v8021_v32 = vpop.eup %8020 }
0x2acd   :  { %v6690_v53 = vmul.f32 %v8021_v32, %v9827_v41  ;;  %v6699_v11 = vrot.slane %v8021_v32, 2 }
0x2b1f   :  { %v6686_v10 = vpop.permute.xlu1 %6685 }
0x2b20   :  { %v6687_v17 = vrot.slane %v6686_v10, 2 }
0x2b22   :  { %8022 = vtanh.f32 %v6687_v17 }
0x2b2f   :  { %v8023_v12 = vpop.eup %8022 }
0x2b30   :  { %v6691_v23 = vmul.f32 %v8023_v12, %v8021_v32 }
0x2b32   :  { %6693 = vrot.lane.b32.xlu0 %v6691_v23, %s8169_s23 }
0x2ba4   :  { %v6694_v58 = vpop.permute.xlu0 %6693 }
0x2ba5   :  { %v6696_v4 = vadd.f32 %v6694_v58, %v6690_v53 }
0x2ba7   :  { %8024 = vtanh.f32 %v6696_v4 }
0x2bb4   :  { %v8025_v5 = vpop.eup %8024 }
0x2bb5   :  { %6702 = vrot.lane.b32.xlu1 %v8025_v5, %s8169_s23 }
0x2c27   :  { %v6703_v33 = vpop.permute.xlu1 %6702 }
0x2c28   :  { %v6705_v39 = vmul.f32 %v6703_v33, %v6699_v11 }
0x2c2a   :  { %7785 = vmatmul.mubr.msk.f32.vlgmr.msra.gmra.mxu0 %vm1457_vm2, %v6705_v39 }
0x2c2b   :  { %6957 = vmatpush1.msra.mxu0 %v9654_v18  ;;  %7004 = vmatprep.mubr.f32.mxu0 %v8167_v0 }
0x2c2c   :  { %6958 = vmatprep.subr.mxu0 %v9658_v40 }
0x2c2d   :  { %6959 = vmatpush1.msra.mxu0 %v9662_v42 }
0x2c2e   :  { %6960 = vmatprep.subr.mxu0 %v9665_v44 }
0x2c2f   :  { %6961 = vmatpush1.msra.mxu0 %v9669_v45 }
0x2c30   :  { %6962 = vmatprep.subr.mxu0 %v9672_v38 }
0x2c31   :  { %6963 = vmatpush1.msra.mxu0 %v9675_v35 }
0x2c32   :  { %6964 = vmatprep.subr.mxu0 %v9678_v52 }
0x2c33   :  { %6965 = vmatpush1.msra.mxu0 %v9681_v49 }
0x2c34   :  { %6966 = vmatprep.subr.mxu0 %v9684_v50 }
0x2c35   :  { %6967 = vmatpush1.msra.mxu0 %v9687_v54 }
0x2c36   :  { %6968 = vmatprep.subr.mxu0 %v9690_v9 }
0x2c37   :  { %6969 = vmatpush1.msra.mxu0 %v9693_v63 }
0x2c38   :  { %6970 = vmatprep.subr.mxu0 %v9696_v1 }
0x2c39   :  { %6971 = vmatpush1.msra.mxu0 %v9699_v2 }
0x2c3a   :  { %7186 = vmatprep.subr.mxu0 %v9651_v16 }
0x2cea   :  { %v6776_v41 = vpop.f32.mrf.mxu0 }
0x2cec   :  { %v6778_v59 = vpop.f32.mrf.mxu0 }
0x2ced   :  { %v6783_v60 = vcombine.low %v6776_v41, %v6778_v59  ;;  %v6936_v41 = vld [vmem:[#allocation2 + $0x10] sm:$0xf] }
0x2cef   :  { %v6790_v61 = vrot.slane %v6783_v60, %v8448_v15 }
0x2cf1   :  { %v6792_v57 = vadd.f32 %v6790_v61, %v6706_v62 }
0x2cf3   :  { %6800 = vrot.lane.b32.xlu0 %v6792_v57, %s8169_s23  ;;  %v7786_v14 = vmul.f32 -1.442695, %v6792_v57 }
0x2cf5   :  { %8026 = vpow2.f32 %v7786_v14 }
0x2d02   :  { %v8027_v51 = vpop.eup %8026 }
0x2d03   :  { %v6796_v20 = vadd.f32 1.0, %v8027_v51 }
0x2d05   :  { %8028 = vrcp.f32 %v6796_v20 }
0x2d12   :  { %v8029_v25 = vpop.eup %8028 }
0x2d13   :  { %v6805_v21 = vmul.f32 %v8029_v25, %v6696_v4  ;;  %v6814_v36 = vrot.slane %v8029_v25, 2 }
0x2d65   :  { %v6801_v34 = vpop.permute.xlu0 %6800 }
0x2d66   :  { %v6802_v26 = vrot.slane %v6801_v34, 2 }
0x2d68   :  { %8030 = vtanh.f32 %v6802_v26 }
0x2d75   :  { %v8031_v8 = vpop.eup %8030 }
0x2d76   :  { %v6806_v27 = vmul.f32 %v8031_v8, %v8029_v25 }
0x2d78   :  { %6808 = vrot.lane.b32.xlu1 %v6806_v27, %s8169_s23 }
0x2dea   :  { %v6809_v22 = vpop.permute.xlu1 %6808 }
0x2deb   :  { %v6811_v24 = vadd.f32 %v6809_v22, %v6805_v21 }
0x2ded   :  { %8032 = vtanh.f32 %v6811_v24 }
0x2dfa   :  { %v8033_v43 = vpop.eup %8032 }
0x2dfb   :  { %6817 = vrot.lane.b32.xlu0 %v8033_v43, %s8169_s23 }
0x2e6d   :  { %v6818_v28 = vpop.permute.xlu0 %6817 }
0x2e6e   :  { %v6820_v3 = vmul.f32 %v6818_v28, %v6814_v36 }
0x2e70   :  { %7787 = vmatmul.mubr.msk.f32.vlgmr.msra.gmra.mxu1 %vm1457_vm2, %v6820_v3 }
0x2e71   :  { %7072 = vmatpush1.msra.mxu1 %v9654_v18  ;;  %7119 = vmatprep.mubr.f32.mxu1 %v8167_v0 }
0x2e72   :  { %7073 = vmatprep.subr.mxu1 %v9658_v40 }
0x2e73   :  { %7074 = vmatpush1.msra.mxu1 %v9662_v42 }
0x2e74   :  { %7075 = vmatprep.subr.mxu1 %v9665_v44 }
0x2e75   :  { %7076 = vmatpush1.msra.mxu1 %v9669_v45 }
0x2e76   :  { %7077 = vmatprep.subr.mxu1 %v9672_v38 }
0x2e77   :  { %7078 = vmatpush1.msra.mxu1 %v9675_v35 }
0x2e78   :  { %7079 = vmatprep.subr.mxu1 %v9678_v52 }
0x2e79   :  { %7080 = vmatpush1.msra.mxu1 %v9681_v49 }
0x2e7a   :  { %7081 = vmatprep.subr.mxu1 %v9684_v50 }
0x2e7b   :  { %7082 = vmatpush1.msra.mxu1 %v9687_v54 }
0x2e7c   :  { %7083 = vmatprep.subr.mxu1 %v9690_v9 }
0x2e7d   :  { %7084 = vmatpush1.msra.mxu1 %v9693_v63 }
0x2e7e   :  { %7085 = vmatprep.subr.mxu1 %v9696_v1 }
0x2e7f   :  { %7086 = vmatpush1.msra.mxu1 %v9699_v2 }
0x2e80   :  { %7301 = vmatprep.subr.mxu1 %v9651_v16 }
0x2f30   :  { %v6891_v55 = vpop.f32.mrf.mxu1 }
0x2f32   :  { %v6893_v56 = vpop.f32.mrf.mxu1 }
0x2f33   :  { %v6898_v37 = vcombine.low %v6891_v55, %v6893_v56 }
0x2f35   :  { %v6905_v29 = vrot.slane %v6898_v37, %v8448_v15 }
0x2f37   :  { %v6907_v19 = vadd.f32 %v6905_v29, %v6821_v46 }
0x2f39   :  { %6915 = vrot.lane.b32.xlu1 %v6907_v19, %s8169_s23  ;;  %v7788_v47 = vmul.f32 -1.442695, %v6907_v19 }
0x2f3b   :  { %8034 = vpow2.f32 %v7788_v47  ;;  %v7166_v47 = vld [vmem:[#allocation2 + $0x18] sm:$0xf] }
0x2f48   :  { %v8035_v48 = vpop.eup %8034 }
0x2f49   :  { %v6911_v6 = vadd.f32 1.0, %v8035_v48 }
0x2f4b   :  { %8036 = vrcp.f32 %v6911_v6 }
0x2f58   :  { %v8037_v30 = vpop.eup %8036 }
0x2f59   :  { %v6920_v17 = vmul.f32 %v8037_v30, %v6811_v24  ;;  %v6929_v53 = vrot.slane %v8037_v30, 2 }
0x2fab   :  { %v6916_v7 = vpop.permute.xlu1 %6915 }
0x2fac   :  { %v6917_v31 = vrot.slane %v6916_v7, 2 }
0x2fae   :  { %8038 = vtanh.f32 %v6917_v31 }
0x2fbb   :  { %v8039_v10 = vpop.eup %8038 }
0x2fbc   :  { %v6921_v16 = vmul.f32 %v8039_v10, %v8037_v30 }
0x2fbe   :  { %6923 = vrot.lane.b32.xlu0 %v6921_v16, %s8169_s23 }
0x3030   :  { %v6924_v32 = vpop.permute.xlu0 %6923 }
0x3031   :  { %v6926_v12 = vadd.f32 %v6924_v32, %v6920_v17 }
0x3033   :  { %8040 = vtanh.f32 %v6926_v12 }
0x3040   :  { %v8041_v23 = vpop.eup %8040 }
0x3041   :  { %6932 = vrot.lane.b32.xlu1 %v8041_v23, %s8169_s23 }
0x30b3   :  { %v6933_v58 = vpop.permute.xlu1 %6932 }
0x30b4   :  { %v6935_v4 = vmul.f32 %v6933_v58, %v6929_v53 }
0x30b6   :  { %7789 = vmatmul.mubr.msk.f32.vlgmr.msra.gmra.mxu0 %vm1457_vm2, %v6935_v4 }
0x30b7   :  { %7187 = vmatpush1.msra.mxu0 %v9654_v18  ;;  %7234 = vmatprep.mubr.f32.mxu0 %v8167_v0 }
0x30b8   :  { %7188 = vmatprep.subr.mxu0 %v9658_v40 }
0x30b9   :  { %7189 = vmatpush1.msra.mxu0 %v9662_v42 }
0x30ba   :  { %7190 = vmatprep.subr.mxu0 %v9665_v44 }
0x30bb   :  { %7191 = vmatpush1.msra.mxu0 %v9669_v45 }
0x30bc   :  { %7192 = vmatprep.subr.mxu0 %v9672_v38 }
0x30bd   :  { %7193 = vmatpush1.msra.mxu0 %v9675_v35 }
0x30be   :  { %7194 = vmatprep.subr.mxu0 %v9678_v52 }
0x30bf   :  { %7195 = vmatpush1.msra.mxu0 %v9681_v49 }
0x30c0   :  { %7196 = vmatprep.subr.mxu0 %v9684_v50 }
0x30c1   :  { %7197 = vmatpush1.msra.mxu0 %v9687_v54 }
0x30c2   :  { %7198 = vmatprep.subr.mxu0 %v9690_v9 }
0x30c3   :  { %7199 = vmatpush1.msra.mxu0 %v9693_v63 }
0x30c4   :  { %7200 = vmatprep.subr.mxu0 %v9696_v1 }
0x30c5   :  { %7201 = vmatpush1.msra.mxu0 %v9699_v2 }
0x30c6   :  { %7824 = vmatprep.subr.mxu0 %v8167_v0 }
0x3176   :  { %v7006_v5 = vpop.f32.mrf.mxu0 }
0x3178   :  { %v7008_v11 = vpop.f32.mrf.mxu0 }
0x3179   :  { %v7013_v33 = vcombine.low %v7006_v5, %v7008_v11 }
0x317b   :  { %v7020_v39 = vrot.slane %v7013_v33, %v8448_v15 }
0x317d   :  { %v7022_v59 = vadd.f32 %v7020_v39, %v6936_v41 }
0x317f   :  { %7030 = vrot.lane.b32.xlu0 %v7022_v59, %s8169_s23  ;;  %v7790_v60 = vmul.f32 -1.442695, %v7022_v59 }
0x3181   :  { %8042 = vpow2.f32 %v7790_v60  ;;  %v7281_v60 = vld [vmem:[#allocation2 + $0x1c] sm:$0xf] }
0x318e   :  { %v8043_v61 = vpop.eup %8042 }
0x318f   :  { %v7026_v62 = vadd.f32 1.0, %v8043_v61 }
0x3191   :  { %8044 = vrcp.f32 %v7026_v62 }
0x319e   :  { %v8045_v51 = vpop.eup %8044 }
0x319f   :  { %v7035_v26 = vmul.f32 %v8045_v51, %v6926_v12  ;;  %v7044_v21 = vrot.slane %v8045_v51, 2 }
0x31f1   :  { %v7031_v57 = vpop.permute.xlu0 %7030 }
0x31f2   :  { %v7032_v14 = vrot.slane %v7031_v57, 2 }
0x31f4   :  { %8046 = vtanh.f32 %v7032_v14 }
0x3201   :  { %v8047_v20 = vpop.eup %8046 }
0x3202   :  { %v7036_v34 = vmul.f32 %v8047_v20, %v8045_v51 }
0x3204   :  { %7038 = vrot.lane.b32.xlu1 %v7036_v34, %s8169_s23 }
0x3276   :  { %v7039_v25 = vpop.permute.xlu1 %7038 }
0x3277   :  { %v7041_v8 = vadd.f32 %v7039_v25, %v7035_v26 }
0x3279   :  { %8048 = vtanh.f32 %v7041_v8 }
0x3286   :  { %v8049_v27 = vpop.eup %8048 }
0x3287   :  { %7047 = vrot.lane.b32.xlu0 %v8049_v27, %s8169_s23  ;;  %v7402_v27 = vld [vmem:[%s10134_s5 + $0x28] sm:$0xff] }
0x32f9   :  { %v7048_v22 = vpop.permute.xlu0 %7047 }
0x32fa   :  { %v7050_v24 = vmul.f32 %v7048_v22, %v7044_v21  ;;  %v7401_v21 = vld [vmem:[%s10134_s5 + $0x20] sm:$0xff]  ;;  %v7400_v22 = vld [vmem:[%s10134_s5 + $0x18] sm:$0xff] }
0x32fc   :  { %7791 = vmatmul.mubr.msk.f32.vlgmr.msra.gmra.mxu1 %vm1457_vm2, %v7050_v24  ;;  %v7399_v24 = vld [vmem:[%s10134_s5 + $0x10] sm:$0xff] }
0x32fd   :  { %7302 = vmatpush1.msra.mxu1 %v9654_v18  ;;  %7349 = vmatprep.mubr.f32.mxu1 %v8167_v0 }
0x32fe   :  { %7303 = vmatprep.subr.mxu1 %v9658_v40 }
0x32ff   :  { %7304 = vmatpush1.msra.mxu1 %v9662_v42 }
0x3300   :  { %7305 = vmatprep.subr.mxu1 %v9665_v44 }
0x3301   :  { %7306 = vmatpush1.msra.mxu1 %v9669_v45  ;;  %v7051_v45 = vld [vmem:[#allocation2 + $0x14] sm:$0xf] }
0x3302   :  { %7307 = vmatprep.subr.mxu1 %v9672_v38 }
0x3303   :  { %7308 = vmatpush1.msra.mxu1 %v9675_v35 }
0x3304   :  { %7309 = vmatprep.subr.mxu1 %v9678_v52 }
0x3305   :  { %7310 = vmatpush1.msra.mxu1 %v9681_v49 }
0x3306   :  { %7311 = vmatprep.subr.mxu1 %v9684_v50 }
0x3307   :  { %7312 = vmatpush1.msra.mxu1 %v9687_v54 }
0x3308   :  { %7313 = vmatprep.subr.mxu1 %v9690_v9 }
0x3309   :  { %7314 = vmatpush1.msra.mxu1 %v9693_v63 }
0x330a   :  { %7315 = vmatprep.subr.mxu1 %v9696_v1 }
0x330b   :  { %7316 = vmatpush1.msra.mxu1 %v9699_v2 }
0x330c   :  { %7843 = vmatprep.subr.mxu1 %v8167_v0 }
0x33bc   :  { %v7121_v18 = vpop.f32.mrf.mxu1 }
0x33be   :  { %v7123_v40 = vpop.f32.mrf.mxu1 }
0x33bf   :  { %v7128_v42 = vcombine.low %v7121_v18, %v7123_v40 }
0x33c1   :  { %v7135_v44 = vrot.slane %v7128_v42, %v8448_v15 }
0x33c3   :  { %v7137_v38 = vadd.f32 %v7135_v44, %v7051_v45  ;;  %v7398_v44 = vld [vmem:[%s10134_s5 + $0x8] sm:$0xff]  ;;  %v7397_v45 = vld [vmem:[%s10134_s5] sm:$0xff] }
0x33c5   :  { %7145 = vrot.lane.b32.xlu1 %v7137_v38, %s8169_s23  ;;  %v7792_v35 = vmul.f32 -1.442695, %v7137_v38  ;;  %v7493_v38 = vld [vmem:[%s10136_s7 + $0x38] sm:$0xff] }
0x33c7   :  { %8050 = vpow2.f32 %v7792_v35  ;;  %v7492_v35 = vld [vmem:[%s10136_s7 + $0x30] sm:$0xff] }
0x33d4   :  { %v8051_v52 = vpop.eup %8050 }
0x33d5   :  { %v7141_v49 = vadd.f32 1.0, %v8051_v52  ;;  %v7491_v52 = vld [vmem:[%s10136_s7 + $0x28] sm:$0xff] }
0x33d7   :  { %8052 = vrcp.f32 %v7141_v49  ;;  %v7490_v49 = vld [vmem:[%s10136_s7 + $0x20] sm:$0xff] }
0x33e4   :  { %v8053_v9 = vpop.eup %8052 }
0x33e5   :  { %v7150_v2 = vmul.f32 %v8053_v9, %v7041_v8  ;;  %v7159_v3 = vrot.slane %v8053_v9, 2  ;;  %v7403_v8 = vld [vmem:[%s10134_s5 + $0x30] sm:$0xff] }
0x3437   :  { %v7146_v50 = vpop.permute.xlu1 %7145 }
0x3438   :  { %v7147_v54 = vrot.slane %v7146_v50, 2  ;;  %v7489_v50 = vld [vmem:[%s10136_s7 + $0x18] sm:$0xff] }
0x343a   :  { %8054 = vtanh.f32 %v7147_v54 }
0x3447   :  { %v8055_v63 = vpop.eup %8054 }
0x3448   :  { %v7151_v1 = vmul.f32 %v8055_v63, %v8053_v9 }
0x344a   :  { %7153 = vrot.lane.b32.xlu0 %v7151_v1, %s8169_s23 }
0x34bc   :  { %v7154_v43 = vpop.permute.xlu0 %7153 }
0x34bd   :  { %v7156_v36 = vadd.f32 %v7154_v43, %v7150_v2  ;;  %v7488_v43 = vld [vmem:[%s10136_s7 + $0x10] sm:$0xff] }
0x34bf   :  { %8056 = vtanh.f32 %v7156_v36 }
0x34cc   :  { %v8057_v28 = vpop.eup %8056 }
0x34cd   :  { %7162 = vrot.lane.b32.xlu1 %v8057_v28, %s8169_s23  ;;  %v7797_v28 = vld [vmem:[%s10135_s6] ss:$0 sm:$0xff] }
0x353f   :  { %v7163_v55 = vpop.permute.xlu1 %7162 }
0x3540   :  { %v7165_v56 = vmul.f32 %v7163_v55, %v7159_v3 }
0x3542   :  { %7793 = vmatmul.mubr.msk.f32.vlgmr.msra.gmra.mxu0 %vm1457_vm2, %v7165_v56 }
0x3543   :  { %7840 = vmatprep.mubr.msk.f32.mxu0 %vm8171_vm4, %v8167_v0 }
0x3602   :  { %v7236_v37 = vpop.f32.mrf.mxu0 }
0x3604   :  { %v7238_v29 = vpop.f32.mrf.mxu0 }
0x3605   :  { %v7243_v46 = vcombine.low %v7236_v37, %v7238_v29  ;;  %v7576_v29 = vld [vmem:[%s10138_s9 + $0x8] sm:$0xff] }
0x3607   :  { %v7250_v19 = vrot.slane %v7243_v46, %v8448_v15  ;;  %v7575_v46 = vld [vmem:[%s10138_s9] sm:$0xff]  ;;  %s8134_s9 = scalar_lea.vmem %s7667_s1, 32 }
0x3608   :  { %p8135_p1 = scmp.ne.s32.totalorder %s7667_s1, %s8134_s9  ;;  %p8140_p3 = scmp.lt.s32.totalorder %s8134_s9, %s8134_s9 }
0x3609   :  { %v7252_v48 = vadd.f32 %v7250_v19, %v7166_v47  ;;  %v7799_v19 = vld [vmem:[%s10137_s8] ss:$0 sm:$0xff] }
0x360a   :  { %p8141_p4 = por %p8140_p3, %p8139_p2 }
0x360b   :  { %7260 = vrot.lane.b32.xlu0 %v7252_v48, %s8169_s23  ;;  %v7794_v6 = vmul.f32 -1.442695, %v7252_v48 }
0x360c   :  { %p8142_p5 = pnand %p8141_p4, %p8135_p1 }
0x360d   :  { %8058 = vpow2.f32 %v7794_v6 }
0x361a   :  { %v8059_v7 = vpop.eup %8058 }
0x361b   :  { %v7256_v31 = vadd.f32 1.0, %v8059_v7 }
0x361d   :  { %8060 = vrcp.f32 %v7256_v31  ;;  %v7801_v31 = vld [vmem:[%s10139_s10] ss:$0 sm:$0xff] }
0x362a   :  { %v8061_v16 = vpop.eup %8060 }
0x362b   :  { %v7265_v12 = vmul.f32 %v8061_v16, %v7156_v36  ;;  %v7274_v4 = vrot.slane %v8061_v16, 2  ;;  %v7487_v36 = vld [vmem:[%s10136_s7 + $0x8] sm:$0xff] }
0x367d   :  { %v7261_v30 = vpop.permute.xlu0 %7260 }
0x367e   :  { %v7262_v10 = vrot.slane %v7261_v30, 2 }
0x3680   :  { %8062 = vtanh.f32 %v7262_v10 }
0x368d   :  { %v8063_v17 = vpop.eup %8062 }
0x368e   :  { %v7266_v32 = vmul.f32 %v8063_v17, %v8061_v16 }
0x3690   :  { %7268 = vrot.lane.b32.xlu1 %v7266_v32, %s8169_s23 }
0x3702   :  { %v7269_v23 = vpop.permute.xlu1 %7268 }
0x3703   :  { %v7271_v53 = vadd.f32 %v7269_v23, %v7265_v12 }
0x3705   :  { %8064 = vtanh.f32 %v7271_v53 }
0x3712   :  { %v8065_v58 = vpop.eup %8064 }
0x3713   :  { %7277 = vrot.lane.b32.xlu0 %v8065_v58, %s8169_s23 }
0x3785   :  { %v7278_v5 = vpop.permute.xlu0 %7277 }
0x3786   :  { %v7280_v11 = vmul.f32 %v7278_v5, %v7274_v4 }
0x3788   :  { %7795 = vmatmul.mubr.msk.f32.vlgmr.msra.gmra.mxu1 %vm1457_vm2, %v7280_v11 }
0x3789   :  { %7844 = vmatpush3.msra.mxu1 %v7493_v38  ;;  %7859 = vmatprep.mubr.msk.f32.mxu1 %vm8171_vm4, %v8167_v0 }
0x378a   :  { %7845 = vmatprep.subr.mxu1 %v8167_v0 }
0x378b   :  { %7846 = vmatpush3.msra.mxu1 %v7492_v35 }
0x378c   :  { %7847 = vmatprep.subr.mxu1 %v8167_v0 }
0x378d   :  { %7848 = vmatpush3.msra.mxu1 %v7491_v52 }
0x378e   :  { %7849 = vmatprep.subr.mxu1 %v8167_v0 }
0x378f   :  { %7850 = vmatpush3.msra.mxu1 %v7490_v49 }
0x3790   :  { %7851 = vmatprep.subr.mxu1 %v8167_v0 }
0x3791   :  { %7852 = vmatpush3.msra.mxu1 %v7489_v50 }
0x3792   :  { %7853 = vmatprep.subr.mxu1 %v8167_v0 }
0x3793   :  { %7854 = vmatpush3.msra.mxu1 %v7488_v43 }
0x3794   :  { %7855 = vmatprep.subr.mxu1 %v8167_v0 }
0x3795   :  { %7856 = vmatpush3.msra.mxu1 %v7487_v36 }
0x3796   :  { %7857 = vmatprep.subr.mxu1 %v8167_v0 }
0x3848   :  { %v7351_v33 = vpop.f32.mrf.mxu1 }
0x384a   :  { %v7353_v39 = vpop.f32.mrf.mxu1 }
0x384b   :  { %v7358_v41 = vcombine.low %v7351_v33, %v7353_v39 }
0x384d   :  { %v7365_v59 = vrot.slane %v7358_v41, %v8448_v15  ;;  %v7404_v15 = vld [vmem:[%s10134_s5 + $0x38] sm:$0xff] }
0x384e   :  { %7825 = vmatpush3.msra.mxu0 %v7404_v15 }
0x384f   :  { %v7367_v61 = vadd.f32 %v7365_v59, %v7281_v60  ;;  %7826 = vmatprep.subr.mxu0 %v8167_v0 }
0x3850   :  { %7827 = vmatpush3.msra.mxu0 %v7403_v8 }
0x3851   :  { %7375 = vrot.lane.b32.xlu1 %v7367_v61, %s8169_s23  ;;  %v7796_v62 = vmul.f32 -1.442695, %v7367_v61  ;;  %7828 = vmatprep.subr.mxu0 %v8167_v0 }
0x3852   :  { %7829 = vmatpush3.msra.mxu0 %v7402_v27 }
0x3853   :  { %8066 = vpow2.f32 %v7796_v62  ;;  %7830 = vmatprep.subr.mxu0 %v8167_v0 }
0x3854   :  { %7831 = vmatpush3.msra.mxu0 %v7401_v21 }
0x3855   :  { %7832 = vmatprep.subr.mxu0 %v8167_v0 }
0x3856   :  { %7833 = vmatpush3.msra.mxu0 %v7400_v22 }
0x3857   :  { %7834 = vmatprep.subr.mxu0 %v8167_v0 }
0x3858   :  { %7835 = vmatpush3.msra.mxu0 %v7399_v24 }
0x3859   :  { %7836 = vmatprep.subr.mxu0 %v8167_v0 }
0x385a   :  { %7837 = vmatpush3.msra.mxu0 %v7398_v44 }
0x385b   :  { %7838 = vmatprep.subr.mxu0 %v8167_v0 }
0x385c   :  { %7839 = vmatpush3.msra.mxu0 %v7397_v45 }
0x385d   :  { %7862 = vmatprep.subr.mxu0 %v8167_v0 }
0x3860   :  { %v8067_v57 = vpop.eup %8066 }
0x3861   :  { %v7371_v14 = vadd.f32 1.0, %v8067_v57 }
0x3863   :  { %8068 = vrcp.f32 %v7371_v14 }
0x3870   :  { %v8069_v34 = vpop.eup %8068 }
0x3871   :  { %v7380_v18 = vmul.f32 %v8069_v34, %v7271_v53  ;;  %v7389_v9 = vrot.slane %v8069_v34, 2 }
0x38c3   :  { %v7376_v51 = vpop.permute.xlu1 %7375 }
0x38c4   :  { %v7377_v20 = vrot.slane %v7376_v51, 2 }
0x38c6   :  { %8070 = vtanh.f32 %v7377_v20 }
0x38d3   :  { %v8071_v26 = vpop.eup %8070 }
0x38d4   :  { %v7381_v25 = vmul.f32 %v8071_v26, %v8069_v34 }
0x38d6   :  { %7383 = vrot.lane.b32.xlu0 %v7381_v25, %s8169_s23 }
0x3948   :  { %v7384_v40 = vpop.permute.xlu0 %7383 }
0x3949   :  { %v7386_v42 = vadd.f32 %v7384_v40, %v7380_v18 }
0x394b   :  { %8072 = vtanh.f32 %v7386_v42 }
0x3958   :  { %v8073_v54 = vpop.eup %8072 }
0x3959   :  { %7392 = vrot.lane.b32.xlu1 %v8073_v54, %s8169_s23 }
0x39cb   :  { %v7393_v63 = vpop.permute.xlu1 %7392 }
0x39cc   :  { %v7395_v1 = vmul.f32 %v7393_v63, %v7389_v9 }
0x39ce   :  { %v7396_v2 = vsel %vm2530_vm3, %v7395_v1, %v9901_v13  ;;  %v7486_v13 = vld [vmem:[%s10136_s7] sm:$0xff] }
0x39cf   :  { %7841 = vmatmul.mubr.msk.f32.vlgmr.msra.gmra.mxu0 %vm1457_vm2, %v7396_v2  ;;  %7858 = vmatpush3.msra.mxu1 %v7486_v13 }
0x39d0   :  { %7866 = vmatprep.mubr.msk.f32.mxu0 %vm8171_vm4, %v8167_v0  ;;  %7863 = vmatpush3.msra.mxu0 %v7576_v29 }
0x39d1   :  { %7864 = vmatprep.subr.mxu0 %v8167_v0 }
0x39d2   :  { %7865 = vmatpush3.msra.mxu0 %v7575_v46 }
0x3a8f   :  { %v7481_v3 = vpop.f32.mrf.mxu0 }
0x3a90   :  { %v7482_v55 = vadd.f32 %v7797_v28, %v7481_v3 }
0x3a91   :  { %v7842_v56 = vpop.f32.mrf.mxu0 }
0x3a92   :  { %v7485_v37 = vmax.f32 %v7482_v55, 0.0 }
0x3a94   :  { %7860 = vmatmul.mubr.msk.f32.vlgmr.msra.gmra.mxu1 %vm1457_vm2, %v7485_v37 }
0x3b54   :  { %v7570_v47 = vpop.f32.mrf.mxu1 }
0x3b55   :  { %v7571_v48 = vadd.f32 %v7799_v19, %v7570_v47 }
0x3b56   :  { %v7861_v6 = vpop.f32.mrf.mxu1 }
0x3b57   :  { %v7574_v7 = vmax.f32 %v7571_v48, 0.0 }
0x3b59   :  { %7867 = vmatmul.mubr.msk.f32.vlgmr.msra.gmra.mxu0 %vm7584_vm5, %v7574_v7 }
0x3c19   :  { %v7654_v30 = vpop.f32.mrf.mxu0 }
0x3c1a   :  { %v7655_v0 = vadd.f32 %v7801_v31, %v7654_v30 }
0x3c1b   :  { %v7868_v10 = vpop.f32.mrf.mxu0 }
0x3c1c   :  { %7659 = vst.msk [vmem:[#allocation11] sm:$0x3] %vm7658_vm6, %v7655_v0 }
0x3c1d   :  { %8145 = shalt.err (!%p8142_p5)
}
0x3c1e   :  { %7669 = dma.vmem_to_hbm [thread:$0]  %s7667_s1, 32, %s10140_s11, [#allocation7]  }
0x3c1f   :  { %8158 = dma.done.wait [#allocation7], 32  }
0x3c20   :  { %8159 = vsyncadd [#allocation7], 4294967264 }
0x3c21   :  { %7673 = vsyncpa [#allocation6], 1 }
0x3c22   :  { %7674 = vsyncpa [#allocation9], 1 }
0x3c23   :  { %7675 = vsyncpa [#allocation7], 1 }

</bundles_post_ra>
